<compile_context>
chip_gen: v5e
topology: v5e:2x2
jax: 0.10.0
libtpu: 0.0.40
codegen_flags: <defaults>
</compile_context>

<pallas_src>
import math

import jax
import jax.numpy as jnp
from jax.experimental import pallas as pl
from jax.experimental.pallas import tpu as pltpu

PHONE_IN, PHONE_H, PHONE_OUT = 360, 256, 42
PHONE_OUT_PAD = 128                      # lane-dense phone output width
WORD_IN, WH1, WH2, WH3, WORD_OUT = 5964, 512, 256, 64, 2
N_FRAMES = WORD_IN // PHONE_OUT          # 142 frames -> 142 * 42 == 5964
BN_EPS = 1e-5


# ----------------------------------------------------------------------------
# Phone_NN (fc1..fc5 + sigmoids, no final softmax), applied row-wise.
# ----------------------------------------------------------------------------
def _phone_kernel(x_ref, w1, b1, w2, b2, w3, b3, w4, b4, w5, b5, o_ref):
    bf16 = jnp.bfloat16
    h = jax.nn.sigmoid(
        jnp.dot(x_ref[...], w1[...], preferred_element_type=jnp.float32) + b1[...])
    h = jax.nn.sigmoid(
        jnp.dot(h.astype(bf16), w2[...], preferred_element_type=jnp.float32) + b2[...])
    h = jax.nn.sigmoid(
        jnp.dot(h.astype(bf16), w3[...], preferred_element_type=jnp.float32) + b3[...])
    h = jax.nn.sigmoid(
        jnp.dot(h.astype(bf16), w4[...], preferred_element_type=jnp.float32) + b4[...])
    out = jnp.dot(h.astype(bf16), w5[...], preferred_element_type=jnp.float32) + b5[...]
    o_ref[...] = out.astype(o_ref.dtype)


def phone_forward(x2d, phone_params):
    """x2d: (N, 360) f32 -> (N, 42) bf16; Phone_NN without its final softmax."""
    n = x2d.shape[0]
    ngrid = 2                                    # even 2-way split for v7x megacore
    tm = ((pl.cdiv(n, ngrid) + 7) // 8) * 8      # 284 -> 144
    n_pad = ngrid * tm
    xp = jnp.pad(x2d, ((0, n_pad - n), (0, 0))).astype(jnp.bfloat16)

    (w1, b1), (w2, b2), (w3, b3), (w4, b4), (w5, b5) = phone_params
    # Pad fc5 out-dim 42 -> 128 with zero columns so the output store is lane-dense.
    w5p = jnp.pad(w5, ((0, 0), (0, PHONE_OUT_PAD - PHONE_OUT)))
    b5p = jnp.pad(b5, ((0, 0), (0, PHONE_OUT_PAD - PHONE_OUT)))

    def full_spec(a):
        return pl.BlockSpec(a.shape, lambda i: (0, 0))

    flat = [w1, b1, w2, b2, w3, b3, w4, b4, w5p, b5p]
    in_specs = ([pl.BlockSpec((tm, PHONE_IN), lambda i: (i, 0))]
                + [full_spec(a) for a in flat])

    out = pl.pallas_call(
        _phone_kernel,
        grid=(ngrid,),
        in_specs=in_specs,
        out_specs=pl.BlockSpec((tm, PHONE_OUT_PAD), lambda i: (i, 0)),
        out_shape=jax.ShapeDtypeStruct((n_pad, PHONE_OUT_PAD), jnp.bfloat16),
        compiler_params=pltpu.CompilerParams(
            dimension_semantics=("parallel",)),
    )(xp, *flat)
    return out[:n, :PHONE_OUT]


# ----------------------------------------------------------------------------
# word_NN_only (eval): fc1 (K-tiled, accumulated) + relu, fc2/fc3 (+ folded BN)
# + relu, fc4, softmax(dim=1).
# ----------------------------------------------------------------------------
def _word_kernel(x_ref, w1, b1, w2, b2, w3, b3, w4, b4, o_ref, acc_ref):
    kk = pl.program_id(0)
    bf16 = jnp.bfloat16

    @pl.when(kk == 0)
    def _():
        acc_ref[...] = jnp.zeros_like(acc_ref)

    acc_ref[...] += jnp.dot(x_ref[...], w1[...],
                            preferred_element_type=jnp.float32)

    @pl.when(kk == pl.num_programs(0) - 1)
    def _():
        h = jnp.maximum(acc_ref[...] + b1[...], 0.0)     # fc1 + relu (bn1 folded -> fc2)
        h = jnp.maximum(
            jnp.dot(h.astype(bf16), w2[...], preferred_element_type=jnp.float32)
            + b2[...], 0.0)                              # fc2 + relu (bn2 folded -> fc3)
        h = jnp.maximum(
            jnp.dot(h.astype(bf16), w3[...], preferred_element_type=jnp.float32)
            + b3[...], 0.0)                              # fc3 + relu (bn3 folded -> fc4)
        logits = jnp.dot(h.astype(bf16), w4[...],
                         preferred_element_type=jnp.float32) + b4[...]
        m = jnp.max(logits, axis=-1, keepdims=True)
        e = jnp.exp(logits - m)
        o_ref[...] = e / jnp.sum(e, axis=-1, keepdims=True)


def word_forward(xc, word_params, tk=2048):
    """xc: (B, 5964) bf16 -> softmax probs (B, 2) f32."""
    b = xc.shape[0]
    w1, b1, w2, b2, w3, b3, w4, b4 = word_params
    k = w1.shape[0]
    k_pad = pl.cdiv(k, tk) * tk                          # 5964 -> 6144
    xp = jnp.pad(xc, ((0, 0), (0, k_pad - k)))
    w1p = jnp.pad(w1, ((0, k_pad - k), (0, 0)))
    nk = k_pad // tk

    def full_spec(a):
        return pl.BlockSpec(a.shape, lambda kk: (0, 0))

    return pl.pallas_call(
        _word_kernel,
        grid=(nk,),
        in_specs=[pl.BlockSpec((b, tk), lambda kk: (0, kk)),      # activations
                  pl.BlockSpec((tk, WH1), lambda kk: (kk, 0)),    # streamed w1 K-tile
                  full_spec(b1), full_spec(w2), full_spec(b2),
                  full_spec(w3), full_spec(b3),
                  full_spec(w4), full_spec(b4)],
        out_specs=pl.BlockSpec((b, WORD_OUT), lambda kk: (0, 0)),
        out_shape=jax.ShapeDtypeStruct((b, WORD_OUT), jnp.float32),
        scratch_shapes=[pltpu.VMEM((b, WH1), jnp.float32)],
        compiler_params=pltpu.CompilerParams(
            dimension_semantics=("arbitrary",)),
    )(xp, w1p, b1, w2, b2, w3, b3, w4, b4)


# ----------------------------------------------------------------------------
# Parameter init (deterministic, torch-Linear-like uniform(-1/sqrt(fan_in), ..))
# ----------------------------------------------------------------------------
def _linear(key, fan_in, fan_out):
    kw, kb = jax.random.split(key)
    bound = 1.0 / math.sqrt(float(fan_in))
    w = jax.random.uniform(kw, (fan_in, fan_out), jnp.float32, -bound, bound)
    b = jax.random.uniform(kb, (1, fan_out), jnp.float32, -bound, bound)
    return w, b


def make_params(key):
    keys = jax.random.split(key, 9)
    phone_dims = [(PHONE_IN, PHONE_H), (PHONE_H, PHONE_H), (PHONE_H, PHONE_H),
                  (PHONE_H, PHONE_H), (PHONE_H, PHONE_OUT)]
    phone_f32 = [_linear(k, i, o) for k, (i, o) in zip(keys[:5], phone_dims)]
    # Weights in bf16 (halves HBM traffic, native MXU path); biases stay f32.
    phone_params = [(w.astype(jnp.bfloat16), b) for (w, b) in phone_f32]

    word_dims = [(WORD_IN, WH1), (WH1, WH2), (WH2, WH3), (WH3, WORD_OUT)]
    (w1, b1), (w2, b2), (w3, b3), (w4, b4) = [
        _linear(k, i, o) for k, (i, o) in zip(keys[5:], word_dims)]

    # Eval-mode BatchNorm (gamma=1, beta=0, running mean=0 / var=1) as a
    # per-feature scale/shift, folded into the next linear layer:
    #   (h*s + t) @ w + b  ==  h @ (s.T * w) + (t @ w + b)
    def bn_scale_shift(nf):
        gamma = jnp.ones((1, nf), jnp.float32)
        beta = jnp.zeros((1, nf), jnp.float32)
        rmean = jnp.zeros((1, nf), jnp.float32)
        rvar = jnp.ones((1, nf), jnp.float32)
        scale = gamma / jnp.sqrt(rvar + BN_EPS)
        shift = beta - rmean * scale
        return scale, shift

    s1, t1 = bn_scale_shift(WH1)
    s2, t2 = bn_scale_shift(WH2)
    s3, t3 = bn_scale_shift(WH3)
    w2f, b2f = s1.reshape(-1, 1) * w2, b2 + t1 @ w2
    w3f, b3f = s2.reshape(-1, 1) * w3, b3 + t2 @ w3
    w4f, b4f = s3.reshape(-1, 1) * w4, b4 + t3 @ w4

    bf = jnp.bfloat16
    word_params = (w1.astype(bf), b1, w2f.astype(bf), b2f,
                   w3f.astype(bf), b3f, w4f.astype(bf), b4f)
    return phone_params, word_params


# ----------------------------------------------------------------------------
# Full module forward (of the 3-tuple the PyTorch module returns, only `out` is
# an array; the submodule handles have no array equivalent).
# ----------------------------------------------------------------------------
@jax.jit
def word_nn_temp_combine_forward(x, phone_params, word_params):
    b, t, f = x.shape
    frames = phone_forward(x.reshape(b * t, f), phone_params)   # (B*T, 42) bf16
    cat = frames.reshape(b, t * PHONE_OUT)                      # == torch.cat(dim=1)
    return word_forward(cat, word_params)                       # (B, 2) f32


def reference_forward(x, phone_params, word_params):
    """Pure-JAX f32 reference using the same (bf16-stored, BN-folded) weights."""
    b, t, f = x.shape
    h = x.reshape(b * t, f).astype(jnp.float32)
    for i, (w, bi) in enumerate(phone_params):
        h = h @ w.astype(jnp.float32) + bi
        if i < len(phone_params) - 1:
            h = jax.nn.sigmoid(h)
    h = h.reshape(b, t * PHONE_OUT)
    w1, b1, w2, b2, w3, b3, w4, b4 = word_params
    h = jnp.maximum(h @ w1.astype(jnp.float32) + b1, 0.0)
    h = jnp.maximum(h @ w2.astype(jnp.float32) + b2, 0.0)
    h = jnp.maximum(h @ w3.astype(jnp.float32) + b3, 0.0)
    return jax.nn.softmax(h @ w4.astype(jnp.float32) + b4, axis=-1)


if __name__ == "__main__":
    key = jax.random.PRNGKey(0)
    k_x, k_p = jax.random.split(key)

    B = 2
    x = jax.random.normal(k_x, (B, N_FRAMES, PHONE_IN), jnp.float32)
    phone_params, word_params = make_params(k_p)

    out = word_nn_temp_combine_forward(x, phone_params, word_params)
    out = jax.block_until_ready(out)

    ref = reference_forward(x, phone_params, word_params)
    assert out.shape == (B, WORD_OUT)
    assert jnp.allclose(jnp.sum(out, axis=-1), 1.0, atol=1e-3)
    assert jnp.allclose(out, ref, atol=2e-2, rtol=2e-2)

    print("KERNEL_OK")
</pallas_src>

<mosaic_0001>
module attributes {stable_mosaic.version = 11 : i64} {
  func.func @_phone_kernel(%arg0: i32, %arg1: memref<144x360xbf16, #tpu.memory_space<vmem>>, %arg2: memref<360x256xbf16, #tpu.memory_space<vmem>>, %arg3: memref<1x256xf32, #tpu.memory_space<vmem>>, %arg4: memref<256x256xbf16, #tpu.memory_space<vmem>>, %arg5: memref<1x256xf32, #tpu.memory_space<vmem>>, %arg6: memref<256x256xbf16, #tpu.memory_space<vmem>>, %arg7: memref<1x256xf32, #tpu.memory_space<vmem>>, %arg8: memref<256x256xbf16, #tpu.memory_space<vmem>>, %arg9: memref<1x256xf32, #tpu.memory_space<vmem>>, %arg10: memref<256x128xbf16, #tpu.memory_space<vmem>>, %arg11: memref<1x128xf32, #tpu.memory_space<vmem>>, %arg12: memref<144x128xbf16, #tpu.memory_space<vmem>>) attributes {dimension_semantics = [#tpu.dimension_semantics<parallel>], iteration_bounds = array<i64: 2>, scalar_prefetch = 0 : i64, scratch_operands = 0 : i64, tpu.core_type = #tpu.core_type<tc>, window_params = [{transform_indices = @transform_0, window_bounds = array<i64: 144, 360>}, {pipeline_mode = #tpu.pipeline_mode<synchronous>, transform_indices = @transform_1, window_bounds = array<i64: 360, 256>}, {pipeline_mode = #tpu.pipeline_mode<synchronous>, transform_indices = @transform_2, window_bounds = array<i64: 1, 256>}, {pipeline_mode = #tpu.pipeline_mode<synchronous>, transform_indices = @transform_3, window_bounds = array<i64: 256, 256>}, {pipeline_mode = #tpu.pipeline_mode<synchronous>, transform_indices = @transform_4, window_bounds = array<i64: 1, 256>}, {pipeline_mode = #tpu.pipeline_mode<synchronous>, transform_indices = @transform_5, window_bounds = array<i64: 256, 256>}, {pipeline_mode = #tpu.pipeline_mode<synchronous>, transform_indices = @transform_6, window_bounds = array<i64: 1, 256>}, {pipeline_mode = #tpu.pipeline_mode<synchronous>, transform_indices = @transform_7, window_bounds = array<i64: 256, 256>}, {pipeline_mode = #tpu.pipeline_mode<synchronous>, transform_indices = @transform_8, window_bounds = array<i64: 1, 256>}, {pipeline_mode = #tpu.pipeline_mode<synchronous>, transform_indices = @transform_9, window_bounds = array<i64: 256, 128>}, {pipeline_mode = #tpu.pipeline_mode<synchronous>, transform_indices = @transform_10, window_bounds = array<i64: 1, 128>}, {transform_indices = @transform_11, window_bounds = array<i64: 144, 128>}]} {
    %c0 = arith.constant 0 : index
    %c0_0 = arith.constant 0 : index
    %0 = vector.load %arg1[%c0, %c0_0] : memref<144x360xbf16, #tpu.memory_space<vmem>>, vector<144x360xbf16>
    %c0_1 = arith.constant 0 : index
    %c0_2 = arith.constant 0 : index
    %1 = vector.load %arg2[%c0_1, %c0_2] : memref<360x256xbf16, #tpu.memory_space<vmem>>, vector<360x256xbf16>
    %cst = arith.constant dense<0.000000e+00> : vector<144x256xf32>
    %2 = tpu.matmul %0, %1, %cst {dimension_numbers = #tpu.dot_dimension_numbers<[1], [0], [0], [1], [0, 0, 1, 1], [], []>} : vector<144x360xbf16>, vector<360x256xbf16>, vector<144x256xf32> -> vector<144x256xf32>
    %c0_3 = arith.constant 0 : index
    %c0_4 = arith.constant 0 : index
    %3 = vector.load %arg3[%c0_3, %c0_4] : memref<1x256xf32, #tpu.memory_space<vmem>>, vector<1x256xf32>
    %4 = vector.broadcast %3 : vector<1x256xf32> to vector<144x256xf32>
    %5 = arith.addf %2, %4 : vector<144x256xf32>
    %6 = arith.negf %5 : vector<144x256xf32>
    %7 = math.exp %6 : vector<144x256xf32>
    %cst_5 = arith.constant 1.000000e+00 : f32
    %8 = vector.broadcast %cst_5 : f32 to vector<144x256xf32>
    %9 = arith.addf %8, %7 : vector<144x256xf32>
    %10 = arith.divf %8, %9 : vector<144x256xf32>
    %11 = arith.truncf %10 : vector<144x256xf32> to vector<144x256xbf16>
    %c0_6 = arith.constant 0 : index
    %c0_7 = arith.constant 0 : index
    %12 = vector.load %arg4[%c0_6, %c0_7] : memref<256x256xbf16, #tpu.memory_space<vmem>>, vector<256x256xbf16>
    %cst_8 = arith.constant dense<0.000000e+00> : vector<144x256xf32>
    %13 = tpu.matmul %11, %12, %cst_8 {dimension_numbers = #tpu.dot_dimension_numbers<[1], [0], [0], [1], [0, 0, 1, 1], [], []>} : vector<144x256xbf16>, vector<256x256xbf16>, vector<144x256xf32> -> vector<144x256xf32>
    %c0_9 = arith.constant 0 : index
    %c0_10 = arith.constant 0 : index
    %14 = vector.load %arg5[%c0_9, %c0_10] : memref<1x256xf32, #tpu.memory_space<vmem>>, vector<1x256xf32>
    %15 = vector.broadcast %14 : vector<1x256xf32> to vector<144x256xf32>
    %16 = arith.addf %13, %15 : vector<144x256xf32>
    %17 = arith.negf %16 : vector<144x256xf32>
    %18 = math.exp %17 : vector<144x256xf32>
    %cst_11 = arith.constant 1.000000e+00 : f32
    %19 = vector.broadcast %cst_11 : f32 to vector<144x256xf32>
    %20 = arith.addf %19, %18 : vector<144x256xf32>
    %21 = arith.divf %19, %20 : vector<144x256xf32>
    %22 = arith.truncf %21 : vector<144x256xf32> to vector<144x256xbf16>
    %c0_12 = arith.constant 0 : index
    %c0_13 = arith.constant 0 : index
    %23 = vector.load %arg6[%c0_12, %c0_13] : memref<256x256xbf16, #tpu.memory_space<vmem>>, vector<256x256xbf16>
    %cst_14 = arith.constant dense<0.000000e+00> : vector<144x256xf32>
    %24 = tpu.matmul %22, %23, %cst_14 {dimension_numbers = #tpu.dot_dimension_numbers<[1], [0], [0], [1], [0, 0, 1, 1], [], []>} : vector<144x256xbf16>, vector<256x256xbf16>, vector<144x256xf32> -> vector<144x256xf32>
    %c0_15 = arith.constant 0 : index
    %c0_16 = arith.constant 0 : index
    %25 = vector.load %arg7[%c0_15, %c0_16] : memref<1x256xf32, #tpu.memory_space<vmem>>, vector<1x256xf32>
    %26 = vector.broadcast %25 : vector<1x256xf32> to vector<144x256xf32>
    %27 = arith.addf %24, %26 : vector<144x256xf32>
    %28 = arith.negf %27 : vector<144x256xf32>
    %29 = math.exp %28 : vector<144x256xf32>
    %cst_17 = arith.constant 1.000000e+00 : f32
    %30 = vector.broadcast %cst_17 : f32 to vector<144x256xf32>
    %31 = arith.addf %30, %29 : vector<144x256xf32>
    %32 = arith.divf %30, %31 : vector<144x256xf32>
    %33 = arith.truncf %32 : vector<144x256xf32> to vector<144x256xbf16>
    %c0_18 = arith.constant 0 : index
    %c0_19 = arith.constant 0 : index
    %34 = vector.load %arg8[%c0_18, %c0_19] : memref<256x256xbf16, #tpu.memory_space<vmem>>, vector<256x256xbf16>
    %cst_20 = arith.constant dense<0.000000e+00> : vector<144x256xf32>
    %35 = tpu.matmul %33, %34, %cst_20 {dimension_numbers = #tpu.dot_dimension_numbers<[1], [0], [0], [1], [0, 0, 1, 1], [], []>} : vector<144x256xbf16>, vector<256x256xbf16>, vector<144x256xf32> -> vector<144x256xf32>
    %c0_21 = arith.constant 0 : index
    %c0_22 = arith.constant 0 : index
    %36 = vector.load %arg9[%c0_21, %c0_22] : memref<1x256xf32, #tpu.memory_space<vmem>>, vector<1x256xf32>
    %37 = vector.broadcast %36 : vector<1x256xf32> to vector<144x256xf32>
    %38 = arith.addf %35, %37 : vector<144x256xf32>
    %39 = arith.negf %38 : vector<144x256xf32>
    %40 = math.exp %39 : vector<144x256xf32>
    %cst_23 = arith.constant 1.000000e+00 : f32
    %41 = vector.broadcast %cst_23 : f32 to vector<144x256xf32>
    %42 = arith.addf %41, %40 : vector<144x256xf32>
    %43 = arith.divf %41, %42 : vector<144x256xf32>
    %44 = arith.truncf %43 : vector<144x256xf32> to vector<144x256xbf16>
    %c0_24 = arith.constant 0 : index
    %c0_25 = arith.constant 0 : index
    %45 = vector.load %arg10[%c0_24, %c0_25] : memref<256x128xbf16, #tpu.memory_space<vmem>>, vector<256x128xbf16>
    %cst_26 = arith.constant dense<0.000000e+00> : vector<144x128xf32>
    %46 = tpu.matmul %44, %45, %cst_26 {dimension_numbers = #tpu.dot_dimension_numbers<[1], [0], [0], [1], [0, 0, 1, 1], [], []>} : vector<144x256xbf16>, vector<256x128xbf16>, vector<144x128xf32> -> vector<144x128xf32>
    %c0_27 = arith.constant 0 : index
    %c0_28 = arith.constant 0 : index
    %47 = vector.load %arg11[%c0_27, %c0_28] : memref<1x128xf32, #tpu.memory_space<vmem>>, vector<1x128xf32>
    %48 = vector.broadcast %47 : vector<1x128xf32> to vector<144x128xf32>
    %49 = arith.addf %46, %48 : vector<144x128xf32>
    %50 = arith.truncf %49 : vector<144x128xf32> to vector<144x128xbf16>
    %c0_29 = arith.constant 0 : index
    %c0_30 = arith.constant 0 : index
    %51 = vector.load %arg12[%c0_29, %c0_30] : memref<144x128xbf16, #tpu.memory_space<vmem>>, vector<144x128xbf16>
    tpu.vector_store %arg12[%c0_29, %c0_30], %50 {strides = array<i32>} : memref<144x128xbf16, #tpu.memory_space<vmem>>, vector<144x128xbf16>,
    return
  }
  func.func @transform_0(%arg0: i32) -> (i32, i32) {
    %c0_i32 = arith.constant 0 : i32
    %c0_i32_0 = arith.constant 0 : i32
    return %arg0, %c0_i32 : i32, i32
  }
  func.func @transform_1(%arg0: i32) -> (i32, i32) {
    %c0_i32 = arith.constant 0 : i32
    %c0_i32_0 = arith.constant 0 : i32
    %c0_i32_1 = arith.constant 0 : i32
    return %c0_i32, %c0_i32_0 : i32, i32
  }
  func.func @transform_2(%arg0: i32) -> (i32, i32) {
    %c0_i32 = arith.constant 0 : i32
    %c0_i32_0 = arith.constant 0 : i32
    %c0_i32_1 = arith.constant 0 : i32
    return %c0_i32, %c0_i32_0 : i32, i32
  }
  func.func @transform_3(%arg0: i32) -> (i32, i32) {
    %c0_i32 = arith.constant 0 : i32
    %c0_i32_0 = arith.constant 0 : i32
    %c0_i32_1 = arith.constant 0 : i32
    return %c0_i32, %c0_i32_0 : i32, i32
  }
  func.func @transform_4(%arg0: i32) -> (i32, i32) {
    %c0_i32 = arith.constant 0 : i32
    %c0_i32_0 = arith.constant 0 : i32
    %c0_i32_1 = arith.constant 0 : i32
    return %c0_i32, %c0_i32_0 : i32, i32
  }
  func.func @transform_5(%arg0: i32) -> (i32, i32) {
    %c0_i32 = arith.constant 0 : i32
    %c0_i32_0 = arith.constant 0 : i32
    %c0_i32_1 = arith.constant 0 : i32
    return %c0_i32, %c0_i32_0 : i32, i32
  }
  func.func @transform_6(%arg0: i32) -> (i32, i32) {
    %c0_i32 = arith.constant 0 : i32
    %c0_i32_0 = arith.constant 0 : i32
    %c0_i32_1 = arith.constant 0 : i32
    return %c0_i32, %c0_i32_0 : i32, i32
  }
  func.func @transform_7(%arg0: i32) -> (i32, i32) {
    %c0_i32 = arith.constant 0 : i32
    %c0_i32_0 = arith.constant 0 : i32
    %c0_i32_1 = arith.constant 0 : i32
    return %c0_i32, %c0_i32_0 : i32, i32
  }
  func.func @transform_8(%arg0: i32) -> (i32, i32) {
    %c0_i32 = arith.constant 0 : i32
    %c0_i32_0 = arith.constant 0 : i32
    %c0_i32_1 = arith.constant 0 : i32
    return %c0_i32, %c0_i32_0 : i32, i32
  }
  func.func @transform_9(%arg0: i32) -> (i32, i32) {
    %c0_i32 = arith.constant 0 : i32
    %c0_i32_0 = arith.constant 0 : i32
    %c0_i32_1 = arith.constant 0 : i32
    return %c0_i32, %c0_i32_0 : i32, i32
  }
  func.func @transform_10(%arg0: i32) -> (i32, i32) {
    %c0_i32 = arith.constant 0 : i32
    %c0_i32_0 = arith.constant 0 : i32
    %c0_i32_1 = arith.constant 0 : i32
    return %c0_i32, %c0_i32_0 : i32, i32
  }
  func.func @transform_11(%arg0: i32) -> (i32, i32) {
    %c0_i32 = arith.constant 0 : i32
    %c0_i32_0 = arith.constant 0 : i32
    return %arg0, %c0_i32 : i32, i32
  }
}

module attributes {stable_mosaic.version = 11 : i64} {
  func.func @_word_kernel(%arg0: i32, %arg1: memref<2x2048xbf16, #tpu.memory_space<vmem>>, %arg2: memref<2048x512xbf16, #tpu.memory_space<vmem>>, %arg3: memref<1x512xf32, #tpu.memory_space<vmem>>, %arg4: memref<512x256xbf16, #tpu.memory_space<vmem>>, %arg5: memref<1x256xf32, #tpu.memory_space<vmem>>, %arg6: memref<256x64xbf16, #tpu.memory_space<vmem>>, %arg7: memref<1x64xf32, #tpu.memory_space<vmem>>, %arg8: memref<64x2xbf16, #tpu.memory_space<vmem>>, %arg9: memref<1x2xf32, #tpu.memory_space<vmem>>, %arg10: memref<2x2xf32, #tpu.memory_space<vmem>>, %arg11: memref<2x512xf32, #tpu.memory_space<vmem>>) attributes {dimension_semantics = [#tpu.dimension_semantics<arbitrary>], iteration_bounds = array<i64: 3>, scalar_prefetch = 0 : i64, scratch_operands = 1 : i64, tpu.core_type = #tpu.core_type<tc>, window_params = [{transform_indices = @transform_0, window_bounds = array<i64: 2, 2048>}, {transform_indices = @transform_1, window_bounds = array<i64: 2048, 512>}, {pipeline_mode = #tpu.pipeline_mode<synchronous>, transform_indices = @transform_2, window_bounds = array<i64: 1, 512>}, {pipeline_mode = #tpu.pipeline_mode<synchronous>, transform_indices = @transform_3, window_bounds = array<i64: 512, 256>}, {pipeline_mode = #tpu.pipeline_mode<synchronous>, transform_indices = @transform_4, window_bounds = array<i64: 1, 256>}, {pipeline_mode = #tpu.pipeline_mode<synchronous>, transform_indices = @transform_5, window_bounds = array<i64: 256, 64>}, {pipeline_mode = #tpu.pipeline_mode<synchronous>, transform_indices = @transform_6, window_bounds = array<i64: 1, 64>}, {pipeline_mode = #tpu.pipeline_mode<synchronous>, transform_indices = @transform_7, window_bounds = array<i64: 64, 2>}, {pipeline_mode = #tpu.pipeline_mode<synchronous>, transform_indices = @transform_8, window_bounds = array<i64: 1, 2>}, {pipeline_mode = #tpu.pipeline_mode<synchronous>, transform_indices = @transform_9, window_bounds = array<i64: 2, 2>}]} {
    %c0_i32 = arith.constant 0 : i32
    %0 = arith.cmpi eq, %arg0, %c0_i32 : i32
    %1 = arith.extui %0 : i1 to i32
    %c0_i32_0 = arith.constant 0 : i32
    %2 = arith.cmpi ne, %1, %c0_i32_0 : i32
    scf.if %2 {
      %cst_9 = arith.constant 0.000000e+00 : f32
      %12 = vector.broadcast %cst_9 : f32 to vector<2x512xf32>
      %c0_10 = arith.constant 0 : index
      %c0_11 = arith.constant 0 : index
      %13 = vector.load %arg11[%c0_10, %c0_11] : memref<2x512xf32, #tpu.memory_space<vmem>>, vector<2x512xf32>
      tpu.vector_store %arg11[%c0_10, %c0_11], %12 {strides = array<i32>} : memref<2x512xf32, #tpu.memory_space<vmem>>, vector<2x512xf32>,
    } else {
    }
    %c0 = arith.constant 0 : index
    %c0_1 = arith.constant 0 : index
    %3 = vector.load %arg11[%c0, %c0_1] : memref<2x512xf32, #tpu.memory_space<vmem>>, vector<2x512xf32>
    %c0_2 = arith.constant 0 : index
    %c0_3 = arith.constant 0 : index
    %4 = vector.load %arg1[%c0_2, %c0_3] : memref<2x2048xbf16, #tpu.memory_space<vmem>>, vector<2x2048xbf16>
    %c0_4 = arith.constant 0 : index
    %c0_5 = arith.constant 0 : index
    %5 = vector.load %arg2[%c0_4, %c0_5] : memref<2048x512xbf16, #tpu.memory_space<vmem>>, vector<2048x512xbf16>
    %cst = arith.constant dense<0.000000e+00> : vector<2x512xf32>
    %6 = tpu.matmul %4, %5, %cst {dimension_numbers = #tpu.dot_dimension_numbers<[1], [0], [0], [1], [0, 0, 1, 1], [], []>} : vector<2x2048xbf16>, vector<2048x512xbf16>, vector<2x512xf32> -> vector<2x512xf32>
    %7 = arith.addf %3, %6 : vector<2x512xf32>
    %c0_6 = arith.constant 0 : index
    %c0_7 = arith.constant 0 : index
    %8 = vector.load %arg11[%c0_6, %c0_7] : memref<2x512xf32, #tpu.memory_space<vmem>>, vector<2x512xf32>
    tpu.vector_store %arg11[%c0_6, %c0_7], %7 {strides = array<i32>} : memref<2x512xf32, #tpu.memory_space<vmem>>, vector<2x512xf32>,
    %c2_i32 = arith.constant 2 : i32
    %9 = arith.cmpi eq, %arg0, %c2_i32 : i32
    %10 = arith.extui %9 : i1 to i32
    %c0_i32_8 = arith.constant 0 : i32
    %11 = arith.cmpi ne, %10, %c0_i32_8 : i32
    scf.if %11 {
      %c0_9 = arith.constant 0 : index
      %c0_10 = arith.constant 0 : index
      %12 = vector.load %arg11[%c0_9, %c0_10] : memref<2x512xf32, #tpu.memory_space<vmem>>, vector<2x512xf32>
      %c0_11 = arith.constant 0 : index
      %c0_12 = arith.constant 0 : index
      %13 = vector.load %arg3[%c0_11, %c0_12] : memref<1x512xf32, #tpu.memory_space<vmem>>, vector<1x512xf32>
      %14 = vector.broadcast %13 : vector<1x512xf32> to vector<2x512xf32>
      %15 = arith.addf %12, %14 : vector<2x512xf32>
      %cst_13 = arith.constant 0.000000e+00 : f32
      %16 = vector.broadcast %cst_13 : f32 to vector<2x512xf32>
      %17 = arith.maximumf %15, %16 : vector<2x512xf32>
      %18 = arith.truncf %17 : vector<2x512xf32> to vector<2x512xbf16>
      %c0_14 = arith.constant 0 : index
      %c0_15 = arith.constant 0 : index
      %19 = vector.load %arg4[%c0_14, %c0_15] : memref<512x256xbf16, #tpu.memory_space<vmem>>, vector<512x256xbf16>
      %cst_16 = arith.constant dense<0.000000e+00> : vector<2x256xf32>
      %20 = tpu.matmul %18, %19, %cst_16 {dimension_numbers = #tpu.dot_dimension_numbers<[1], [0], [0], [1], [0, 0, 1, 1], [], []>} : vector<2x512xbf16>, vector<512x256xbf16>, vector<2x256xf32> -> vector<2x256xf32>
      %c0_17 = arith.constant 0 : index
      %c0_18 = arith.constant 0 : index
      %21 = vector.load %arg5[%c0_17, %c0_18] : memref<1x256xf32, #tpu.memory_space<vmem>>, vector<1x256xf32>
      %22 = vector.broadcast %21 : vector<1x256xf32> to vector<2x256xf32>
      %23 = arith.addf %20, %22 : vector<2x256xf32>
      %cst_19 = arith.constant 0.000000e+00 : f32
      %24 = vector.broadcast %cst_19 : f32 to vector<2x256xf32>
      %25 = arith.maximumf %23, %24 : vector<2x256xf32>
      %26 = arith.truncf %25 : vector<2x256xf32> to vector<2x256xbf16>
      %c0_20 = arith.constant 0 : index
      %c0_21 = arith.constant 0 : index
      %27 = vector.load %arg6[%c0_20, %c0_21] : memref<256x64xbf16, #tpu.memory_space<vmem>>, vector<256x64xbf16>
      %cst_22 = arith.constant dense<0.000000e+00> : vector<2x64xf32>
      %28 = tpu.matmul %26, %27, %cst_22 {dimension_numbers = #tpu.dot_dimension_numbers<[1], [0], [0], [1], [0, 0, 1, 1], [], []>} : vector<2x256xbf16>, vector<256x64xbf16>, vector<2x64xf32> -> vector<2x64xf32>
      %c0_23 = arith.constant 0 : index
      %c0_24 = arith.constant 0 : index
      %29 = vector.load %arg7[%c0_23, %c0_24] : memref<1x64xf32, #tpu.memory_space<vmem>>, vector<1x64xf32>
      %30 = vector.broadcast %29 : vector<1x64xf32> to vector<2x64xf32>
      %31 = arith.addf %28, %30 : vector<2x64xf32>
      %cst_25 = arith.constant 0.000000e+00 : f32
      %32 = vector.broadcast %cst_25 : f32 to vector<2x64xf32>
      %33 = arith.maximumf %31, %32 : vector<2x64xf32>
      %34 = arith.truncf %33 : vector<2x64xf32> to vector<2x64xbf16>
      %c0_26 = arith.constant 0 : index
      %c0_27 = arith.constant 0 : index
      %35 = vector.load %arg8[%c0_26, %c0_27] : memref<64x2xbf16, #tpu.memory_space<vmem>>, vector<64x2xbf16>
      %cst_28 = arith.constant dense<0.000000e+00> : vector<2x2xf32>
      %36 = tpu.matmul %34, %35, %cst_28 {dimension_numbers = #tpu.dot_dimension_numbers<[1], [0], [0], [1], [0, 0, 1, 1], [], []>} : vector<2x64xbf16>, vector<64x2xbf16>, vector<2x2xf32> -> vector<2x2xf32>
      %c0_29 = arith.constant 0 : index
      %c0_30 = arith.constant 0 : index
      %37 = vector.load %arg9[%c0_29, %c0_30] : memref<1x2xf32, #tpu.memory_space<vmem>>, vector<1x2xf32>
      %38 = vector.broadcast %37 : vector<1x2xf32> to vector<2x2xf32>
      %39 = arith.addf %36, %38 : vector<2x2xf32>
      %cst_31 = arith.constant dense<0xFF800000> : vector<2xf32>
      %40 = vector.multi_reduction <maximumf>, %39, %cst_31 [1] : vector<2x2xf32> to vector<2xf32>
      %41 = vector.shape_cast %40 : vector<2xf32> to vector<2x1xf32>
      %42 = vector.broadcast %41 : vector<2x1xf32> to vector<2x2xf32>
      %43 = arith.subf %39, %42 : vector<2x2xf32>
      %44 = math.exp %43 : vector<2x2xf32>
      %cst_32 = arith.constant dense<0.000000e+00> : vector<2xf32>
      %45 = vector.multi_reduction <add>, %44, %cst_32 [1] : vector<2x2xf32> to vector<2xf32>
      %46 = vector.shape_cast %45 : vector<2xf32> to vector<2x1xf32>
      %47 = vector.broadcast %46 : vector<2x1xf32> to vector<2x2xf32>
      %48 = arith.divf %44, %47 : vector<2x2xf32>
      %c0_33 = arith.constant 0 : index
      %c0_34 = arith.constant 0 : index
      %49 = vector.load %arg10[%c0_33, %c0_34] : memref<2x2xf32, #tpu.memory_space<vmem>>, vector<2x2xf32>
      tpu.vector_store %arg10[%c0_33, %c0_34], %48 {strides = array<i32>} : memref<2x2xf32, #tpu.memory_space<vmem>>, vector<2x2xf32>,
    } else {
    }
    return
  }
  func.func @transform_0(%arg0: i32) -> (i32, i32) {
    %c0_i32 = arith.constant 0 : i32
    %c0_i32_0 = arith.constant 0 : i32
    return %c0_i32, %arg0 : i32, i32
  }
  func.func @transform_1(%arg0: i32) -> (i32, i32) {
    %c0_i32 = arith.constant 0 : i32
    %c0_i32_0 = arith.constant 0 : i32
    return %arg0, %c0_i32 : i32, i32
  }
  func.func @transform_2(%arg0: i32) -> (i32, i32) {
    %c0_i32 = arith.constant 0 : i32
    %c0_i32_0 = arith.constant 0 : i32
    %c0_i32_1 = arith.constant 0 : i32
    return %c0_i32, %c0_i32_0 : i32, i32
  }
  func.func @transform_3(%arg0: i32) -> (i32, i32) {
    %c0_i32 = arith.constant 0 : i32
    %c0_i32_0 = arith.constant 0 : i32
    %c0_i32_1 = arith.constant 0 : i32
    return %c0_i32, %c0_i32_0 : i32, i32
  }
  func.func @transform_4(%arg0: i32) -> (i32, i32) {
    %c0_i32 = arith.constant 0 : i32
    %c0_i32_0 = arith.constant 0 : i32
    %c0_i32_1 = arith.constant 0 : i32
    return %c0_i32, %c0_i32_0 : i32, i32
  }
  func.func @transform_5(%arg0: i32) -> (i32, i32) {
    %c0_i32 = arith.constant 0 : i32
    %c0_i32_0 = arith.constant 0 : i32
    %c0_i32_1 = arith.constant 0 : i32
    return %c0_i32, %c0_i32_0 : i32, i32
  }
  func.func @transform_6(%arg0: i32) -> (i32, i32) {
    %c0_i32 = arith.constant 0 : i32
    %c0_i32_0 = arith.constant 0 : i32
    %c0_i32_1 = arith.constant 0 : i32
    return %c0_i32, %c0_i32_0 : i32, i32
  }
  func.func @transform_7(%arg0: i32) -> (i32, i32) {
    %c0_i32 = arith.constant 0 : i32
    %c0_i32_0 = arith.constant 0 : i32
    %c0_i32_1 = arith.constant 0 : i32
    return %c0_i32, %c0_i32_0 : i32, i32
  }
  func.func @transform_8(%arg0: i32) -> (i32, i32) {
    %c0_i32 = arith.constant 0 : i32
    %c0_i32_0 = arith.constant 0 : i32
    %c0_i32_1 = arith.constant 0 : i32
    return %c0_i32, %c0_i32_0 : i32, i32
  }
  func.func @transform_9(%arg0: i32) -> (i32, i32) {
    %c0_i32 = arith.constant 0 : i32
    %c0_i32_0 = arith.constant 0 : i32
    %c0_i32_1 = arith.constant 0 : i32
    return %c0_i32, %c0_i32_0 : i32, i32
  }
}

</mosaic_0001>

<bundles_post_ra>
// kernel: word_nn_temp_combine_forward.2
= control target key start
LH: loop header
LB: loop body
LE: loop exit
PB: predicated region body
PF: predicated region fallthrough
CT: control target
= control target key end

     0   :  { %16 = vsyncpa [#allocation3], 0  ;;  %s11631_s0 = inlined_call_operand.vmem [shape: bf16[288,360], index: 0, kind: input, shape index: {}]   ;;  %s11632_s1 = inlined_call_operand.hbm [shape: bf16[360,256], index: 1, kind: input, shape index: {}]   ;;  %s11633_s2 = inlined_call_operand.hbm [shape: f32[1,256], index: 2, kind: input, shape index: {}]   ;;  %s11634_s3 = inlined_call_operand.hbm [shape: bf16[256,256], index: 3, kind: input, shape index: {}]   ;;  %s11635_s4 = inlined_call_operand.hbm [shape: f32[1,256], index: 4, kind: input, shape index: {}]   ;;  %s11636_s5 = inlined_call_operand.hbm [shape: bf16[256,256], index: 5, kind: input, shape index: {}]   ;;  %s11637_s6 = inlined_call_operand.hbm [shape: f32[1,256], index: 6, kind: input, shape index: {}]   ;;  %s11638_s7 = inlined_call_operand.hbm [shape: bf16[256,256], index: 7, kind: input, shape index: {}]   ;;  %s11639_s8 = inlined_call_operand.hbm [shape: f32[1,256], index: 8, kind: input, shape index: {}]   ;;  %s11640_s9 = inlined_call_operand.vmem [shape: bf16[256,128], index: 9, kind: input, shape index: {}]   ;;  %s11641_s10 = inlined_call_operand.vmem [shape: f32[1,128], index: 10, kind: input, shape index: {}]   ;;  %s11642_s11 = inlined_call_operand.vmem [shape: bf16[288,128], index: 11, kind: output, shape index: {}]  }
   0x1   :  { %17 = vsyncpa [#allocation5], 0 }
   0x2   :  { %18 = vsyncpa [#allocation8], 0 }
   0x3   :  { %19 = vsyncpa [#allocation11], 0 }
   0x4   :  { %20 = vsyncpa [#allocation14], 0  ;;  %s7949_s17 = smov 0  }
   0x5 LB: > { %s319_s20 = sshll.u32 %s11633_s2, 4  ;;  %s11643_s21 = sadd.s32 4294967295, %s7877_s17   ;;  %s7877_s17 = sphi %s7949_s17, %s26_s17   ;;  %s320_s20 = int_to_ptr.hbm [resolvable:$true] %s319_s20 }
   0x6   : > { %p5788_p0 = scmp.ge.s32.totalorder %s7877_s17, 1  ;;  %p293_p1 = scmp.lt.s32.totalorder %s7877_s17, 3 }
   0x7   : > { %p7962_p2 = scmp.eq.s32.totalorder %s11643_s21, 0  ;;  %s7879_s24 = smov [#allocation4]  }
   0x8   : > { %p7966_p3 = pnand %p5788_p0, %p293_p1  ;;  %s321_s25 = sshll.u32 %s7879_s24, 4  ;;  %s322_s25 = int_to_ptr.vmem [resolvable:$true] %s321_s25 }
   0x9   : > { %s345_s28 = sshll.u32 %s11635_s4, 4  ;;  %s371_s12 = sshll.u32 %s11637_s6, 4  ;;  %s346_s28 = int_to_ptr.hbm [resolvable:$true] %s345_s28  ;;  %s372_s12 = int_to_ptr.hbm [resolvable:$true] %s371_s12 }
   0xa   : > { %p6974_p4 = pneg %p7966_p3  ;;  %s7880_s14 = smov [#allocation7]  }
   0xb   : > { %s347_s15 = sshll.u32 %s7880_s14, 4  ;;  %s7881_s16 = smov [#allocation10]   ;;  %s348_s15 = int_to_ptr.vmem [resolvable:$true] %s347_s15 }
   0xc   : > { %p7980_p5 = pnand %p7962_p2, %p6974_p4  ;;  %s373_s18 = sshll.u32 %s7881_s16, 4  ;;  %s374_s18 = int_to_ptr.vmem [resolvable:$true] %s373_s18 }
   0xd   : > { %s304_s26 = sshll.u32 %s11632_s1, 4  ;;  %s7882_s27 = smov [#allocation2]   ;;  %s305_s26 = int_to_ptr.hbm [resolvable:$true] %s304_s26 }
   0xe   : > { %6980 = dma.hbm_to_vmem [thread:$0]  (!%p7980_p5), %s320_s20, 32, %s322_s25, [#allocation5]  }
   0xf   : > { %6986 = dma.hbm_to_vmem [thread:$0]  (!%p7980_p5), %s346_s28, 32, %s348_s15, [#allocation8]  }
  0x10   : > { %6992 = dma.hbm_to_vmem [thread:$0]  (!%p7980_p5), %s372_s12, 32, %s374_s18, [#allocation11]  }
  0x11   : > { %s306_s29 = sshll.u32 %s7882_s27, 4  ;;  %s330_s20 = sshll.u32 %s11634_s3, 4  ;;  %s307_s29 = int_to_ptr.vmem [resolvable:$true] %s306_s29  ;;  %s331_s20 = int_to_ptr.hbm [resolvable:$true] %s330_s20 }
  0x12   : > { %s7883_s25 = smov 128   ;;  %s7884_s28 = smov 8  }
  0x13   : > { %6977 = dma.hbm_to_vmem [thread:$0]  (!%p7980_p5), %s305_s26, 5760, %s307_s29, [#allocation3], %s7883_s25, %s7883_s25, %s7884_s28  }
  0x14   : > { %s7885_s15 = smov [#allocation6]   ;;  %s356_s12 = sshll.u32 %s11636_s5, 4  ;;  %s357_s12 = int_to_ptr.hbm [resolvable:$true] %s356_s12 }
  0x15   : > { %s332_s16 = sshll.u32 %s7885_s15, 4  ;;  %s382_s30 = sshll.u32 %s11638_s7, 4  ;;  %s333_s16 = int_to_ptr.vmem [resolvable:$true] %s332_s16  ;;  %s383_s30 = int_to_ptr.hbm [resolvable:$true] %s382_s30 }
  0x16   : > { %6983 = dma.hbm_to_vmem [thread:$0]  (!%p7980_p5), %s331_s20, 4096, %s333_s16, [#allocation5], %s7883_s25, %s7883_s25, %s7884_s28  }
  0x17   : > { %s7886_s14 = smov [#allocation9]   ;;  %s7887_s26 = smov [#allocation12]  }
  0x18   : > { %s358_s21 = sshll.u32 %s7886_s14, 4  ;;  %s384_s29 = sshll.u32 %s7887_s26, 4  ;;  %s359_s21 = int_to_ptr.vmem [resolvable:$true] %s358_s21  ;;  %s385_s29 = int_to_ptr.vmem [resolvable:$true] %s384_s29 }
  0x19   : > { %6989 = dma.hbm_to_vmem [thread:$0]  (!%p7980_p5), %s357_s12, 4096, %s359_s21, [#allocation8], %s7883_s25, %s7883_s25, %s7884_s28  }
  0x1a   : > { %s397_s24 = sshll.u32 %s11639_s8, 4  ;;  %s7888_s20 = smov [#allocation13]   ;;  %s398_s24 = int_to_ptr.hbm [resolvable:$true] %s397_s24 }
  0x1b   : > { %6995 = dma.hbm_to_vmem [thread:$0]  (!%p7980_p5), %s383_s30, 4096, %s385_s29, [#allocation11], %s7883_s25, %s7883_s25, %s7884_s28  }
  0x1c   : > { %s399_s16 = sshll.u32 %s7888_s20, 4  ;;  %428 = sbr.rel (%p7966_p3) target bundleno = 1200 (0x4b0), region = 64  ;;  %s400_s16 = int_to_ptr.vmem [resolvable:$true] %s399_s16 }
  0x1d   : > { %6998 = dma.hbm_to_vmem [thread:$0]  (!%p7980_p5), %s398_s24, 32, %s400_s16, [#allocation14]  }
  0x21   : > { %7856 = dma.done.wait (%p7962_p2), [#allocation3], 5760  }
  0x22   : > { %7858 = vsyncadd (%p7962_p2), [#allocation3], 4294961536 }
  0x23   : > { %7860 = dma.done.wait (%p7962_p2), [#allocation5], 4128  }
  0x24   : > { %7862 = vsyncadd (%p7962_p2), [#allocation5], 4294963168 }
  0x25   : > { %7864 = dma.done.wait (%p7962_p2), [#allocation8], 4128  }
  0x26   : > { %7866 = vsyncadd (%p7962_p2), [#allocation8], 4294963168 }
  0x27   : > { %7868 = dma.done.wait (%p7962_p2), [#allocation11], 4128  }
  0x28   : > { %7870 = vsyncadd (%p7962_p2), [#allocation11], 4294963168 }
  0x29   : > { %7872 = dma.done.wait (%p7962_p2), [#allocation14], 32  }
  0x2a   : > { %7874 = vsyncadd (%p7962_p2), [#allocation14], 4294967264  ;;  %v5975_v0 = vld [vmem:[#allocation2 + $0x70] sm:$0xf]  ;;  %v6747_v1 = vld [vmem:[#allocation2 + $0x74] sm:$0xf0] }
  0x2b   : > { %v6039_v2 = vld [vmem:[#allocation2 + $0xf0] sm:$0xf]  ;;  %v5976_v3 = vor.u32 %v6747_v1, %v5975_v0  ;;  %v6763_v4 = vld [vmem:[#allocation2 + $0xf4] sm:$0xf0]  ;;  %v8037_v5 = vld [vmem:[#allocation2 + $0x160] sm:$0xff]  ;;  %vm994_vm0 = vcmask 1043456  }
  0x2c   : > { %v5967_v6 = vld [vmem:[#allocation2 + $0x60] sm:$0xf]  ;;  %v6040_v7 = vor.u32 %v6763_v4, %v6039_v2  ;;  %v874_v8 = vunpack.c.l.b16 %v8037_v5  ;;  %v6745_v9 = vld [vmem:[#allocation2 + $0x64] sm:$0xf0]  ;;  %v6087_v13 = vld [vmem:[#allocation2 + $0x150] sm:$0xf]  ;;  %v875_v58 = vunpack.c.h.b16 %v8037_v5 }
  0x2d   : > { %v6031_v10 = vld [vmem:[#allocation2 + $0xe0] sm:$0xf]  ;;  %v6761_v11 = vld [vmem:[#allocation2 + $0xe4] sm:$0xf0]  ;;  %1001 = vmatpush.bf16.msra.mxu0 %v5976_v3  ;;  %v5968_v12 = vor.u32 %v6745_v9, %v5967_v6  ;;  %v6775_v16 = vld [vmem:[#allocation2 + $0x154] sm:$0xf0] }
  0x2e   : > { %1055 = vmatpush.bf16.msra.mxu1 %v6040_v7  ;;  %v920_v14 = vpack.c.b16 %v874_v8, %v874_v8  ;;  %v6032_v15 = vor.u32 %v6761_v11, %v6031_v10  ;;  %v5959_v17 = vld [vmem:[#allocation2 + $0x50] sm:$0xf]  ;;  %v6743_v18 = vld [vmem:[#allocation2 + $0x54] sm:$0xf0]  ;;  %v6088_v22 = vor.u32 %v6775_v16, %v6087_v13  ;;  %v6079_v24 = vld [vmem:[#allocation2 + $0x140] sm:$0xf]  ;;  %v921_v7 = vpack.c.b16 %v875_v58, %v875_v58 }
  0x2f   : > { %v6023_v19 = vld [vmem:[#allocation2 + $0xd0] sm:$0xf]  ;;  %v6759_v20 = vld [vmem:[#allocation2 + $0xd4] sm:$0xf0]  ;;  %v5960_v23 = vor.u32 %v6743_v18, %v5959_v17  ;;  %s11647_s21 = sadd.s32 4294967295, %s7877_s17   ;;  %vm966_vm1 = vcmask 850944  }
  0x30   : > { %v996_v21 = vsel %vm994_vm0, %v920_v14, 0  ;;  %s505_s22 = smul.u32 18, %s11647_s21  ;;  %v6024_v25 = vor.u32 %v6759_v20, %v6023_v19  ;;  %v6773_v26 = vld [vmem:[#allocation2 + $0x144] sm:$0xf0]  ;;  %v5951_v27 = vld [vmem:[#allocation2 + $0x40] sm:$0xf] }
  0x31   : > { %1110 = vmatpush.bf16.msra.mxu2 %v996_v21  ;;  %1002 = vmatpush.bf16.msra.mxu0 %v5968_v12  ;;  %v6741_v28 = vld [vmem:[#allocation2 + $0x44] sm:$0xf0]  ;;  %v6015_v29 = vld [vmem:[#allocation2 + $0xc0] sm:$0xf]  ;;  %v6080_v31 = vor.u32 %v6773_v26, %v6079_v24  ;;  %v6071_v33 = vld [vmem:[#allocation2 + $0x130] sm:$0xf] }
  0x32   : > { %1056 = vmatpush.bf16.msra.mxu1 %v6032_v15  ;;  %v6757_v30 = vld [vmem:[#allocation2 + $0xc4] sm:$0xf0]  ;;  %v5952_v32 = vor.u32 %v6741_v28, %v5951_v27  ;;  %p506_p6 = scmp.lt.s32.totalorder %s505_s22, 35  ;;  %v6771_v35 = vld [vmem:[#allocation2 + $0x134] sm:$0xf0]  ;;  %v999_v21 = vsel %vm994_vm0, %v921_v7, 0 }
  0x33   : > { %v6016_v34 = vor.u32 %v6757_v30, %v6015_v29  ;;  %v5943_v36 = vld [vmem:[#allocation2 + $0x30] sm:$0xf]  ;;  %v6739_v37 = vld [vmem:[#allocation2 + $0x34] sm:$0xf0]  ;;  %v6072_v40 = vor.u32 %v6771_v35, %v6071_v33  ;;  %v6063_v42 = vld [vmem:[#allocation2 + $0x120] sm:$0xf] }
  0x34   : > { %v6007_v38 = vld [vmem:[#allocation2 + $0xb0] sm:$0xf]  ;;  %v6755_v39 = vld [vmem:[#allocation2 + $0xb4] sm:$0xf0]  ;;  %v5944_v41 = vor.u32 %v6739_v37, %v5943_v36  ;;  %s11961_s22 = smov (!%p506_p6, %s505_s22), 35 }
  0x35   : > { %1111 = vmatpush.bf16.msra.mxu2 %v6088_v22  ;;  %1003 = vmatpush.bf16.msra.mxu0 %v5960_v23  ;;  %v6008_v43 = vor.u32 %v6755_v39, %v6007_v38  ;;  %v6769_v44 = vld [vmem:[#allocation2 + $0x124] sm:$0xf0]  ;;  %v5935_v45 = vld [vmem:[#allocation2 + $0x20] sm:$0xf]  ;;  %v6055_v51 = vld [vmem:[#allocation2 + $0x110] sm:$0xf] }
  0x36   : > { %1057 = vmatpush.bf16.msra.mxu1 %v6024_v25  ;;  %v6737_v46 = vld [vmem:[#allocation2 + $0x24] sm:$0xf0]  ;;  %v5999_v47 = vld [vmem:[#allocation2 + $0xa0] sm:$0xf]  ;;  %v6064_v49 = vor.u32 %v6769_v44, %v6063_v42  ;;  %s6941_s23 = smul.u32 12, %s11961_s22  ;;  %s5808_s12 = sshll.u32 %s11961_s22, 2 }
  0x37   : > { %v6753_v48 = vld [vmem:[#allocation2 + $0xa4] sm:$0xf0]  ;;  %v5936_v50 = vor.u32 %v6737_v46, %v5935_v45  ;;  %v6767_v53 = vld [vmem:[#allocation2 + $0x114] sm:$0xf0]  ;;  %v5927_v54 = vld [vmem:[#allocation2 + $0x10] sm:$0xf]  ;;  %s11598_s27 = scalar_lea.vmem %s11642_s11, %s5808_s12 }
  0x38   : > { %v6000_v52 = vor.u32 %v6753_v48, %v5999_v47  ;;  %v6735_v55 = vld [vmem:[#allocation2 + $0x14] sm:$0xf0]  ;;  %v5991_v56 = vld [vmem:[#allocation2 + $0x90] sm:$0xf]  ;;  %v6056_v59 = vor.u32 %v6767_v53, %v6055_v51  ;;  %v6047_v61 = vld [vmem:[#allocation2 + $0x100] sm:$0xf]  ;;  %s8050_s28 = scalar_lea.vmem %s11631_s0, %s6941_s23 }
  0x39   : > { %1112 = vmatpush.bf16.msra.mxu2 %v6080_v31  ;;  %1004 = vmatpush.bf16.msra.mxu0 %v5952_v32  ;;  %v6751_v57 = vld [vmem:[#allocation2 + $0x94] sm:$0xf0]  ;;  %v5928_v60 = vor.u32 %v6735_v55, %v5927_v54  ;;  %v6765_v62 = vld [vmem:[#allocation2 + $0x104] sm:$0xf0]  ;;  %v5919_v0 = vld [vmem:[#allocation2] sm:$0xf] }
  0x3a   : > { %1058 = vmatpush.bf16.msra.mxu1 %v6016_v34  ;;  %v5992_v63 = vor.u32 %v6751_v57, %v5991_v56  ;;  %v6733_v1 = vld [vmem:[#allocation2 + $0x4] sm:$0xf0]  ;;  %v5983_v2 = vld [vmem:[#allocation2 + $0x80] sm:$0xf]  ;;  %v6762_v4 = vld [vmem:[#allocation2 + $0xf4] sm:$0xf]  ;;  %v6048_v8 = vor.u32 %v6765_v62, %v6047_v61 }
  0x3b   : > { %v6749_v3 = vld [vmem:[#allocation2 + $0x84] sm:$0xf0]  ;;  %v6041_v5 = vld [vmem:[#allocation2 + $0xf8] sm:$0xf0]  ;;  %v5920_v9 = vor.u32 %v6733_v1, %v5919_v0  ;;  %v6707_v10 = vld [vmem:[%s8050_s28 + $0x10] sm:$0xf0] }
  0x3c   : > { %v5819_v6 = vld [vmem:[%s8050_s28 + $0x8] sm:$0xf]  ;;  %v5811_v11 = vld [vmem:[%s8050_s28] sm:$0xf]  ;;  %v6706_v12 = vld [vmem:[%s8050_s28 + $0x8] sm:$0xf0]  ;;  %v5984_v13 = vor.u32 %v6749_v3, %v5983_v2  ;;  %v6044_v14 = vor.u32 %v6762_v4, %v6041_v5 }
  0x3d   : > { %1113 = vmatpush.bf16.msra.mxu2 %v6072_v40  ;;  %1005 = vmatpush.bf16.msra.mxu0 %v5944_v41  ;;  %v6705_v15 = vld [vmem:[%s8050_s28 + $0x4] sm:$0xf]  ;;  %v5813_v16 = vld [vmem:[%s8050_s28 + $0xc] sm:$0xf0]  ;;  %v6033_v18 = vld [vmem:[#allocation2 + $0xe8] sm:$0xf0]  ;;  %v8058_v19 = vor.u32 %v6707_v10, %v5819_v6  ;;  %v8060_v20 = vor.u32 %v6706_v12, %v5811_v11 }
  0x3e   : > { %1059 = vmatpush.bf16.msra.mxu1 %v6008_v43  ;;  %v6760_v17 = vld [vmem:[#allocation2 + $0xe4] sm:$0xf]  ;;  %v6774_v22 = vld [vmem:[#allocation2 + $0x154] sm:$0xf]  ;;  %v6089_v23 = vld [vmem:[#allocation2 + $0x158] sm:$0xf0]  ;;  %v8063_v24 = vor.u32 %v6705_v15, %v5813_v16 }
  0x3f   : > { %v6036_v25 = vor.u32 %v6760_v17, %v6033_v18  ;;  %v6092_v26 = vor.u32 %v6774_v22, %v6089_v23  ;;  %v6758_v27 = vld [vmem:[#allocation2 + $0xd4] sm:$0xf]  ;;  %v6025_v28 = vld [vmem:[#allocation2 + $0xd8] sm:$0xf0]  ;;  %v5831_v30 = vld [vmem:[%s8050_s28 + $0x20] sm:$0xf] }
  0x40   : > { %v6028_v29 = vor.u32 %v6758_v27, %v6025_v28  ;;  %v6710_v31 = vld [vmem:[%s8050_s28 + $0x28] sm:$0xf0]  ;;  %v5823_v32 = vld [vmem:[%s8050_s28 + $0x18] sm:$0xf]  ;;  %v6709_v33 = vld [vmem:[%s8050_s28 + $0x20] sm:$0xf0] }
  0x41   : > { %1114 = vmatpush.bf16.msra.mxu2 %v6064_v49  ;;  %1006 = vmatpush.bf16.msra.mxu0 %v5936_v50  ;;  %v6708_v34 = vld [vmem:[%s8050_s28 + $0x1c] sm:$0xf]  ;;  %v5825_v35 = vld [vmem:[%s8050_s28 + $0x24] sm:$0xf0]  ;;  %v8075_v36 = vor.u32 %v6710_v31, %v5831_v30  ;;  %v8077_v37 = vor.u32 %v6709_v33, %v5823_v32  ;;  %v6772_v39 = vld [vmem:[#allocation2 + $0x144] sm:$0xf] }
  0x42   : > { %1060 = vmatpush.bf16.msra.mxu1 %v6000_v52  ;;  %v8079_v38 = vor.u32 %v6708_v34, %v5825_v35  ;;  %v6081_v40 = vld [vmem:[#allocation2 + $0x148] sm:$0xf0]  ;;  %v6756_v42 = vld [vmem:[#allocation2 + $0xc4] sm:$0xf]  ;;  %v5843_v45 = vld [vmem:[%s8050_s28 + $0x38] sm:$0xf] }
  0x43   : > { %v6084_v41 = vor.u32 %v6772_v39, %v6081_v40  ;;  %v6017_v43 = vld [vmem:[#allocation2 + $0xc8] sm:$0xf0]  ;;  %v6713_v46 = vld [vmem:[%s8050_s28 + $0x40] sm:$0xf0]  ;;  %v5835_v47 = vld [vmem:[%s8050_s28 + $0x30] sm:$0xf] }
  0x44   : > { %v6020_v44 = vor.u32 %v6756_v42, %v6017_v43  ;;  %v6712_v48 = vld [vmem:[%s8050_s28 + $0x38] sm:$0xf0]  ;;  %v6711_v49 = vld [vmem:[%s8050_s28 + $0x34] sm:$0xf]  ;;  %v5837_v50 = vld [vmem:[%s8050_s28 + $0x3c] sm:$0xf0]  ;;  %v8091_v51 = vor.u32 %v6713_v46, %v5843_v45 }
  0x45   : > { %1115 = vmatpush.bf16.msra.mxu2 %v6056_v59  ;;  %1007 = vmatpush.bf16.msra.mxu0 %v5928_v60  ;;  %v8093_v52 = vor.u32 %v6712_v48, %v5835_v47  ;;  %v8095_v53 = vor.u32 %v6711_v49, %v5837_v50  ;;  %v6770_v54 = vld [vmem:[#allocation2 + $0x134] sm:$0xf]  ;;  %v6073_v55 = vld [vmem:[#allocation2 + $0x138] sm:$0xf0]  ;;  %v5855_v60 = vld [vmem:[%s8050_s28 + $0x50] sm:$0xf] }
  0x46   : > { %1061 = vmatpush.bf16.msra.mxu1 %v5992_v63  ;;  %v6754_v56 = vld [vmem:[#allocation2 + $0xb4] sm:$0xf]  ;;  %v6076_v57 = vor.u32 %v6770_v54, %v6073_v55  ;;  %v6009_v58 = vld [vmem:[#allocation2 + $0xb8] sm:$0xf0]  ;;  %v5847_v62 = vld [vmem:[%s8050_s28 + $0x48] sm:$0xf] }
  0x47   : > { %v6012_v59 = vor.u32 %v6754_v56, %v6009_v58  ;;  %v6716_v61 = vld [vmem:[%s8050_s28 + $0x58] sm:$0xf0]  ;;  %v6715_v63 = vld [vmem:[%s8050_s28 + $0x50] sm:$0xf0]  ;;  %v6714_v0 = vld [vmem:[%s8050_s28 + $0x4c] sm:$0xf] }
  0x48   : > { %v5849_v1 = vld [vmem:[%s8050_s28 + $0x54] sm:$0xf0]  ;;  %v8107_v2 = vor.u32 %v6716_v61, %v5855_v60  ;;  %v8109_v3 = vor.u32 %v6715_v63, %v5847_v62  ;;  %v6752_v5 = vld [vmem:[#allocation2 + $0xa4] sm:$0xf]  ;;  %v6001_v6 = vld [vmem:[#allocation2 + $0xa8] sm:$0xf0] }
  0x49   : > { %1116 = vmatpush.bf16.msra.mxu2 %v6048_v8  ;;  %1008 = vmatpush.bf16.msra.mxu0 %v5920_v9  ;;  %v8111_v4 = vor.u32 %v6714_v0, %v5849_v1  ;;  %v6768_v7 = vld [vmem:[#allocation2 + $0x124] sm:$0xf]  ;;  %v6004_v8 = vor.u32 %v6752_v5, %v6001_v6  ;;  %v6065_v9 = vld [vmem:[#allocation2 + $0x128] sm:$0xf0]  ;;  %v5867_v11 = vld [vmem:[%s8050_s28 + $0x68] sm:$0xf] }
  0x4a   : > { %1062 = vmatpush.bf16.msra.mxu1 %v5984_v13  ;;  %v6068_v10 = vor.u32 %v6768_v7, %v6065_v9  ;;  %v6719_v12 = vld [vmem:[%s8050_s28 + $0x70] sm:$0xf0]  ;;  %v5859_v13 = vld [vmem:[%s8050_s28 + $0x60] sm:$0xf]  ;;  %v6717_v15 = vld [vmem:[%s8050_s28 + $0x64] sm:$0xf] }
  0x4b   : > { %v5861_v16 = vld [vmem:[%s8050_s28 + $0x6c] sm:$0xf0]  ;;  %v8123_v17 = vor.u32 %v6719_v12, %v5867_v11  ;;  %v6746_v22 = vld [vmem:[#allocation2 + $0x74] sm:$0xf]  ;;  %v5977_v23 = vld [vmem:[#allocation2 + $0x78] sm:$0xf0] }
  0x4c   : > { %6093 = vmatmul.msk.bf16.vlgmr.msra.gmra.mxu2 %vm966_vm1, %v8058_v19  ;;  %1009 = vmatmul.bf16.vlgmr.msra.gmra.mxu0 %v8060_v20  ;;  %v5969_v27 = vld [vmem:[#allocation2 + $0x68] sm:$0xf0]  ;;  %v6750_v28 = vld [vmem:[#allocation2 + $0x94] sm:$0xf]  ;;  %v6057_v33 = vld [vmem:[#allocation2 + $0x118] sm:$0xf0] }
  0x4d   : > { %1217 = vmatpush.bf16.msrb.mxu2 %v6044_v14  ;;  %1272 = vmatpush.bf16.msrb.mxu0 %v999_v21  ;;  %v6718_v14 = vld [vmem:[%s8050_s28 + $0x68] sm:$0xf0]  ;;  %v8127_v21 = vor.u32 %v6717_v15, %v5861_v16  ;;  %v6766_v31 = vld [vmem:[#allocation2 + $0x114] sm:$0xf]  ;;  %v5961_v35 = vld [vmem:[#allocation2 + $0x58] sm:$0xf0] }
  0x4e   : > { %1063 = vmatmul.bf16.vlgmr.msra.gmra.mxu1 %v8063_v24  ;;  %v8125_v18 = vor.u32 %v6718_v14, %v5859_v13  ;;  %v6742_v34 = vld [vmem:[#allocation2 + $0x54] sm:$0xf]  ;;  %v6060_v39 = vor.u32 %v6766_v31, %v6057_v33  ;;  %v5879_v40 = vld [vmem:[%s8050_s28 + $0x80] sm:$0xf]  ;;  %v6722_v42 = vld [vmem:[%s8050_s28 + $0x88] sm:$0xf0] }
  0x4f   : > { %v5871_v43 = vld [vmem:[%s8050_s28 + $0x78] sm:$0xf]  ;;  %v6720_v45 = vld [vmem:[%s8050_s28 + $0x7c] sm:$0xf]  ;;  %v5873_v46 = vld [vmem:[%s8050_s28 + $0x84] sm:$0xf0]  ;;  %v8139_v47 = vor.u32 %v6722_v42, %v5879_v40 }
  0x50   : > { %v8143_v49 = vor.u32 %v6720_v45, %v5873_v46  ;;  %v6740_v50 = vld [vmem:[#allocation2 + $0x44] sm:$0xf]  ;;  %v5953_v54 = vld [vmem:[#allocation2 + $0x48] sm:$0xf0]  ;;  %v6738_v55 = vld [vmem:[#allocation2 + $0x34] sm:$0xf] }
  0x51   : > { %1218 = vmatpush.bf16.msrb.mxu2 %v6036_v25  ;;  %1273 = vmatpush.bf16.msrb.mxu0 %v6092_v26  ;;  %v6744_v25 = vld [vmem:[#allocation2 + $0x64] sm:$0xf]  ;;  %v5980_v26 = vor.u32 %v6746_v22, %v5977_v23  ;;  %v5945_v56 = vld [vmem:[#allocation2 + $0x38] sm:$0xf0]  ;;  %v5937_v60 = vld [vmem:[#allocation2 + $0x28] sm:$0xf0] }
  0x52   : > { %v5972_v32 = vor.u32 %v6744_v25, %v5969_v27  ;;  %v5948_v58 = vor.u32 %v6738_v55, %v5945_v56  ;;  %v5891_v61 = vld [vmem:[%s8050_s28 + $0x98] sm:$0xf]  ;;  %v6725_v63 = vld [vmem:[%s8050_s28 + $0xa0] sm:$0xf0]  ;;  %v5883_v0 = vld [vmem:[%s8050_s28 + $0x90] sm:$0xf] }
  0x53   : > { %1163 = vmatpush.bf16.msra.mxu3 %v5980_v26  ;;  %v6724_v1 = vld [vmem:[%s8050_s28 + $0x98] sm:$0xf0]  ;;  %v6723_v5 = vld [vmem:[%s8050_s28 + $0x94] sm:$0xf]  ;;  %v5885_v6 = vld [vmem:[%s8050_s28 + $0x9c] sm:$0xf0]  ;;  %v8155_v7 = vor.u32 %v6725_v63, %v5891_v61 }
  0x54   : > { %v6734_v9 = vld [vmem:[#allocation2 + $0x14] sm:$0xf]  ;;  %v8159_v11 = vor.u32 %v6723_v5, %v5885_v6  ;;  %v6748_v12 = vld [vmem:[#allocation2 + $0x84] sm:$0xf]  ;;  %v5985_v13 = vld [vmem:[#allocation2 + $0x88] sm:$0xf0] }
  0x55   : > { %1219 = vmatpush.bf16.msrb.mxu2 %v6028_v29  ;;  %1274 = vmatpush.bf16.msrb.mxu0 %v6084_v41  ;;  %v5993_v29 = vld [vmem:[#allocation2 + $0x98] sm:$0xf0]  ;;  %v5964_v41 = vor.u32 %v6742_v34, %v5961_v35  ;;  %v5988_v15 = vor.u32 %v6748_v12, %v5985_v13  ;;  %v6732_v16 = vld [vmem:[#allocation2 + $0x4] sm:$0xf]  ;;  %v5921_v22 = vld [vmem:[#allocation2 + $0x8] sm:$0xf0] }
  0x56   : > { %v5996_v30 = vor.u32 %v6750_v28, %v5993_v29  ;;  %v5924_v23 = vor.u32 %v6732_v16, %v5921_v22  ;;  %v5903_v25 = vld [vmem:[%s8050_s28 + $0xb0] sm:$0xf]  ;;  %v6728_v26 = vld [vmem:[%s8050_s28 + $0xb8] sm:$0xf0]  ;;  %v5895_v27 = vld [vmem:[%s8050_s28 + $0xa8] sm:$0xf] }
  0x57   : > { %1164 = vmatpush.bf16.msra.mxu3 %v5972_v32  ;;  %v6727_v28 = vld [vmem:[%s8050_s28 + $0xb0] sm:$0xf0]  ;;  %v6726_v29 = vld [vmem:[%s8050_s28 + $0xac] sm:$0xf]  ;;  %v6205_v31 = vld [vmem:[#allocation6 + $0x70] sm:$0xf] }
  0x58   : > { %v6791_v32 = vld [vmem:[#allocation6 + $0x74] sm:$0xf0]  ;;  %v6049_v34 = vld [vmem:[#allocation2 + $0x108] sm:$0xf0]  ;;  %v8174_v40 = vor.u32 %v6727_v28, %v5895_v27  ;;  %v6189_v45 = vld [vmem:[#allocation6 + $0x50] sm:$0xf] }
  0x59   : > { %1220 = vmatpush.bf16.msrb.mxu2 %v6020_v44  ;;  %1275 = vmatpush.bf16.msrb.mxu0 %v6076_v57  ;;  %v6721_v44 = vld [vmem:[%s8050_s28 + $0x80] sm:$0xf0]  ;;  %v5956_v57 = vor.u32 %v6740_v50, %v5953_v54  ;;  %v6206_v35 = vor.u32 %v6791_v32, %v6205_v31  ;;  %v600_v54 = vld [vmem:[#allocation4] sm:$0x3]  ;;  %v6181_v55 = vld [vmem:[#allocation6 + $0x40] sm:$0xf] }
  0x5a   : > { %v8141_v48 = vor.u32 %v6721_v44, %v5871_v43  ;;  %v6764_v33 = vld [vmem:[#allocation2 + $0x104] sm:$0xf]  ;;  %v6197_v43 = vld [vmem:[#allocation6 + $0x60] sm:$0xf]  ;;  %v6789_v44 = vld [vmem:[#allocation6 + $0x64] sm:$0xf0] }
  0x5b   : > { %1165 = vmatpush.bf16.msra.mxu3 %v5964_v41  ;;  %v6052_v41 = vor.u32 %v6764_v33, %v6049_v34  ;;  %2225 = vmatpush.bf16.msrb.mxu1 %v6206_v35  ;;  %v6787_v46 = vld [vmem:[#allocation6 + $0x54] sm:$0xf0]  ;;  %v6785_v56 = vld [vmem:[#allocation6 + $0x44] sm:$0xf0]  ;;  %v6165_v16 = vld [vmem:[#allocation6 + $0x20] sm:$0xf] }
  0x5c   : > { %6094 = vmatmul.msk.bf16.gmra.mxu2 %vm966_vm1, %v8075_v36  ;;  %1014 = vmatmul.bf16.gmra.mxu0 %v8077_v37  ;;  %v6190_v50 = vor.u32 %v6787_v46, %v6189_v45  ;;  %v5907_v61 = vld [vmem:[%s8050_s28 + $0xc0] sm:$0xf]  ;;  %v6729_v63 = vld [vmem:[%s8050_s28 + $0xc4] sm:$0xf]  ;;  %v6781_v22 = vld [vmem:[#allocation6 + $0x24] sm:$0xf0] }
  0x5d   : > { %1221 = vmatpush.bf16.msrb.mxu2 %v6012_v59  ;;  %1276 = vmatpush.bf16.msrb.mxu0 %v6068_v10  ;;  %v6736_v59 = vld [vmem:[#allocation2 + $0x24] sm:$0xf]  ;;  %v5929_v10 = vld [vmem:[#allocation2 + $0x18] sm:$0xf0]  ;;  %v6149_v34 = vld [vmem:[#allocation6] sm:$0xf] }
  0x5e   : > { %1068 = vmatmul.bf16.gmra.mxu1 %v8079_v38  ;;  %v5940_v62 = vor.u32 %v6736_v59, %v5937_v60  ;;  %v5932_v14 = vor.u32 %v6734_v9, %v5929_v10  ;;  %v5915_v59 = vld [vmem:[%s8050_s28 + $0xc8] sm:$0xf]  ;;  %v6731_v60 = vld [vmem:[%s8050_s28 + $0xd0] sm:$0xf0]  ;;  %v6783_v5 = vld [vmem:[#allocation6 + $0x34] sm:$0xf0] }
  0x5f   : > { %1166 = vmatpush.bf16.msra.mxu3 %v5956_v57  ;;  %v6182_v57 = vor.u32 %v6785_v56, %v6181_v55  ;;  %v8191_v9 = vor.u32 %v6731_v60, %v5915_v59  ;;  %v6777_v35 = vld [vmem:[#allocation6 + $0x4] sm:$0xf0]  ;;  %v6207_v59 = vld [vmem:[#allocation6 + $0x78] sm:$0xf0] }
  0x61   : > { %1222 = vmatpush.bf16.msrb.mxu2 %v6004_v8  ;;  %1277 = vmatpush.bf16.msrb.mxu0 %v6060_v39  ;;  %v8157_v8 = vor.u32 %v6724_v1, %v5883_v0  ;;  %v8172_v39 = vor.u32 %v6728_v26, %v5903_v25  ;;  %v5909_v0 = vld [vmem:[%s8050_s28 + $0xcc] sm:$0xf0]  ;;  %v6173_v1 = vld [vmem:[#allocation6 + $0x30] sm:$0xf]  ;;  %v6779_v26 = vld [vmem:[#allocation6 + $0x14] sm:$0xf0] }
  0x62   : > { %v6174_v6 = vor.u32 %v6783_v5, %v6173_v1  ;;  %v8195_v13 = vor.u32 %v6729_v63, %v5909_v0  ;;  %v6157_v25 = vld [vmem:[#allocation6 + $0x10] sm:$0xf] }
  0x63   : > { %1167 = vmatpush.bf16.msra.mxu3 %v5948_v58  ;;  %v8182_v58 = vperm.slane %v600_v54, 0  ;;  %v6158_v28 = vor.u32 %v6779_v26, %v6157_v25  ;;  %v6271_v26 = vld [vmem:[#allocation6 + $0xf8] sm:$0xf0] }
  0x65   : > { %1223 = vmatpush.bf16.msrb.mxu2 %v5996_v30  ;;  %v5897_v30 = vld [vmem:[%s8050_s28 + $0xb4] sm:$0xf0]  ;;  %1278 = vmatpush.bf16.msrb.mxu0 %v6052_v41  ;;  %v6150_v41 = vor.u32 %v6777_v35, %v6149_v34 }
  0x66   : > { %v8176_v42 = vor.u32 %v6726_v29, %v5897_v30 }
  0x67   : > { %1168 = vmatpush.bf16.msra.mxu3 %v5940_v62  ;;  %v6730_v62 = vld [vmem:[%s8050_s28 + $0xc8] sm:$0xf0] }
  0x68   : > { %v8193_v10 = vor.u32 %v6730_v62, %v5907_v61 }
  0x69   : > { %1224 = vmatpush.bf16.msrb.mxu2 %v5988_v15 }
  0x6b   : > { %1169 = vmatpush.bf16.msra.mxu3 %v5932_v14 }
  0x6c   : > { %6095 = vmatmul.msk.bf16.gmra.mxu2 %vm966_vm1, %v8091_v51  ;;  %1019 = vmatmul.bf16.gmra.mxu0 %v8093_v52 }
  0x6e   : > { %1073 = vmatmul.bf16.gmra.mxu1 %v8095_v53 }
  0x6f   : > { %1170 = vmatpush.bf16.msra.mxu3 %v5924_v23  ;;  %v6166_v23 = vor.u32 %v6781_v22, %v6165_v16  ;;  %v6807_v22 = vld [vmem:[#allocation6 + $0xf4] sm:$0xf0] }
  0x72   : > { %1171 = vmatmul.bf16.vlgmr.msra.gmra.mxu3 %v8060_v20  ;;  %v6198_v20 = vor.u32 %v6789_v44, %v6197_v43 }
  0x74   : > { %2226 = vmatpush.bf16.msrb.mxu1 %v6198_v20 }
  0x78   : > { %2227 = vmatpush.bf16.msrb.mxu1 %v6190_v50 }
  0x7c   : > { %6096 = vmatmul.msk.bf16.gmra.mxu2 %vm966_vm1, %v8107_v2  ;;  %1024 = vmatmul.bf16.gmra.mxu0 %v8109_v3 }
  0x7d   : > { %2228 = vmatpush.bf16.msrb.mxu1 %v6182_v57 }
  0x7e   : > { %1078 = vmatmul.bf16.gmra.mxu1 %v8111_v4 }
  0x81   : > { %2229 = vmatpush.bf16.msrb.mxu1 %v6174_v6 }
  0x82   : > { %1176 = vmatmul.bf16.gmra.mxu3 %v8077_v37 }
  0x85   : > { %2230 = vmatpush.bf16.msrb.mxu1 %v6166_v23  ;;  %v6806_v23 = vld [vmem:[#allocation6 + $0xf4] sm:$0xf] }
  0x89   : > { %2231 = vmatpush.bf16.msrb.mxu1 %v6158_v28  ;;  %v6274_v28 = vor.u32 %v6806_v23, %v6271_v26  ;;  %v6805_v26 = vld [vmem:[#allocation6 + $0xe4] sm:$0xf0] }
  0x8b   : > { %2387 = vmatpush.bf16.msra.mxu0 %v6274_v28 }
  0x8c   : > { %6097 = vmatmul.msk.bf16.gmra.mxu2 %vm966_vm1, %v8123_v17  ;;  %1029 = vmatmul.bf16.gmra.mxu0 %v8125_v18 }
  0x8d   : > { %2232 = vmatpush.bf16.msrb.mxu1 %v6150_v41 }
  0x8e   : > { %1083 = vmatmul.bf16.gmra.mxu1 %v8127_v21 }
  0x92   : > { %1181 = vmatmul.bf16.gmra.mxu3 %v8093_v52  ;;  %v6790_v52 = vld [vmem:[#allocation6 + $0x74] sm:$0xf] }
  0x93   : > { %v6210_v60 = vor.u32 %v6790_v52, %v6207_v59 }
  0x95   : > { %2333 = vmatpush.bf16.msra.mxu2 %v6210_v60 }
  0x9c   : > { %6098 = vmatmul.msk.bf16.gmra.mxu2 %vm966_vm1, %v8139_v47  ;;  %1034 = vmatmul.bf16.gmra.mxu0 %v8141_v48 }
  0x9e   : > { %1088 = vmatmul.bf16.gmra.mxu1 %v8143_v49 }
  0xa2   : > { %1186 = vmatmul.bf16.gmra.mxu3 %v8109_v3 }
  0xac   : > { %6099 = vmatmul.msk.bf16.gmra.mxu2 %vm966_vm1, %v8155_v7  ;;  %1039 = vmatmul.bf16.gmra.mxu0 %v8157_v8 }
  0xae   : > { %1093 = vmatmul.bf16.gmra.mxu1 %v8159_v11 }
  0xb2   : > { %1191 = vmatmul.bf16.gmra.mxu3 %v8125_v18 }
  0xbc   : > { %6100 = vmatmul.msk.bf16.gmra.mxu2 %vm966_vm1, %v8172_v39  ;;  %1044 = vmatmul.bf16.gmra.mxu0 %v8174_v40 }
  0xbe   : > { %1098 = vmatmul.bf16.gmra.mxu1 %v8176_v42 }
  0xc2   : > { %1196 = vmatmul.bf16.gmra.mxu3 %v8141_v48 }
  0xc9   : > { %v1010_v12 = vpop.f32.mrf.mxu0 }
  0xca   : > { %v1011_v14 = vadd.f32 %v1010_v12, %v8182_v58 }
  0xcb   : > { %v1064_v15 = vpop.f32.mrf.mxu1 }
  0xcc   : > { %v1065_v37 = vadd.f32 %v1064_v15, %v1011_v14  ;;  %6101 = vmatmul.msk.bf16.gmra.mxu2 %vm966_vm1, %v8191_v9  ;;  %1049 = vmatmul.bf16.gmra.mxu0 %v8193_v10  ;;  %v6269_v15 = vld [vmem:[#allocation6 + $0xf0] sm:$0xf] }
  0xcd   : > { %v6270_v25 = vor.u32 %v6807_v22, %v6269_v15  ;;  %v6788_v15 = vld [vmem:[#allocation6 + $0x64] sm:$0xf] }
  0xce   : > { %1103 = vmatmul.bf16.gmra.mxu1 %v8195_v13 }
  0xcf   : > { %v1118_v27 = vpop.f32.mrf.mxu2  ;;  %2279 = vmatpush.bf16.msrb.mxu3 %v6270_v25  ;;  %v6261_v25 = vld [vmem:[#allocation6 + $0xe0] sm:$0xf] }
  0xd0   : > { %v1119_v29 = vadd.f32 %v1118_v27, %v1065_v37 }
  0xd1   : > { %v1012_v30 = vpop.f32.mrf.mxu0 }
  0xd2   : > { %v6111_v31 = vmul.f32 -1.442695, %v1119_v29  ;;  %v1013_v32 = vadd.f32 %v1012_v30, %v8182_v58  ;;  %1201 = vmatmul.bf16.gmra.mxu3 %v8157_v8 }
  0xd3   : > { %v1066_v33 = vpop.f32.mrf.mxu1 }
  0xd4   : > { %7034 = vpow2.f32 %v6111_v31  ;;  %v1067_v43 = vadd.f32 %v1066_v33, %v1013_v32 }
  0xd7   : > { %v1120_v44 = vpop.f32.mrf.mxu2 }
  0xd8   : > { %v1121_v20 = vadd.f32 %v1120_v44, %v1067_v43 }
  0xd9   : > { %v1015_v45 = vpop.f32.mrf.mxu0 }
  0xda   : > { %v7035_v46 = vpop.eup %7034  ;;  %v6113_v50 = vmul.f32 -1.442695, %v1121_v20  ;;  %v1016_v54 = vadd.f32 %v1015_v45, %v8182_v58 }
  0xdb   : > { %v1069_v55 = vpop.f32.mrf.mxu1  ;;  %v8205_v56 = vadd.f32 1.0, %v7035_v46 }
  0xdc   : > { %7036 = vpow2.f32 %v6113_v50  ;;  %v1070_v57 = vadd.f32 %v1069_v55, %v1016_v54  ;;  %1225 = vmatmul.bf16.vlgmr.msrb.gmra.mxu2 %v8063_v24  ;;  %6102 = vmatmul.msk.bf16.vlgmr.msrb.gmra.mxu0 %vm966_vm1, %v8058_v19 }
  0xdd   : > { %7038 = vrcp.f32 %v8205_v56  ;;  %v1478_v44 = vand.u32 2147483647, %v8205_v56  ;;  %v1480_v50 = vand.u32 2147483648, %v8205_v56  ;;  %vm1474_vm3 = vweird.f32 %v8205_v56 }
  0xdf   : > { %v1123_v61 = vpop.f32.mrf.mxu2  ;;  %vm8234_vm6 = vcmp.eq.f32.partialorder %v1478_v44, 8.507059e+37 }
  0xe0   : > { %v1124_v62 = vadd.f32 %v1123_v61, %v1070_v57 }
  0xe1   : > { %v1017_v63 = vpop.f32.mrf.mxu0 }
  0xe2   : > { %v7037_v0 = vpop.eup %7036  ;;  %v6115_v1 = vmul.f32 -1.442695, %v1124_v62  ;;  %v1018_v5 = vadd.f32 %v1017_v63, %v8182_v58  ;;  %1206 = vmatmul.bf16.gmra.mxu3 %v8174_v40 }
  0xe3   : > { %v1071_v6 = vpop.f32.mrf.mxu1  ;;  %v8212_v12 = vpop.eup %7038  ;;  %v1435_v24 = vadd.f32 1.0, %v7037_v0 }
  0xe4   : > { %v1470_v19 = vmul.f32 %v8212_v12, %v8205_v56  ;;  %7040 = vpow2.f32 %v6115_v1  ;;  %v1072_v14 = vadd.f32 %v1071_v6, %v1018_v5  ;;  %vm1475_vm2 = vweird.f32 %v8212_v12 }
  0xe5   : > { %7042 = vrcp.f32 %v1435_v24  ;;  %v1508_v54 = vand.u32 2147483647, %v1435_v24  ;;  %v1510_v55 = vand.u32 2147483648, %v1435_v24  ;;  %vm8230_vm5 = vmor %vm1474_vm3, %vm1475_vm2  ;;  %vm1504_vm7 = vweird.f32 %v1435_v24 }
  0xe6   : > { %v1471_v16 = vsub.f32 1.0, %v1470_v19  ;;  %v1481_v6 = vor.u32 1.1754944e-38, %v1480_v50 }
  0xe7   : > { %v1125_v37 = vpop.f32.mrf.mxu2  ;;  %vm1509_vm9 = vcmp.eq.f32.partialorder %v1508_v54, 8.507059e+37  ;;  %v1511_v19 = vor.u32 1.1754944e-38, %v1510_v55 }
  0xe8   : > { %v1126_v27 = vadd.f32 %v1125_v37, %v1072_v14  ;;  %v1472_v34 = vmul.f32 %v8212_v12, %v1471_v16  ;;  %v6199_v16 = vld [vmem:[#allocation6 + $0x68] sm:$0xf0] }
  0xe9   : > { %v1020_v29 = vpop.f32.mrf.mxu0  ;;  %v6202_v37 = vor.u32 %v6788_v15, %v6199_v16 }
  0xea   : > { %v7041_v30 = vpop.eup %7040  ;;  %v6117_v31 = vmul.f32 -1.442695, %v1126_v27  ;;  %v1021_v32 = vadd.f32 %v1020_v29, %v8182_v58  ;;  %v1473_v20 = vadd.f32 %v8212_v12, %v1472_v34  ;;  %v6804_v27 = vld [vmem:[#allocation6 + $0xe4] sm:$0xf] }
  0xeb   : > { %v1074_v33 = vpop.f32.mrf.mxu1  ;;  %v7043_v35 = vpop.eup %7042  ;;  %v8219_v3 = vadd.f32 1.0, %v7041_v30  ;;  %v6263_v30 = vld [vmem:[#allocation6 + $0xe8] sm:$0xf0]  ;;  %2334 = vmatpush.bf16.msra.mxu2 %v6202_v37 }
  0xec   : > { %7044 = vpow2.f32 %v6117_v31  ;;  %v1075_v41 = vadd.f32 %v1074_v33, %v1021_v32  ;;  %1230 = vmatmul.bf16.gmra.mxu2 %v8079_v38  ;;  %6103 = vmatmul.msk.bf16.gmra.mxu0 %vm966_vm1, %v8075_v36  ;;  %v1500_v43 = vmul.f32 %v7043_v35, %v1435_v24  ;;  %vm1505_vm4 = vweird.f32 %v7043_v35 }
  0xed   : > { %7046 = vrcp.f32 %v8219_v3  ;;  %v1477_v56 = vsel %vm8230_vm5, %v8212_v12, %v1473_v20  ;;  %vm1506_vm8 = vmor %vm1504_vm7, %vm1505_vm4  ;;  %v6262_v32 = vor.u32 %v6805_v26, %v6261_v25  ;;  %v6266_v33 = vor.u32 %v6804_v27, %v6263_v30  ;;  %v6786_v25 = vld [vmem:[#allocation6 + $0x54] sm:$0xf]  ;;  %v6191_v26 = vld [vmem:[#allocation6 + $0x58] sm:$0xf0] }
  0xee   : > { %v1501_v45 = vsub.f32 1.0, %v1500_v43  ;;  %v1482_v12 = vsel %vm8234_vm6, %v1481_v6, %v1477_v56  ;;  %v1538_v55 = vand.u32 2147483647, %v8219_v3  ;;  %v1540_v52 = vand.u32 2147483648, %v8219_v3  ;;  %v6253_v27 = vld [vmem:[#allocation6 + $0xd0] sm:$0xf] }
  0xef   : > { %v1128_v46 = vpop.f32.mrf.mxu2  ;;  %2280 = vmatpush.bf16.msrb.mxu3 %v6262_v32  ;;  %2388 = vmatpush.bf16.msra.mxu0 %v6266_v33  ;;  %vm1534_vm11 = vweird.f32 %v8219_v3  ;;  %v6194_v33 = vor.u32 %v6786_v25, %v6191_v26  ;;  %v6784_v26 = vld [vmem:[#allocation6 + $0x44] sm:$0xf] }
  0xf0   : > { %v1129_v57 = vadd.f32 %v1128_v46, %v1075_v41  ;;  %v1502_v38 = vmul.f32 %v7043_v35, %v1501_v45  ;;  %vm8275_vm14 = vcmp.eq.f32.partialorder %v1538_v55, 8.507059e+37  ;;  %v1541_v16 = vor.u32 1.1754944e-38, %v1540_v52 }
  0xf1   : > { %v1022_v36 = vpop.f32.mrf.mxu0  ;;  %2335 = vmatpush.bf16.msra.mxu2 %v6194_v33 }
  0xf2   : > { %v7045_v60 = vpop.eup %7044  ;;  %v6119_v61 = vmul.f32 -1.442695, %v1129_v57  ;;  %v1023_v62 = vadd.f32 %v1022_v36, %v8182_v58  ;;  %v1503_v0 = vadd.f32 %v7043_v35, %v1502_v38  ;;  %1211 = vmatmul.bf16.gmra.mxu3 %v8193_v10 }
  0xf3   : > { %v1076_v63 = vpop.f32.mrf.mxu1  ;;  %v8242_v1 = vpop.eup %7046  ;;  %v8244_v5 = vadd.f32 1.0, %v7045_v60 }
  0xf4   : > { %7048 = vpow2.f32 %v6119_v61  ;;  %v1077_v24 = vadd.f32 %v1076_v63, %v1023_v62  ;;  %v1507_v14 = vsel %vm1506_vm8, %v7043_v35, %v1503_v0  ;;  %v1530_v22 = vmul.f32 %v8242_v1, %v8219_v3 }
  0xf5   : > { %7050 = vrcp.f32 %v8244_v5  ;;  %v1512_v23 = vsel %vm1509_vm9, %v1511_v19, %v1507_v14  ;;  %vm1535_vm10 = vweird.f32 %v8242_v1  ;;  %v1568_v59 = vand.u32 2147483647, %v8244_v5 }
  0xf6   : > { %v8252_v28 = vpack.c.bf16 %v1512_v23, %v1482_v12  ;;  %v1531_v29 = vsub.f32 1.0, %v1530_v22  ;;  %vm8271_vm13 = vmor %vm1534_vm11, %vm1535_vm10  ;;  %vm1564_vm15 = vweird.f32 %v8244_v5 }
  0xf7   : > { %v1130_v31 = vpop.f32.mrf.mxu2  ;;  %vm1569_vm2 = vcmp.eq.f32.partialorder %v1568_v59, 8.507059e+37 }
  0xf8   : > { %v1131_v34 = vadd.f32 %v1130_v31, %v1077_v24  ;;  %2233 = vmatmul.bf16.vlgmr.msrb.gmra.mxu1 %v8252_v28  ;;  %v1532_v18 = vmul.f32 %v8242_v1, %v1531_v29  ;;  %v6803_v31 = vld [vmem:[#allocation6 + $0xd4] sm:$0xf0] }
  0xf9   : > { %v1025_v35 = vpop.f32.mrf.mxu0 }
  0xfa   : > { %v7049_v41 = vpop.eup %7048  ;;  %v6121_v43 = vmul.f32 -1.442695, %v1131_v34  ;;  %v1026_v44 = vadd.f32 %v1025_v35, %v8182_v58  ;;  %v1533_v57 = vadd.f32 %v8242_v1, %v1532_v18  ;;  %v6254_v34 = vor.u32 %v6803_v31, %v6253_v27  ;;  %v6183_v27 = vld [vmem:[#allocation6 + $0x48] sm:$0xf0] }
  0xfb   : > { %v1079_v20 = vpop.f32.mrf.mxu1  ;;  %v7051_v45 = vpop.eup %7050  ;;  %v8257_v46 = vadd.f32 1.0, %v7049_v41  ;;  %v6186_v33 = vor.u32 %v6784_v26, %v6183_v27 }
  0xfc   : > { %7052 = vpow2.f32 %v6121_v43  ;;  %v1080_v50 = vadd.f32 %v1079_v20, %v1026_v44  ;;  %1235 = vmatmul.bf16.gmra.mxu2 %v8095_v53  ;;  %6104 = vmatmul.msk.bf16.gmra.mxu0 %vm966_vm1, %v8091_v51  ;;  %v1560_v54 = vmul.f32 %v7051_v45, %v8244_v5  ;;  %v1570_v53 = vand.u32 2147483648, %v8244_v5 }
  0xfd   : > { %7054 = vrcp.f32 %v8257_v46  ;;  %vm1565_vm12 = vweird.f32 %v7051_v45  ;;  %v1537_v3 = vsel %vm8271_vm13, %v8242_v1, %v1533_v57  ;;  %2281 = vmatpush.bf16.msrb.mxu3 %v6254_v34  ;;  %v1598_v57 = vand.u32 2147483647, %v8257_v46  ;;  %2336 = vmatpush.bf16.msra.mxu2 %v6186_v33 }
  0xfe   : > { %v1561_v38 = vsub.f32 1.0, %v1560_v54  ;;  %vm1566_vm0 = vmor %vm1564_vm15, %vm1565_vm12  ;;  %v1571_v22 = vor.u32 1.1754944e-38, %v1570_v53  ;;  %v1542_v1 = vsel %vm8275_vm14, %v1541_v16, %v1537_v3  ;;  %v1600_v59 = vand.u32 2147483648, %v8257_v46 }
  0xff   : > { %v1133_v36 = vpop.f32.mrf.mxu2  ;;  %vm1594_vm4 = vweird.f32 %v8257_v46  ;;  %vm8317_vm7 = vcmp.eq.f32.partialorder %v1598_v57, 8.507059e+37 }
 0x100   : > { %v1134_v60 = vadd.f32 %v1133_v36, %v1080_v50  ;;  %v1562_v51 = vmul.f32 %v7051_v45, %v1561_v38  ;;  %v1601_v16 = vor.u32 1.1754944e-38, %v1600_v59 }
 0x101   : > { %v1027_v61 = vpop.f32.mrf.mxu0 }
 0x102   : > { %v7053_v56 = vpop.eup %7052  ;;  %v6123_v0 = vmul.f32 -1.442695, %v1134_v60  ;;  %v1028_v6 = vadd.f32 %v1027_v61, %v8182_v58  ;;  %v1563_v24 = vadd.f32 %v7051_v45, %v1562_v51 }
 0x103   : > { %v1081_v19 = vpop.f32.mrf.mxu1  ;;  %v8284_v14 = vpop.eup %7054  ;;  %v8286_v15 = vadd.f32 1.0, %v7053_v56 }
 0x104   : > { %7056 = vpow2.f32 %v6123_v0  ;;  %v1082_v5 = vadd.f32 %v1081_v19, %v1028_v6  ;;  %v1567_v12 = vsel %vm1566_vm0, %v7051_v45, %v1563_v24  ;;  %v1590_v23 = vmul.f32 %v8284_v14, %v8257_v46 }
 0x105   : > { %7058 = vrcp.f32 %v8286_v15  ;;  %v1572_v37 = vsel %vm1569_vm2, %v1571_v22, %v1567_v12  ;;  %vm1595_vm3 = vweird.f32 %v8284_v14  ;;  %v1628_v53 = vand.u32 2147483647, %v8286_v15 }
 0x106   : > { %v8294_v29 = vpack.c.bf16 %v1572_v37, %v1542_v1  ;;  %v1591_v30 = vsub.f32 1.0, %v1590_v23  ;;  %vm8313_vm6 = vmor %vm1594_vm4, %vm1595_vm3  ;;  %vm1624_vm8 = vweird.f32 %v8286_v15  ;;  %v6802_v23 = vld [vmem:[#allocation6 + $0xd4] sm:$0xf]  ;;  %v6255_v1 = vld [vmem:[#allocation6 + $0xd8] sm:$0xf0] }
 0x107   : > { %v1135_v32 = vpop.f32.mrf.mxu2  ;;  %vm1629_vm10 = vcmp.eq.f32.partialorder %v1628_v53, 8.507059e+37  ;;  %v6258_v25 = vor.u32 %v6802_v23, %v6255_v1 }
 0x108   : > { %v1136_v35 = vadd.f32 %v1135_v32, %v1082_v5  ;;  %2238 = vmatmul.bf16.gmra.mxu1 %v8294_v29  ;;  %v1592_v48 = vmul.f32 %v8284_v14, %v1591_v30 }
 0x109   : > { %v1030_v41 = vpop.f32.mrf.mxu0  ;;  %2389 = vmatpush.bf16.msra.mxu0 %v6258_v25  ;;  %v6175_v25 = vld [vmem:[#allocation6 + $0x38] sm:$0xf0] }
 0x10a   : > { %v7057_v43 = vpop.eup %7056  ;;  %v6125_v44 = vmul.f32 -1.442695, %v1136_v35  ;;  %v1031_v20 = vadd.f32 %v1030_v41, %v8182_v58  ;;  %v1593_v38 = vadd.f32 %v8284_v14, %v1592_v48 }
 0x10b   : > { %v1084_v18 = vpop.f32.mrf.mxu1  ;;  %v7059_v45 = vpop.eup %7058  ;;  %v8299_v50 = vadd.f32 1.0, %v7057_v43 }
 0x10c   : > { %7060 = vpow2.f32 %v6125_v44  ;;  %v1085_v54 = vadd.f32 %v1084_v18, %v1031_v20  ;;  %1240 = vmatmul.bf16.gmra.mxu2 %v8111_v4  ;;  %6105 = vmatmul.msk.bf16.gmra.mxu0 %vm966_vm1, %v8107_v2  ;;  %v1620_v55 = vmul.f32 %v7059_v45, %v8286_v15  ;;  %v1630_v4 = vand.u32 2147483648, %v8286_v15 }
 0x10d   : > { %7062 = vrcp.f32 %v8299_v50  ;;  %vm1625_vm5 = vweird.f32 %v7059_v45  ;;  %v1597_v46 = vsel %vm8313_vm6, %v8284_v14, %v1593_v38  ;;  %vm1654_vm12 = vweird.f32 %v8299_v50 }
 0x10e   : > { %v1621_v36 = vsub.f32 1.0, %v1620_v55  ;;  %vm1626_vm9 = vmor %vm1624_vm8, %vm1625_vm5  ;;  %v1631_v22 = vor.u32 1.1754944e-38, %v1630_v4  ;;  %v1602_v14 = vsel %vm8317_vm7, %v1601_v16, %v1597_v46  ;;  %v1658_v55 = vand.u32 2147483647, %v8299_v50 }
 0x10f   : > { %v1138_v52 = vpop.f32.mrf.mxu2 }
 0x110   : > { %v1139_v60 = vadd.f32 %v1138_v52, %v1085_v54  ;;  %v1622_v2 = vmul.f32 %v7059_v45, %v1621_v36  ;;  %v1660_v52 = vand.u32 2147483648, %v8299_v50  ;;  %vm8359_vm15 = vcmp.eq.f32.partialorder %v1658_v55, 8.507059e+37 }
 0x111   : > { %v1032_v51 = vpop.f32.mrf.mxu0 }
 0x112   : > { %v7061_v63 = vpop.eup %7060  ;;  %v6127_v56 = vmul.f32 -1.442695, %v1139_v60  ;;  %v1033_v0 = vadd.f32 %v1032_v51, %v8182_v58  ;;  %v1623_v19 = vadd.f32 %v7059_v45, %v1622_v2  ;;  %v1661_v46 = vor.u32 1.1754944e-38, %v1660_v52 }
 0x113   : > { %v1086_v6 = vpop.f32.mrf.mxu1  ;;  %v8326_v3 = vpop.eup %7062  ;;  %v8328_v24 = vadd.f32 1.0, %v7061_v63 }
 0x114   : > { %v1650_v15 = vmul.f32 %v8326_v3, %v8299_v50  ;;  %7064 = vpow2.f32 %v6127_v56  ;;  %v1087_v5 = vadd.f32 %v1086_v6, %v1033_v0  ;;  %v1627_v12 = vsel %vm1626_vm9, %v7059_v45, %v1623_v19 }
 0x115   : > { %7066 = vrcp.f32 %v8328_v24  ;;  %v1632_v37 = vsel %vm1629_vm10, %v1631_v22, %v1627_v12  ;;  %vm1655_vm11 = vweird.f32 %v8326_v3  ;;  %v1688_v59 = vand.u32 2147483647, %v8328_v24  ;;  %v6800_v12 = vld [vmem:[#allocation6 + $0xc4] sm:$0xf] }
 0x116   : > { %v8336_v30 = vpack.c.bf16 %v1632_v37, %v1602_v14  ;;  %v1651_v31 = vsub.f32 1.0, %v1650_v15  ;;  %vm8355_vm14 = vmor %vm1654_vm12, %vm1655_vm11  ;;  %vm1684_vm0 = vweird.f32 %v8328_v24  ;;  %v6245_v15 = vld [vmem:[#allocation6 + $0xc0] sm:$0xf]  ;;  %v6247_v14 = vld [vmem:[#allocation6 + $0xc8] sm:$0xf0] }
 0x117   : > { %v1140_v32 = vpop.f32.mrf.mxu2  ;;  %vm1689_vm3 = vcmp.eq.f32.partialorder %v1688_v59, 8.507059e+37  ;;  %v6782_v37 = vld [vmem:[#allocation6 + $0x34] sm:$0xf]  ;;  %v6250_v27 = vor.u32 %v6800_v12, %v6247_v14 }
 0x118   : > { %v1141_v34 = vadd.f32 %v1140_v32, %v1087_v5  ;;  %2243 = vmatmul.bf16.gmra.mxu1 %v8336_v30  ;;  %v1652_v18 = vmul.f32 %v8326_v3, %v1651_v31  ;;  %v6801_v5 = vld [vmem:[#allocation6 + $0xc4] sm:$0xf0]  ;;  %v6178_v33 = vor.u32 %v6782_v37, %v6175_v25 }
 0x119   : > { %v1035_v35 = vpop.f32.mrf.mxu0  ;;  %v6246_v1 = vor.u32 %v6801_v5, %v6245_v15  ;;  %2390 = vmatpush.bf16.msra.mxu0 %v6250_v27  ;;  %v6798_v15 = vld [vmem:[#allocation6 + $0xb4] sm:$0xf] }
 0x11a   : > { %v7065_v41 = vpop.eup %7064  ;;  %v6129_v43 = vmul.f32 -1.442695, %v1141_v34  ;;  %v1036_v44 = vadd.f32 %v1035_v35, %v8182_v58  ;;  %v1653_v57 = vadd.f32 %v8326_v3, %v1652_v18  ;;  %2337 = vmatpush.bf16.msra.mxu2 %v6178_v33  ;;  %v8423_v33 = vpop.f32.mrf.mxu3 }
 0x11b   : > { %v1089_v20 = vpop.f32.mrf.mxu1  ;;  %v7067_v48 = vpop.eup %7066  ;;  %v8341_v8 = vadd.f32 1.0, %v7065_v41  ;;  %2282 = vmatpush.bf16.msrb.mxu3 %v6246_v1  ;;  %v6167_v1 = vld [vmem:[#allocation6 + $0x28] sm:$0xf0] }
 0x11c   : > { %7068 = vpow2.f32 %v6129_v43  ;;  %v1090_v45 = vadd.f32 %v1089_v20, %v1036_v44  ;;  %1245 = vmatmul.bf16.gmra.mxu2 %v8127_v21  ;;  %6106 = vmatmul.msk.bf16.gmra.mxu0 %vm966_vm1, %v8123_v17  ;;  %v1680_v54 = vmul.f32 %v7067_v48, %v8328_v24  ;;  %v1690_v21 = vand.u32 2147483648, %v8328_v24 }
 0x11d   : > { %7070 = vrcp.f32 %v8341_v8  ;;  %vm1685_vm13 = vweird.f32 %v7067_v48  ;;  %v1657_v50 = vsel %vm8355_vm14, %v8326_v3, %v1653_v57  ;;  %v1718_v55 = vand.u32 2147483647, %v8341_v8 }
 0x11e   : > { %v1681_v38 = vsub.f32 1.0, %v1680_v54  ;;  %vm1686_vm2 = vmor %vm1684_vm0, %vm1685_vm13  ;;  %v1691_v19 = vor.u32 1.1754944e-38, %v1690_v21  ;;  %v1662_v3 = vsel %vm8359_vm15, %v1661_v46, %v1657_v50  ;;  %v1720_v52 = vand.u32 2147483648, %v8341_v8 }
 0x11f   : > { %v1143_v36 = vpop.f32.mrf.mxu2  ;;  %vm1714_vm5 = vweird.f32 %v8341_v8  ;;  %vm8401_vm8 = vcmp.eq.f32.partialorder %v1718_v55, 8.507059e+37 }
 0x120   : > { %v1144_v53 = vadd.f32 %v1143_v36, %v1090_v45  ;;  %v1682_v17 = vmul.f32 %v7067_v48, %v1681_v38 }
 0x121   : > { %v1037_v4 = vpop.f32.mrf.mxu0 }
 0x122   : > { %v7069_v51 = vpop.eup %7068  ;;  %v6131_v61 = vmul.f32 -1.442695, %v1144_v53  ;;  %v1038_v62 = vadd.f32 %v1037_v4, %v8182_v58  ;;  %v1683_v56 = vadd.f32 %v7067_v48, %v1682_v17 }
 0x123   : > { %v1091_v63 = vpop.f32.mrf.mxu1  ;;  %v8368_v0 = vpop.eup %7070  ;;  %v8370_v6 = vadd.f32 1.0, %v7069_v51 }
 0x124   : > { %v1710_v24 = vmul.f32 %v8368_v0, %v8341_v8  ;;  %7072 = vpow2.f32 %v6131_v61  ;;  %v1092_v16 = vadd.f32 %v1091_v63, %v1038_v62  ;;  %v1687_v22 = vsel %vm1686_vm2, %v7067_v48, %v1683_v56 }
 0x125   : > { %7074 = vrcp.f32 %v8370_v6  ;;  %v1692_v23 = vsel %vm1689_vm3, %v1691_v19, %v1687_v22  ;;  %vm1715_vm4 = vweird.f32 %v8368_v0  ;;  %v1748_v59 = vand.u32 2147483647, %v8370_v6  ;;  %v6799_v22 = vld [vmem:[#allocation6 + $0xb4] sm:$0xf0] }
 0x126   : > { %v8378_v26 = vpack.c.bf16 %v1692_v23, %v1662_v3  ;;  %v1711_v31 = vsub.f32 1.0, %v1710_v24  ;;  %vm8397_vm7 = vmor %vm1714_vm5, %vm1715_vm4  ;;  %vm1744_vm9 = vweird.f32 %v8370_v6  ;;  %v1721_v56 = vor.u32 1.1754944e-38, %v1720_v52  ;;  %v6239_v3 = vld [vmem:[#allocation6 + $0xb8] sm:$0xf0]  ;;  %v6780_v23 = vld [vmem:[#allocation6 + $0x24] sm:$0xf] }
 0x127   : > { %v1145_v32 = vpop.f32.mrf.mxu2  ;;  %vm1749_vm11 = vcmp.eq.f32.partialorder %v1748_v59, 8.507059e+37  ;;  %v6242_v37 = vor.u32 %v6798_v15, %v6239_v3 }
 0x128   : > { %v1146_v34 = vadd.f32 %v1145_v32, %v1092_v16  ;;  %2248 = vmatmul.bf16.gmra.mxu1 %v8378_v26  ;;  %v1712_v40 = vmul.f32 %v8368_v0, %v1711_v31  ;;  %v6237_v16 = vld [vmem:[#allocation6 + $0xb0] sm:$0xf]  ;;  %v6170_v31 = vor.u32 %v6780_v23, %v6167_v1 }
 0x129   : > { %v1040_v35 = vpop.f32.mrf.mxu0  ;;  %v6238_v12 = vor.u32 %v6799_v22, %v6237_v16  ;;  %2391 = vmatpush.bf16.msra.mxu0 %v6242_v37  ;;  %v6796_v16 = vld [vmem:[#allocation6 + $0xa4] sm:$0xf] }
 0x12a   : > { %v7073_v41 = vpop.eup %7072  ;;  %v6133_v43 = vmul.f32 -1.442695, %v1146_v34  ;;  %v1041_v44 = vadd.f32 %v1040_v35, %v8182_v58  ;;  %v1713_v57 = vadd.f32 %v8368_v0, %v1712_v40  ;;  %2338 = vmatpush.bf16.msra.mxu2 %v6170_v31  ;;  %v6776_v31 = vld [vmem:[#allocation6 + $0x4] sm:$0xf] }
 0x12b   : > { %v1094_v20 = vpop.f32.mrf.mxu1  ;;  %v7075_v18 = vpop.eup %7074  ;;  %v8383_v48 = vadd.f32 1.0, %v7073_v41  ;;  %2283 = vmatpush.bf16.msrb.mxu3 %v6238_v12  ;;  %v6159_v12 = vld [vmem:[#allocation6 + $0x18] sm:$0xf0] }
 0x12c   : > { %7076 = vpow2.f32 %v6133_v43  ;;  %v1095_v45 = vadd.f32 %v1094_v20, %v1041_v44  ;;  %1250 = vmatmul.bf16.gmra.mxu2 %v8143_v49  ;;  %6107 = vmatmul.msk.bf16.gmra.mxu0 %vm966_vm1, %v8139_v47  ;;  %v1740_v54 = vmul.f32 %v7075_v18, %v8370_v6  ;;  %v1750_v49 = vand.u32 2147483648, %v8370_v6 }
 0x12d   : > { %7078 = vrcp.f32 %v8383_v48  ;;  %vm1745_vm6 = vweird.f32 %v7075_v18  ;;  %v1717_v8 = vsel %vm8397_vm7, %v8368_v0, %v1713_v57  ;;  %vm1774_vm13 = vweird.f32 %v8383_v48 }
 0x12e   : > { %v1741_v38 = vsub.f32 1.0, %v1740_v54  ;;  %vm1746_vm10 = vmor %vm1744_vm9, %vm1745_vm6  ;;  %v1751_v46 = vor.u32 1.1754944e-38, %v1750_v49  ;;  %v1722_v0 = vsel %vm8401_vm8, %v1721_v56, %v1717_v8  ;;  %v1778_v54 = vand.u32 2147483647, %v8383_v48  ;;  %v8441_v49 = vpop.f32.mrf.mxu3 }
 0x12f   : > { %v1148_v36 = vpop.f32.mrf.mxu2 }
 0x130   : > { %v1149_v21 = vadd.f32 %v1148_v36, %v1095_v45  ;;  %v1742_v47 = vmul.f32 %v7075_v18, %v1741_v38  ;;  %v1780_v36 = vand.u32 2147483648, %v8383_v48  ;;  %vm8447_vm0 = vcmp.eq.f32.partialorder %v1778_v54, 8.507059e+37 }
 0x131   : > { %v1042_v53 = vpop.f32.mrf.mxu0 }
 0x132   : > { %v7077_v60 = vpop.eup %7076  ;;  %v6135_v2 = vmul.f32 -1.442695, %v1149_v21  ;;  %v1043_v51 = vadd.f32 %v1042_v53, %v8182_v58  ;;  %v1743_v62 = vadd.f32 %v7075_v18, %v1742_v47 }
 0x133   : > { %v1096_v61 = vpop.f32.mrf.mxu1  ;;  %v8410_v63 = vpop.eup %7078  ;;  %v8412_v50 = vadd.f32 1.0, %v7077_v60 }
 0x134   : > { %v1770_v6 = vmul.f32 %v8410_v63, %v8383_v48  ;;  %7080 = vpow2.f32 %v6135_v2  ;;  %v1097_v19 = vadd.f32 %v1096_v61, %v1043_v51  ;;  %v1747_v24 = vsel %vm1746_vm10, %v7075_v18, %v1743_v62 }
 0x135   : > { %7082 = vrcp.f32 %v8412_v50  ;;  %v1752_v5 = vsel %vm1749_vm11, %v1751_v46, %v1747_v24  ;;  %vm1775_vm12 = vweird.f32 %v8410_v63  ;;  %v1808_v52 = vand.u32 2147483647, %v8412_v50  ;;  %v6797_v24 = vld [vmem:[#allocation6 + $0xa4] sm:$0xf0] }
 0x136   : > { %v8420_v14 = vpack.c.bf16 %v1752_v5, %v1722_v0  ;;  %v1771_v25 = vsub.f32 1.0, %v1770_v6  ;;  %vm8443_vm15 = vmor %vm1774_vm13, %vm1775_vm12  ;;  %vm1804_vm2 = vweird.f32 %v8412_v50  ;;  %v1781_v62 = vor.u32 1.1754944e-38, %v1780_v36  ;;  %v6231_v0 = vld [vmem:[#allocation6 + $0xa8] sm:$0xf0]  ;;  %v6778_v5 = vld [vmem:[#allocation6 + $0x14] sm:$0xf] }
 0x137   : > { %v1150_v27 = vpop.f32.mrf.mxu2  ;;  %vm1809_vm4 = vcmp.eq.f32.partialorder %v1808_v52, 8.507059e+37  ;;  %v6234_v23 = vor.u32 %v6796_v16, %v6231_v0 }
 0x138   : > { %v1151_v32 = vadd.f32 %v1150_v27, %v1097_v19  ;;  %2253 = vmatmul.bf16.gmra.mxu1 %v8420_v14  ;;  %v1772_v44 = vmul.f32 %v8410_v63, %v1771_v25  ;;  %v6229_v19 = vld [vmem:[#allocation6 + $0xa0] sm:$0xf]  ;;  %v6162_v25 = vor.u32 %v6778_v5, %v6159_v12  ;;  %v6794_v12 = vld [vmem:[#allocation6 + $0x94] sm:$0xf] }
 0x139   : > { %v1045_v34 = vpop.f32.mrf.mxu0  ;;  %v6230_v15 = vor.u32 %v6797_v24, %v6229_v19  ;;  %2392 = vmatpush.bf16.msra.mxu0 %v6234_v23  ;;  %v6223_v23 = vld [vmem:[#allocation6 + $0x98] sm:$0xf0] }
 0x13a   : > { %v7081_v35 = vpop.eup %7080  ;;  %v6137_v41 = vmul.f32 -1.442695, %v1151_v32  ;;  %v1046_v43 = vadd.f32 %v1045_v34, %v8182_v58  ;;  %v1773_v55 = vadd.f32 %v8410_v63, %v1772_v44  ;;  %v6151_v32 = vld [vmem:[#allocation6 + $0x8] sm:$0xf0]  ;;  %2339 = vmatpush.bf16.msra.mxu2 %v6162_v25 }
 0x13b   : > { %v1099_v10 = vpop.f32.mrf.mxu1  ;;  %v7083_v20 = vpop.eup %7082  ;;  %v8427_v40 = vadd.f32 1.0, %v7081_v35  ;;  %2284 = vmatpush.bf16.msrb.mxu3 %v6230_v15  ;;  %v6154_v35 = vor.u32 %v6776_v31, %v6151_v32  ;;  %v6226_v31 = vor.u32 %v6794_v12, %v6223_v23 }
 0x13c   : > { %7084 = vpow2.f32 %v6137_v41  ;;  %v1100_v18 = vadd.f32 %v1099_v10, %v1046_v43  ;;  %1255 = vmatmul.bf16.gmra.mxu2 %v8159_v11  ;;  %6108 = vmatmul.msk.bf16.gmra.mxu0 %vm966_vm1, %v8155_v7  ;;  %v1800_v45 = vmul.f32 %v7083_v20, %v8412_v50  ;;  %v1810_v11 = vand.u32 2147483648, %v8412_v50 }
 0x13d   : > { %7086 = vrcp.f32 %v8427_v40  ;;  %vm1805_vm14 = vweird.f32 %v7083_v20  ;;  %v1777_v2 = vsel %vm8443_vm15, %v8410_v63, %v1773_v55  ;;  %vm1834_vm6 = vweird.f32 %v8427_v40  ;;  %2393 = vmatpush.bf16.msra.mxu0 %v6226_v31 }
 0x13e   : > { %v1801_v57 = vsub.f32 1.0, %v1800_v45  ;;  %vm1806_vm3 = vmor %vm1804_vm2, %vm1805_vm14  ;;  %v1811_v56 = vor.u32 1.1754944e-38, %v1810_v11  ;;  %v1782_v63 = vsel %vm8447_vm0, %v1781_v62, %v1777_v2  ;;  %2340 = vmatpush.bf16.msra.mxu2 %v6154_v35 }
 0x13f   : > { %v1153_v38 = vpop.f32.mrf.mxu2 }
 0x140   : > { %v1154_v59 = vadd.f32 %v1153_v38, %v1100_v18  ;;  %v1802_v7 = vmul.f32 %v7083_v20, %v1801_v57  ;;  %v8471_v18 = vpop.f32.mrf.mxu3  ;;  %v1838_v38 = vand.u32 2147483647, %v8427_v40 }
 0x141   : > { %v1047_v21 = vpop.f32.mrf.mxu0 }
 0x142   : > { %v7085_v17 = vpop.eup %7084  ;;  %v6139_v4 = vmul.f32 -1.442695, %v1154_v59  ;;  %v1048_v60 = vadd.f32 %v1047_v21, %v8182_v58  ;;  %v1803_v51 = vadd.f32 %v7083_v20, %v1802_v7  ;;  %v6221_v7 = vld [vmem:[#allocation6 + $0x90] sm:$0xf]  ;;  %v6795_v21 = vld [vmem:[#allocation6 + $0x94] sm:$0xf0] }
 0x143   : > { %v1101_v48 = vpop.f32.mrf.mxu1  ;;  %v8456_v61 = vpop.eup %7086  ;;  %v8458_v8 = vadd.f32 1.0, %v7085_v17  ;;  %v6222_v17 = vor.u32 %v6795_v21, %v6221_v7  ;;  %vm8491_vm9 = vcmp.eq.f32.partialorder %v1838_v38, 8.507059e+37 }
 0x144   : > { %v1830_v50 = vmul.f32 %v8456_v61, %v8427_v40  ;;  %7088 = vpow2.f32 %v6139_v4  ;;  %v1102_v46 = vadd.f32 %v1101_v48, %v1048_v60  ;;  %v1807_v6 = vsel %vm1806_vm3, %v7083_v20, %v1803_v51 }
 0x145   : > { %7090 = vrcp.f32 %v8458_v8  ;;  %v1812_v22 = vsel %vm1809_vm4, %v1811_v56, %v1807_v6  ;;  %vm1835_vm5 = vweird.f32 %v8456_v61  ;;  %v1868_v11 = vand.u32 2147483647, %v8458_v8  ;;  %2285 = vmatpush.bf16.msrb.mxu3 %v6222_v17 }
 0x146   : > { %v8466_v3 = vpack.c.bf16 %v1812_v22, %v1782_v63  ;;  %v1831_v1 = vsub.f32 1.0, %v1830_v50  ;;  %vm8487_vm8 = vmor %vm1834_vm6, %vm1835_vm5  ;;  %vm1864_vm10 = vweird.f32 %v8458_v8 }
 0x147   : > { %v1155_v37 = vpop.f32.mrf.mxu2  ;;  %vm1869_vm12 = vcmp.eq.f32.partialorder %v1868_v11, 8.507059e+37 }
 0x148   : > { %v1156_v27 = vadd.f32 %v1155_v37, %v1102_v46  ;;  %2258 = vmatmul.bf16.gmra.mxu1 %v8466_v3  ;;  %v1832_v20 = vmul.f32 %v8456_v61, %v1831_v1  ;;  %v8507_v63 = vpop.f32.mrf.mxu3  ;;  %v7610_v1 = vld [vmem:[#allocation4] sm:$0x3] }
 0x149   : > { %v1050_v34 = vpop.f32.mrf.mxu0  ;;  %v8514_v37 = vperm.slane %v7610_v1, 1 }
 0x14a   : > { %v7089_v41 = vpop.eup %7088  ;;  %v6141_v43 = vmul.f32 -1.442695, %v1156_v27  ;;  %v1051_v10 = vadd.f32 %v1050_v34, %v8182_v58  ;;  %v1833_v36 = vadd.f32 %v8456_v61, %v1832_v20 }
 0x14b   : > { %v1104_v44 = vpop.f32.mrf.mxu1  ;;  %v7091_v45 = vpop.eup %7090  ;;  %v8473_v54 = vadd.f32 1.0, %v7089_v41  ;;  %v1178_v23 = vadd.f32 %v8471_v18, %v8514_v37 }
 0x14c   : > { %7092 = vpow2.f32 %v6141_v43  ;;  %v1105_v55 = vadd.f32 %v1104_v44, %v1051_v10  ;;  %1260 = vmatmul.bf16.gmra.mxu2 %v8176_v42  ;;  %6109 = vmatmul.msk.bf16.gmra.mxu0 %vm966_vm1, %v8172_v39  ;;  %v1860_v57 = vmul.f32 %v7091_v45, %v8458_v8  ;;  %v1840_v42 = vand.u32 2147483648, %v8427_v40 }
 0x14d   : > { %7094 = vrcp.f32 %v8473_v54  ;;  %v1870_v39 = vand.u32 2147483648, %v8458_v8  ;;  %vm1865_vm7 = vweird.f32 %v7091_v45  ;;  %v1837_v56 = vsel %vm8487_vm8, %v8456_v61, %v1833_v36 }
 0x14e   : > { %v1861_v52 = vsub.f32 1.0, %v1860_v57  ;;  %v1841_v19 = vor.u32 1.1754944e-38, %v1840_v42  ;;  %vm1866_vm11 = vmor %vm1864_vm10, %vm1865_vm7  ;;  %v1173_v10 = vadd.f32 %v8423_v33, %v8514_v37  ;;  %vm1894_vm14 = vweird.f32 %v8473_v54 }
 0x14f   : > { %v1158_v59 = vpop.f32.mrf.mxu2  ;;  %v1871_v8 = vor.u32 1.1754944e-38, %v1870_v39  ;;  %v1898_v33 = vand.u32 2147483647, %v8473_v54 }
 0x150   : > { %v1159_v47 = vadd.f32 %v1158_v59, %v1105_v55  ;;  %v1862_v53 = vmul.f32 %v7091_v45, %v1861_v52  ;;  %v1842_v61 = vsel %vm8491_vm9, %v1841_v19, %v1837_v56  ;;  %v8529_v55 = vpop.f32.mrf.mxu3 }
 0x151   : > { %v1052_v4 = vpop.f32.mrf.mxu0  ;;  %vm1899_vm2 = vcmp.eq.f32.partialorder %v1898_v33, 8.507059e+37 }
 0x152   : > { %v7093_v40 = vpop.eup %7092  ;;  %v6143_v2 = vmul.f32 -1.442695, %v1159_v47  ;;  %v1053_v51 = vadd.f32 %v1052_v4, %v8182_v58  ;;  %v1863_v50 = vadd.f32 %v7091_v45, %v1862_v53 }
 0x153   : > { %v1106_v62 = vpop.f32.mrf.mxu1  ;;  %v8500_v46 = vpop.eup %7094  ;;  %v8502_v6 = vadd.f32 1.0, %v7093_v40 }
 0x154   : > { %v1890_v24 = vmul.f32 %v8500_v46, %v8473_v54  ;;  %7096 = vpow2.f32 %v6143_v2  ;;  %v1107_v58 = vadd.f32 %v1106_v62, %v1053_v51  ;;  %v1867_v16 = vsel %vm1866_vm11, %v7091_v45, %v1863_v50  ;;  %v6213_v50 = vld [vmem:[#allocation6 + $0x80] sm:$0xf] }
 0x155   : > { %7098 = vrcp.f32 %v8502_v6  ;;  %v1872_v22 = vsel %vm1869_vm12, %v1871_v8, %v1867_v16  ;;  %vm1895_vm13 = vweird.f32 %v8500_v46  ;;  %v1928_v52 = vand.u32 2147483647, %v8502_v6  ;;  %v6792_v8 = vld [vmem:[#allocation6 + $0x84] sm:$0xf] }
 0x156   : > { %v8512_v15 = vpack.c.bf16 %v1872_v22, %v1842_v61  ;;  %v1891_v0 = vsub.f32 1.0, %v1890_v24  ;;  %vm8536_vm15 = vmor %vm1894_vm14, %vm1895_vm13  ;;  %vm1924_vm0 = vweird.f32 %v8502_v6  ;;  %v1175_v51 = vadd.f32 %v8441_v49, %v8514_v37  ;;  %v6215_v24 = vld [vmem:[#allocation6 + $0x88] sm:$0xf0] }
 0x157   : > { %v1160_v5 = vpop.f32.mrf.mxu2  ;;  %vm1929_vm4 = vcmp.eq.f32.partialorder %v1928_v52, 8.507059e+37  ;;  %v6218_v16 = vor.u32 %v6792_v8, %v6215_v24 }
 0x158   : > { %v1161_v25 = vadd.f32 %v1160_v5, %v1107_v58  ;;  %2263 = vmatmul.bf16.gmra.mxu1 %v8512_v15  ;;  %v1892_v35 = vmul.f32 %v8500_v46, %v1891_v0  ;;  %v8556_v61 = vpop.f32.mrf.mxu3 }
 0x159   : > { %v1280_v27 = vpop.f32.mrf.mxu0  ;;  %2394 = vmatpush.bf16.msra.mxu0 %v6218_v16 }
 0x15a   : > { %v7097_v32 = vpop.eup %7096  ;;  %v6145_v34 = vmul.f32 -1.442695, %v1161_v25  ;;  %v1893_v20 = vadd.f32 %v8500_v46, %v1892_v35 }
 0x15b   : > { %v7099_v41 = vpop.eup %7098  ;;  %v8518_v43 = vadd.f32 1.0, %v7097_v32 }
 0x15c   : > { %7100 = vpow2.f32 %v6145_v34  ;;  %1265 = vmatmul.bf16.gmra.mxu2 %v8195_v13  ;;  %6110 = vmatmul.msk.bf16.gmra.mxu0 %vm966_vm1, %v8191_v9  ;;  %v1920_v44 = vmul.f32 %v7099_v41, %v8502_v6  ;;  %v1900_v13 = vand.u32 2147483648, %v8473_v54  ;;  %v1930_v9 = vand.u32 2147483648, %v8502_v6 }
 0x15d   : > { %7102 = vrcp.f32 %v8518_v43  ;;  %vm1925_vm1 = vweird.f32 %v7099_v41  ;;  %v1897_v7 = vsel %vm8536_vm15, %v8500_v46, %v1893_v20  ;;  %v6793_v46 = vld [vmem:[#allocation6 + $0x84] sm:$0xf0]  ;;  %vm1954_vm5 = vweird.f32 %v8518_v43 }
 0x15e   : > { %v1921_v45 = vsub.f32 1.0, %v1920_v44  ;;  %v1901_v53 = vor.u32 1.1754944e-38, %v1900_v13  ;;  %vm1926_vm3 = vmor %vm1924_vm0, %vm1925_vm1  ;;  %v1931_v17 = vor.u32 1.1754944e-38, %v1930_v9  ;;  %v6214_v19 = vor.u32 %v6793_v46, %v6213_v50 }
 0x15f   : > { %v1226_v57 = vpop.f32.mrf.mxu2  ;;  %v1958_v18 = vand.u32 2147483647, %v8518_v43  ;;  %v1960_v35 = vand.u32 2147483648, %v8518_v43 }
 0x160   : > { %v1227_v38 = vadd.f32 %v1226_v57, %v1173_v10  ;;  %v1922_v36 = vmul.f32 %v7099_v41, %v1921_v45  ;;  %v1902_v40 = vsel %vm1899_vm2, %v1901_v53, %v1897_v7  ;;  %2286 = vmatpush.bf16.msrb.mxu3 %v6214_v19  ;;  %v8583_v9 = vpop.f32.mrf.mxu3 }
 0x161   : > { %v1282_v11 = vpop.f32.mrf.mxu0  ;;  %vm1959_vm11 = vcmp.eq.f32.partialorder %v1958_v18, 8.507059e+37 }
 0x162   : > { %v7101_v42 = vpop.eup %7100  ;;  %v1281_v39 = vadd.f32 %v1280_v27, %v1227_v38  ;;  %v1923_v21 = vadd.f32 %v7099_v41, %v1922_v36  ;;  %v1961_v38 = vor.u32 1.1754944e-38, %v1960_v35 }
 0x163   : > { %v8544_v54 = vpop.eup %7102  ;;  %v8546_v47 = vadd.f32 1.0, %v7101_v42 }
 0x164   : > { %v1950_v4 = vmul.f32 %v8544_v54, %v8518_v43  ;;  %v6112_v60 = vmul.f32 -1.442695, %v1281_v39  ;;  %v1927_v48 = vsel %vm1926_vm3, %v7099_v41, %v1923_v21  ;;  %vm1955_vm6 = vweird.f32 %v8544_v54 }
 0x165   : > { %7104 = vrcp.f32 %v8546_v47  ;;  %v1932_v2 = vsel %vm1929_vm4, %v1931_v17, %v1927_v48  ;;  %v1988_v44 = vand.u32 2147483647, %v8546_v47  ;;  %vm8575_vm8 = vmor %vm1954_vm5, %vm1955_vm6  ;;  %vm1984_vm9 = vweird.f32 %v8546_v47 }
 0x166   : > { %7106 = vpow2.f32 %v6112_v60  ;;  %v8553_v62 = vpack.c.bf16 %v1932_v2, %v1902_v40  ;;  %v1951_v56 = vsub.f32 1.0, %v1950_v4 }
 0x167   : > { %v1228_v6 = vpop.f32.mrf.mxu2  ;;  %vm1989_vm12 = vcmp.eq.f32.partialorder %v1988_v44, 8.507059e+37 }
 0x168   : > { %v1229_v58 = vadd.f32 %v1228_v6, %v1175_v51  ;;  %2268 = vmatmul.bf16.gmra.mxu1 %v8553_v62  ;;  %v1952_v49 = vmul.f32 %v8544_v54, %v1951_v56  ;;  %v1183_v51 = vadd.f32 %v8529_v55, %v8514_v37  ;;  %v8600_v50 = vpop.f32.mrf.mxu3 }
 0x169   : > { %v1285_v22 = vpop.f32.mrf.mxu0 }
 0x16a   : > { %v1283_v0 = vadd.f32 %v1282_v11, %v1229_v58  ;;  %v1953_v31 = vadd.f32 %v8544_v54, %v1952_v49 }
 0x16b   : > { %v7105_v5 = vpop.eup %7104 }
 0x16c   : > { %v7107_v12 = vpop.eup %7106  ;;  %v6114_v1 = vmul.f32 -1.442695, %v1283_v0  ;;  %2341 = vmatmul.bf16.vlgmr.msra.gmra.mxu2 %v8252_v28  ;;  %v1980_v25 = vmul.f32 %v7105_v5, %v8546_v47  ;;  %v1990_v28 = vand.u32 2147483648, %v8546_v47  ;;  %vm1985_vm7 = vweird.f32 %v7105_v5 }
 0x16d   : > { %v8563_v27 = vadd.f32 1.0, %v7107_v12  ;;  %v1957_v33 = vsel %vm8575_vm8, %v8544_v54, %v1953_v31  ;;  %vm1986_vm10 = vmor %vm1984_vm9, %vm1985_vm7  ;;  %v1180_v54 = vadd.f32 %v8507_v63, %v8514_v37 }
 0x16e   : > { %7108 = vpow2.f32 %v6114_v1  ;;  %v1981_v32 = vsub.f32 1.0, %v1980_v25  ;;  %v1991_v36 = vor.u32 1.1754944e-38, %v1990_v28  ;;  %v1962_v7 = vsel %vm1959_vm11, %v1961_v38, %v1957_v33 }
 0x16f   : > { %7110 = vrcp.f32 %v8563_v27  ;;  %v1231_v34 = vpop.f32.mrf.mxu2  ;;  %vm1489_vm14 = vweird.f32 %v8563_v27  ;;  %v1495_v0 = vand.u32 2147483648, %v8563_v27  ;;  %v1185_v1 = vadd.f32 %v8556_v61, %v8514_v37 }
 0x170   : > { %v1232_v41 = vadd.f32 %v1231_v34, %v1178_v23  ;;  %v1982_v10 = vmul.f32 %v7105_v5, %v1981_v32  ;;  %v8627_v44 = vpop.f32.mrf.mxu3 }
 0x171   : > { %v1287_v20 = vpop.f32.mrf.mxu0  ;;  %v1496_v28 = vor.u32 1.1754944e-38, %v1495_v0 }
 0x172   : > { %v1286_v57 = vadd.f32 %v1285_v22, %v1232_v41  ;;  %v1983_v13 = vadd.f32 %v7105_v5, %v1982_v10  ;;  %v1493_v22 = vand.u32 2147483647, %v8563_v27 }
 0x174   : > { %v7109_v52 = vpop.eup %7108  ;;  %v6116_v11 = vmul.f32 -1.442695, %v1286_v57  ;;  %v1987_v43 = vsel %vm1986_vm10, %v7105_v5, %v1983_v13  ;;  %vm1494_vm2 = vcmp.eq.f32.partialorder %v1493_v22, 8.507059e+37  ;;  %v6371_v22 = vld [vmem:[#allocation9 + $0x78] sm:$0xf0] }
 0x175   : > { %v8585_v59 = vpop.eup %7110  ;;  %v1436_v42 = vadd.f32 1.0, %v7109_v52  ;;  %v8587_v39 = vpop.f32.mrf.mxu1  ;;  %v1992_v21 = vsel %vm1989_vm12, %v1991_v36, %v1987_v43 }
 0x176   : > { %7112 = vpow2.f32 %v6116_v11  ;;  %v8591_v47 = vpack.c.bf16 %v1992_v21, %v1962_v7  ;;  %v1485_v53 = vmul.f32 %v8585_v59, %v8563_v27  ;;  %vm1490_vm13 = vweird.f32 %v8585_v59 }
 0x177   : > { %7114 = vrcp.f32 %v1436_v42  ;;  %v1233_v17 = vpop.f32.mrf.mxu2  ;;  %v1525_v49 = vand.u32 2147483648, %v1436_v42  ;;  %v1523_v23 = vand.u32 2147483647, %v1436_v42  ;;  %vm8614_vm15 = vmor %vm1489_vm14, %vm1490_vm13  ;;  %vm1519_vm0 = vweird.f32 %v1436_v42 }
 0x178   : > { %v1234_v4 = vadd.f32 %v1233_v17, %v1180_v54  ;;  %2273 = vmatmul.bf16.gmra.mxu1 %v8591_v47  ;;  %v1486_v60 = vsub.f32 1.0, %v1485_v53 }
 0x179   : > { %v1290_v48 = vpop.f32.mrf.mxu0  ;;  %v1526_v61 = vor.u32 1.1754944e-38, %v1525_v49  ;;  %vm1524_vm4 = vcmp.eq.f32.partialorder %v1523_v23, 8.507059e+37 }
 0x17a   : > { %v1288_v40 = vadd.f32 %v1287_v20, %v1234_v4  ;;  %v1487_v63 = vmul.f32 %v8585_v59, %v1486_v60  ;;  %v6839_v60 = vld [vmem:[#allocation9 + $0xf4] sm:$0xf0] }
 0x17c   : > { %v7113_v2 = vpop.eup %7112  ;;  %v6118_v56 = vmul.f32 -1.442695, %v1288_v40  ;;  %2346 = vmatmul.bf16.gmra.mxu2 %v8294_v29  ;;  %v1488_v55 = vadd.f32 %v8585_v59, %v1487_v63 }
 0x17d   : > { %v7115_v46 = vpop.eup %7114  ;;  %v8602_v6 = vadd.f32 1.0, %v7113_v2  ;;  %v8604_v19 = vpop.f32.mrf.mxu1 }
 0x17e   : > { %7116 = vpow2.f32 %v6118_v56  ;;  %v1515_v8 = vmul.f32 %v7115_v46, %v1436_v42  ;;  %vm1520_vm1 = vweird.f32 %v7115_v46  ;;  %v1492_v34 = vsel %vm8614_vm15, %v8585_v59, %v1488_v55  ;;  %v8646_v56 = vpop.f32.mrf.mxu3 }
 0x17f   : > { %7118 = vrcp.f32 %v8602_v6  ;;  %v1236_v24 = vpop.f32.mrf.mxu2  ;;  %vm1521_vm3 = vmor %vm1519_vm0, %vm1520_vm1  ;;  %v1497_v57 = vsel %vm1494_vm2, %v1496_v28, %v1492_v34  ;;  %v1188_v59 = vadd.f32 %v8583_v9, %v8514_v37  ;;  %v1553_v53 = vand.u32 2147483647, %v8602_v6  ;;  %v6433_v9 = vld [vmem:[#allocation9 + $0xf0] sm:$0xf] }
 0x180   : > { %v1237_v58 = vadd.f32 %v1236_v24, %v1183_v51  ;;  %v1516_v29 = vsub.f32 1.0, %v1515_v8  ;;  %vm1549_vm5 = vweird.f32 %v8602_v6  ;;  %v6434_v63 = vor.u32 %v6839_v60, %v6433_v9  ;;  %v6822_v8 = vld [vmem:[#allocation9 + $0x74] sm:$0xf]  ;;  %v6425_v60 = vld [vmem:[#allocation9 + $0xe0] sm:$0xf] }
 0x181   : > { %v1292_v16 = vpop.f32.mrf.mxu0  ;;  %vm1554_vm10 = vcmp.eq.f32.partialorder %v1553_v53, 8.507059e+37 }
 0x182   : > { %v1291_v5 = vadd.f32 %v1290_v48, %v1237_v58  ;;  %v1517_v12 = vmul.f32 %v7115_v46, %v1516_v29  ;;  %v1555_v58 = vand.u32 2147483648, %v8602_v6  ;;  %3395 = vmatpush.bf16.msra.mxu3 %v6434_v63 }
 0x184   : > { %v7117_v31 = vpop.eup %7116  ;;  %v6120_v32 = vmul.f32 -1.442695, %v1291_v5  ;;  %v1518_v18 = vadd.f32 %v7115_v46, %v1517_v12  ;;  %v6374_v5 = vor.u32 %v6822_v8, %v6371_v22  ;;  %v1190_v12 = vadd.f32 %v8600_v50, %v8514_v37 }
 0x185   : > { %v8621_v27 = vpop.eup %7118  ;;  %v8623_v35 = vadd.f32 1.0, %v7117_v31  ;;  %v8625_v41 = vpop.f32.mrf.mxu1 }
 0x186   : > { %7120 = vpow2.f32 %v6120_v32  ;;  %v1522_v10 = vsel %vm1521_vm3, %v7115_v46, %v1518_v18  ;;  %v1545_v20 = vmul.f32 %v8621_v27, %v8602_v6  ;;  %vm1550_vm6 = vweird.f32 %v8621_v27  ;;  %v6823_v46 = vld [vmem:[#allocation9 + $0x74] sm:$0xf0]  ;;  %3449 = vmatpush.bf16.msrb.mxu2 %v6374_v5 }
 0x187   : > { %7122 = vrcp.f32 %v8623_v35  ;;  %v1238_v45 = vpop.f32.mrf.mxu2  ;;  %v1527_v33 = vsel %vm1524_vm4, %v1526_v61, %v1522_v10  ;;  %v1583_v55 = vand.u32 2147483647, %v8623_v35  ;;  %v1585_v29 = vand.u32 2147483648, %v8623_v35  ;;  %vm8657_vm8 = vmor %vm1549_vm5, %vm1550_vm6 }
 0x188   : > { %v1239_v13 = vadd.f32 %v1238_v45, %v1185_v1  ;;  %v2010_v38 = vpack.c.bf16 %v1527_v33, %v1497_v57  ;;  %v1546_v36 = vsub.f32 1.0, %v1545_v20  ;;  %vm1579_vm9 = vweird.f32 %v8623_v35  ;;  %v6838_v20 = vld [vmem:[#allocation9 + $0xf4] sm:$0xf]  ;;  %v6435_v45 = vld [vmem:[#allocation9 + $0xf8] sm:$0xf0] }
 0x189   : > { %v1295_v52 = vpop.f32.mrf.mxu0  ;;  %v1556_v6 = vor.u32 1.1754944e-38, %v1555_v58  ;;  %v1586_v18 = vor.u32 1.1754944e-38, %v1585_v29  ;;  %vm1584_vm12 = vcmp.eq.f32.partialorder %v1583_v55, 8.507059e+37  ;;  %v1195_v29 = vadd.f32 %v8646_v56, %v8514_v37 }
 0x18a   : > { %v1293_v11 = vadd.f32 %v1292_v16, %v1239_v13  ;;  %2287 = vmatmul.bf16.vlgmr.msrb.gmra.mxu3 %v2010_v38  ;;  %2395 = vmatmul.bf16.vlgmr.msra.gmra.mxu0 %v2010_v38  ;;  %v1547_v7 = vmul.f32 %v8621_v27, %v1546_v36  ;;  %v6438_v36 = vor.u32 %v6838_v20, %v6435_v45  ;;  %v6363_v20 = vld [vmem:[#allocation9 + $0x68] sm:$0xf0] }
 0x18c   : > { %v7121_v43 = vpop.eup %7120  ;;  %v6122_v42 = vmul.f32 -1.442695, %v1293_v11  ;;  %2351 = vmatmul.bf16.gmra.mxu2 %v8336_v30  ;;  %v6369_v30 = vld [vmem:[#allocation9 + $0x70] sm:$0xf]  ;;  %v1548_v2 = vadd.f32 %v8621_v27, %v1547_v7  ;;  %3503 = vmatpush.bf16.msrb.mxu0 %v6438_v36 }
 0x18d   : > { %v7123_v21 = vpop.eup %7122  ;;  %v8636_v54 = vadd.f32 1.0, %v7121_v43  ;;  %v8643_v48 = vpop.f32.mrf.mxu1  ;;  %v6370_v16 = vor.u32 %v6823_v46, %v6369_v30  ;;  %v6837_v30 = vld [vmem:[#allocation9 + $0xe4] sm:$0xf0] }
 0x18e   : > { %7124 = vpow2.f32 %v6122_v42  ;;  %v1575_v17 = vmul.f32 %v7123_v21, %v8623_v35  ;;  %vm1580_vm7 = vweird.f32 %v7123_v21  ;;  %v1552_v31 = vsel %vm8657_vm8, %v8621_v27, %v1548_v2  ;;  %v8675_v43 = vpop.f32.mrf.mxu3 }
 0x18f   : > { %7126 = vrcp.f32 %v8636_v54  ;;  %v1241_v4 = vpop.f32.mrf.mxu2  ;;  %3341 = vmatpush.bf16.msra.mxu1 %v6370_v16  ;;  %vm1581_vm11 = vmor %vm1579_vm9, %vm1580_vm7  ;;  %v1557_v35 = vsel %vm1554_vm10, %v1556_v6, %v1552_v31  ;;  %v1193_v42 = vadd.f32 %v8627_v44, %v8514_v37  ;;  %vm1609_vm14 = vweird.f32 %v8636_v54 }
 0x190   : > { %v1242_v40 = vadd.f32 %v1241_v4, %v1188_v59  ;;  %v1576_v51 = vsub.f32 1.0, %v1575_v17  ;;  %v1613_v63 = vand.u32 2147483647, %v8636_v54  ;;  %v1615_v46 = vand.u32 2147483648, %v8636_v54 }
 0x191   : > { %v1297_v24 = vpop.f32.mrf.mxu0  ;;  %v1198_v36 = vadd.f32 %v8675_v43, %v8514_v37  ;;  %v6427_v43 = vld [vmem:[#allocation9 + $0xe8] sm:$0xf0] }
 0x192   : > { %v1296_v0 = vadd.f32 %v1295_v52, %v1242_v40  ;;  %v1577_v49 = vmul.f32 %v7123_v21, %v1576_v51  ;;  %vm1614_vm2 = vcmp.eq.f32.partialorder %v1613_v63, 8.507059e+37 }
 0x194   : > { %v7125_v1 = vpop.eup %7124  ;;  %v6124_v25 = vmul.f32 -1.442695, %v1296_v0  ;;  %v1578_v32 = vadd.f32 %v7123_v21, %v1577_v49 }
 0x195   : > { %v8665_v50 = vpop.eup %7126  ;;  %v8667_v34 = vadd.f32 1.0, %v7125_v1  ;;  %v8673_v52 = vpop.f32.mrf.mxu1  ;;  %v1616_v1 = vor.u32 1.1754944e-38, %v1615_v46 }
 0x196   : > { %7128 = vpow2.f32 %v6124_v25  ;;  %v1582_v28 = vsel %vm1581_vm11, %v7123_v21, %v1578_v32  ;;  %v1605_v61 = vmul.f32 %v8665_v50, %v8636_v54  ;;  %vm1610_vm13 = vweird.f32 %v8665_v50 }
 0x197   : > { %7130 = vrcp.f32 %v8667_v34  ;;  %v1243_v27 = vpop.f32.mrf.mxu2  ;;  %v1587_v10 = vsel %vm1584_vm12, %v1586_v18, %v1582_v28  ;;  %v1645_v8 = vand.u32 2147483648, %v8667_v34  ;;  %v1643_v55 = vand.u32 2147483647, %v8667_v34  ;;  %vm8696_vm15 = vmor %vm1609_vm14, %vm1610_vm13  ;;  %v6361_v18 = vld [vmem:[#allocation9 + $0x60] sm:$0xf] }
 0x198   : > { %v1244_v57 = vadd.f32 %v1243_v27, %v1190_v12  ;;  %v2012_v33 = vpack.c.bf16 %v1587_v10, %v1557_v35  ;;  %v1606_v13 = vsub.f32 1.0, %v1605_v61  ;;  %vm1639_vm0 = vweird.f32 %v8667_v34  ;;  %v8706_v12 = vpop.f32.mrf.mxu3  ;;  %v6821_v28 = vld [vmem:[#allocation9 + $0x64] sm:$0xf0]  ;;  %v6820_v61 = vld [vmem:[#allocation9 + $0x64] sm:$0xf] }
 0x199   : > { %v1300_v38 = vpop.f32.mrf.mxu0  ;;  %v1646_v25 = vor.u32 1.1754944e-38, %v1645_v8  ;;  %vm1644_vm4 = vcmp.eq.f32.partialorder %v1643_v55, 8.507059e+37  ;;  %v6362_v10 = vor.u32 %v6821_v28, %v6361_v18  ;;  %v1200_v16 = vadd.f32 %v8706_v12, %v8514_v37  ;;  %v6819_v18 = vld [vmem:[#allocation9 + $0x54] sm:$0xf0]  ;;  %v6818_v28 = vld [vmem:[#allocation9 + $0x54] sm:$0xf] }
 0x19a   : > { %v1298_v11 = vadd.f32 %v1297_v24, %v1244_v57  ;;  %2292 = vmatmul.bf16.gmra.mxu3 %v2012_v33  ;;  %2400 = vmatmul.bf16.gmra.mxu0 %v2012_v33  ;;  %v1607_v21 = vmul.f32 %v8665_v50, %v1606_v13  ;;  %v6366_v33 = vor.u32 %v6820_v61, %v6363_v20 }
 0x19b   : > { %3342 = vmatpush.bf16.msra.mxu1 %v6362_v10 }
 0x19c   : > { %v7129_v59 = vpop.eup %7128  ;;  %v6126_v7 = vmul.f32 -1.442695, %v1298_v11  ;;  %2356 = vmatmul.bf16.gmra.mxu2 %v8378_v26  ;;  %v1608_v44 = vadd.f32 %v8665_v50, %v1607_v21  ;;  %v6426_v26 = vor.u32 %v6837_v30, %v6425_v60  ;;  %v6417_v60 = vld [vmem:[#allocation9 + $0xd0] sm:$0xf] }
 0x19d   : > { %v7131_v53 = vpop.eup %7130  ;;  %v8681_v17 = vadd.f32 1.0, %v7129_v59  ;;  %v8700_v0 = vpop.f32.mrf.mxu1  ;;  %3450 = vmatpush.bf16.msrb.mxu2 %v6366_v33 }
 0x19e   : > { %7132 = vpow2.f32 %v6126_v7  ;;  %v1635_v4 = vmul.f32 %v7131_v53, %v8667_v34  ;;  %vm1640_vm1 = vweird.f32 %v7131_v53  ;;  %3396 = vmatpush.bf16.msra.mxu3 %v6426_v26  ;;  %v1612_v49 = vsel %vm8696_vm15, %v8665_v50, %v1608_v44  ;;  %v6835_v26 = vld [vmem:[#allocation9 + $0xd4] sm:$0xf0] }
 0x19f   : > { %7134 = vrcp.f32 %v8681_v17  ;;  %v1246_v9 = vpop.f32.mrf.mxu2  ;;  %vm1641_vm3 = vmor %vm1639_vm0, %vm1640_vm1  ;;  %v1617_v34 = vsel %vm1614_vm2, %v1616_v1, %v1612_v49  ;;  %vm1669_vm5 = vweird.f32 %v8681_v17  ;;  %v1673_v63 = vand.u32 2147483647, %v8681_v17 }
 0x1a0   : > { %v1247_v40 = vadd.f32 %v1246_v9, %v1193_v42  ;;  %v1636_v2 = vsub.f32 1.0, %v1635_v4  ;;  %v1675_v46 = vand.u32 2147483648, %v8681_v17 }
 0x1a1   : > { %v1302_v51 = vpop.f32.mrf.mxu0  ;;  %vm1674_vm10 = vcmp.eq.f32.partialorder %v1673_v63, 8.507059e+37 }
 0x1a2   : > { %v1301_v24 = vadd.f32 %v1300_v38, %v1247_v40  ;;  %v1637_v58 = vmul.f32 %v7131_v53, %v1636_v2 }
 0x1a4   : > { %v7133_v22 = vpop.eup %7132  ;;  %v6128_v54 = vmul.f32 -1.442695, %v1301_v24  ;;  %v1638_v5 = vadd.f32 %v7131_v53, %v1637_v58  ;;  %v6418_v24 = vor.u32 %v6835_v26, %v6417_v60  ;;  %v6834_v60 = vld [vmem:[#allocation9 + $0xd4] sm:$0xf] }
 0x1a5   : > { %v8708_v56 = vpop.eup %7134  ;;  %v8710_v23 = vadd.f32 1.0, %v7133_v22  ;;  %v8722_v21 = vpop.f32.mrf.mxu1 }
 0x1a6   : > { %7136 = vpow2.f32 %v6128_v54  ;;  %v1642_v31 = vsel %vm1641_vm3, %v7131_v53, %v1638_v5  ;;  %v1665_v32 = vmul.f32 %v8708_v56, %v8681_v17  ;;  %v8724_v53 = vpop.f32.mrf.mxu3  ;;  %vm1670_vm6 = vweird.f32 %v8708_v56  ;;  %3397 = vmatpush.bf16.msra.mxu3 %v6418_v24 }
 0x1a7   : > { %7138 = vrcp.f32 %v8710_v23  ;;  %v1248_v50 = vpop.f32.mrf.mxu2  ;;  %v1647_v6 = vsel %vm1644_vm4, %v1646_v25, %v1642_v31  ;;  %v1705_v8 = vand.u32 2147483648, %v8710_v23  ;;  %vm8741_vm8 = vmor %vm1669_vm5, %vm1670_vm6  ;;  %vm1699_vm9 = vweird.f32 %v8710_v23 }
 0x1a8   : > { %v1249_v27 = vadd.f32 %v1248_v50, %v1195_v29  ;;  %v2014_v35 = vpack.c.bf16 %v1647_v6, %v1617_v34  ;;  %v1666_v45 = vsub.f32 1.0, %v1665_v32  ;;  %v1703_v29 = vand.u32 2147483647, %v8710_v23  ;;  %v6353_v6 = vld [vmem:[#allocation9 + $0x50] sm:$0xf] }
 0x1a9   : > { %v1305_v57 = vpop.f32.mrf.mxu0  ;;  %v1676_v17 = vor.u32 1.1754944e-38, %v1675_v46  ;;  %v1706_v31 = vor.u32 1.1754944e-38, %v1705_v8  ;;  %v6354_v33 = vor.u32 %v6819_v18, %v6353_v6  ;;  %v6345_v6 = vld [vmem:[#allocation9 + $0x40] sm:$0xf] }
 0x1aa   : > { %v1303_v13 = vadd.f32 %v1302_v51, %v1249_v27  ;;  %2297 = vmatmul.bf16.gmra.mxu3 %v2014_v35  ;;  %2405 = vmatmul.bf16.gmra.mxu0 %v2014_v35  ;;  %v1667_v59 = vmul.f32 %v8708_v56, %v1666_v45  ;;  %vm1704_vm12 = vcmp.eq.f32.partialorder %v1703_v29, 8.507059e+37  ;;  %v6355_v45 = vld [vmem:[#allocation9 + $0x58] sm:$0xf0] }
 0x1ab   : > { %3343 = vmatpush.bf16.msra.mxu1 %v6354_v33 }
 0x1ac   : > { %v7137_v38 = vpop.eup %7136  ;;  %v6130_v11 = vmul.f32 -1.442695, %v1303_v13  ;;  %2361 = vmatmul.bf16.gmra.mxu2 %v8420_v14  ;;  %v6836_v14 = vld [vmem:[#allocation9 + $0xe4] sm:$0xf]  ;;  %v1668_v40 = vadd.f32 %v8708_v56, %v1667_v59  ;;  %v6358_v13 = vor.u32 %v6818_v28, %v6355_v45 }
 0x1ad   : > { %v7139_v42 = vpop.eup %7138  ;;  %v8720_v7 = vadd.f32 1.0, %v7137_v38  ;;  %v6430_v2 = vor.u32 %v6836_v14, %v6427_v43  ;;  %v8757_v61 = vpop.f32.mrf.mxu1 }
 0x1ae   : > { %7140 = vpow2.f32 %v6130_v11  ;;  %v1695_v4 = vmul.f32 %v7139_v42, %v8710_v23  ;;  %vm1700_vm7 = vweird.f32 %v7139_v42  ;;  %v1672_v5 = vsel %vm8741_vm8, %v8708_v56, %v1668_v40  ;;  %v1204_v10 = vpop.f32.mrf.mxu3  ;;  %3451 = vmatpush.bf16.msrb.mxu2 %v6358_v13 }
 0x1af   : > { %7142 = vrcp.f32 %v8720_v7  ;;  %v1251_v9 = vpop.f32.mrf.mxu2  ;;  %3504 = vmatpush.bf16.msrb.mxu0 %v6430_v2  ;;  %vm1701_vm11 = vmor %vm1699_vm9, %vm1700_vm7  ;;  %v1677_v34 = vsel %vm1674_vm10, %v1676_v17, %v1672_v5  ;;  %v1203_v11 = vadd.f32 %v8724_v53, %v8514_v37  ;;  %vm1729_vm14 = vweird.f32 %v8720_v7 }
 0x1b0   : > { %v1252_v30 = vadd.f32 %v1251_v9, %v1198_v36  ;;  %v1696_v44 = vsub.f32 1.0, %v1695_v4  ;;  %v1733_v26 = vand.u32 2147483647, %v8720_v7  ;;  %v1205_v29 = vadd.f32 %v1204_v10, %v8514_v37  ;;  %v6817_v10 = vld [vmem:[#allocation9 + $0x44] sm:$0xf0] }
 0x1b1   : > { %v1307_v51 = vpop.f32.mrf.mxu0  ;;  %v6346_v45 = vor.u32 %v6817_v10, %v6345_v6  ;;  %v6401_v6 = vld [vmem:[#allocation9 + $0xb0] sm:$0xf] }
 0x1b2   : > { %v1306_v58 = vadd.f32 %v1305_v57, %v1252_v30  ;;  %v1697_v55 = vmul.f32 %v7139_v42, %v1696_v44  ;;  %v6419_v30 = vld [vmem:[#allocation9 + $0xd8] sm:$0xf0]  ;;  %vm1734_vm2 = vcmp.eq.f32.partialorder %v1733_v26, 8.507059e+37 }
 0x1b3   : > { %3344 = vmatpush.bf16.msra.mxu1 %v6346_v45 }
 0x1b4   : > { %v7141_v54 = vpop.eup %7140  ;;  %v6132_v49 = vmul.f32 -1.442695, %v1306_v58  ;;  %v1698_v1 = vadd.f32 %v7139_v42, %v1697_v55 }
 0x1b5   : > { %v8749_v25 = vpop.eup %7142  ;;  %v8751_v12 = vadd.f32 1.0, %v7141_v54  ;;  %v8773_v46 = vpop.f32.mrf.mxu1 }
 0x1b6   : > { %7144 = vpow2.f32 %v6132_v49  ;;  %v1702_v32 = vsel %vm1701_vm11, %v7139_v42, %v1698_v1  ;;  %v1725_v50 = vmul.f32 %v8749_v25, %v8720_v7  ;;  %vm1730_vm13 = vweird.f32 %v8749_v25  ;;  %v1207_v24 = vpop.f32.mrf.mxu3 }
 0x1b7   : > { %7146 = vrcp.f32 %v8751_v12  ;;  %v1253_v56 = vpop.f32.mrf.mxu2  ;;  %v1707_v23 = vsel %vm1704_vm12, %v1706_v31, %v1702_v32  ;;  %v1765_v63 = vand.u32 2147483648, %v8751_v12  ;;  %v1763_v55 = vand.u32 2147483647, %v8751_v12  ;;  %vm8779_vm15 = vmor %vm1729_vm14, %vm1730_vm13 }
 0x1b8   : > { %v1254_v27 = vadd.f32 %v1253_v56, %v1200_v16  ;;  %v2016_v35 = vpack.c.bf16 %v1707_v23, %v1677_v34  ;;  %v1726_v20 = vsub.f32 1.0, %v1725_v50  ;;  %vm1759_vm0 = vweird.f32 %v8751_v12  ;;  %v6833_v23 = vld [vmem:[#allocation9 + $0xc4] sm:$0xf0] }
 0x1b9   : > { %v1310_v57 = vpop.f32.mrf.mxu0  ;;  %v1766_v31 = vor.u32 1.1754944e-38, %v1765_v63  ;;  %vm1764_vm4 = vcmp.eq.f32.partialorder %v1763_v55, 8.507059e+37 }
 0x1ba   : > { %v1308_v38 = vadd.f32 %v1307_v51, %v1254_v27  ;;  %2302 = vmatmul.bf16.gmra.mxu3 %v2016_v35  ;;  %2410 = vmatmul.bf16.gmra.mxu0 %v2016_v35  ;;  %v1727_v42 = vmul.f32 %v8749_v25, %v1726_v20  ;;  %v1735_v51 = vand.u32 2147483648, %v8720_v7  ;;  %v6816_v20 = vld [vmem:[#allocation9 + $0x44] sm:$0xf] }
 0x1bc   : > { %v7145_v36 = vpop.eup %7144  ;;  %v6134_v59 = vmul.f32 -1.442695, %v1308_v38  ;;  %2366 = vmatmul.bf16.gmra.mxu2 %v8466_v3  ;;  %v1728_v53 = vadd.f32 %v8749_v25, %v1727_v42  ;;  %v6422_v3 = vor.u32 %v6834_v60, %v6419_v30  ;;  %v1736_v17 = vor.u32 1.1754944e-38, %v1735_v51 }
 0x1bd   : > { %v7147_v4 = vpop.eup %7146  ;;  %v8763_v9 = vadd.f32 1.0, %v7145_v36 }
 0x1be   : > { %7148 = vpow2.f32 %v6134_v59  ;;  %v1755_v14 = vmul.f32 %v7147_v4, %v8751_v12  ;;  %vm1760_vm1 = vweird.f32 %v7147_v4  ;;  %3505 = vmatpush.bf16.msrb.mxu0 %v6422_v3  ;;  %v1732_v54 = vsel %vm8779_vm15, %v8749_v25, %v1728_v53  ;;  %v6409_v12 = vld [vmem:[#allocation9 + $0xc0] sm:$0xf]  ;;  %v6832_v53 = vld [vmem:[#allocation9 + $0xc4] sm:$0xf] }
 0x1bf   : > { %7150 = vrcp.f32 %v8763_v9  ;;  %v1256_v43 = vpop.f32.mrf.mxu2  ;;  %vm1761_vm3 = vmor %vm1759_vm0, %vm1760_vm1  ;;  %v1737_v56 = vsel %vm1734_vm2, %v1736_v17, %v1732_v54  ;;  %v6410_v27 = vor.u32 %v6833_v23, %v6409_v12  ;;  %v1208_v59 = vadd.f32 %v1207_v24, %v8514_v37 }
 0x1c0   : > { %v1257_v40 = vadd.f32 %v1256_v43, %v1203_v11  ;;  %v1756_v44 = vsub.f32 1.0, %v1755_v14  ;;  %v8794_v11 = vpop.f32.mrf.mxu1  ;;  %vm1789_vm6 = vweird.f32 %v8763_v9  ;;  %v1793_v51 = vand.u32 2147483647, %v8763_v9 }
 0x1c1   : > { %v1312_v2 = vpop.f32.mrf.mxu0  ;;  %3398 = vmatpush.bf16.msra.mxu3 %v6410_v27  ;;  %v1795_v63 = vand.u32 2147483648, %v8763_v9 }
 0x1c2   : > { %v1311_v8 = vadd.f32 %v1310_v57, %v1257_v40  ;;  %v1757_v58 = vmul.f32 %v7147_v4, %v1756_v44  ;;  %v6347_v57 = vld [vmem:[#allocation9 + $0x48] sm:$0xf0]  ;;  %vm1794_vm10 = vcmp.eq.f32.partialorder %v1793_v51, 8.507059e+37 }
 0x1c3   : > { %v6350_v13 = vor.u32 %v6816_v20, %v6347_v57  ;;  %v6411_v44 = vld [vmem:[#allocation9 + $0xc8] sm:$0xf0]  ;;  %v6815_v20 = vld [vmem:[#allocation9 + $0x34] sm:$0xf0] }
 0x1c4   : > { %v7149_v7 = vpop.eup %7148  ;;  %v6136_v22 = vmul.f32 -1.442695, %v1311_v8  ;;  %v1758_v49 = vadd.f32 %v7147_v4, %v1757_v58  ;;  %v6414_v26 = vor.u32 %v6832_v53, %v6411_v44 }
 0x1c5   : > { %v8787_v5 = vpop.eup %7150  ;;  %v8789_v1 = vadd.f32 1.0, %v7149_v7  ;;  %3452 = vmatpush.bf16.msrb.mxu2 %v6350_v13  ;;  %v6339_v13 = vld [vmem:[#allocation9 + $0x38] sm:$0xf0] }
 0x1c6   : > { %7152 = vpow2.f32 %v6136_v22  ;;  %v1762_v32 = vsel %vm1761_vm3, %v7147_v4, %v1758_v49  ;;  %v1785_v50 = vmul.f32 %v8787_v5, %v8763_v9  ;;  %v1209_v4 = vpop.f32.mrf.mxu3  ;;  %vm1790_vm5 = vweird.f32 %v8787_v5  ;;  %3506 = vmatpush.bf16.msrb.mxu0 %v6414_v26 }
 0x1c7   : > { %7154 = vrcp.f32 %v8789_v1  ;;  %v1258_v25 = vpop.f32.mrf.mxu2  ;;  %v1767_v34 = vsel %vm1764_vm4, %v1766_v31, %v1762_v32  ;;  %v1825_v8 = vand.u32 2147483648, %v8789_v1  ;;  %v1823_v55 = vand.u32 2147483647, %v8789_v1  ;;  %vm8813_vm8 = vmor %vm1789_vm6, %vm1790_vm5 }
 0x1c8   : > { %v1259_v18 = vadd.f32 %v1258_v25, %v1205_v29  ;;  %v2018_v28 = vpack.c.bf16 %v1767_v34, %v1737_v56  ;;  %v1786_v35 = vsub.f32 1.0, %v1785_v50  ;;  %v1210_v29 = vadd.f32 %v1209_v4, %v8514_v37  ;;  %v8826_v25 = vpop.f32.mrf.mxu1 }
 0x1c9   : > { %v1315_v38 = vpop.f32.mrf.mxu0  ;;  %vm1819_vm9 = vweird.f32 %v8789_v1  ;;  %v1796_v32 = vor.u32 1.1754944e-38, %v1795_v63  ;;  %v1826_v50 = vor.u32 1.1754944e-38, %v1825_v8  ;;  %vm1824_vm12 = vcmp.eq.f32.partialorder %v1823_v55, 8.507059e+37 }
 0x1ca   : > { %v1313_v33 = vadd.f32 %v1312_v2, %v1259_v18  ;;  %2307 = vmatmul.bf16.gmra.mxu3 %v2018_v28  ;;  %2415 = vmatmul.bf16.gmra.mxu0 %v2018_v28  ;;  %v1787_v14 = vmul.f32 %v8787_v5, %v1786_v35  ;;  %v6831_v18 = vld [vmem:[#allocation9 + $0xb4] sm:$0xf0]  ;;  %v6337_v28 = vld [vmem:[#allocation9 + $0x30] sm:$0xf] }
 0x1cb   : > { %v6402_v45 = vor.u32 %v6831_v18, %v6401_v6  ;;  %v6338_v57 = vor.u32 %v6815_v20, %v6337_v28 }
 0x1cc   : > { %v7153_v36 = vpop.eup %7152  ;;  %v6138_v42 = vmul.f32 -1.442695, %v1313_v33  ;;  %2371 = vmatmul.bf16.gmra.mxu2 %v8512_v15  ;;  %v1788_v15 = vadd.f32 %v8787_v5, %v1787_v14  ;;  %v6814_v33 = vld [vmem:[#allocation9 + $0x34] sm:$0xf]  ;;  %v6393_v14 = vld [vmem:[#allocation9 + $0xa0] sm:$0xf] }
 0x1cd   : > { %v7155_v43 = vpop.eup %7154  ;;  %v8799_v60 = vadd.f32 1.0, %v7153_v36  ;;  %v6342_v36 = vor.u32 %v6814_v33, %v6339_v13  ;;  %3399 = vmatpush.bf16.msra.mxu3 %v6402_v45  ;;  %3345 = vmatpush.bf16.msra.mxu1 %v6338_v57 }
 0x1ce   : > { %7156 = vpow2.f32 %v6138_v42  ;;  %v1815_v30 = vmul.f32 %v7155_v43, %v8789_v1  ;;  %vm1820_vm7 = vweird.f32 %v7155_v43  ;;  %v1792_v9 = vsel %vm8813_vm8, %v8787_v5, %v1788_v15  ;;  %v1212_v56 = vpop.f32.mrf.mxu3  ;;  %v6403_v42 = vld [vmem:[#allocation9 + $0xb8] sm:$0xf0] }
 0x1cf   : > { %7158 = vrcp.f32 %v8799_v60  ;;  %v1261_v40 = vpop.f32.mrf.mxu2  ;;  %vm1821_vm11 = vmor %vm1819_vm9, %vm1820_vm7  ;;  %v1797_v12 = vsel %vm1794_vm10, %v1796_v32, %v1792_v9  ;;  %3453 = vmatpush.bf16.msrb.mxu2 %v6342_v36  ;;  %v1853_v8 = vand.u32 2147483647, %v8799_v60  ;;  %vm1849_vm14 = vweird.f32 %v8799_v60  ;;  %v6813_v9 = vld [vmem:[#allocation9 + $0x24] sm:$0xf0] }
 0x1d0   : > { %v1262_v3 = vadd.f32 %v1261_v40, %v1208_v59  ;;  %v1816_v2 = vsub.f32 1.0, %v1815_v30  ;;  %v6830_v59 = vld [vmem:[#allocation9 + $0xb4] sm:$0xf]  ;;  %v1213_v40 = vadd.f32 %v1212_v56, %v8514_v37 }
 0x1d1   : > { %v1317_v31 = vpop.f32.mrf.mxu0  ;;  %v6406_v4 = vor.u32 %v6830_v59, %v6403_v42  ;;  %vm1854_vm2 = vcmp.eq.f32.partialorder %v1853_v8, 8.507059e+37 }
 0x1d2   : > { %v1316_v24 = vadd.f32 %v1315_v38, %v1262_v3  ;;  %v1817_v58 = vmul.f32 %v7155_v43, %v1816_v2 }
 0x1d3   : > { %3507 = vmatpush.bf16.msrb.mxu0 %v6406_v4 }
 0x1d4   : > { %v7157_v7 = vpop.eup %7156  ;;  %v6140_v22 = vmul.f32 -1.442695, %v1316_v24  ;;  %v1818_v54 = vadd.f32 %v7155_v43, %v1817_v58  ;;  %v8841_v24 = vpop.f32.mrf.mxu1 }
 0x1d5   : > { %v8821_v49 = vpop.eup %7158  ;;  %v8823_v17 = vadd.f32 1.0, %v7157_v7 }
 0x1d6   : > { %7160 = vpow2.f32 %v6140_v22  ;;  %v1822_v34 = vsel %vm1821_vm11, %v7155_v43, %v1818_v54  ;;  %v1845_v5 = vmul.f32 %v8821_v49, %v8799_v60  ;;  %v6829_v43 = vld [vmem:[#allocation9 + $0xa4] sm:$0xf0]  ;;  %vm1850_vm13 = vweird.f32 %v8821_v49  ;;  %v1214_v58 = vpop.f32.mrf.mxu3  ;;  %v6329_v22 = vld [vmem:[#allocation9 + $0x20] sm:$0xf]  ;;  %v6812_v54 = vld [vmem:[#allocation9 + $0x24] sm:$0xf] }
 0x1d7   : > { %7162 = vrcp.f32 %v8823_v17  ;;  %v1263_v1 = vpop.f32.mrf.mxu2  ;;  %v1827_v23 = vsel %vm1824_vm12, %v1826_v50, %v1822_v34  ;;  %v6394_v3 = vor.u32 %v6829_v43, %v6393_v14  ;;  %v1885_v7 = vand.u32 2147483648, %v8823_v17  ;;  %vm8850_vm15 = vmor %vm1849_vm14, %vm1850_vm13 }
 0x1d8   : > { %v1264_v27 = vadd.f32 %v1263_v1, %v1210_v29  ;;  %v2020_v35 = vpack.c.bf16 %v1827_v23, %v1797_v12  ;;  %v1846_v10 = vsub.f32 1.0, %v1845_v5  ;;  %v1883_v56 = vand.u32 2147483647, %v8823_v17 }
 0x1d9   : > { %v1320_v51 = vpop.f32.mrf.mxu0  ;;  %3400 = vmatpush.bf16.msra.mxu3 %v6394_v3  ;;  %v1215_v34 = vadd.f32 %v1214_v58, %v8514_v37  ;;  %v6330_v1 = vor.u32 %v6813_v9, %v6329_v22  ;;  %vm1879_vm0 = vweird.f32 %v8823_v17 }
 0x1da   : > { %v1318_v38 = vadd.f32 %v1317_v31, %v1264_v27  ;;  %2312 = vmatmul.bf16.gmra.mxu3 %v2020_v35  ;;  %2420 = vmatmul.bf16.gmra.mxu0 %v2020_v35  ;;  %v1847_v44 = vmul.f32 %v8821_v49, %v1846_v10  ;;  %v6331_v31 = vld [vmem:[#allocation9 + $0x28] sm:$0xf0]  ;;  %v1886_v35 = vor.u32 1.1754944e-38, %v1885_v7  ;;  %vm1884_vm4 = vcmp.eq.f32.partialorder %v1883_v56, 8.507059e+37 }
 0x1db   : > { %v6334_v12 = vor.u32 %v6812_v54, %v6331_v31  ;;  %3346 = vmatpush.bf16.msra.mxu1 %v6330_v1 }
 0x1dc   : > { %v7161_v30 = vpop.eup %7160  ;;  %v6142_v53 = vmul.f32 -1.442695, %v1318_v38  ;;  %2376 = vmatmul.bf16.gmra.mxu2 %v8553_v62  ;;  %v1855_v62 = vand.u32 2147483648, %v8799_v60  ;;  %v1848_v29 = vadd.f32 %v8821_v49, %v1847_v44  ;;  %v8863_v36 = vpop.f32.mrf.mxu1 }
 0x1dd   : > { %v7163_v15 = vpop.eup %7162  ;;  %v8834_v2 = vadd.f32 1.0, %v7161_v30  ;;  %3454 = vmatpush.bf16.msrb.mxu2 %v6334_v12 }
 0x1de   : > { %7164 = vpow2.f32 %v6142_v53  ;;  %v1875_v26 = vmul.f32 %v7163_v15, %v8823_v17  ;;  %vm1880_vm1 = vweird.f32 %v7163_v15  ;;  %v1852_v6 = vsel %vm8850_vm15, %v8821_v49, %v1848_v29 }
 0x1df   : > { %7166 = vrcp.f32 %v8834_v2  ;;  %v1266_v63 = vpop.f32.mrf.mxu2  ;;  %v1856_v27 = vor.u32 1.1754944e-38, %v1855_v62  ;;  %vm1881_vm3 = vmor %vm1879_vm0, %vm1880_vm1  ;;  %vm1909_vm6 = vweird.f32 %v8834_v2 }
 0x1e0   : > { %v1267_v55 = vadd.f32 %v1266_v63, %v1213_v40  ;;  %v1876_v16 = vsub.f32 1.0, %v1875_v26  ;;  %v1913_v26 = vand.u32 2147483647, %v8834_v2 }
 0x1e1   : > { %v1857_v45 = vsel %vm1854_vm2, %v1856_v27, %v1852_v6  ;;  %v1322_v38 = vpop.f32.mrf.mxu0 }
 0x1e2   : > { %v1321_v32 = vadd.f32 %v1320_v51, %v1267_v55  ;;  %v1877_v50 = vmul.f32 %v7163_v15, %v1876_v16  ;;  %vm1914_vm11 = vcmp.eq.f32.partialorder %v1913_v26, 8.507059e+37 }
 0x1e4   : > { %v7165_v23 = vpop.eup %7164  ;;  %v6144_v60 = vmul.f32 -1.442695, %v1321_v32  ;;  %v1878_v18 = vadd.f32 %v7163_v15, %v1877_v50  ;;  %v8879_v58 = vpop.f32.mrf.mxu1 }
 0x1e5   : > { %v8858_v28 = vpop.eup %7166  ;;  %v1464_v37 = vadd.f32 1.0, %v7165_v23 }
 0x1e6   : > { %7168 = vpow2.f32 %v6144_v60  ;;  %v1882_v10 = vsel %vm1881_vm3, %v7163_v15, %v1878_v18  ;;  %v1905_v20 = vmul.f32 %v8858_v28, %v8834_v2  ;;  %vm1910_vm5 = vweird.f32 %v8858_v28  ;;  %v2059_v60 = vld [vmem:[#allocation7] sm:$0x3] }
 0x1e7   : > { %7170 = vrcp.f32 %v1464_v37  ;;  %v1268_v49 = vpop.f32.mrf.mxu2  ;;  %v1887_v17 = vsel %vm1884_vm4, %v1886_v35, %v1882_v10  ;;  %v1915_v15 = vand.u32 2147483648, %v8834_v2  ;;  %v1943_v63 = vand.u32 2147483647, %v1464_v37  ;;  %vm8875_vm8 = vmor %vm1909_vm6, %vm1910_vm5 }
 0x1e8   : > { %v1269_v57 = vadd.f32 %v1268_v49, %v1215_v34  ;;  %v2022_v33 = vpack.c.bf16 %v1887_v17, %v1857_v45  ;;  %v1906_v13 = vsub.f32 1.0, %v1905_v20  ;;  %vm1939_vm9 = vweird.f32 %v1464_v37 }
 0x1e9   : > { %v1916_v22 = vor.u32 1.1754944e-38, %v1915_v15  ;;  %vm1944_vm12 = vcmp.eq.f32.partialorder %v1943_v63, 8.507059e+37  ;;  %v8891_v18 = vperm.slane %v2059_v60, 1 }
 0x1ea   : > { %v1323_v59 = vadd.f32 %v1322_v38, %v1269_v57  ;;  %2317 = vmatmul.bf16.gmra.mxu3 %v2022_v33  ;;  %2425 = vmatmul.bf16.gmra.mxu0 %v2022_v33  ;;  %v1907_v14 = vmul.f32 %v8858_v28, %v1906_v13 }
 0x1ec   : > { %v7169_v42 = vpop.eup %7168  ;;  %v6146_v4 = vmul.f32 -1.442695, %v1323_v59  ;;  %2381 = vmatmul.bf16.gmra.mxu2 %v8591_v47  ;;  %v1908_v44 = vadd.f32 %v8858_v28, %v1907_v14  ;;  %v1945_v47 = vand.u32 2147483648, %v1464_v37  ;;  %v8887_v12 = vpop.f32.mrf.mxu1 }
 0x1ed   : > { %v7171_v43 = vpop.eup %7170  ;;  %v8867_v30 = vadd.f32 1.0, %v7169_v42 }
 0x1ee   : > { %7172 = vpow2.f32 %v6146_v4  ;;  %v1935_v40 = vmul.f32 %v7171_v43, %v1464_v37  ;;  %vm1940_vm7 = vweird.f32 %v7171_v43  ;;  %v1912_v55 = vsel %vm8875_vm8, %v8858_v28, %v1908_v44  ;;  %v6828_v28 = vld [vmem:[#allocation9 + $0xa4] sm:$0xf]  ;;  %v6395_v37 = vld [vmem:[#allocation9 + $0xa8] sm:$0xf0] }
 0x1ef   : > { %7174 = vrcp.f32 %v8867_v30  ;;  %v2342_v53 = vpop.f32.mrf.mxu2  ;;  %vm1941_vm10 = vmor %vm1939_vm9, %vm1940_vm7  ;;  %v1946_v2 = vor.u32 1.1754944e-38, %v1945_v47  ;;  %v1917_v32 = vsel %vm1914_vm11, %v1916_v22, %v1912_v55  ;;  %v6398_v10 = vor.u32 %v6828_v28, %v6395_v37  ;;  %v6811_v55 = vld [vmem:[#allocation9 + $0x14] sm:$0xf0]  ;;  %v6387_v22 = vld [vmem:[#allocation9 + $0x98] sm:$0xf0] }
 0x1f0   : > { %v1936_v3 = vsub.f32 1.0, %v1935_v40  ;;  %vm1969_vm14 = vweird.f32 %v8867_v30  ;;  %v1975_v20 = vand.u32 2147483648, %v8867_v30  ;;  %v1973_v45 = vand.u32 2147483647, %v8867_v30 }
 0x1f1   : > { %3508 = vmatpush.bf16.msrb.mxu0 %v6398_v10  ;;  %v2343_v4 = vadd.f32 %v2342_v53, %v8891_v18  ;;  %v8903_v40 = vperm.slane %v2059_v60, 0  ;;  %v6810_v53 = vld [vmem:[#allocation9 + $0x14] sm:$0xf] }
 0x1f2   : > { %v1937_v51 = vmul.f32 %v7171_v43, %v1936_v3  ;;  %v1976_v59 = vor.u32 1.1754944e-38, %v1975_v20  ;;  %vm1974_vm3 = vcmp.eq.f32.partialorder %v1973_v45, 8.507059e+37 }
 0x1f4   : > { %v7173_v62 = vpop.eup %7172  ;;  %v1938_v29 = vadd.f32 %v7171_v43, %v1937_v51  ;;  %v8907_v51 = vpop.f32.mrf.mxu1 }
 0x1f5   : > { %v7175_v16 = vpop.eup %7174  ;;  %v1468_v7 = vadd.f32 1.0, %v7173_v62  ;;  %v6321_v62 = vld [vmem:[#allocation9 + $0x10] sm:$0xf] }
 0x1f6   : > { %v1942_v9 = vsel %vm1941_vm10, %v7171_v43, %v1938_v29  ;;  %v1965_v54 = vmul.f32 %v7175_v16, %v8867_v30  ;;  %vm1970_vm13 = vweird.f32 %v7175_v16  ;;  %v6385_v43 = vld [vmem:[#allocation9 + $0x90] sm:$0xf]  ;;  %v6827_v30 = vld [vmem:[#allocation9 + $0x94] sm:$0xf0]  ;;  %v6322_v29 = vor.u32 %v6811_v55, %v6321_v62 }
 0x1f7   : > { %7176 = vrcp.f32 %v1468_v7  ;;  %v8885_v31 = vpop.f32.mrf.mxu2  ;;  %v1947_v50 = vsel %vm1944_vm12, %v1946_v2, %v1942_v9  ;;  %v2005_v49 = vand.u32 2147483648, %v1468_v7  ;;  %v2003_v57 = vand.u32 2147483647, %v1468_v7  ;;  %vm8896_vm15 = vmor %vm1969_vm14, %vm1970_vm13 }
 0x1f8   : > { %v2024_v56 = vpack.c.bf16 %v1947_v50, %v1917_v32  ;;  %v1966_v34 = vsub.f32 1.0, %v1965_v54  ;;  %vm1999_vm0 = vweird.f32 %v1468_v7  ;;  %v6386_v26 = vor.u32 %v6827_v30, %v6385_v43  ;;  %3347 = vmatpush.bf16.msra.mxu1 %v6322_v29  ;;  %v6377_v50 = vld [vmem:[#allocation9 + $0x80] sm:$0xf] }
 0x1f9   : > { %v2006_v42 = vor.u32 1.1754944e-38, %v2005_v49  ;;  %vm2004_vm4 = vcmp.eq.f32.partialorder %v2003_v57, 8.507059e+37  ;;  %v2235_v32 = vadd.f32 %v8587_v39, %v8903_v40  ;;  %v2345_v60 = vadd.f32 %v8885_v31, %v8891_v18  ;;  %v6809_v57 = vld [vmem:[#allocation9 + $0x4] sm:$0xf0]  ;;  %v6315_v31 = vld [vmem:[#allocation9 + $0x8] sm:$0xf0] }
 0x1fa   : > { %2322 = vmatmul.bf16.gmra.mxu3 %v2024_v56  ;;  %2430 = vmatmul.bf16.gmra.mxu0 %v2024_v56  ;;  %v1967_v5 = vmul.f32 %v7175_v16, %v1966_v34  ;;  %v6825_v56 = vld [vmem:[#allocation9 + $0x84] sm:$0xf0]  ;;  %v6824_v34 = vld [vmem:[#allocation9 + $0x84] sm:$0xf]  ;;  %v2240_v30 = vadd.f32 %v8625_v41, %v8903_v40  ;;  %v8950_v62 = vadd.f32 %v8794_v11, %v8903_v40 }
 0x1fb   : > { %3401 = vmatpush.bf16.msra.mxu3 %v6386_v26 }
 0x1fc   : > { %v1968_v27 = vadd.f32 %v7175_v16, %v1967_v5  ;;  %v2274_v49 = vpop.f32.mrf.mxu1 }
 0x1fd   : > { %v7177_v1 = vpop.eup %7176 }
 0x1fe   : > { %v1995_v23 = vmul.f32 %v7177_v1, %v1468_v7  ;;  %vm2000_vm1 = vweird.f32 %v7177_v1  ;;  %v1972_v13 = vsel %vm8896_vm15, %v7175_v16, %v1968_v27  ;;  %v6323_v16 = vld [vmem:[#allocation9 + $0x18] sm:$0xf0]  ;;  %v6826_v7 = vld [vmem:[#allocation9 + $0x94] sm:$0xf] }
 0x1ff   : > { %v8889_v6 = vpop.f32.mrf.mxu2  ;;  %vm2001_vm2 = vmor %vm1999_vm0, %vm2000_vm1  ;;  %v1977_v15 = vsel %vm1974_vm3, %v1976_v59, %v1972_v13  ;;  %v6326_v9 = vor.u32 %v6810_v53, %v6323_v16  ;;  %v6390_v54 = vor.u32 %v6826_v7, %v6387_v22  ;;  %v2237_v59 = vadd.f32 %v8604_v19, %v8903_v40 }
 0x200   : > { %v1996_v35 = vsub.f32 1.0, %v1995_v23  ;;  %v6379_v23 = vld [vmem:[#allocation9 + $0x88] sm:$0xf0]  ;;  %v8930_v19 = vadd.f32 %v8673_v52, %v8903_v40  ;;  %v8946_v52 = vadd.f32 %v8773_v46, %v8903_v40  ;;  %v8960_v53 = vadd.f32 %v8841_v24, %v8903_v40 }
 0x201   : > { %3455 = vmatpush.bf16.msrb.mxu2 %v6326_v9  ;;  %3509 = vmatpush.bf16.msrb.mxu0 %v6390_v54  ;;  %v6382_v37 = vor.u32 %v6824_v34, %v6379_v23  ;;  %v8966_v46 = vadd.f32 %v8863_v36, %v8903_v40  ;;  %v8981_v36 = vadd.f32 %v8887_v12, %v8903_v40 }
 0x202   : > { %v1997_v17 = vmul.f32 %v7177_v1, %v1996_v35  ;;  %v8988_v9 = vadd.f32 %v2274_v49, %v8903_v40 }
 0x204   : > { %v1998_v38 = vadd.f32 %v7177_v1, %v1997_v17  ;;  %v6313_v17 = vld [vmem:[#allocation9] sm:$0xf]  ;;  %v2276_v24 = vpop.f32.mrf.mxu1 }
 0x205   : > { %3510 = vmatpush.bf16.msrb.mxu0 %v6382_v37  ;;  %v6314_v13 = vor.u32 %v6809_v57, %v6313_v17  ;;  %v8995_v12 = vadd.f32 %v2276_v24, %v8903_v40 }
 0x206   : > { %v2002_v14 = vsel %vm2001_vm2, %v7177_v1, %v1998_v38  ;;  %v6378_v1 = vor.u32 %v6825_v56, %v6377_v50  ;;  %v6808_v38 = vld [vmem:[#allocation9 + $0x4] sm:$0xf] }
 0x207   : > { %v8905_v44 = vpop.f32.mrf.mxu2  ;;  %v2396_v3 = vpop.f32.mrf.mxu0  ;;  %v2007_v47 = vsel %vm2004_vm4, %v2006_v42, %v2002_v14  ;;  %v6318_v42 = vor.u32 %v6808_v38, %v6315_v31  ;;  %3348 = vmatpush.bf16.msra.mxu1 %v6314_v13  ;;  %v2348_v14 = vadd.f32 %v8889_v6, %v8891_v18  ;;  %v8938_v6 = vadd.f32 %v8722_v21, %v8903_v40 }
 0x208   : > { %v2397_v63 = vadd.f32 %v2396_v3, %v2343_v4  ;;  %v2026_v8 = vpack.c.bf16 %v2007_v47, %v1977_v15  ;;  %3402 = vmatpush.bf16.msra.mxu3 %v6378_v1  ;;  %v8926_v3 = vadd.f32 %v8643_v48, %v8903_v40  ;;  %v8942_v48 = vadd.f32 %v8757_v61, %v8903_v40 }
 0x209   : > { %3456 = vmatpush.bf16.msrb.mxu2 %v6318_v42  ;;  %v8956_v21 = vadd.f32 %v8826_v25, %v8903_v40  ;;  %v8974_v25 = vadd.f32 %v8879_v58, %v8903_v40  ;;  %v2350_v54 = vadd.f32 %v8905_v44, %v8891_v18 }
 0x20a   : > { %v6276_v2 = vmul.f32 -1.442695, %v2397_v63  ;;  %2327 = vmatmul.bf16.gmra.mxu3 %v2026_v8  ;;  %2435 = vmatmul.bf16.gmra.mxu0 %v2026_v8  ;;  %v8934_v63 = vadd.f32 %v8700_v0, %v8903_v40 }
 0x20c   : > { %7178 = vpow2.f32 %v6276_v2  ;;  %v8985_v2 = vadd.f32 %v8907_v51, %v8903_v40 }
 0x20d   : > { %v2288_v5 = vpop.f32.mrf.mxu3 }
 0x20e   : > { %v2289_v28 = vadd.f32 %v2288_v5, %v2235_v32 }
 0x20f   : > { %v8913_v27 = vpop.f32.mrf.mxu2  ;;  %v2398_v35 = vpop.f32.mrf.mxu0 }
 0x210   : > { %v6275_v10 = vmul.f32 -1.442695, %v2289_v28  ;;  %v2399_v39 = vadd.f32 %v2398_v35, %v2345_v60  ;;  %v2353_v34 = vadd.f32 %v8913_v27, %v8891_v18 }
 0x212   : > { %v7179_v20 = vpop.eup %7178  ;;  %7180 = vpow2.f32 %v6275_v10  ;;  %v6278_v45 = vmul.f32 -1.442695, %v2399_v39 }
 0x213   : > { %v8915_v33 = vadd.f32 1.0, %v7179_v20 }
 0x214   : > { %7182 = vpow2.f32 %v6278_v45 }
 0x215   : > { %7184 = vrcp.f32 %v8915_v33  ;;  %v2290_v4 = vpop.f32.mrf.mxu3  ;;  %v2611_v11 = vand.u32 2147483648, %v8915_v33  ;;  %v2609_v22 = vand.u32 2147483647, %v8915_v33  ;;  %vm2605_vm5 = vweird.f32 %v8915_v33 }
 0x216   : > { %v2291_v43 = vadd.f32 %v2290_v4, %v2237_v59 }
 0x217   : > { %v2354_v15 = vpop.f32.mrf.mxu2  ;;  %v2401_v47 = vpop.f32.mrf.mxu0  ;;  %v2612_v51 = vor.u32 1.1754944e-38, %v2611_v11  ;;  %vm9004_vm6 = vcmp.eq.f32.partialorder %v2609_v22, 8.507059e+37 }
 0x218   : > { %v7181_v26 = vpop.eup %7180  ;;  %v6277_v41 = vmul.f32 -1.442695, %v2291_v43  ;;  %v2402_v8 = vadd.f32 %v2401_v47, %v2348_v14  ;;  %v9002_v44 = vadd.f32 %v2354_v15, %v8891_v18 }
 0x219   : > { %v8952_v0 = vadd.f32 1.0, %v7181_v26 }
 0x21a   : > { %v7183_v55 = vpop.eup %7182  ;;  %7186 = vpow2.f32 %v6277_v41  ;;  %v6280_v61 = vmul.f32 -1.442695, %v2402_v8 }
 0x21b   : > { %v8962_v29 = vpop.eup %7184  ;;  %7188 = vrcp.f32 %v8952_v0  ;;  %v8970_v16 = vadd.f32 1.0, %v7183_v55  ;;  %v2596_v50 = vand.u32 2147483648, %v8952_v0  ;;  %vm2590_vm8 = vweird.f32 %v8952_v0 }
 0x21c   : > { %v2601_v7 = vmul.f32 %v8962_v29, %v8915_v33  ;;  %7190 = vpow2.f32 %v6280_v61  ;;  %vm2606_vm7 = vweird.f32 %v8962_v29  ;;  %v2594_v10 = vand.u32 2147483647, %v8952_v0 }
 0x21d   : > { %7192 = vrcp.f32 %v8970_v16  ;;  %v2293_v58 = vpop.f32.mrf.mxu3  ;;  %v9017_v49 = vor.u32 1.1754944e-38, %v2596_v50  ;;  %v2641_v57 = vand.u32 2147483648, %v8970_v16  ;;  %v2639_v38 = vand.u32 2147483647, %v8970_v16  ;;  %vm9030_vm9 = vmor %vm2605_vm5, %vm2606_vm7 }
 0x21e   : > { %v2602_v32 = vsub.f32 1.0, %v2601_v7  ;;  %v2294_v56 = vadd.f32 %v2293_v58, %v2240_v30  ;;  %vm2635_vm10 = vweird.f32 %v8970_v16  ;;  %vm9043_vm11 = vcmp.eq.f32.partialorder %v2594_v10, 8.507059e+37 }
 0x21f   : > { %v2357_v5 = vpop.f32.mrf.mxu2  ;;  %v2403_v1 = vpop.f32.mrf.mxu0  ;;  %vm9051_vm13 = vcmp.eq.f32.partialorder %v2639_v38, 8.507059e+37 }
 0x220   : > { %v7187_v23 = vpop.eup %7186  ;;  %v2603_v60 = vmul.f32 %v8962_v29, %v2602_v32  ;;  %v6279_v28 = vmul.f32 -1.442695, %v2294_v56  ;;  %v2404_v37 = vadd.f32 %v2403_v1, %v2350_v54  ;;  %v9049_v8 = vadd.f32 %v2357_v5, %v8891_v18 }
 0x221   : > { %v9008_v40 = vpop.eup %7188  ;;  %v9012_v27 = vadd.f32 1.0, %v7187_v23 }
 0x222   : > { %v7191_v39 = vpop.eup %7190  ;;  %v2586_v20 = vmul.f32 %v9008_v40, %v8952_v0  ;;  %7194 = vpow2.f32 %v6279_v28  ;;  %v6282_v45 = vmul.f32 -1.442695, %v2404_v37  ;;  %v2604_v42 = vadd.f32 %v8962_v29, %v2603_v60 }
 0x223   : > { %v7193_v17 = vpop.eup %7192  ;;  %7196 = vrcp.f32 %v9012_v27  ;;  %v9021_v13 = vadd.f32 1.0, %v7191_v39  ;;  %v2626_v14 = vand.u32 2147483648, %v9012_v27  ;;  %v2624_v30 = vand.u32 2147483647, %v9012_v27 }
 0x224   : > { %v2587_v31 = vsub.f32 1.0, %v2586_v20  ;;  %v2631_v59 = vmul.f32 %v7193_v17, %v8970_v16  ;;  %7198 = vpow2.f32 %v6282_v45  ;;  %v2608_v33 = vsel %vm9030_vm9, %v8962_v29, %v2604_v42 }
 0x225   : > { %7200 = vrcp.f32 %v9021_v13  ;;  %v2295_v43 = vpop.f32.mrf.mxu3  ;;  %vm2591_vm12 = vweird.f32 %v9008_v40  ;;  %vm2620_vm14 = vweird.f32 %v9012_v27  ;;  %vm2636_vm1 = vweird.f32 %v7193_v17 }
 0x226   : > { %v2588_v15 = vmul.f32 %v9008_v40, %v2587_v31  ;;  %v2632_v47 = vsub.f32 1.0, %v2631_v59  ;;  %v2296_v26 = vadd.f32 %v2295_v43, %v8926_v3  ;;  %v2642_v3 = vor.u32 1.1754944e-38, %v2641_v57  ;;  %vm9065_vm15 = vmor %vm2590_vm8, %vm2591_vm12 }
 0x227   : > { %v2359_v55 = vpop.f32.mrf.mxu2  ;;  %v2406_v61 = vpop.f32.mrf.mxu0  ;;  %v2613_v32 = vsel %vm9004_vm6, %v2612_v51, %v2608_v33  ;;  %v2627_v56 = vor.u32 1.1754944e-38, %v2626_v14  ;;  %vm9070_vm0 = vcmp.eq.f32.partialorder %v2624_v30, 8.507059e+37  ;;  %vm2637_vm2 = vmor %vm2635_vm10, %vm2636_vm1  ;;  %v2669_v35 = vand.u32 2147483647, %v9021_v13 }
 0x228   : > { %v7195_v24 = vpop.eup %7194  ;;  %v2633_v7 = vmul.f32 %v7193_v17, %v2632_v47  ;;  %v6281_v29 = vmul.f32 -1.442695, %v2296_v26  ;;  %v2407_v22 = vadd.f32 %v2406_v61, %v2353_v34  ;;  %v2589_v50 = vadd.f32 %v9008_v40, %v2588_v15 }
 0x229   : > { %v7197_v58 = vpop.eup %7196  ;;  %v9056_v54 = vadd.f32 1.0, %v7195_v24  ;;  %vm2665_vm4 = vweird.f32 %v9021_v13  ;;  %v9094_v59 = vadd.f32 %v2359_v55, %v8891_v18  ;;  %vm9099_vm5 = vcmp.eq.f32.partialorder %v2669_v35, 8.507059e+37 }
 0x22a   : > { %v7199_v5 = vpop.eup %7198  ;;  %v2616_v34 = vmul.f32 %v7197_v58, %v9012_v27  ;;  %7202 = vpow2.f32 %v6281_v29  ;;  %v6284_v23 = vmul.f32 -1.442695, %v2407_v22  ;;  %v2634_v60 = vadd.f32 %v7193_v17, %v2633_v7 }
 0x22b   : > { %v9074_v51 = vpop.eup %7200  ;;  %7204 = vrcp.f32 %v9056_v54  ;;  %v9077_v37 = vadd.f32 1.0, %v7199_v5  ;;  %v2593_v0 = vsel %vm9065_vm15, %v9008_v40, %v2589_v50  ;;  %vm2621_vm3 = vweird.f32 %v7197_v58 }
 0x22c   : > { %v2617_v10 = vsub.f32 1.0, %v2616_v34  ;;  %v2661_v39 = vmul.f32 %v9074_v51, %v9021_v13  ;;  %7206 = vpow2.f32 %v6284_v23  ;;  %v2638_v20 = vsel %vm2637_vm2, %v7193_v17, %v2634_v60  ;;  %vm2622_vm7 = vmor %vm2620_vm14, %vm2621_vm3 }
 0x22d   : > { %7208 = vrcp.f32 %v9077_v37  ;;  %v2298_v45 = vpop.f32.mrf.mxu3  ;;  %v2643_v57 = vsel %vm9051_vm13, %v2642_v3, %v2638_v20  ;;  %v2598_v17 = vsel %vm9043_vm11, %v9017_v49, %v2593_v0  ;;  %v2671_v43 = vand.u32 2147483648, %v9021_v13 }
 0x22e   : > { %v2618_v16 = vmul.f32 %v7197_v58, %v2617_v10  ;;  %v2299_v40 = vadd.f32 %v2298_v45, %v8930_v19  ;;  %v3126_v38 = vpack.c.bf16 %v2643_v57, %v2613_v32  ;;  %v2662_v31 = vsub.f32 1.0, %v2661_v39 }
 0x22f   : > { %v2362_v42 = vpop.f32.mrf.mxu2  ;;  %v2408_v4 = vpop.f32.mrf.mxu0  ;;  %vm2666_vm6 = vweird.f32 %v9074_v51  ;;  %v2699_v41 = vand.u32 2147483647, %v9077_v37  ;;  %v2701_v55 = vand.u32 2147483648, %v9077_v37  ;;  %vm2695_vm9 = vweird.f32 %v9077_v37 }
 0x230   : > { %v7203_v30 = vpop.eup %7202  ;;  %v6283_v15 = vmul.f32 -1.442695, %v2299_v40  ;;  %v2409_v19 = vadd.f32 %v2408_v4, %v9002_v44  ;;  %3403 = vmatmul.bf16.vlgmr.msra.gmra.mxu3 %v3126_v38  ;;  %3511 = vmatmul.bf16.vlgmr.msrb.gmra.mxu0 %v3126_v38  ;;  %v2619_v47 = vadd.f32 %v7197_v58, %v2618_v16  ;;  %v2663_v49 = vmul.f32 %v9074_v51, %v2662_v31  ;;  %vm9128_vm8 = vmor %vm2665_vm4, %vm2666_vm6 }
 0x231   : > { %v9106_v26 = vpop.eup %7204  ;;  %v9108_v33 = vadd.f32 1.0, %v7203_v30  ;;  %v9139_v34 = vadd.f32 %v2362_v42, %v8891_v18  ;;  %vm9142_vm10 = vcmp.eq.f32.partialorder %v2699_v41, 8.507059e+37  ;;  %v2702_v35 = vor.u32 1.1754944e-38, %v2701_v55 }
 0x232   : > { %v7207_v44 = vpop.eup %7206  ;;  %v2646_v61 = vmul.f32 %v9106_v26, %v9056_v54  ;;  %7210 = vpow2.f32 %v6283_v15  ;;  %v6286_v11 = vmul.f32 -1.442695, %v2409_v19  ;;  %v2623_v3 = vsel %vm2622_vm7, %v7197_v58, %v2619_v47 }
 0x233   : > { %v7209_v24 = vpop.eup %7208  ;;  %7212 = vrcp.f32 %v9108_v33  ;;  %v9119_v7 = vadd.f32 1.0, %v7207_v44  ;;  %v2628_v27 = vsel %vm9070_vm0, %v2627_v56, %v2623_v3  ;;  %v2664_v29 = vadd.f32 %v9074_v51, %v2663_v49 }
 0x234   : > { %7214 = vpow2.f32 %v6286_v11  ;;  %v3125_v22 = vpack.c.bf16 %v2628_v27, %v2598_v17  ;;  %v2672_v58 = vor.u32 1.1754944e-38, %v2671_v43  ;;  %v2691_v50 = vmul.f32 %v7209_v24, %v9077_v37 }
 0x235   : > { %7216 = vrcp.f32 %v9119_v7  ;;  %v2300_v5 = vpop.f32.mrf.mxu3  ;;  %v2668_v56 = vsel %vm9128_vm8, %v9074_v51, %v2664_v29  ;;  %v2647_v1 = vsub.f32 1.0, %v2646_v61  ;;  %vm2696_vm11 = vweird.f32 %v7209_v24 }
 0x236   : > { %v2301_v13 = vadd.f32 %v2300_v5, %v8934_v63  ;;  %3349 = vmatmul.bf16.vlgmr.msra.gmra.mxu1 %v3125_v22  ;;  %3457 = vmatmul.bf16.vlgmr.msrb.gmra.mxu2 %v3125_v22  ;;  %v2692_v23 = vsub.f32 1.0, %v2691_v50  ;;  %vm2650_vm12 = vweird.f32 %v9056_v54  ;;  %v2673_v63 = vsel %vm9099_vm5, %v2672_v58, %v2668_v56  ;;  %vm2697_vm14 = vmor %vm2695_vm9, %vm2696_vm11 }
 0x237   : > { %v2364_v28 = vpop.f32.mrf.mxu2  ;;  %v2411_v0 = vpop.f32.mrf.mxu0  ;;  %v2648_v51 = vmul.f32 %v9106_v26, %v2647_v1  ;;  %vm2651_vm13 = vweird.f32 %v9106_v26  ;;  %v2654_v40 = vand.u32 2147483647, %v9056_v54  ;;  %v2656_v38 = vand.u32 2147483648, %v9056_v54 }
 0x238   : > { %v7211_v10 = vpop.eup %7210  ;;  %v6285_v39 = vmul.f32 -1.442695, %v2301_v13  ;;  %v2412_v20 = vadd.f32 %v2411_v0, %v9049_v8  ;;  %v2693_v45 = vmul.f32 %v7209_v24, %v2692_v23  ;;  %vm2680_vm1 = vweird.f32 %v9108_v33  ;;  %vm9184_vm15 = vmor %vm2650_vm12, %vm2651_vm13  ;;  %v6854_v0 = vld [vmem:[#allocation12 + $0x74] sm:$0xf] }
 0x239   : > { %v9151_v57 = vpop.eup %7212  ;;  %v9153_v16 = vadd.f32 1.0, %v7211_v10  ;;  %v2649_v43 = vadd.f32 %v9106_v26, %v2648_v51  ;;  %v9173_v15 = vadd.f32 %v2364_v28, %v8891_v18  ;;  %v2684_v41 = vand.u32 2147483647, %v9108_v33 }
 0x23a   : > { %v7215_v31 = vpop.eup %7214  ;;  %7218 = vpow2.f32 %v6285_v39  ;;  %v6288_v42 = vmul.f32 -1.442695, %v2412_v20  ;;  %v2694_v4 = vadd.f32 %v7209_v24, %v2693_v45  ;;  %v2676_v8 = vmul.f32 %v9151_v57, %v9108_v33  ;;  %v6597_v45 = vld [vmem:[#allocation12 + $0xf0] sm:$0xf] }
 0x23b   : > { %v9160_v17 = vpop.eup %7216  ;;  %7220 = vrcp.f32 %v9153_v16  ;;  %v9163_v14 = vadd.f32 1.0, %v7215_v31  ;;  %v2686_v11 = vand.u32 2147483648, %v9108_v33  ;;  %v2653_v29 = vsel %vm9184_vm15, %v9106_v26, %v2649_v43 }
 0x23c   : > { %v2721_v30 = vmul.f32 %v9160_v17, %v9119_v7  ;;  %7222 = vpow2.f32 %v6288_v42  ;;  %v2698_v19 = vsel %vm2697_vm14, %v7209_v24, %v2694_v4  ;;  %v2677_v37 = vsub.f32 1.0, %v2676_v8 }
 0x23d   : > { %7224 = vrcp.f32 %v9163_v14  ;;  %v2303_v47 = vpop.f32.mrf.mxu3  ;;  %v2703_v49 = vsel %vm9142_vm10, %v2702_v35, %v2698_v19  ;;  %vm9192_vm0 = vcmp.eq.f32.partialorder %v2654_v40, 8.507059e+37  ;;  %vm2681_vm2 = vweird.f32 %v9151_v57  ;;  %v6535_v35 = vld [vmem:[#allocation12 + $0x78] sm:$0xf0]  ;;  %v6871_v40 = vld [vmem:[#allocation12 + $0xf4] sm:$0xf0] }
 0x23e   : > { %v2304_v55 = vadd.f32 %v2303_v47, %v8938_v6  ;;  %v3128_v44 = vpack.c.bf16 %v2703_v49, %v2673_v63  ;;  %v2722_v3 = vsub.f32 1.0, %v2721_v30  ;;  %v2678_v22 = vmul.f32 %v9151_v57, %v2677_v37  ;;  %vm2682_vm4 = vmor %vm2680_vm1, %vm2681_vm2 }
 0x23f   : > { %v2367_v24 = vpop.f32.mrf.mxu2  ;;  %v2413_v27 = vpop.f32.mrf.mxu0  ;;  %v2657_v50 = vor.u32 1.1754944e-38, %v2656_v38  ;;  %vm9199_vm3 = vcmp.eq.f32.partialorder %v2684_v41, 8.507059e+37  ;;  %v2687_v13 = vor.u32 1.1754944e-38, %v2686_v11  ;;  %vm2725_vm5 = vweird.f32 %v9119_v7 }
 0x240   : > { %v7219_v54 = vpop.eup %7218  ;;  %v6287_v32 = vmul.f32 -1.442695, %v2304_v55  ;;  %v2414_v58 = vadd.f32 %v2413_v27, %v9094_v59  ;;  %3408 = vmatmul.bf16.gmra.mxu3 %v3128_v44  ;;  %3516 = vmatmul.bf16.gmra.mxu0 %v3128_v44  ;;  %v2679_v1 = vadd.f32 %v9151_v57, %v2678_v22  ;;  %v2723_v23 = vmul.f32 %v9160_v17, %v2722_v3 }
 0x241   : > { %v9203_v26 = vpop.eup %7220  ;;  %v9205_v56 = vadd.f32 1.0, %v7219_v54  ;;  %v2658_v59 = vsel %vm9192_vm0, %v2657_v50, %v2653_v29  ;;  %v6538_v20 = vor.u32 %v6854_v0, %v6535_v35  ;;  %vm2726_vm6 = vweird.f32 %v9160_v17 }
 0x242   : > { %v7223_v60 = vpop.eup %7222  ;;  %7226 = vpow2.f32 %v6287_v32  ;;  %v6290_v28 = vmul.f32 -1.442695, %v2414_v58  ;;  %v2683_v39 = vsel %vm2682_vm4, %v9151_v57, %v2679_v1  ;;  %v2724_v33 = vadd.f32 %v9160_v17, %v2723_v23  ;;  %vm9242_vm7 = vmor %vm2725_vm5, %vm2726_vm6 }
 0x243   : > { %v9216_v51 = vpop.eup %7224  ;;  %7228 = vrcp.f32 %v9205_v56  ;;  %v9219_v10 = vadd.f32 1.0, %v7223_v60  ;;  %v2688_v63 = vsel %vm9199_vm3, %v2687_v13, %v2683_v39  ;;  %4565 = vmatpush.bf16.msra.mxu2 %v6538_v20  ;;  %v2729_v42 = vand.u32 2147483647, %v9119_v7 }
 0x244   : > { %7230 = vpow2.f32 %v6290_v28  ;;  %v3127_v31 = vpack.c.bf16 %v2688_v63, %v2658_v59  ;;  %v2731_v4 = vand.u32 2147483648, %v9119_v7  ;;  %v2751_v57 = vmul.f32 %v9216_v51, %v9163_v14 }
 0x245   : > { %v2305_v38 = vpop.f32.mrf.mxu3  ;;  %v2706_v8 = vmul.f32 %v9203_v26, %v9153_v16  ;;  %v9233_v43 = vadd.f32 %v2367_v24, %v8891_v18  ;;  %v2759_v19 = vand.u32 2147483647, %v9163_v14  ;;  %7232 = vrcp.f32 %v9219_v10 }
 0x246   : > { %v2306_v30 = vadd.f32 %v2305_v38, %v8942_v48  ;;  %3354 = vmatmul.bf16.gmra.mxu1 %v3127_v31  ;;  %3462 = vmatmul.bf16.gmra.mxu2 %v3127_v31  ;;  %v2752_v41 = vsub.f32 1.0, %v2751_v57  ;;  %vm2755_vm8 = vweird.f32 %v9163_v14  ;;  %v6598_v48 = vor.u32 %v6871_v40, %v6597_v45  ;;  %v6870_v38 = vld [vmem:[#allocation12 + $0xf4] sm:$0xf]  ;;  %v6599_v31 = vld [vmem:[#allocation12 + $0xf8] sm:$0xf0] }
 0x247   : > { %v2369_v47 = vpop.f32.mrf.mxu2  ;;  %v2416_v49 = vpop.f32.mrf.mxu0  ;;  %v2728_v11 = vsel %vm9242_vm7, %v9160_v17, %v2724_v33  ;;  %v2761_v3 = vand.u32 2147483648, %v9163_v14  ;;  %vm2730_vm9 = vcmp.eq.f32.partialorder %v2729_v42, 8.507059e+37  ;;  %v2732_v7 = vor.u32 1.1754944e-38, %v2731_v4 }
 0x248   : > { %v7227_v55 = vpop.eup %7226  ;;  %v6289_v44 = vmul.f32 -1.442695, %v2306_v30  ;;  %v2417_v61 = vadd.f32 %v2416_v49, %v9139_v34  ;;  %v2753_v27 = vmul.f32 %v9216_v51, %v2752_v41  ;;  %vm2756_vm10 = vweird.f32 %v9216_v51  ;;  %4511 = vmatpush.bf16.msrb.mxu3 %v6598_v48  ;;  %v6855_v30 = vld [vmem:[#allocation12 + $0x74] sm:$0xf0] }
 0x249   : > { %v9252_v24 = vpop.eup %7228  ;;  %v9256_v6 = vadd.f32 1.0, %v7227_v55  ;;  %vm9258_vm11 = vcmp.eq.f32.partialorder %v2759_v19, 8.507059e+37  ;;  %v2707_v17 = vsub.f32 1.0, %v2706_v8  ;;  %v2733_v32 = vsel %vm2730_vm9, %v2732_v7, %v2728_v11  ;;  %vm2757_vm12 = vmor %vm2755_vm8, %vm2756_vm10 }
 0x24a   : > { %v7231_v29 = vpop.eup %7230  ;;  %v6292_v22 = vmul.f32 -1.442695, %v2417_v61  ;;  %7234 = vpow2.f32 %v6289_v44  ;;  %v2754_v58 = vadd.f32 %v9216_v51, %v2753_v27  ;;  %v2762_v50 = vor.u32 1.1754944e-38, %v2761_v3 }
 0x24b   : > { %v9262_v54 = vadd.f32 1.0, %v7231_v29  ;;  %v2708_v5 = vmul.f32 %v9203_v26, %v2707_v17  ;;  %vm2711_vm13 = vweird.f32 %v9203_v26  ;;  %v9269_v1 = vpop.eup %7232  ;;  %v2714_v60 = vand.u32 2147483647, %v9153_v16 }
 0x24c   : > { %7236 = vpow2.f32 %v6292_v22  ;;  %v2758_v23 = vsel %vm2757_vm12, %v9216_v51, %v2754_v58  ;;  %v2716_v28 = vand.u32 2147483648, %v9153_v16  ;;  %v2736_v59 = vmul.f32 %v9252_v24, %v9205_v56 }
 0x24d   : > { %v2308_v13 = vpop.f32.mrf.mxu3  ;;  %7238 = vrcp.f32 %v9262_v54  ;;  %v2763_v0 = vsel %vm9258_vm11, %v2762_v50, %v2758_v23  ;;  %v2709_v35 = vadd.f32 %v9203_v26, %v2708_v5  ;;  %v9282_v39 = vadd.f32 %v2369_v47, %v8891_v18 }
 0x24e   : > { %v2309_v14 = vadd.f32 %v2308_v13, %v8946_v52  ;;  %v3130_v63 = vpack.c.bf16 %v2763_v0, %v2733_v32  ;;  %vm2710_vm14 = vweird.f32 %v9153_v16  ;;  %v2737_v33 = vsub.f32 1.0, %v2736_v59 }
 0x24f   : > { %v9284_v51 = vpop.f32.mrf.mxu2  ;;  %v2418_v20 = vpop.f32.mrf.mxu0  ;;  %v2781_v45 = vmul.f32 %v9269_v1, %v9219_v10  ;;  %7240 = vrcp.f32 %v9256_v6  ;;  %vm9293_vm1 = vmor %vm2710_vm14, %vm2711_vm13  ;;  %vm9297_vm15 = vcmp.eq.f32.partialorder %v2714_v60, 8.507059e+37  ;;  %v2717_v57 = vor.u32 1.1754944e-38, %v2716_v28 }
 0x250   : > { %v6291_v52 = vmul.f32 -1.442695, %v2309_v14  ;;  %v2419_v40 = vadd.f32 %v2418_v20, %v9173_v15  ;;  %v7235_v42 = vpop.eup %7234  ;;  %3413 = vmatmul.bf16.gmra.mxu3 %v3130_v63  ;;  %3521 = vmatmul.bf16.gmra.mxu0 %v3130_v63  ;;  %v2738_v8 = vmul.f32 %v9252_v24, %v2737_v33  ;;  %vm2741_vm0 = vweird.f32 %v9252_v24  ;;  %v6533_v15 = vld [vmem:[#allocation12 + $0x70] sm:$0xf]  ;;  %v6852_v20 = vld [vmem:[#allocation12 + $0x64] sm:$0xf] }
 0x251   : > { %v2713_v49 = vsel %vm9293_vm1, %v9203_v26, %v2709_v35  ;;  %v2744_v37 = vand.u32 2147483647, %v9205_v56  ;;  %vm2740_vm2 = vweird.f32 %v9205_v56  ;;  %v2746_v55 = vand.u32 2147483648, %v9205_v56 }
 0x252   : > { %v7237_v19 = vpop.eup %7236  ;;  %7242 = vpow2.f32 %v6291_v52  ;;  %v6294_v47 = vmul.f32 -1.442695, %v2419_v40  ;;  %v2739_v48 = vadd.f32 %v9252_v24, %v2738_v8  ;;  %v9314_v61 = vadd.f32 1.0, %v7235_v42  ;;  %vm9318_vm3 = vmor %vm2740_vm2, %vm2741_vm0 }
 0x253   : > { %v9307_v41 = vadd.f32 1.0, %v7237_v19  ;;  %v9312_v44 = vpop.eup %7238  ;;  %v6602_v26 = vor.u32 %v6870_v38, %v6599_v31  ;;  %v6534_v3 = vor.u32 %v6855_v30, %v6533_v15  ;;  %v2718_v27 = vsel %vm9297_vm15, %v2717_v57, %v2713_v49 }
 0x254   : > { %7244 = vpow2.f32 %v6294_v47  ;;  %v2743_v56 = vsel %vm9318_vm3, %v9252_v24, %v2739_v48  ;;  %v2747_v29 = vor.u32 1.1754944e-38, %v2746_v55  ;;  %v2782_v22 = vsub.f32 1.0, %v2781_v45  ;;  %v6527_v45 = vld [vmem:[#allocation12 + $0x68] sm:$0xf0] }
 0x255   : > { %v2310_v7 = vpop.f32.mrf.mxu3  ;;  %v9327_v34 = vpop.eup %7240  ;;  %7246 = vrcp.f32 %v9307_v41  ;;  %vm2745_vm4 = vcmp.eq.f32.partialorder %v2744_v37, 8.507059e+37  ;;  %4619 = vmatpush.bf16.msra.mxu0 %v6602_v26  ;;  %4457 = vmatpush.bf16.msrb.mxu1 %v6534_v3  ;;  %v2789_v32 = vand.u32 2147483647, %v9219_v10  ;;  %v2791_v24 = vand.u32 2147483648, %v9219_v10 }
 0x256   : > { %v2311_v17 = vadd.f32 %v2310_v7, %v8950_v62  ;;  %v2748_v58 = vsel %vm2745_vm4, %v2747_v29, %v2743_v56  ;;  %v2783_v13 = vmul.f32 %v9269_v1, %v2782_v22  ;;  %v2811_v23 = vmul.f32 %v9312_v44, %v9262_v54 }
 0x257   : > { %v2374_v50 = vpop.f32.mrf.mxu2  ;;  %v2421_v5 = vpop.f32.mrf.mxu0  ;;  %v3129_v59 = vpack.c.bf16 %v2748_v58, %v2718_v27  ;;  %vm2786_vm5 = vweird.f32 %v9269_v1  ;;  %v2766_v14 = vmul.f32 %v9327_v34, %v9256_v6  ;;  %7248 = vrcp.f32 %v9314_v61 }
 0x258   : > { %v7243_v60 = vpop.eup %7242  ;;  %v6293_v28 = vmul.f32 -1.442695, %v2311_v17  ;;  %v2422_v62 = vadd.f32 %v2421_v5, %v9233_v43  ;;  %v2784_v35 = vadd.f32 %v9269_v1, %v2783_v13  ;;  %vm2785_vm6 = vweird.f32 %v9219_v10 }
 0x259   : > { %v9341_v0 = vadd.f32 1.0, %v7243_v60  ;;  %3359 = vmatmul.bf16.gmra.mxu1 %v3129_v59  ;;  %3467 = vmatmul.bf16.gmra.mxu2 %v3129_v59  ;;  %v2812_v43 = vsub.f32 1.0, %v2811_v23  ;;  %v9348_v52 = vadd.f32 %v9284_v51, %v8891_v18  ;;  %vm9352_vm7 = vmor %vm2785_vm6, %vm2786_vm5  ;;  %vm9356_vm8 = vcmp.eq.f32.partialorder %v2789_v32, 8.507059e+37  ;;  %v6591_v23 = vld [vmem:[#allocation12 + $0xe8] sm:$0xf0] }
 0x25a   : > { %v7245_v63 = vpop.eup %7244  ;;  %7250 = vpow2.f32 %v6293_v28  ;;  %v6296_v33 = vmul.f32 -1.442695, %v2422_v62  ;;  %v2792_v31 = vor.u32 1.1754944e-38, %v2791_v24  ;;  %v2788_v42 = vsel %vm9352_vm7, %v9269_v1, %v2784_v35  ;;  %v6868_v24 = vld [vmem:[#allocation12 + $0xe4] sm:$0xf] }
 0x25b   : > { %7252 = vrcp.f32 %v9341_v0  ;;  %v9360_v10 = vpop.eup %7246  ;;  %v2813_v51 = vmul.f32 %v9312_v44, %v2812_v43  ;;  %vm2816_vm9 = vweird.f32 %v9312_v44  ;;  %v9367_v4 = vadd.f32 1.0, %v7245_v63  ;;  %v6525_v62 = vld [vmem:[#allocation12 + $0x60] sm:$0xf] }
 0x25c   : > { %7254 = vpow2.f32 %v6296_v33  ;;  %v2819_v57 = vand.u32 2147483647, %v9262_v54  ;;  %v2821_v8 = vand.u32 2147483648, %v9262_v54  ;;  %v6530_v15 = vor.u32 %v6852_v20, %v6527_v45 }
 0x25d   : > { %v2313_v16 = vpop.f32.mrf.mxu3  ;;  %v2814_v19 = vadd.f32 %v9312_v44, %v2813_v51  ;;  %vm2815_vm10 = vweird.f32 %v9262_v54  ;;  %v2767_v47 = vsub.f32 1.0, %v2766_v14  ;;  %v9374_v1 = vpop.eup %7248  ;;  %v9378_v49 = vmul.f32 %v9360_v10, %v9307_v41  ;;  %v6853_v14 = vld [vmem:[#allocation12 + $0x64] sm:$0xf0] }
 0x25e   : > { %v2314_v30 = vadd.f32 %v2313_v16, %v8956_v21  ;;  %v9381_v37 = vadd.f32 %v2374_v50, %v8891_v18  ;;  %v2793_v11 = vsel %vm9356_vm8, %v2792_v31, %v2788_v42  ;;  %vm2817_vm11 = vmor %vm2815_vm10, %vm2816_vm9  ;;  %v2822_v21 = vor.u32 1.1754944e-38, %v2821_v8  ;;  %4566 = vmatpush.bf16.msra.mxu2 %v6530_v15  ;;  %v6589_v50 = vld [vmem:[#allocation12 + $0xe0] sm:$0xf] }
 0x25f   : > { %v2377_v48 = vpop.f32.mrf.mxu2  ;;  %v2423_v55 = vpop.f32.mrf.mxu0  ;;  %v2818_v7 = vsel %vm2817_vm11, %v9312_v44, %v2814_v19  ;;  %vm2820_vm12 = vcmp.eq.f32.partialorder %v2819_v57, 8.507059e+37  ;;  %7256 = vrcp.f32 %v9367_v4  ;;  %v2768_v29 = vmul.f32 %v9327_v34, %v2767_v47 }
 0x260   : > { %v7251_v54 = vpop.eup %7250  ;;  %v6295_v26 = vmul.f32 -1.442695, %v2314_v30  ;;  %v2424_v3 = vadd.f32 %v2423_v55, %v9282_v39  ;;  %v2823_v56 = vsel %vm2820_vm12, %v2822_v21, %v2818_v7  ;;  %v2774_v22 = vand.u32 2147483647, %v9256_v6  ;;  %v6869_v39 = vld [vmem:[#allocation12 + $0xe4] sm:$0xf0] }
 0x261   : > { %v9389_v27 = vpop.eup %7252  ;;  %v3132_v58 = vpack.c.bf16 %v2823_v56, %v2793_v11  ;;  %vm2770_vm13 = vweird.f32 %v9256_v6  ;;  %v9395_v5 = vadd.f32 1.0, %v7251_v54  ;;  %v2769_v13 = vadd.f32 %v9327_v34, %v2768_v29 }
 0x262   : > { %v7255_v17 = vpop.eup %7254  ;;  %7258 = vpow2.f32 %v6295_v26  ;;  %v6298_v32 = vmul.f32 -1.442695, %v2424_v3  ;;  %vm2771_vm14 = vweird.f32 %v9327_v34  ;;  %v9402_v60 = vadd.f32 %v2377_v48, %v8891_v18 }
 0x263   : > { %v9397_v44 = vadd.f32 1.0, %v7255_v17  ;;  %3418 = vmatmul.bf16.gmra.mxu3 %v3132_v58  ;;  %3526 = vmatmul.bf16.gmra.mxu0 %v3132_v58  ;;  %v2776_v28 = vand.u32 2147483648, %v9256_v6  ;;  %v2796_v59 = vmul.f32 %v9374_v1, %v9314_v61  ;;  %v9409_v35 = vmul.f32 %v9389_v27, %v9341_v0  ;;  %vm9422_vm15 = vmor %vm2770_vm13, %vm2771_vm14 }
 0x264   : > { %7260 = vpow2.f32 %v6298_v32  ;;  %vm9412_vm1 = vcmp.eq.f32.partialorder %v2774_v22, 8.507059e+37  ;;  %v2804_v33 = vand.u32 2147483647, %v9314_v61  ;;  %v2806_v38 = vand.u32 2147483648, %v9314_v61 }
 0x265   : > { %7262 = vrcp.f32 %v9397_v44  ;;  %v2315_v20 = vpop.f32.mrf.mxu3  ;;  %v2797_v40 = vsub.f32 1.0, %v2796_v59  ;;  %v6590_v31 = vor.u32 %v6869_v39, %v6589_v50  ;;  %v9427_v42 = vpop.eup %7256  ;;  %v6594_v57 = vor.u32 %v6868_v24, %v6591_v23  ;;  %v6519_v59 = vld [vmem:[#allocation12 + $0x58] sm:$0xf0] }
 0x266   : > { %v2316_v43 = vadd.f32 %v2315_v20, %v8960_v53  ;;  %7264 = vrcp.f32 %v9395_v5  ;;  %v2773_v53 = vsel %vm9422_vm15, %v9327_v34, %v2769_v13  ;;  %v6526_v6 = vor.u32 %v6853_v14, %v6525_v62 }
 0x267   : > { %v2379_v51 = vpop.f32.mrf.mxu2  ;;  %v2426_v16 = vpop.f32.mrf.mxu0  ;;  %v2777_v30 = vor.u32 1.1754944e-38, %v2776_v28  ;;  %v2798_v19 = vmul.f32 %v9374_v1, %v2797_v40  ;;  %vm2801_vm0 = vweird.f32 %v9374_v1  ;;  %4512 = vmatpush.bf16.msrb.mxu3 %v6590_v31  ;;  %vm2800_vm2 = vweird.f32 %v9314_v61  ;;  %4620 = vmatpush.bf16.msra.mxu0 %v6594_v57  ;;  %v6850_v28 = vld [vmem:[#allocation12 + $0x54] sm:$0xf] }
 0x268   : > { %v7259_v8 = vpop.eup %7258  ;;  %v6297_v15 = vmul.f32 -1.442695, %v2316_v43  ;;  %v2427_v48 = vadd.f32 %v2426_v16, %v9348_v52  ;;  %4458 = vmatpush.bf16.msrb.mxu1 %v6526_v6  ;;  %v2842_v34 = vsub.f32 1.0, %v9378_v49  ;;  %vm2805_vm3 = vcmp.eq.f32.partialorder %v2804_v33, 8.507059e+37  ;;  %vm2802_vm4 = vmor %vm2800_vm2, %vm2801_vm0 }
 0x269   : > { %v9435_v47 = vadd.f32 1.0, %v7259_v8  ;;  %v2778_v11 = vsel %vm9412_vm1, %v2777_v30, %v2773_v53  ;;  %v2799_v21 = vadd.f32 %v9374_v1, %v2798_v19  ;;  %v2807_v54 = vor.u32 1.1754944e-38, %v2806_v38 }
 0x26a   : > { %v7261_v55 = vpop.eup %7260  ;;  %7266 = vpow2.f32 %v6297_v15  ;;  %v6300_v61 = vmul.f32 -1.442695, %v2427_v48  ;;  %v2843_v52 = vmul.f32 %v9360_v10, %v2842_v34  ;;  %vm2845_vm5 = vweird.f32 %v9307_v41 }
 0x26b   : > { %v9443_v26 = vpop.eup %7262  ;;  %v9445_v3 = vadd.f32 1.0, %v7261_v55  ;;  %v2803_v49 = vsel %vm2802_vm4, %v9374_v1, %v2799_v21  ;;  %vm2846_vm6 = vweird.f32 %v9360_v10  ;;  %v2851_v7 = vand.u32 2147483648, %v9307_v41 }
 0x26c   : > { %v9454_v56 = vpop.eup %7264  ;;  %7268 = vrcp.f32 %v9435_v47  ;;  %v2808_v29 = vsel %vm2805_vm3, %v2807_v54, %v2803_v49  ;;  %v2844_v17 = vadd.f32 %v9360_v10, %v2843_v52  ;;  %v2871_v32 = vmul.f32 %v9427_v42, %v9367_v4  ;;  %vm9474_vm7 = vmor %vm2845_vm5, %vm2846_vm6  ;;  %v6581_v52 = vld [vmem:[#allocation12 + $0xd0] sm:$0xf]  ;;  %v6867_v49 = vld [vmem:[#allocation12 + $0xd4] sm:$0xf0] }
 0x26d   : > { %v2318_v22 = vpop.f32.mrf.mxu3  ;;  %v3131_v58 = vpack.c.bf16 %v2808_v29, %v2778_v11  ;;  %7270 = vpow2.f32 %v6300_v61  ;;  %v2849_v50 = vand.u32 2147483647, %v9307_v41  ;;  %v9464_v39 = vmul.f32 %v9443_v26, %v9397_v44 }
 0x26e   : > { %v2319_v1 = vadd.f32 %v2318_v22, %v8966_v46  ;;  %7272 = vrcp.f32 %v9445_v3  ;;  %v9468_v13 = vadd.f32 %v2379_v51, %v8891_v18  ;;  %v2872_v46 = vsub.f32 1.0, %v2871_v32 }
 0x26f   : > { %v2428_v24 = vpop.f32.mrf.mxu0  ;;  %3364 = vmatmul.bf16.gmra.mxu1 %v3131_v58  ;;  %3472 = vmatmul.bf16.gmra.mxu2 %v3131_v58  ;;  %v2382_v14 = vpop.f32.mrf.mxu2  ;;  %v2848_v63 = vsel %vm9474_vm7, %v9360_v10, %v2844_v17  ;;  %v2852_v33 = vor.u32 1.1754944e-38, %v2851_v7  ;;  %vm2876_vm8 = vweird.f32 %v9427_v42  ;;  %v2879_v45 = vand.u32 2147483647, %v9367_v4  ;;  %v6866_v17 = vld [vmem:[#allocation12 + $0xd4] sm:$0xf] }
 0x270   : > { %v6299_v62 = vmul.f32 -1.442695, %v2319_v1  ;;  %v2429_v20 = vadd.f32 %v2428_v24, %v9381_v37  ;;  %v7267_v43 = vpop.eup %7266  ;;  %v2873_v41 = vmul.f32 %v9427_v42, %v2872_v46  ;;  %v2881_v40 = vand.u32 2147483648, %v9367_v4 }
 0x271   : > { %vm2850_vm9 = vcmp.eq.f32.partialorder %v2849_v50, 8.507059e+37  ;;  %v6522_v31 = vor.u32 %v6850_v28, %v6519_v59  ;;  %v9489_v37 = vadd.f32 %v2382_v14, %v8891_v18  ;;  %vm2875_vm10 = vweird.f32 %v9367_v4  ;;  %v6583_v50 = vld [vmem:[#allocation12 + $0xd8] sm:$0xf0]  ;;  %v6517_v28 = vld [vmem:[#allocation12 + $0x50] sm:$0xf] }
 0x272   : > { %7274 = vpow2.f32 %v6299_v62  ;;  %v6302_v38 = vmul.f32 -1.442695, %v2429_v20  ;;  %v9486_v53 = vpop.eup %7268  ;;  %v2853_v10 = vsel %vm2850_vm9, %v2852_v33, %v2848_v63  ;;  %v2874_v51 = vadd.f32 %v9427_v42, %v2873_v41  ;;  %vm2877_vm11 = vmor %vm2875_vm10, %vm2876_vm8  ;;  %v6851_v59 = vld [vmem:[#allocation12 + $0x54] sm:$0xf0] }
 0x273   : > { %v7271_v16 = vpop.eup %7270  ;;  %v9493_v57 = vadd.f32 1.0, %v7267_v43  ;;  %v2882_v6 = vor.u32 1.1754944e-38, %v2881_v40  ;;  %4567 = vmatpush.bf16.msra.mxu2 %v6522_v31  ;;  %v2827_v8 = vsub.f32 1.0, %v9409_v35  ;;  %vm2880_vm12 = vcmp.eq.f32.partialorder %v2879_v45, 8.507059e+37 }
 0x274   : > { %7276 = vpow2.f32 %v6302_v38  ;;  %v9498_v15 = vpop.eup %7272  ;;  %v9500_v30 = vadd.f32 1.0, %v7271_v16  ;;  %v2878_v19 = vsel %vm2877_vm11, %v9427_v42, %v2874_v51  ;;  %v2834_v4 = vand.u32 2147483647, %v9341_v0 }
 0x275   : > { %v2320_v48 = vpop.f32.mrf.mxu3  ;;  %v2883_v34 = vsel %vm2880_vm12, %v2882_v6, %v2878_v19  ;;  %v2828_v11 = vmul.f32 %v9389_v27, %v2827_v8  ;;  %v2856_v21 = vmul.f32 %v9454_v56, %v9395_v5  ;;  %v9510_v35 = vmul.f32 %v9486_v53, %v9435_v47 }
 0x276   : > { %v2321_v55 = vadd.f32 %v2320_v48, %v8974_v25  ;;  %v3134_v54 = vpack.c.bf16 %v2883_v34, %v2853_v10  ;;  %vm2831_vm13 = vweird.f32 %v9389_v27  ;;  %v2836_v42 = vand.u32 2147483648, %v9341_v0 }
 0x277   : > { %v2431_v61 = vpop.f32.mrf.mxu0  ;;  %v2829_v25 = vadd.f32 %v9389_v27, %v2828_v11  ;;  %vm2830_vm14 = vweird.f32 %v9341_v0  ;;  %v2857_v22 = vsub.f32 1.0, %v2856_v21  ;;  %7278 = vrcp.f32 %v9500_v30  ;;  %v2384_v6 = vpop.f32.mrf.mxu2 }
 0x278   : > { %v7275_v7 = vpop.eup %7274  ;;  %v6301_v29 = vmul.f32 -1.442695, %v2321_v55  ;;  %3423 = vmatmul.bf16.gmra.mxu3 %v3134_v54  ;;  %3531 = vmatmul.bf16.gmra.mxu0 %v3134_v54  ;;  %vm9519_vm1 = vcmp.eq.f32.partialorder %v2834_v4, 8.507059e+37  ;;  %v2866_v1 = vand.u32 2147483648, %v9395_v5  ;;  %vm9526_vm15 = vmor %vm2830_vm14, %vm2831_vm13  ;;  %vm2861_vm0 = vweird.f32 %v9454_v56  ;;  %v6848_v54 = vld [vmem:[#allocation12 + $0x44] sm:$0xf] }
 0x279   : > { %v9517_v32 = vadd.f32 1.0, %v7275_v7  ;;  %v2858_v23 = vmul.f32 %v9454_v56, %v2857_v22  ;;  %v2864_v46 = vand.u32 2147483647, %v9395_v5  ;;  %v2833_v62 = vsel %vm9526_vm15, %v9389_v27, %v2829_v25 }
 0x27a   : > { %v7277_v24 = vpop.eup %7276  ;;  %7280 = vpow2.f32 %v6301_v29  ;;  %v2837_v14 = vor.u32 1.1754944e-38, %v2836_v42  ;;  %vm2860_vm2 = vweird.f32 %v9395_v5  ;;  %v2432_v33 = vadd.f32 %v2431_v61, %v9402_v60  ;;  %v6511_v42 = vld [vmem:[#allocation12 + $0x48] sm:$0xf0] }
 0x27b   : > { %7282 = vrcp.f32 %v9517_v32  ;;  %v9538_v20 = vadd.f32 1.0, %v7277_v24  ;;  %v2859_v63 = vadd.f32 %v9454_v56, %v2858_v23  ;;  %v6582_v43 = vor.u32 %v6867_v49, %v6581_v52  ;;  %vm2862_vm3 = vmor %vm2860_vm2, %vm2861_vm0 }
 0x27c   : > { %v2867_v41 = vor.u32 1.1754944e-38, %v2866_v1  ;;  %v6586_v45 = vor.u32 %v6866_v17, %v6583_v50  ;;  %v6518_v40 = vor.u32 %v6851_v59, %v6517_v28  ;;  %v2902_v31 = vsub.f32 1.0, %v9464_v39 }
 0x27d   : > { %v2323_v38 = vpop.f32.mrf.mxu3  ;;  %v2863_v10 = vsel %vm2862_vm3, %v9454_v56, %v2859_v63  ;;  %vm2865_vm4 = vcmp.eq.f32.partialorder %v2864_v46, 8.507059e+37  ;;  %v6304_v27 = vmul.f32 -1.442695, %v2432_v33  ;;  %4513 = vmatpush.bf16.msrb.mxu3 %v6582_v43  ;;  %v9545_v51 = vpop.eup %7278  ;;  %7284 = vrcp.f32 %v9493_v57 }
 0x27e   : > { %v2324_v5 = vadd.f32 %v2323_v38, %v8981_v36  ;;  %v2838_v60 = vsel %vm9519_vm1, %v2837_v14, %v2833_v62  ;;  %v2868_v16 = vsel %vm2865_vm4, %v2867_v41, %v2863_v10  ;;  %4621 = vmatpush.bf16.msra.mxu0 %v6586_v45  ;;  %4459 = vmatpush.bf16.msrb.mxu1 %v6518_v40  ;;  %vm2906_vm5 = vweird.f32 %v9443_v26  ;;  %v6865_v10 = vld [vmem:[#allocation12 + $0xc4] sm:$0xf0] }
 0x27f   : > { %v2433_v8 = vpop.f32.mrf.mxu0  ;;  %v2903_v39 = vmul.f32 %v9443_v26, %v2902_v31  ;;  %v3133_v19 = vpack.c.bf16 %v2868_v16, %v2838_v60  ;;  %7286 = vpow2.f32 %v6304_v27  ;;  %v9560_v11 = vadd.f32 %v2384_v6, %v8891_v18  ;;  %v6573_v31 = vld [vmem:[#allocation12 + $0xc0] sm:$0xf]  ;;  %v6864_v60 = vld [vmem:[#allocation12 + $0xc4] sm:$0xf]  ;;  %v6575_v16 = vld [vmem:[#allocation12 + $0xc8] sm:$0xf0] }
 0x280   : > { %v7281_v56 = vpop.eup %7280  ;;  %v6303_v48 = vmul.f32 -1.442695, %v2324_v5  ;;  %v2434_v36 = vadd.f32 %v2433_v8, %v9468_v13  ;;  %7288 = vrcp.f32 %v9538_v20  ;;  %v2931_v13 = vmul.f32 %v9498_v15, %v9445_v3  ;;  %v6509_v6 = vld [vmem:[#allocation12 + $0x40] sm:$0xf] }
 0x281   : > { %v9552_v4 = vpop.eup %7282  ;;  %v9555_v34 = vadd.f32 1.0, %v7281_v56  ;;  %v2904_v55 = vadd.f32 %v9443_v26, %v2903_v39  ;;  %3369 = vmatmul.bf16.gmra.mxu1 %v3133_v19  ;;  %3477 = vmatmul.bf16.gmra.mxu2 %v3133_v19  ;;  %vm2905_vm6 = vweird.f32 %v9397_v44  ;;  %v2909_v61 = vand.u32 2147483647, %v9397_v44  ;;  %v6849_v19 = vld [vmem:[#allocation12 + $0x44] sm:$0xf0] }
 0x282   : > { %7290 = vpow2.f32 %v6303_v48  ;;  %v6306_v21 = vmul.f32 -1.442695, %v2434_v36  ;;  %v2911_v52 = vand.u32 2147483648, %v9397_v44  ;;  %v9570_v49 = vmul.f32 %v9545_v51, %v9500_v30  ;;  %vm9578_vm7 = vmor %vm2905_vm6, %vm2906_vm5 }
 0x283   : > { %7292 = vrcp.f32 %v9555_v34  ;;  %v9574_v18 = vmul.f32 %v9552_v4, %v9517_v32  ;;  %v2932_v29 = vsub.f32 1.0, %v2931_v13  ;;  %v9582_v25 = vpop.eup %7284  ;;  %v2908_v44 = vsel %vm9578_vm7, %v9443_v26, %v2904_v55 }
 0x284   : > { %7294 = vpow2.f32 %v6306_v21  ;;  %vm2936_vm8 = vweird.f32 %v9498_v15  ;;  %v2941_v22 = vand.u32 2147483648, %v9445_v3  ;;  %v6514_v17 = vor.u32 %v6848_v54, %v6511_v42 }
 0x285   : > { %v2325_v58 = vpop.f32.mrf.mxu3  ;;  %v7287_v1 = vpop.eup %7286  ;;  %v2933_v50 = vmul.f32 %v9498_v15, %v2932_v29  ;;  %v2939_v24 = vand.u32 2147483647, %v9445_v3  ;;  %v2887_v23 = vsub.f32 1.0, %v9510_v35  ;;  %vm2910_vm9 = vcmp.eq.f32.partialorder %v2909_v61, 8.507059e+37 }
 0x286   : > { %v2326_v0 = vadd.f32 %v2325_v58, %v8985_v2  ;;  %v9593_v46 = vpop.eup %7288  ;;  %v9595_v28 = vadd.f32 1.0, %v7287_v1  ;;  %v2912_v26 = vor.u32 1.1754944e-38, %v2911_v52  ;;  %vm2935_vm10 = vweird.f32 %v9445_v3  ;;  %4568 = vmatpush.bf16.msra.mxu2 %v6514_v17 }
 0x287   : > { %v2436_v59 = vpop.f32.mrf.mxu0  ;;  %v2934_v14 = vadd.f32 %v9498_v15, %v2933_v50  ;;  %v2888_v33 = vmul.f32 %v9486_v53, %v2887_v23  ;;  %v2894_v2 = vand.u32 2147483647, %v9435_v47  ;;  %vm2937_vm11 = vmor %vm2935_vm10, %vm2936_vm8  ;;  %v2942_v45 = vor.u32 1.1754944e-38, %v2941_v22 }
 0x288   : > { %v7291_v62 = vpop.eup %7290  ;;  %v6305_v63 = vmul.f32 -1.442695, %v2326_v0  ;;  %v2913_v41 = vsel %vm2910_vm9, %v2912_v26, %v2908_v44  ;;  %v2916_v3 = vmul.f32 %v9582_v25, %v9493_v57  ;;  %vm2940_vm12 = vcmp.eq.f32.partialorder %v2939_v24, 8.507059e+37 }
 0x289   : > { %v9601_v43 = vpop.eup %7292  ;;  %v9603_v35 = vadd.f32 1.0, %v7291_v62  ;;  %v2938_v38 = vsel %vm2937_vm11, %v9498_v15, %v2934_v14  ;;  %vm2890_vm13 = vweird.f32 %v9435_v47  ;;  %v2889_v5 = vadd.f32 %v9486_v53, %v2888_v33 }
 0x28a   : > { %v7295_v40 = vpop.eup %7294  ;;  %7296 = vpow2.f32 %v6305_v63  ;;  %v2943_v27 = vsel %vm2940_vm12, %v2942_v45, %v2938_v38  ;;  %vm2891_vm14 = vweird.f32 %v9486_v53  ;;  %vm9614_vm1 = vcmp.eq.f32.partialorder %v2894_v2, 8.507059e+37 }
 0x28b   : > { %7298 = vrcp.f32 %v9595_v28  ;;  %v3136_v8 = vpack.c.bf16 %v2943_v27, %v2913_v41  ;;  %v2896_v15 = vand.u32 2147483648, %v9435_v47  ;;  %v2917_v56 = vsub.f32 1.0, %v2916_v3  ;;  %vm9628_vm0 = vmor %vm2890_vm13, %vm2891_vm14 }
 0x28c   : > { %7300 = vrcp.f32 %v9603_v35  ;;  %v9620_v48 = vadd.f32 1.0, %v7295_v40  ;;  %vm2921_vm15 = vweird.f32 %v9582_v25  ;;  %v2924_v36 = vand.u32 2147483647, %v9493_v57 }
 0x28d   : > { %v2328_v55 = vpop.f32.mrf.mxu3  ;;  %3428 = vmatmul.bf16.gmra.mxu3 %v3136_v8  ;;  %3536 = vmatmul.bf16.gmra.mxu0 %v3136_v8  ;;  %v2918_v13 = vmul.f32 %v9582_v25, %v2917_v56  ;;  %v2926_v54 = vand.u32 2147483648, %v9493_v57  ;;  %v2437_v42 = vadd.f32 %v2436_v59, %v9489_v37  ;;  %v6574_v61 = vor.u32 %v6865_v10, %v6573_v31 }
 0x28e   : > { %v2893_v52 = vsel %vm9628_vm0, %v9486_v53, %v2889_v5  ;;  %v6578_v7 = vor.u32 %v6864_v60, %v6575_v16  ;;  %v2329_v29 = vadd.f32 %v2328_v55, %v8988_v9  ;;  %v6510_v44 = vor.u32 %v6849_v19, %v6509_v6 }
 0x28f   : > { %v2438_v47 = vpop.f32.mrf.mxu0  ;;  %v2897_v17 = vor.u32 1.1754944e-38, %v2896_v15  ;;  %v2919_v58 = vadd.f32 %v9582_v25, %v2918_v13  ;;  %vm2920_vm2 = vweird.f32 %v9493_v57  ;;  %v6308_v1 = vmul.f32 -1.442695, %v2437_v42  ;;  %4514 = vmatpush.bf16.msrb.mxu3 %v6574_v61  ;;  %v6846_v42 = vld [vmem:[#allocation12 + $0x34] sm:$0xf] }
 0x290   : > { %v7297_v22 = vpop.eup %7296  ;;  %vm2922_vm3 = vmor %vm2920_vm2, %vm2921_vm15  ;;  %v2927_v37 = vor.u32 1.1754944e-38, %v2926_v54  ;;  %4622 = vmatpush.bf16.msra.mxu0 %v6578_v7  ;;  %v6307_v53 = vmul.f32 -1.442695, %v2329_v29  ;;  %4460 = vmatpush.bf16.msrb.mxu1 %v6510_v44  ;;  %v2439_v9 = vadd.f32 %v2438_v47, %v9560_v11  ;;  %v2962_v24 = vsub.f32 1.0, %v9570_v49  ;;  %v6503_v29 = vld [vmem:[#allocation12 + $0x38] sm:$0xf0] }
 0x291   : > { %v9641_v50 = vpop.eup %7298  ;;  %v2898_v0 = vsel %vm9614_vm1, %v2897_v17, %v2893_v52  ;;  %v2923_v57 = vsel %vm2922_vm3, %v9582_v25, %v2919_v58  ;;  %vm2925_vm4 = vcmp.eq.f32.partialorder %v2924_v36, 8.507059e+37  ;;  %7302 = vpow2.f32 %v6308_v1  ;;  %v6565_v44 = vld [vmem:[#allocation12 + $0xb0] sm:$0xf]  ;;  %v6863_v47 = vld [vmem:[#allocation12 + $0xb4] sm:$0xf0] }
 0x292   : > { %v9650_v23 = vpop.eup %7300  ;;  %v9652_v26 = vadd.f32 1.0, %v7297_v22  ;;  %v2928_v59 = vsel %vm2925_vm4, %v2927_v37, %v2923_v57  ;;  %v6310_v62 = vmul.f32 -1.442695, %v2439_v9  ;;  %v2963_v14 = vmul.f32 %v9545_v51, %v2962_v24  ;;  %v6862_v58 = vld [vmem:[#allocation12 + $0xb4] sm:$0xf] }
 0x293   : > { %v3135_v63 = vpack.c.bf16 %v2928_v59, %v2898_v0  ;;  %7304 = vpow2.f32 %v6307_v53  ;;  %vm2966_vm5 = vweird.f32 %v9545_v51  ;;  %v2969_v11 = vand.u32 2147483647, %v9500_v30  ;;  %v6567_v1 = vld [vmem:[#allocation12 + $0xb8] sm:$0xf0] }
 0x294   : > { %7306 = vpow2.f32 %v6310_v62  ;;  %v2964_v49 = vadd.f32 %v9545_v51, %v2963_v14  ;;  %v2971_v25 = vand.u32 2147483648, %v9500_v30  ;;  %v2991_v33 = vmul.f32 %v9593_v46, %v9538_v20 }
 0x295   : > { %v2330_v2 = vpop.f32.mrf.mxu3  ;;  %v9663_v41 = vmul.f32 %v9641_v50, %v9595_v28  ;;  %7308 = vrcp.f32 %v9620_v48  ;;  %3374 = vmatmul.bf16.gmra.mxu1 %v3135_v63  ;;  %3482 = vmatmul.bf16.gmra.mxu2 %v3135_v63  ;;  %vm2965_vm6 = vweird.f32 %v9500_v30  ;;  %v2999_v45 = vand.u32 2147483647, %v9538_v20 }
 0x296   : > { %7310 = vrcp.f32 %v9652_v26  ;;  %vm9669_vm7 = vcmp.eq.f32.partialorder %v2969_v11, 8.507059e+37  ;;  %v2992_v40 = vsub.f32 1.0, %v2991_v33  ;;  %vm2995_vm8 = vweird.f32 %v9538_v20  ;;  %vm9676_vm9 = vmor %vm2965_vm6, %vm2966_vm5 }
 0x297   : > { %v7303_v38 = vpop.eup %7302  ;;  %vm2996_vm10 = vweird.f32 %v9593_v46  ;;  %v3001_v30 = vand.u32 2147483648, %v9538_v20  ;;  %v2331_v10 = vadd.f32 %v2330_v2, %v8995_v12  ;;  %v2947_v27 = vsub.f32 1.0, %v9574_v18 }
 0x298   : > { %v9684_v5 = vadd.f32 1.0, %v7303_v38  ;;  %v2968_v60 = vsel %vm9676_vm9, %v9545_v51, %v2964_v49  ;;  %v2972_v16 = vor.u32 1.1754944e-38, %v2971_v25  ;;  %v2993_v6 = vmul.f32 %v9593_v46, %v2992_v40  ;;  %vm9707_vm13 = vmor %vm2995_vm8, %vm2996_vm10 }
 0x299   : > { %v7305_v8 = vpop.eup %7304  ;;  %vm9690_vm11 = vcmp.eq.f32.partialorder %v2999_v45, 8.507059e+37  ;;  %v6309_v15 = vmul.f32 -1.442695, %v2331_v10  ;;  %v2948_v56 = vmul.f32 %v9552_v4, %v2947_v27  ;;  %v2954_v12 = vand.u32 2147483647, %v9517_v32 }
 0x29a   : > { %v7307_v18 = vpop.eup %7306  ;;  %v9696_v19 = vadd.f32 1.0, %v7305_v8  ;;  %v2994_v36 = vadd.f32 %v9593_v46, %v2993_v6  ;;  %vm2951_vm12 = vweird.f32 %v9552_v4  ;;  %v2956_v51 = vand.u32 2147483648, %v9517_v32  ;;  %v6501_v27 = vld [vmem:[#allocation12 + $0x30] sm:$0xf]  ;;  %v3175_v6 = vld [vmem:[#allocation10] sm:$0x3] }
 0x29b   : > { %v9701_v55 = vpop.eup %7308  ;;  %v3002_v13 = vor.u32 1.1754944e-38, %v3001_v30  ;;  %7312 = vpow2.f32 %v6309_v15  ;;  %v2949_v54 = vadd.f32 %v9552_v4, %v2948_v56  ;;  %vm2950_vm14 = vweird.f32 %v9517_v32 }
 0x29c   : > { %v9713_v61 = vpop.eup %7310  ;;  %7314 = vrcp.f32 %v9684_v5  ;;  %v2973_v52 = vsel %vm9669_vm7, %v2972_v16, %v2968_v60  ;;  %v2998_v20 = vsel %vm9707_vm13, %v9593_v46, %v2994_v36  ;;  %v2976_v7 = vmul.f32 %v9601_v43, %v9555_v34  ;;  %vm9730_vm1 = vmor %vm2950_vm14, %vm2951_vm12  ;;  %v6847_v60 = vld [vmem:[#allocation12 + $0x34] sm:$0xf0] }
 0x29d   : > { %7316 = vrcp.f32 %v9696_v19  ;;  %v9724_v32 = vadd.f32 1.0, %v7307_v18  ;;  %v3003_v22 = vsel %vm9690_vm11, %v3002_v13, %v2998_v20  ;;  %vm9734_vm15 = vcmp.eq.f32.partialorder %v2954_v12, 8.507059e+37 }
 0x29e   : > { %v3138_v37 = vpack.c.bf16 %v3003_v22, %v2973_v52  ;;  %v2953_v53 = vsel %vm9730_vm1, %v9552_v4, %v2949_v54  ;;  %v2957_v9 = vor.u32 1.1754944e-38, %v2956_v51  ;;  %v2977_v24 = vsub.f32 1.0, %v2976_v7  ;;  %v6844_v54 = vld [vmem:[#allocation12 + $0x24] sm:$0xf]  ;;  %v6495_v7 = vld [vmem:[#allocation12 + $0x28] sm:$0xf0] }
 0x29f   : > { %vm2981_vm0 = vweird.f32 %v9601_v43  ;;  %v2986_v0 = vand.u32 2147483648, %v9555_v34  ;;  %v6506_v57 = vor.u32 %v6846_v42, %v6503_v29  ;;  %v6566_v59 = vor.u32 %v6863_v47, %v6565_v44  ;;  %v6557_v29 = vld [vmem:[#allocation12 + $0xa0] sm:$0xf]  ;;  %v6861_v22 = vld [vmem:[#allocation12 + $0xa4] sm:$0xf0] }
 0x2a0   : > { %3433 = vmatmul.bf16.gmra.mxu3 %v3138_v37  ;;  %3541 = vmatmul.bf16.gmra.mxu0 %v3138_v37  ;;  %v2978_v62 = vmul.f32 %v9601_v43, %v2977_v24  ;;  %v2984_v14 = vand.u32 2147483647, %v9555_v34  ;;  %v6570_v63 = vor.u32 %v6862_v58, %v6567_v1  ;;  %v3022_v11 = vsub.f32 1.0, %v9663_v41 }
 0x2a1   : > { %v7313_v49 = vpop.eup %7312  ;;  %v3006_v4 = vmul.f32 %v9650_v23, %v9603_v35  ;;  %7318 = vrcp.f32 %v9724_v32  ;;  %v2958_v25 = vsel %vm9734_vm15, %v2957_v9, %v2953_v53  ;;  %vm2980_vm2 = vweird.f32 %v9555_v34  ;;  %4569 = vmatpush.bf16.msra.mxu2 %v6506_v57  ;;  %4515 = vmatpush.bf16.msrb.mxu3 %v6566_v59 }
 0x2a2   : > { %v9752_v33 = vpop.eup %7314  ;;  %v2979_v2 = vadd.f32 %v9601_v43, %v2978_v62  ;;  %4623 = vmatpush.bf16.msra.mxu0 %v6570_v63  ;;  %v3023_v41 = vmul.f32 %v9641_v50, %v3022_v11  ;;  %vm3026_vm3 = vweird.f32 %v9641_v50  ;;  %v3029_v45 = vand.u32 2147483647, %v9595_v28  ;;  %vm2982_vm4 = vmor %vm2980_vm2, %vm2981_vm0 }
 0x2a3   : > { %v9758_v3 = vpop.eup %7316  ;;  %v2987_v40 = vor.u32 1.1754944e-38, %v2986_v0  ;;  %vm3025_vm5 = vweird.f32 %v9595_v28  ;;  %v3031_v34 = vand.u32 2147483648, %v9595_v28  ;;  %v3051_v38 = vmul.f32 %v9701_v55, %v9620_v48 }
 0x2a4   : > { %v9766_v31 = vadd.f32 1.0, %v7313_v49  ;;  %v2983_v30 = vsel %vm2982_vm4, %v9601_v43, %v2979_v2  ;;  %vm2985_vm6 = vcmp.eq.f32.partialorder %v2984_v14, 8.507059e+37  ;;  %v3024_v10 = vadd.f32 %v9641_v50, %v3023_v41  ;;  %vm9772_vm7 = vmor %vm3025_vm5, %vm3026_vm3 }
 0x2a5   : > { %v2988_v16 = vsel %vm2985_vm6, %v2987_v40, %v2983_v30  ;;  %vm9776_vm8 = vcmp.eq.f32.partialorder %v3029_v45, 8.507059e+37  ;;  %v3032_v8 = vor.u32 1.1754944e-38, %v3031_v34  ;;  %v3052_v39 = vsub.f32 1.0, %v3051_v38  ;;  %v6559_v45 = vld [vmem:[#allocation12 + $0xa8] sm:$0xf0] }
 0x2a6   : > { %v3137_v15 = vpack.c.bf16 %v2988_v16, %v2958_v25  ;;  %v3028_v43 = vsel %vm9772_vm7, %v9641_v50, %v3024_v10  ;;  %v3059_v56 = vand.u32 2147483647, %v9620_v48  ;;  %v3061_v12 = vand.u32 2147483648, %v9620_v48  ;;  %v6845_v40 = vld [vmem:[#allocation12 + $0x24] sm:$0xf0] }
 0x2a7   : > { %v9785_v18 = vpop.eup %7318  ;;  %v3053_v36 = vmul.f32 %v9701_v55, %v3052_v39  ;;  %vm3056_vm9 = vweird.f32 %v9701_v55  ;;  %v6502_v51 = vor.u32 %v6847_v60, %v6501_v27  ;;  %v3007_v21 = vsub.f32 1.0, %v3006_v4 }
 0x2a8   : > { %v3081_v13 = vmul.f32 %v9752_v33, %v9684_v5  ;;  %7320 = vrcp.f32 %v9766_v31  ;;  %3379 = vmatmul.bf16.gmra.mxu1 %v3137_v15  ;;  %3487 = vmatmul.bf16.gmra.mxu2 %v3137_v15  ;;  %v3033_v50 = vsel %vm9776_vm8, %v3032_v8, %v3028_v43  ;;  %vm3055_vm10 = vweird.f32 %v9620_v48 }
 0x2a9   : > { %v3054_v42 = vadd.f32 %v9701_v55, %v3053_v36  ;;  %4461 = vmatpush.bf16.msrb.mxu1 %v6502_v51  ;;  %v3008_v52 = vmul.f32 %v9650_v23, %v3007_v21  ;;  %vm3011_vm11 = vweird.f32 %v9650_v23  ;;  %v3016_v20 = vand.u32 2147483648, %v9603_v35  ;;  %vm3057_vm12 = vmor %vm3055_vm10, %vm3056_vm9 }
 0x2aa   : > { %vm3060_vm13 = vcmp.eq.f32.partialorder %v3059_v56, 8.507059e+37  ;;  %v3062_v44 = vor.u32 1.1754944e-38, %v3061_v12  ;;  %v3014_v47 = vand.u32 2147483647, %v9603_v35  ;;  %v3036_v48 = vmul.f32 %v9713_v61, %v9652_v26 }
 0x2ab   : > { %v3058_v17 = vsel %vm3057_vm12, %v9701_v55, %v3054_v42  ;;  %v3009_v46 = vadd.f32 %v9650_v23, %v3008_v52  ;;  %vm3010_vm14 = vweird.f32 %v9603_v35  ;;  %v3044_v58 = vand.u32 2147483647, %v9652_v26 }
 0x2ac   : > { %v3063_v1 = vsel %vm3060_vm13, %v3062_v44, %v3058_v17  ;;  %vm9810_vm1 = vmor %vm3010_vm14, %vm3011_vm11  ;;  %v3017_v53 = vor.u32 1.1754944e-38, %v3016_v20  ;;  %v3037_v9 = vsub.f32 1.0, %v3036_v48  ;;  %v3046_v24 = vand.u32 2147483648, %v9652_v26  ;;  %v6487_v48 = vld [vmem:[#allocation12 + $0x18] sm:$0xf0] }
 0x2ad   : > { %v9815_v0 = vpop.f32.mrf.mxu0  ;;  %v3140_v55 = vpack.c.bf16 %v3063_v1, %v3033_v50  ;;  %v3013_v35 = vsel %vm9810_vm1, %v9650_v23, %v3009_v46  ;;  %v6498_v57 = vor.u32 %v6844_v54, %v6495_v7  ;;  %v6558_v59 = vor.u32 %v6861_v22, %v6557_v29  ;;  %v6860_v23 = vld [vmem:[#allocation12 + $0xa4] sm:$0xf] }
 0x2ae   : > { %v9820_v62 = vpop.eup %7320  ;;  %vm3015_vm15 = vcmp.eq.f32.partialorder %v3014_v47, 8.507059e+37  ;;  %v3038_v14 = vmul.f32 %v9713_v61, %v3037_v9  ;;  %vm3041_vm0 = vweird.f32 %v9713_v61  ;;  %v3082_v63 = vsub.f32 1.0, %v3081_v13  ;;  %v6842_v47 = vld [vmem:[#allocation12 + $0x14] sm:$0xf]  ;;  %v6549_v9 = vld [vmem:[#allocation12 + $0x90] sm:$0xf] }
 0x2af   : > { %v3066_v11 = vmul.f32 %v9758_v3, %v9696_v19  ;;  %v3018_v49 = vsel %vm3015_vm15, %v3017_v53, %v3013_v35  ;;  %vm3040_vm2 = vweird.f32 %v9652_v26  ;;  %vm9827_vm3 = vcmp.eq.f32.partialorder %v3044_v58, 8.507059e+37  ;;  %4570 = vmatpush.bf16.msra.mxu2 %v6498_v57  ;;  %4516 = vmatpush.bf16.msrb.mxu3 %v6558_v59  ;;  %v6493_v26 = vld [vmem:[#allocation12 + $0x20] sm:$0xf]  ;;  %v6858_v59 = vld [vmem:[#allocation12 + $0x94] sm:$0xf] }
 0x2b0   : > { %3438 = vmatmul.bf16.gmra.mxu3 %v3140_v55  ;;  %3546 = vmatmul.bf16.gmra.mxu0 %v3140_v55  ;;  %v3039_v25 = vadd.f32 %v9713_v61, %v3038_v14  ;;  %v3083_v2 = vmul.f32 %v9752_v33, %v3082_v63  ;;  %vm3086_vm4 = vweird.f32 %v9752_v33  ;;  %v3111_v41 = vmul.f32 %v9785_v18, %v9724_v32  ;;  %vm3042_vm5 = vmor %vm3040_vm2, %vm3041_vm0  ;;  %v6551_v14 = vld [vmem:[#allocation12 + $0x98] sm:$0xf0] }
 0x2b1   : > { %v3047_v34 = vor.u32 1.1754944e-38, %v3046_v24  ;;  %vm3085_vm6 = vweird.f32 %v9684_v5  ;;  %v3089_v38 = vand.u32 2147483647, %v9684_v5  ;;  %v3091_v30 = vand.u32 2147483648, %v9684_v5  ;;  %v6859_v24 = vld [vmem:[#allocation12 + $0x94] sm:$0xf0] }
 0x2b2   : > { %v3043_v10 = vsel %vm3042_vm5, %v9713_v61, %v3039_v25  ;;  %v3084_v27 = vadd.f32 %v9752_v33, %v3083_v2  ;;  %v3112_v60 = vsub.f32 1.0, %v3111_v41  ;;  %v3119_v16 = vand.u32 2147483647, %v9724_v32  ;;  %vm9848_vm7 = vmor %vm3085_vm6, %vm3086_vm4  ;;  %v6843_v25 = vld [vmem:[#allocation12 + $0x14] sm:$0xf0] }
 0x2b3   : > { %v3350_v28 = vpop.f32.mrf.mxu1  ;;  %v3404_v8 = vpop.f32.mrf.mxu3  ;;  %v3048_v39 = vsel %vm9827_vm3, %v3047_v34, %v3043_v10  ;;  %v3121_v5 = vand.u32 2147483648, %v9724_v32  ;;  %v6562_v61 = vor.u32 %v6860_v23, %v6559_v45  ;;  %v6494_v43 = vor.u32 %v6845_v40, %v6493_v26  ;;  %v6485_v23 = vld [vmem:[#allocation12 + $0x10] sm:$0xf]  ;;  %v6840_v26 = vld [vmem:[#allocation12 + $0x4] sm:$0xf] }
 0x2b4   : > { %v3139_v56 = vpack.c.bf16 %v3048_v39, %v3018_v49  ;;  %v3088_v12 = vsel %vm9848_vm7, %v9752_v33, %v3084_v27  ;;  %v3113_v36 = vmul.f32 %v9785_v18, %v3112_v60  ;;  %vm3116_vm8 = vweird.f32 %v9785_v18  ;;  %v6479_v40 = vld [vmem:[#allocation12 + $0x8] sm:$0xf0] }
 0x2b5   : > { %v3092_v51 = vor.u32 1.1754944e-38, %v3091_v30  ;;  %4624 = vmatpush.bf16.msra.mxu0 %v6562_v61  ;;  %4462 = vmatpush.bf16.msrb.mxu1 %v6494_v43  ;;  %v9858_v21 = vperm.slane %v3175_v6, 0  ;;  %v9860_v13 = vpop.f32.mrf.mxu0  ;;  %v3067_v50 = vsub.f32 1.0, %v3066_v11  ;;  %vm3090_vm9 = vcmp.eq.f32.partialorder %v3089_v38, 8.507059e+37  ;;  %v6857_v43 = vld [vmem:[#allocation12 + $0x84] sm:$0xf0] }
 0x2b6   : > { %v3114_v54 = vadd.f32 %v9785_v18, %v3113_v36  ;;  %vm3115_vm10 = vweird.f32 %v9724_v32  ;;  %vm3120_vm11 = vcmp.eq.f32.partialorder %v3119_v16, 8.507059e+37  ;;  %v3122_v33 = vor.u32 1.1754944e-38, %v3121_v5 }
 0x2b7   : > { %v3093_v42 = vsel %vm3090_vm9, %v3092_v51, %v3088_v12  ;;  %vm3117_vm12 = vmor %vm3115_vm10, %vm3116_vm8  ;;  %v3351_v52 = vadd.f32 %v3350_v28, %v9858_v21  ;;  %v3096_v20 = vmul.f32 %v9820_v62, %v9766_v31  ;;  %v3068_v29 = vmul.f32 %v9758_v3, %v3067_v50 }
 0x2b8   : > { %3384 = vmatmul.bf16.gmra.mxu1 %v3139_v56  ;;  %3492 = vmatmul.bf16.gmra.mxu2 %v3139_v56  ;;  %v3118_v7 = vsel %vm3117_vm12, %v9785_v18, %v3114_v54  ;;  %vm3070_vm13 = vweird.f32 %v9696_v19  ;;  %v3074_v44 = vand.u32 2147483647, %v9696_v19  ;;  %v3076_v46 = vand.u32 2147483648, %v9696_v19 }
 0x2b9   : > { %v3458_v32 = vpop.f32.mrf.mxu2  ;;  %v3123_v22 = vsel %vm3120_vm11, %v3122_v33, %v3118_v7  ;;  %v3405_v17 = vadd.f32 %v3404_v8, %v3351_v52  ;;  %v3097_v58 = vsub.f32 1.0, %v3096_v20  ;;  %vm3071_vm14 = vweird.f32 %v9758_v3 }
 0x2ba   : > { %vm3100_vm1 = vweird.f32 %v9766_v31  ;;  %v3106_v18 = vand.u32 2147483648, %v9766_v31  ;;  %v9875_v1 = vperm.slane %v3175_v6, 1  ;;  %vm3101_vm15 = vweird.f32 %v9820_v62  ;;  %vm9897_vm2 = vmor %vm3070_vm13, %vm3071_vm14 }
 0x2bb   : > { %v3352_v37 = vpop.f32.mrf.mxu1  ;;  %v3406_v53 = vpop.f32.mrf.mxu3  ;;  %v6439_v55 = vmul.f32 -1.442695, %v3405_v17  ;;  %v3098_v35 = vmul.f32 %v9820_v62, %v3097_v58  ;;  %v6490_v57 = vor.u32 %v6842_v47, %v6487_v48  ;;  %v3142_v63 = vpack.c.bf16 %v3123_v22, %v3093_v42  ;;  %vm9888_vm0 = vmor %vm3100_vm1, %vm3101_vm15 }
 0x2bc   : > { %v3069_v11 = vadd.f32 %v9758_v3, %v3068_v29  ;;  %v3104_v49 = vand.u32 2147483647, %v9766_v31  ;;  %v3459_v4 = vadd.f32 %v3458_v32, %v9875_v1  ;;  %v3353_v41 = vadd.f32 %v3352_v37, %v9858_v21 }
 0x2bd   : > { %7322 = vpow2.f32 %v6439_v55  ;;  %v3099_v2 = vadd.f32 %v9820_v62, %v3098_v35  ;;  %4571 = vmatpush.bf16.msra.mxu2 %v6490_v57  ;;  %v6550_v45 = vor.u32 %v6859_v24, %v6549_v9  ;;  %v6554_v30 = vor.u32 %v6858_v59, %v6551_v14  ;;  %v3517_v28 = vpop.f32.mrf.mxu0 }
 0x2be   : > { %v3513_v38 = vadd.f32 %v9815_v0, %v3459_v4  ;;  %v6486_v10 = vor.u32 %v6843_v25, %v6485_v23  ;;  %v6482_v27 = vor.u32 %v6840_v26, %v6479_v40  ;;  %v3107_v16 = vor.u32 1.1754944e-38, %v3106_v18  ;;  %v6543_v23 = vld [vmem:[#allocation12 + $0x88] sm:$0xf0]  ;;  %v6477_v25 = vld [vmem:[#allocation12] sm:$0xf] }
 0x2bf   : > { %v3103_v31 = vsel %vm9888_vm0, %v9820_v62, %v3099_v2  ;;  %v3407_v6 = vadd.f32 %v3406_v53, %v3353_v41  ;;  %4517 = vmatpush.bf16.msrb.mxu3 %v6550_v45  ;;  %v3073_v0 = vsel %vm9897_vm2, %v9758_v3, %v3069_v11  ;;  %v3077_v8 = vor.u32 1.1754944e-38, %v3076_v46  ;;  %4625 = vmatpush.bf16.msra.mxu0 %v6554_v30  ;;  %v6541_v62 = vld [vmem:[#allocation12 + $0x80] sm:$0xf]  ;;  %v6841_v26 = vld [vmem:[#allocation12 + $0x4] sm:$0xf0] }
 0x2c0   : > { %3443 = vmatmul.bf16.gmra.mxu3 %v3142_v63  ;;  %3551 = vmatmul.bf16.gmra.mxu0 %v3142_v63  ;;  %vm3105_vm3 = vcmp.eq.f32.partialorder %v3104_v49, 8.507059e+37  ;;  %v6440_v19 = vmul.f32 -1.442695, %v3513_v38  ;;  %vm3075_vm4 = vcmp.eq.f32.partialorder %v3074_v44, 8.507059e+37  ;;  %v6542_v12 = vor.u32 %v6857_v43, %v6541_v62  ;;  %v6856_v63 = vld [vmem:[#allocation12 + $0x84] sm:$0xf] }
 0x2c1   : > { %v3460_v39 = vpop.f32.mrf.mxu2  ;;  %v3108_v15 = vsel %vm3105_vm3, %v3107_v16, %v3103_v31  ;;  %v6441_v5 = vmul.f32 -1.442695, %v3407_v6  ;;  %4463 = vmatpush.bf16.msrb.mxu1 %v6486_v10  ;;  %4572 = vmatpush.bf16.msra.mxu2 %v6482_v27  ;;  %v3078_v51 = vsel %vm3075_vm4, %v3077_v8, %v3073_v0  ;;  %v6546_v45 = vor.u32 %v6856_v63, %v6543_v23 }
 0x2c2   : > { %v3461_v61 = vadd.f32 %v3460_v39, %v9875_v1  ;;  %7324 = vpow2.f32 %v6440_v19  ;;  %v3141_v42 = vpack.c.bf16 %v3108_v15, %v3078_v51 }
 0x2c3   : > { %v3409_v56 = vpop.f32.mrf.mxu3  ;;  %v7323_v36 = vpop.eup %7322  ;;  %7326 = vpow2.f32 %v6441_v5  ;;  %4518 = vmatpush.bf16.msrb.mxu3 %v6542_v12  ;;  %4626 = vmatpush.bf16.msra.mxu0 %v6546_v45 }
 0x2c4   : > { %v3515_v3 = vadd.f32 %v9860_v13, %v3461_v61  ;;  %v3355_v50 = vpop.f32.mrf.mxu1  ;;  %v9909_v54 = vadd.f32 1.0, %v7323_v36 }
 0x2c5   : > { %v3356_v33 = vadd.f32 %v3355_v50, %v9858_v21  ;;  %v3519_v13 = vpop.f32.mrf.mxu0 }
 0x2c6   : > { %v6442_v52 = vmul.f32 -1.442695, %v3515_v3  ;;  %7328 = vrcp.f32 %v9909_v54  ;;  %v3712_v48 = vand.u32 2147483648, %v9909_v54  ;;  %v3710_v55 = vand.u32 2147483647, %v9909_v54 }
 0x2c7   : > { %v3410_v20 = vadd.f32 %v3409_v56, %v3356_v33  ;;  %vm3706_vm5 = vweird.f32 %v9909_v54 }
 0x2c8   : > { %7330 = vpow2.f32 %v6442_v52  ;;  %v7325_v7 = vpop.eup %7324  ;;  %3389 = vmatmul.bf16.gmra.mxu1 %v3141_v42  ;;  %3497 = vmatmul.bf16.gmra.mxu2 %v3141_v42  ;;  %v9928_v57 = vor.u32 1.1754944e-38, %v3712_v48  ;;  %vm9942_vm6 = vcmp.eq.f32.partialorder %v3710_v55, 8.507059e+37 }
 0x2c9   : > { %v6443_v29 = vmul.f32 -1.442695, %v3410_v20  ;;  %v7327_v44 = vpop.eup %7326  ;;  %v9913_v32 = vadd.f32 1.0, %v7325_v7  ;;  %v3463_v47 = vpop.f32.mrf.mxu2 }
 0x2ca   : > { %v9916_v22 = vadd.f32 1.0, %v7327_v44  ;;  %v3464_v17 = vadd.f32 %v3463_v47, %v9875_v1 }
 0x2cb   : > { %7332 = vpow2.f32 %v6443_v29  ;;  %v3411_v46 = vpop.f32.mrf.mxu3  ;;  %v3725_v35 = vand.u32 2147483647, %v9913_v32  ;;  %v3727_v49 = vand.u32 2147483648, %v9913_v32  ;;  %vm3721_vm7 = vweird.f32 %v9913_v32 }
 0x2cc   : > { %7334 = vrcp.f32 %v9913_v32  ;;  %v3357_v58 = vpop.f32.mrf.mxu1  ;;  %v9920_v18 = vpop.eup %7328  ;;  %v3518_v37 = vadd.f32 %v3517_v28, %v3464_v17  ;;  %v3742_v41 = vand.u32 2147483648, %v9916_v22  ;;  %v3740_v40 = vand.u32 2147483647, %v9916_v22 }
 0x2cd   : > { %7336 = vrcp.f32 %v9916_v22  ;;  %v3702_v9 = vmul.f32 %v9920_v18, %v9909_v54  ;;  %v3358_v24 = vadd.f32 %v3357_v58, %v9858_v21  ;;  %vm3736_vm8 = vweird.f32 %v9916_v22  ;;  %v9954_v8 = vpop.f32.mrf.mxu0 }
 0x2ce   : > { %v7331_v53 = vpop.eup %7330  ;;  %v6444_v14 = vmul.f32 -1.442695, %v3518_v37  ;;  %v6478_v28 = vor.u32 %v6841_v26, %v6477_v25  ;;  %vm3707_vm9 = vweird.f32 %v9920_v18  ;;  %v3743_v61 = vor.u32 1.1754944e-38, %v3742_v41 }
 0x2cf   : > { %v9930_v59 = vadd.f32 1.0, %v7331_v53  ;;  %v3703_v11 = vsub.f32 1.0, %v3702_v9  ;;  %v3412_v4 = vadd.f32 %v3411_v46, %v3358_v24  ;;  %vm9957_vm10 = vcmp.eq.f32.partialorder %v3740_v40, 8.507059e+37  ;;  %vm9966_vm12 = vmor %vm3706_vm5, %vm3707_vm9 }
 0x2d0   : > { %4464 = vmatpush.bf16.msrb.mxu1 %v6478_v28  ;;  %v3728_v56 = vor.u32 1.1754944e-38, %v3727_v49  ;;  %vm9977_vm1 = vcmp.eq.f32.partialorder %v3725_v35, 8.507059e+37 }
 0x2d1   : > { %v7333_v2 = vpop.eup %7332  ;;  %7338 = vrcp.f32 %v9930_v59  ;;  %v3704_v38 = vmul.f32 %v9920_v18, %v3703_v11  ;;  %v6445_v10 = vmul.f32 -1.442695, %v3412_v4  ;;  %v3465_v27 = vpop.f32.mrf.mxu2  ;;  %vm3751_vm14 = vweird.f32 %v9930_v59 }
 0x2d2   : > { %v9937_v34 = vpop.eup %7334  ;;  %v9940_v30 = vadd.f32 1.0, %v7333_v2  ;;  %7340 = vpow2.f32 %v6444_v14  ;;  %v3466_v6 = vadd.f32 %v3465_v27, %v9875_v1  ;;  %v3757_v58 = vand.u32 2147483648, %v9930_v59 }
 0x2d3   : > { %v7337_v31 = vpop.eup %7336  ;;  %v3717_v16 = vmul.f32 %v9937_v34, %v9913_v32  ;;  %v3705_v19 = vadd.f32 %v9920_v18, %v3704_v38  ;;  %v3414_v5 = vpop.f32.mrf.mxu3  ;;  %vm3722_vm11 = vweird.f32 %v9937_v34 }
 0x2d4   : > { %v3732_v0 = vmul.f32 %v7337_v31, %v9916_v22  ;;  %7342 = vrcp.f32 %v9940_v30  ;;  %v3520_v15 = vadd.f32 %v3519_v13, %v3466_v6  ;;  %vm3737_vm13 = vweird.f32 %v7337_v31  ;;  %vm10003_vm2 = vmor %vm3721_vm7, %vm3722_vm11 }
 0x2d5   : > { %v3718_v39 = vsub.f32 1.0, %v3717_v16  ;;  %7344 = vpow2.f32 %v6445_v10  ;;  %v3709_v54 = vsel %vm9966_vm12, %v9920_v18, %v3705_v19  ;;  %v3755_v13 = vand.u32 2147483647, %v9930_v59  ;;  %vm3738_vm15 = vmor %vm3736_vm8, %vm3737_vm13  ;;  %v3524_v32 = vpop.f32.mrf.mxu0 }
 0x2d6   : > { %v3733_v62 = vsub.f32 1.0, %v3732_v0  ;;  %v6446_v3 = vmul.f32 -1.442695, %v3520_v15  ;;  %v3360_v50 = vpop.f32.mrf.mxu1  ;;  %v3714_v53 = vsel %vm9942_vm6, %v9928_v57, %v3709_v54  ;;  %v3758_v26 = vor.u32 1.1754944e-38, %v3757_v58 }
 0x2d7   : > { %v7339_v12 = vpop.eup %7338  ;;  %v3719_v51 = vmul.f32 %v9937_v34, %v3718_v39  ;;  %v3361_v20 = vadd.f32 %v3360_v50, %v9858_v21  ;;  %vm10012_vm3 = vcmp.eq.f32.partialorder %v3755_v13, 8.507059e+37  ;;  %vm3766_vm6 = vweird.f32 %v9940_v30 }
 0x2d8   : > { %v7341_v42 = vpop.eup %7340  ;;  %v3734_v33 = vmul.f32 %v7337_v31, %v3733_v62  ;;  %v3747_v52 = vmul.f32 %v7339_v12, %v9930_v59  ;;  %7346 = vpow2.f32 %v6446_v3  ;;  %vm3752_vm0 = vweird.f32 %v7339_v12 }
 0x2d9   : > { %v9981_v29 = vadd.f32 1.0, %v7341_v42  ;;  %v3720_v44 = vadd.f32 %v9937_v34, %v3719_v51  ;;  %v3415_v17 = vadd.f32 %v3414_v5, %v3361_v20  ;;  %vm3753_vm4 = vmor %vm3751_vm14, %vm3752_vm0  ;;  %v3770_v19 = vand.u32 2147483647, %v9940_v30 }
 0x2da   : > { %v9985_v47 = vpop.eup %7342  ;;  %v3748_v48 = vsub.f32 1.0, %v3747_v52  ;;  %v3735_v46 = vadd.f32 %v7337_v31, %v3734_v33 }
 0x2db   : > { %v7345_v37 = vpop.eup %7344  ;;  %v3762_v18 = vmul.f32 %v9985_v47, %v9940_v30  ;;  %7348 = vrcp.f32 %v9981_v29  ;;  %v6447_v55 = vmul.f32 -1.442695, %v3415_v17  ;;  %v3724_v22 = vsel %vm10003_vm2, %v9937_v34, %v3720_v44  ;;  %v3416_v45 = vpop.f32.mrf.mxu3 }
 0x2dc   : > { %v3749_v9 = vmul.f32 %v7339_v12, %v3748_v48  ;;  %v9997_v24 = vadd.f32 1.0, %v7345_v37  ;;  %v3739_v35 = vsel %vm3738_vm15, %v7337_v31, %v3735_v46  ;;  %v3468_v63 = vpop.f32.mrf.mxu2  ;;  %v3772_v34 = vand.u32 2147483648, %v9940_v30 }
 0x2dd   : > { %v3744_v57 = vsel %vm9957_vm10, %v3743_v61, %v3739_v35  ;;  %v3763_v49 = vsub.f32 1.0, %v3762_v18  ;;  %v3469_v4 = vadd.f32 %v3468_v63, %v9875_v1  ;;  %v3729_v59 = vsel %vm9977_vm1, %v3728_v56, %v3724_v22 }
 0x2de   : > { %7350 = vrcp.f32 %v9997_v24  ;;  %v4241_v23 = vpack.c.bf16 %v3744_v57, %v3714_v53  ;;  %v3750_v25 = vadd.f32 %v7339_v12, %v3749_v9  ;;  %v7347_v2 = vpop.eup %7346  ;;  %v3362_v41 = vpop.f32.mrf.mxu1  ;;  %vm3767_vm5 = vweird.f32 %v9985_v47 }
 0x2df   : > { %7352 = vpow2.f32 %v6447_v55  ;;  %v3764_v40 = vmul.f32 %v9985_v47, %v3763_v49  ;;  %v10023_v38 = vadd.f32 1.0, %v7347_v2  ;;  %v3523_v10 = vadd.f32 %v9954_v8, %v3469_v4  ;;  %vm10040_vm7 = vmor %vm3766_vm6, %vm3767_vm5 }
 0x2e0   : > { %v3363_v27 = vadd.f32 %v3362_v41, %v9858_v21  ;;  %4465 = vmatmul.bf16.vlgmr.msrb.gmra.mxu1 %v4241_v23  ;;  %4573 = vmatmul.bf16.vlgmr.msra.gmra.mxu2 %v4241_v23  ;;  %v3754_v60 = vsel %vm3753_vm4, %v7339_v12, %v3750_v25  ;;  %v3773_v62 = vor.u32 1.1754944e-38, %v3772_v34  ;;  %v3800_v36 = vand.u32 2147483647, %v9997_v24  ;;  %v10057_v20 = vpop.f32.mrf.mxu0 }
 0x2e1   : > { %v10027_v31 = vpop.eup %7348  ;;  %v3759_v16 = vsel %vm10012_vm3, %v3758_v26, %v3754_v60  ;;  %v3765_v6 = vadd.f32 %v9985_v47, %v3764_v40  ;;  %7354 = vrcp.f32 %v10023_v38  ;;  %v6448_v28 = vmul.f32 -1.442695, %v3523_v10 }
 0x2e2   : > { %v3417_v0 = vadd.f32 %v3416_v45, %v3363_v27  ;;  %v4242_v8 = vpack.c.bf16 %v3759_v16, %v3729_v59  ;;  %v3777_v39 = vmul.f32 %v10027_v31, %v9981_v29  ;;  %v3802_v51 = vand.u32 2147483648, %v9997_v24 }
 0x2e3   : > { %7356 = vpow2.f32 %v6448_v28  ;;  %v3769_v12 = vsel %vm10040_vm7, %v9985_v47, %v3765_v6  ;;  %vm3771_vm8 = vcmp.eq.f32.partialorder %v3770_v19, 8.507059e+37  ;;  %vm3796_vm9 = vweird.f32 %v9997_v24 }
 0x2e4   : > { %v7351_v15 = vpop.eup %7350  ;;  %v6449_v5 = vmul.f32 -1.442695, %v3417_v0  ;;  %4519 = vmatmul.bf16.vlgmr.msrb.gmra.mxu3 %v4242_v8  ;;  %4627 = vmatmul.bf16.vlgmr.msra.gmra.mxu0 %v4242_v8  ;;  %v3470_v56 = vpop.f32.mrf.mxu2  ;;  %v3778_v42 = vsub.f32 1.0, %v3777_v39  ;;  %v3774_v7 = vsel %vm3771_vm8, %v3773_v62, %v3769_v12  ;;  %vm3781_vm11 = vweird.f32 %v9981_v29 }
 0x2e5   : > { %v7353_v43 = vpop.eup %7352  ;;  %v3792_v30 = vmul.f32 %v7351_v15, %v9997_v24  ;;  %v3471_v50 = vadd.f32 %v3470_v56, %v9875_v1  ;;  %vm3797_vm10 = vweird.f32 %v7351_v15  ;;  %vm10063_vm12 = vcmp.eq.f32.partialorder %v3800_v36, 8.507059e+37 }
 0x2e6   : > { %v10050_v3 = vadd.f32 1.0, %v7353_v43  ;;  %7358 = vpow2.f32 %v6449_v5  ;;  %v3779_v44 = vmul.f32 %v10027_v31, %v3778_v42  ;;  %v3419_v13 = vpop.f32.mrf.mxu3  ;;  %v3803_v37 = vor.u32 1.1754944e-38, %v3802_v51  ;;  %vm3798_vm14 = vmor %vm3796_vm9, %vm3797_vm10 }
 0x2e7   : > { %v3793_v33 = vsub.f32 1.0, %v3792_v30  ;;  %v10054_v52 = vpop.eup %7354  ;;  %v3525_v54 = vadd.f32 %v3524_v32, %v3471_v50  ;;  %vm3782_vm13 = vweird.f32 %v10027_v31  ;;  %v3785_v14 = vand.u32 2147483647, %v9981_v29 }
 0x2e8   : > { %7360 = vrcp.f32 %v10050_v3  ;;  %v3807_v48 = vmul.f32 %v10054_v52, %v10023_v38  ;;  %v3780_v9 = vadd.f32 %v10027_v31, %v3779_v44  ;;  %v3787_v63 = vand.u32 2147483648, %v9981_v29  ;;  %vm10089_vm1 = vmor %vm3781_vm11, %vm3782_vm13  ;;  %v10103_v16 = vpop.f32.mrf.mxu0 }
 0x2e9   : > { %v3794_v47 = vmul.f32 %v7351_v15, %v3793_v33  ;;  %v7357_v17 = vpop.eup %7356  ;;  %v6450_v46 = vmul.f32 -1.442695, %v3525_v54  ;;  %v3815_v57 = vand.u32 2147483647, %v10023_v38  ;;  %v3817_v32 = vand.u32 2147483648, %v10023_v38  ;;  %v6887_v33 = vld [vmem:[%s11640_s9 + $0x78] sm:$0xff] }
 0x2ea   : > { %v10068_v18 = vadd.f32 1.0, %v7357_v17  ;;  %v3808_v55 = vsub.f32 1.0, %v3807_v48  ;;  %vm3812_vm15 = vweird.f32 %v10054_v52  ;;  %v3784_v26 = vsel %vm10089_vm1, %v10027_v31, %v3780_v9  ;;  %5561 = vmatpush.bf16.msra.mxu3 %v6887_v33 }
 0x2eb   : > { %v3795_v53 = vadd.f32 %v7351_v15, %v3794_v47  ;;  %7362 = vpow2.f32 %v6450_v46  ;;  %v3788_v29 = vor.u32 1.1754944e-38, %v3787_v63  ;;  %vm3811_vm0 = vweird.f32 %v10023_v38 }
 0x2ec   : > { %v7359_v35 = vpop.eup %7358  ;;  %7364 = vrcp.f32 %v10068_v18  ;;  %v3365_v11 = vpop.f32.mrf.mxu1  ;;  %v3809_v2 = vmul.f32 %v10054_v52, %v3808_v55  ;;  %vm3786_vm2 = vcmp.eq.f32.partialorder %v3785_v14, 8.507059e+37  ;;  %vm3813_vm3 = vmor %vm3811_vm0, %vm3812_vm15  ;;  %vm3816_vm4 = vcmp.eq.f32.partialorder %v3815_v57, 8.507059e+37 }
 0x2ed   : > { %v10077_v22 = vadd.f32 1.0, %v7359_v35  ;;  %v3799_v49 = vsel %vm3798_vm14, %v7351_v15, %v3795_v53  ;;  %v3366_v23 = vadd.f32 %v3365_v11, %v9858_v21  ;;  %v3818_v10 = vor.u32 1.1754944e-38, %v3817_v32 }
 0x2ee   : > { %v10080_v4 = vpop.eup %7360  ;;  %v3804_v24 = vsel %vm10063_vm12, %v3803_v37, %v3799_v49  ;;  %v3810_v34 = vadd.f32 %v10054_v52, %v3809_v2  ;;  %v3789_v6 = vsel %vm3786_vm2, %v3788_v29, %v3784_v26  ;;  %v3421_v8 = vpop.f32.mrf.mxu3  ;;  %v3830_v15 = vand.u32 2147483647, %v10050_v3 }
 0x2ef   : > { %v3822_v41 = vmul.f32 %v10080_v4, %v10050_v3  ;;  %7366 = vrcp.f32 %v10077_v22  ;;  %v4243_v45 = vpack.c.bf16 %v3804_v24, %v3774_v7  ;;  %v3420_v40 = vadd.f32 %v3419_v13, %v3366_v23 }
 0x2f0   : > { %v3814_v31 = vsel %vm3813_vm3, %v10054_v52, %v3810_v34  ;;  %vm3827_vm5 = vweird.f32 %v10080_v4  ;;  %v3832_v62 = vand.u32 2147483648, %v10050_v3  ;;  %v3860_v30 = vand.u32 2147483647, %v10077_v22 }
 0x2f1   : > { %4470 = vmatmul.bf16.gmra.mxu1 %v4243_v45  ;;  %4578 = vmatmul.bf16.gmra.mxu2 %v4243_v45  ;;  %v3823_v27 = vsub.f32 1.0, %v3822_v41  ;;  %v7363_v60 = vpop.eup %7362  ;;  %v6451_v59 = vmul.f32 -1.442695, %v3420_v40  ;;  %v3819_v19 = vsel %vm3816_vm4, %v3818_v10, %v3814_v31  ;;  %vm3826_vm6 = vweird.f32 %v10050_v3 }
 0x2f2   : > { %v10107_v28 = vpop.eup %7364  ;;  %v10109_v0 = vadd.f32 1.0, %v7363_v60  ;;  %v3473_v38 = vpop.f32.mrf.mxu2  ;;  %v4244_v61 = vpack.c.bf16 %v3819_v19, %v3789_v6  ;;  %vm3856_vm7 = vweird.f32 %v10077_v22  ;;  %v3862_v52 = vand.u32 2147483648, %v10077_v22  ;;  %vm10134_vm8 = vmor %vm3826_vm6, %vm3827_vm5 }
 0x2f3   : > { %v3824_v39 = vmul.f32 %v10080_v4, %v3823_v27  ;;  %7368 = vpow2.f32 %v6451_v59  ;;  %v3474_v5 = vadd.f32 %v3473_v38, %v9875_v1  ;;  %v3837_v36 = vmul.f32 %v10107_v28, %v10068_v18 }
 0x2f4   : > { %7370 = vrcp.f32 %v10109_v0  ;;  %v3367_v56 = vpop.f32.mrf.mxu1  ;;  %4524 = vmatmul.bf16.gmra.mxu3 %v4244_v61  ;;  %4632 = vmatmul.bf16.gmra.mxu0 %v4244_v61  ;;  %vm10138_vm9 = vcmp.eq.f32.partialorder %v3830_v15, 8.507059e+37  ;;  %v3833_v17 = vor.u32 1.1754944e-38, %v3832_v62  ;;  %vm10145_vm11 = vcmp.eq.f32.partialorder %v3860_v30, 8.507059e+37 }
 0x2f5   : > { %v7367_v43 = vpop.eup %7366  ;;  %v3825_v12 = vadd.f32 %v10080_v4, %v3824_v39  ;;  %v3528_v51 = vadd.f32 %v10057_v20, %v3474_v5  ;;  %v3368_v50 = vadd.f32 %v3367_v56, %v9858_v21  ;;  %v6879_v20 = vld [vmem:[%s11640_s9 + $0x38] sm:$0xff]  ;;  %v3838_v54 = vsub.f32 1.0, %v3837_v36  ;;  %v3532_v57 = vpop.f32.mrf.mxu0 }
 0x2f6   : > { %v3852_v42 = vmul.f32 %v7367_v43, %v10077_v22  ;;  %vm3857_vm10 = vweird.f32 %v7367_v43  ;;  %5507 = vmatpush.bf16.msra.mxu1 %v6879_v20  ;;  %v3863_v63 = vor.u32 1.1754944e-38, %v3862_v52  ;;  %vm3841_vm12 = vweird.f32 %v10068_v18 }
 0x2f7   : > { %v6452_v7 = vmul.f32 -1.442695, %v3528_v51  ;;  %v3422_v44 = vadd.f32 %v3421_v8, %v3368_v50  ;;  %v3829_v48 = vsel %vm10134_vm8, %v10080_v4, %v3825_v12  ;;  %v3839_v9 = vmul.f32 %v10107_v28, %v3838_v54  ;;  %vm3858_vm14 = vmor %vm3856_vm7, %vm3857_vm10 }
 0x2f8   : > { %v3853_v3 = vsub.f32 1.0, %v3852_v42  ;;  %vm3842_vm13 = vweird.f32 %v10107_v28  ;;  %v3834_v23 = vsel %vm10138_vm9, %v3833_v17, %v3829_v48  ;;  %v3845_v24 = vand.u32 2147483647, %v10068_v18 }
 0x2f9   : > { %v7369_v58 = vpop.eup %7368  ;;  %7372 = vpow2.f32 %v6452_v7  ;;  %v6453_v37 = vmul.f32 -1.442695, %v3422_v44  ;;  %v3847_v25 = vand.u32 2147483648, %v10068_v18  ;;  %v3840_v45 = vadd.f32 %v10107_v28, %v3839_v9  ;;  %vm10177_vm15 = vmor %vm3841_vm12, %vm3842_vm13  ;;  %v6886_v9 = vld [vmem:[%s11640_s9 + $0x70] sm:$0xff] }
 0x2fa   : > { %v3854_v53 = vmul.f32 %v7367_v43, %v3853_v3  ;;  %v7371_v55 = vpop.eup %7370  ;;  %v10150_v35 = vadd.f32 1.0, %v7369_v58  ;;  %v3475_v14 = vpop.f32.mrf.mxu2  ;;  %v3875_v34 = vand.u32 2147483647, %v10109_v0  ;;  %v3877_v22 = vand.u32 2147483648, %v10109_v0  ;;  %5562 = vmatpush.bf16.msra.mxu3 %v6886_v9 }
 0x2fb   : > { %7374 = vpow2.f32 %v6453_v37  ;;  %v3476_v11 = vadd.f32 %v3475_v14, %v9875_v1  ;;  %v3867_v32 = vmul.f32 %v7371_v55, %v10109_v0  ;;  %v3424_v4 = vpop.f32.mrf.mxu3  ;;  %vm3872_vm1 = vweird.f32 %v7371_v55 }
 0x2fc   : > { %v3855_v49 = vadd.f32 %v7367_v43, %v3854_v53  ;;  %7376 = vrcp.f32 %v10150_v35  ;;  %vm10181_vm0 = vcmp.eq.f32.partialorder %v3845_v24, 8.507059e+37  ;;  %vm3871_vm2 = vweird.f32 %v10109_v0 }
 0x2fd   : > { %v3530_v2 = vadd.f32 %v10103_v16, %v3476_v11  ;;  %v3868_v26 = vsub.f32 1.0, %v3867_v32  ;;  %v3844_v39 = vsel %vm10177_vm15, %v10107_v28, %v3840_v45  ;;  %v3848_v61 = vor.u32 1.1754944e-38, %v3847_v25  ;;  %vm3873_vm3 = vmor %vm3871_vm2, %vm3872_vm1  ;;  %v3534_v36 = vpop.f32.mrf.mxu0 }
 0x2fe   : > { %v3859_v41 = vsel %vm3858_vm14, %v7367_v43, %v3855_v49  ;;  %v3370_v40 = vpop.f32.mrf.mxu1  ;;  %v3878_v0 = vor.u32 1.1754944e-38, %v3877_v22  ;;  %vm3876_vm4 = vcmp.eq.f32.partialorder %v3875_v34, 8.507059e+37  ;;  %v3890_v13 = vand.u32 2147483647, %v10150_v35 }
 0x2ff   : > { %v3864_v29 = vsel %vm10145_vm11, %v3863_v63, %v3859_v41  ;;  %v7373_v10 = vpop.eup %7372  ;;  %v6454_v27 = vmul.f32 -1.442695, %v3530_v2  ;;  %v3371_v60 = vadd.f32 %v3370_v40, %v9858_v21  ;;  %v3869_v6 = vmul.f32 %v7371_v55, %v3868_v26 }
 0x300   : > { %v4245_v59 = vpack.c.bf16 %v3864_v29, %v3834_v23  ;;  %v10171_v16 = vadd.f32 1.0, %v7373_v10  ;;  %v3849_v12 = vsel %vm10181_vm0, %v3848_v61, %v3844_v39  ;;  %vm3886_vm5 = vweird.f32 %v10150_v35 }
 0x301   : > { %v7375_v8 = vpop.eup %7374  ;;  %7378 = vpow2.f32 %v6454_v27  ;;  %v3425_v19 = vadd.f32 %v3424_v4, %v3371_v60  ;;  %v3870_v18 = vadd.f32 %v7371_v55, %v3869_v6  ;;  %v3892_v53 = vand.u32 2147483648, %v10150_v35 }
 0x302   : > { %4475 = vmatmul.bf16.gmra.mxu1 %v4245_v59  ;;  %4583 = vmatmul.bf16.gmra.mxu2 %v4245_v59  ;;  %v10189_v15 = vpop.eup %7376  ;;  %7380 = vrcp.f32 %v10171_v16  ;;  %v10192_v5 = vadd.f32 1.0, %v7375_v8  ;;  %vm10218_vm7 = vcmp.eq.f32.partialorder %v3890_v13, 8.507059e+37  ;;  %v3905_v41 = vand.u32 2147483647, %v10171_v16  ;;  %v6878_v59 = vld [vmem:[%s11640_s9 + $0x30] sm:$0xff] }
 0x303   : > { %v3882_v62 = vmul.f32 %v10189_v15, %v10150_v35  ;;  %v6455_v43 = vmul.f32 -1.442695, %v3425_v19  ;;  %v3874_v56 = vsel %vm3873_vm3, %v7371_v55, %v3870_v18  ;;  %v3426_v52 = vpop.f32.mrf.mxu3  ;;  %vm3887_vm6 = vweird.f32 %v10189_v15  ;;  %5508 = vmatpush.bf16.msra.mxu1 %v6878_v59 }
 0x304   : > { %7382 = vrcp.f32 %v10192_v5  ;;  %v3478_v28 = vpop.f32.mrf.mxu2  ;;  %v3879_v30 = vsel %vm3876_vm4, %v3878_v0, %v3874_v56  ;;  %v3920_v32 = vand.u32 2147483647, %v10192_v5  ;;  %v3922_v4 = vand.u32 2147483648, %v10192_v5  ;;  %vm10232_vm8 = vmor %vm3886_vm5, %vm3887_vm6 }
 0x305   : > { %7384 = vpow2.f32 %v6455_v43  ;;  %v3479_v51 = vadd.f32 %v3478_v28, %v9875_v1  ;;  %v4246_v50 = vpack.c.bf16 %v3879_v30, %v3849_v12  ;;  %v3883_v42 = vsub.f32 1.0, %v3882_v62 }
 0x306   : > { %v3372_v33 = vpop.f32.mrf.mxu1  ;;  %v3893_v26 = vor.u32 1.1754944e-38, %v3892_v53  ;;  %vm3901_vm9 = vweird.f32 %v10171_v16  ;;  %vm3916_vm11 = vweird.f32 %v10192_v5  ;;  %vm10248_vm12 = vcmp.eq.f32.partialorder %v3920_v32, 8.507059e+37 }
 0x307   : > { %v7379_v20 = vpop.eup %7378  ;;  %v3533_v54 = vadd.f32 %v3532_v57, %v3479_v51  ;;  %v3373_v7 = vadd.f32 %v3372_v33, %v9858_v21  ;;  %4529 = vmatmul.bf16.gmra.mxu3 %v4246_v50  ;;  %4637 = vmatmul.bf16.gmra.mxu0 %v4246_v50  ;;  %v3884_v44 = vmul.f32 %v10189_v15, %v3883_v42  ;;  %v3923_v60 = vor.u32 1.1754944e-38, %v3922_v4 }
 0x308   : > { %v10204_v47 = vpop.eup %7380  ;;  %v10206_v3 = vadd.f32 1.0, %v7379_v20  ;;  %v3907_v6 = vand.u32 2147483648, %v10171_v16  ;;  %vm10256_vm13 = vcmp.eq.f32.partialorder %v3905_v41, 8.507059e+37 }
 0x309   : > { %v6456_v48 = vmul.f32 -1.442695, %v3533_v54  ;;  %v3427_v17 = vadd.f32 %v3426_v52, %v3373_v7  ;;  %v3897_v46 = vmul.f32 %v10204_v47, %v10171_v16  ;;  %v3885_v37 = vadd.f32 %v10189_v15, %v3884_v44 }
 0x30a   : > { %v7383_v58 = vpop.eup %7382  ;;  %7386 = vrcp.f32 %v10206_v3  ;;  %v10242_v40 = vpop.f32.mrf.mxu0  ;;  %vm3902_vm1 = vweird.f32 %v10204_v47  ;;  %v3935_v61 = vand.u32 2147483647, %v10206_v3  ;;  %v3937_v33 = vand.u32 2147483648, %v10206_v3 }
 0x30b   : > { %v7385_v55 = vpop.eup %7384  ;;  %7388 = vpow2.f32 %v6456_v48  ;;  %v6457_v14 = vmul.f32 -1.442695, %v3427_v17  ;;  %v3912_v57 = vmul.f32 %v7383_v58, %v10192_v5  ;;  %v3898_v23 = vsub.f32 1.0, %v3897_v46  ;;  %vm10286_vm15 = vmor %vm3901_vm9, %vm3902_vm1 }
 0x30c   : > { %v10223_v11 = vadd.f32 1.0, %v7385_v55  ;;  %v3480_v49 = vpop.f32.mrf.mxu2  ;;  %v3889_v45 = vsel %vm10232_vm8, %v10189_v15, %v3885_v37  ;;  %vm3917_vm10 = vweird.f32 %v7383_v58  ;;  %v3908_v20 = vor.u32 1.1754944e-38, %v3907_v6 }
 0x30d   : > { %7390 = vpow2.f32 %v6457_v14  ;;  %v3481_v24 = vadd.f32 %v3480_v49, %v9875_v1  ;;  %v3913_v2 = vsub.f32 1.0, %v3912_v57  ;;  %v3899_v34 = vmul.f32 %v10204_v47, %v3898_v23  ;;  %vm3918_vm14 = vmor %vm3916_vm11, %vm3917_vm10 }
 0x30e   : > { %7392 = vrcp.f32 %v10223_v11  ;;  %v3894_v5 = vsel %vm10218_vm7, %v3893_v26, %v3889_v45  ;;  %vm3931_vm2 = vweird.f32 %v10206_v3  ;;  %vm10297_vm3 = vcmp.eq.f32.partialorder %v3935_v61, 8.507059e+37 }
 0x30f   : > { %v3535_v29 = vadd.f32 %v3534_v36, %v3481_v24  ;;  %v3914_v35 = vmul.f32 %v7383_v58, %v3913_v2  ;;  %v3900_v56 = vadd.f32 %v10204_v47, %v3899_v34  ;;  %vm3946_vm4 = vweird.f32 %v10223_v11  ;;  %v6885_v34 = vld [vmem:[%s11640_s9 + $0x68] sm:$0xff] }
 0x310   : > { %v10245_v22 = vpop.eup %7386  ;;  %v3429_v10 = vpop.f32.mrf.mxu3  ;;  %v3950_v46 = vand.u32 2147483647, %v10223_v11  ;;  %v3952_v32 = vand.u32 2147483648, %v10223_v11  ;;  %5563 = vmatpush.bf16.msra.mxu3 %v6885_v34 }
 0x311   : > { %v7389_v31 = vpop.eup %7388  ;;  %v6458_v38 = vmul.f32 -1.442695, %v3535_v29  ;;  %v3915_v8 = vadd.f32 %v7383_v58, %v3914_v35  ;;  %v3927_v39 = vmul.f32 %v10245_v22, %v10206_v3  ;;  %vm3932_vm0 = vweird.f32 %v10245_v22 }
 0x312   : > { %v10262_v18 = vadd.f32 1.0, %v7389_v31  ;;  %v3375_v15 = vpop.f32.mrf.mxu1  ;;  %v3904_v44 = vsel %vm10286_vm15, %v10204_v47, %v3900_v56  ;;  %v3539_v37 = vpop.f32.mrf.mxu0  ;;  %vm3933_vm5 = vmor %vm3931_vm2, %vm3932_vm0  ;;  %v3938_v3 = vor.u32 1.1754944e-38, %v3937_v33  ;;  %vm10324_vm7 = vcmp.eq.f32.partialorder %v3950_v46, 8.507059e+37 }
 0x313   : > { %v7391_v0 = vpop.eup %7390  ;;  %7394 = vpow2.f32 %v6458_v38  ;;  %v3376_v62 = vadd.f32 %v3375_v15, %v9858_v21  ;;  %v3919_v43 = vsel %vm3918_vm14, %v7383_v58, %v3915_v8  ;;  %v3928_v36 = vsub.f32 1.0, %v3927_v39 }
 0x314   : > { %v10271_v28 = vpop.eup %7392  ;;  %7396 = vrcp.f32 %v10262_v18  ;;  %v10274_v12 = vadd.f32 1.0, %v7391_v0  ;;  %v3924_v30 = vsel %vm10248_vm12, %v3923_v60, %v3919_v43  ;;  %v3909_v57 = vsel %vm10256_vm13, %v3908_v20, %v3904_v44 }
 0x315   : > { %v3942_v51 = vmul.f32 %v10271_v28, %v10223_v11  ;;  %v3430_v50 = vadd.f32 %v3429_v10, %v3376_v62  ;;  %v4247_v42 = vpack.c.bf16 %v3924_v30, %v3894_v5  ;;  %v3929_v54 = vmul.f32 %v10245_v22, %v3928_v36 }
 0x316   : > { %7398 = vrcp.f32 %v10274_v12  ;;  %vm3947_vm6 = vweird.f32 %v10271_v28  ;;  %vm3976_vm8 = vweird.f32 %v10274_v12  ;;  %v3980_v10 = vand.u32 2147483647, %v10274_v12 }
 0x317   : > { %v6459_v7 = vmul.f32 -1.442695, %v3430_v50  ;;  %4480 = vmatmul.bf16.gmra.mxu1 %v4247_v42  ;;  %4588 = vmatmul.bf16.gmra.mxu2 %v4247_v42  ;;  %v3943_v13 = vsub.f32 1.0, %v3942_v51  ;;  %v3930_v48 = vadd.f32 %v10245_v22, %v3929_v54  ;;  %vm10338_vm9 = vmor %vm3946_vm4, %vm3947_vm6  ;;  %v3982_v38 = vand.u32 2147483648, %v10274_v12 }
 0x318   : > { %v3483_v16 = vpop.f32.mrf.mxu2  ;;  %v3431_v47 = vpop.f32.mrf.mxu3  ;;  %v3965_v15 = vand.u32 2147483647, %v10262_v18  ;;  %vm10352_vm11 = vcmp.eq.f32.partialorder %v3980_v10, 8.507059e+37  ;;  %vm3961_vm12 = vweird.f32 %v10262_v18  ;;  %v3967_v43 = vand.u32 2147483648, %v10262_v18 }
 0x319   : > { %v7395_v58 = vpop.eup %7394  ;;  %7400 = vpow2.f32 %v6459_v7  ;;  %v3484_v53 = vadd.f32 %v3483_v16, %v9875_v1  ;;  %v3944_v9 = vmul.f32 %v10271_v28, %v3943_v13  ;;  %v3934_v49 = vsel %vm3933_vm5, %v10245_v22, %v3930_v48 }
 0x31a   : > { %v10307_v55 = vpop.eup %7396  ;;  %v10309_v14 = vadd.f32 1.0, %v7395_v58  ;;  %v3377_v63 = vpop.f32.mrf.mxu1  ;;  %v3939_v24 = vsel %vm10297_vm3, %v3938_v3, %v3934_v49  ;;  %v3953_v22 = vor.u32 1.1754944e-38, %v3952_v32  ;;  %v3983_v51 = vor.u32 1.1754944e-38, %v3982_v38 }
 0x31b   : > { %v3538_v4 = vadd.f32 %v10242_v40, %v3484_v53  ;;  %v3378_v23 = vadd.f32 %v3377_v63, %v9858_v21  ;;  %v4248_v2 = vpack.c.bf16 %v3939_v24, %v3909_v57  ;;  %v3945_v41 = vadd.f32 %v10271_v28, %v3944_v9  ;;  %v6877_v40 = vld [vmem:[%s11640_s9 + $0x28] sm:$0xff] }
 0x31c   : > { %v7399_v25 = vpop.eup %7398  ;;  %7402 = vrcp.f32 %v10309_v14  ;;  %v3957_v45 = vmul.f32 %v10307_v55, %v10262_v18  ;;  %vm3962_vm14 = vweird.f32 %v10307_v55  ;;  %vm10365_vm1 = vcmp.eq.f32.partialorder %v3965_v15, 8.507059e+37  ;;  %5509 = vmatpush.bf16.msra.mxu1 %v6877_v40 }
 0x31d   : > { %v6460_v26 = vmul.f32 -1.442695, %v3538_v4  ;;  %v3432_v29 = vadd.f32 %v3431_v47, %v3378_v23  ;;  %v3972_v35 = vmul.f32 %v7399_v25, %v10274_v12  ;;  %4534 = vmatmul.bf16.gmra.mxu3 %v4248_v2  ;;  %4642 = vmatmul.bf16.gmra.mxu0 %v4248_v2  ;;  %v3949_v39 = vsel %vm10338_vm9, %v10271_v28, %v3945_v41  ;;  %v3542_v56 = vpop.f32.mrf.mxu0  ;;  %vm10386_vm0 = vmor %vm3961_vm12, %vm3962_vm14 }
 0x31e   : > { %v3958_v27 = vsub.f32 1.0, %v3957_v45  ;;  %vm3977_vm10 = vweird.f32 %v7399_v25  ;;  %v3954_v42 = vsel %vm10324_vm7, %v3953_v22, %v3949_v39  ;;  %v3995_v52 = vand.u32 2147483647, %v10309_v14 }
 0x31f   : > { %v7401_v60 = vpop.eup %7400  ;;  %7404 = vpow2.f32 %v6460_v26  ;;  %v6461_v59 = vmul.f32 -1.442695, %v3432_v29  ;;  %v3973_v31 = vsub.f32 1.0, %v3972_v35  ;;  %vm3978_vm13 = vmor %vm3976_vm8, %vm3977_vm10  ;;  %v3997_v46 = vand.u32 2147483648, %v10309_v14 }
 0x320   : > { %v10343_v8 = vadd.f32 1.0, %v7401_v60  ;;  %v3485_v19 = vpop.f32.mrf.mxu2  ;;  %v3959_v61 = vmul.f32 %v10307_v55, %v3958_v27  ;;  %v3968_v57 = vor.u32 1.1754944e-38, %v3967_v43  ;;  %vm3991_vm2 = vweird.f32 %v10309_v14 }
 0x321   : > { %7406 = vpow2.f32 %v6461_v59  ;;  %v3486_v11 = vadd.f32 %v3485_v19, %v9875_v1  ;;  %v3974_v5 = vmul.f32 %v7399_v25, %v3973_v31  ;;  %v3998_v23 = vor.u32 1.1754944e-38, %v3997_v46 }
 0x322   : > { %v7403_v0 = vpop.eup %7402  ;;  %7408 = vrcp.f32 %v10343_v8  ;;  %v3960_v13 = vadd.f32 %v10307_v55, %v3959_v61  ;;  %v4010_v24 = vand.u32 2147483647, %v10343_v8  ;;  %vm3996_vm4 = vcmp.eq.f32.partialorder %v3995_v52, 8.507059e+37 }
 0x323   : > { %v3540_v28 = vadd.f32 %v3539_v37, %v3486_v11  ;;  %v3434_v30 = vpop.f32.mrf.mxu3  ;;  %v3975_v36 = vadd.f32 %v7399_v25, %v3974_v5  ;;  %v3987_v50 = vmul.f32 %v7403_v0, %v10309_v14  ;;  %vm3992_vm15 = vweird.f32 %v7403_v0 }
 0x324   : > { %v3964_v32 = vsel %vm10386_vm0, %v10307_v55, %v3960_v13  ;;  %vm3993_vm3 = vmor %vm3991_vm2, %vm3992_vm15  ;;  %v4012_v26 = vand.u32 2147483648, %v10343_v8  ;;  %vm4006_vm5 = vweird.f32 %v10343_v8  ;;  %vm10413_vm6 = vcmp.eq.f32.partialorder %v4010_v24, 8.507059e+37 }
 0x325   : > { %v7405_v20 = vpop.eup %7404  ;;  %v6462_v54 = vmul.f32 -1.442695, %v3540_v28  ;;  %v3380_v7 = vpop.f32.mrf.mxu1  ;;  %v3979_v44 = vsel %vm3978_vm13, %v7399_v25, %v3975_v36  ;;  %v3988_v16 = vsub.f32 1.0, %v3987_v50  ;;  %v3969_v14 = vsel %vm10365_vm1, %v3968_v57, %v3964_v32 }
 0x326   : > { %v10371_v48 = vadd.f32 1.0, %v7405_v20  ;;  %v3381_v12 = vadd.f32 %v3380_v7, %v9858_v21  ;;  %v3984_v17 = vsel %vm10352_vm11, %v3983_v51, %v3979_v44  ;;  %v3544_v34 = vpop.f32.mrf.mxu0  ;;  %v4013_v62 = vor.u32 1.1754944e-38, %v4012_v26  ;;  %v6884_v44 = vld [vmem:[%s11640_s9 + $0x60] sm:$0xff] }
 0x327   : > { %v7407_v58 = vpop.eup %7406  ;;  %7410 = vpow2.f32 %v6462_v54  ;;  %v4249_v37 = vpack.c.bf16 %v3984_v17, %v3954_v42  ;;  %v3989_v53 = vmul.f32 %v7403_v0, %v3988_v16  ;;  %5564 = vmatpush.bf16.msra.mxu3 %v6884_v44 }
 0x328   : > { %v10377_v47 = vpop.eup %7408  ;;  %7412 = vrcp.f32 %v10371_v48  ;;  %v10380_v3 = vadd.f32 1.0, %v7407_v58  ;;  %v3435_v9 = vadd.f32 %v3434_v30, %v3381_v12  ;;  %v4025_v28 = vand.u32 2147483647, %v10371_v48 }
 0x329   : > { %v4002_v49 = vmul.f32 %v10377_v47, %v10343_v8  ;;  %4485 = vmatmul.bf16.gmra.mxu1 %v4249_v37  ;;  %4593 = vmatmul.bf16.gmra.mxu2 %v4249_v37  ;;  %v3990_v4 = vadd.f32 %v7403_v0, %v3989_v53  ;;  %vm4007_vm7 = vweird.f32 %v10377_v47  ;;  %vm4021_vm11 = vweird.f32 %v10371_v48 }
 0x32a   : > { %7414 = vrcp.f32 %v10380_v3  ;;  %v6463_v18 = vmul.f32 -1.442695, %v3435_v9  ;;  %v4040_v19 = vand.u32 2147483647, %v10380_v3  ;;  %v4042_v15 = vand.u32 2147483648, %v10380_v3  ;;  %vm10431_vm9 = vmor %vm4006_vm5, %vm4007_vm7 }
 0x32b   : > { %v3488_v25 = vpop.f32.mrf.mxu2  ;;  %v3436_v2 = vpop.f32.mrf.mxu3  ;;  %v3994_v41 = vsel %vm3993_vm3, %v7403_v0, %v3990_v4  ;;  %v4003_v45 = vsub.f32 1.0, %v4002_v49  ;;  %vm4036_vm8 = vweird.f32 %v10380_v3  ;;  %v4027_v42 = vand.u32 2147483648, %v10371_v48 }
 0x32c   : > { %7416 = vpow2.f32 %v6463_v18  ;;  %v3489_v55 = vadd.f32 %v3488_v25, %v9875_v1  ;;  %v3999_v29 = vsel %vm3996_vm4, %v3998_v23, %v3994_v41  ;;  %vm10435_vm10 = vcmp.eq.f32.partialorder %v4040_v19, 8.507059e+37 }
 0x32d   : > { %v7411_v35 = vpop.eup %7410  ;;  %v3382_v22 = vpop.f32.mrf.mxu1  ;;  %v4250_v10 = vpack.c.bf16 %v3999_v29, %v3969_v14  ;;  %v4004_v27 = vmul.f32 %v10377_v47, %v4003_v45  ;;  %v4043_v7 = vor.u32 1.1754944e-38, %v4042_v15  ;;  %vm10455_vm14 = vcmp.eq.f32.partialorder %v4025_v28, 8.507059e+37 }
 0x32e   : > { %v10408_v60 = vpop.eup %7412  ;;  %v10410_v59 = vadd.f32 1.0, %v7411_v35  ;;  %v3543_v6 = vadd.f32 %v3542_v56, %v3489_v55  ;;  %v3383_v31 = vadd.f32 %v3382_v22, %v9858_v21  ;;  %v4028_v9 = vor.u32 1.1754944e-38, %v4027_v42  ;;  %v3547_v63 = vpop.f32.mrf.mxu0 }
 0x32f   : > { %4539 = vmatmul.bf16.gmra.mxu3 %v4250_v10  ;;  %4647 = vmatmul.bf16.gmra.mxu0 %v4250_v10  ;;  %v4005_v39 = vadd.f32 %v10377_v47, %v4004_v27  ;;  %v4017_v11 = vmul.f32 %v10408_v60, %v10371_v48  ;;  %vm4022_vm13 = vweird.f32 %v10408_v60 }
 0x330   : > { %v7415_v5 = vpop.eup %7414  ;;  %7418 = vrcp.f32 %v10410_v59  ;;  %v6464_v61 = vmul.f32 -1.442695, %v3543_v6  ;;  %v3437_v0 = vadd.f32 %v3436_v2, %v3383_v31  ;;  %v4055_v12 = vand.u32 2147483647, %v10410_v59  ;;  %vm10486_vm3 = vmor %vm4021_vm11, %vm4022_vm13 }
 0x331   : > { %v4032_v43 = vmul.f32 %v7415_v5, %v10380_v3  ;;  %v4018_v56 = vsub.f32 1.0, %v4017_v11  ;;  %v4009_v8 = vsel %vm10431_vm9, %v10377_v47, %v4005_v39  ;;  %vm4037_vm12 = vweird.f32 %v7415_v5  ;;  %v6876_v39 = vld [vmem:[%s11640_s9 + $0x20] sm:$0xff]  ;;  %v6883_v47 = vld [vmem:[%s11640_s9 + $0x58] sm:$0xff] }
 0x332   : > { %v7417_v30 = vpop.eup %7416  ;;  %7420 = vpow2.f32 %v6464_v61  ;;  %v6465_v36 = vmul.f32 -1.442695, %v3437_v0  ;;  %vm4051_vm1 = vweird.f32 %v10410_v59  ;;  %v4014_v57 = vsel %vm10413_vm6, %v4013_v62, %v4009_v8  ;;  %vm4038_vm15 = vmor %vm4036_vm8, %vm4037_vm12  ;;  %5510 = vmatpush.bf16.msra.mxu1 %v6876_v39  ;;  %5565 = vmatpush.bf16.msra.mxu3 %v6883_v47 }
 0x333   : > { %v10441_v33 = vadd.f32 1.0, %v7417_v30  ;;  %v3490_v52 = vpop.f32.mrf.mxu2  ;;  %v3439_v20 = vpop.f32.mrf.mxu3  ;;  %v4033_v54 = vsub.f32 1.0, %v4032_v43  ;;  %v4019_v16 = vmul.f32 %v10408_v60, %v4018_v56  ;;  %v4057_v4 = vand.u32 2147483648, %v10410_v59 }
 0x334   : > { %7422 = vpow2.f32 %v6465_v36  ;;  %v3491_v13 = vadd.f32 %v3490_v52, %v9875_v1  ;;  %vm10468_vm0 = vcmp.eq.f32.partialorder %v4055_v12, 8.507059e+37 }
 0x335   : > { %7424 = vrcp.f32 %v10441_v33  ;;  %v3385_v17 = vpop.f32.mrf.mxu1  ;;  %v4034_v46 = vmul.f32 %v7415_v5, %v4033_v54  ;;  %v4020_v25 = vadd.f32 %v10408_v60, %v4019_v16  ;;  %v4070_v55 = vand.u32 2147483647, %v10441_v33 }
 0x336   : > { %v7419_v58 = vpop.eup %7418  ;;  %v3545_v37 = vadd.f32 %v3544_v34, %v3491_v13  ;;  %v3386_v53 = vadd.f32 %v3385_v17, %v9858_v21  ;;  %v4058_v11 = vor.u32 1.1754944e-38, %v4057_v4  ;;  %vm4066_vm5 = vweird.f32 %v10441_v33  ;;  %v3549_v52 = vpop.f32.mrf.mxu0 }
 0x337   : > { %v4035_v49 = vadd.f32 %v7415_v5, %v4034_v46  ;;  %v4047_v32 = vmul.f32 %v7419_v58, %v10410_v59  ;;  %vm4052_vm2 = vweird.f32 %v7419_v58  ;;  %v4024_v19 = vsel %vm10486_vm3, %v10408_v60, %v4020_v25 }
 0x338   : > { %v7421_v18 = vpop.eup %7420  ;;  %v6466_v23 = vmul.f32 -1.442695, %v3545_v37  ;;  %v3440_v24 = vadd.f32 %v3439_v20, %v3386_v53  ;;  %vm4053_vm4 = vmor %vm4051_vm1, %vm4052_vm2  ;;  %v4029_v62 = vsel %vm10455_vm14, %v4028_v9, %v4024_v19  ;;  %vm10509_vm7 = vcmp.eq.f32.partialorder %v4070_v55, 8.507059e+37  ;;  %v6875_v9 = vld [vmem:[%s11640_s9 + $0x18] sm:$0xff]  ;;  %v6882_v55 = vld [vmem:[%s11640_s9 + $0x50] sm:$0xff] }
 0x339   : > { %v10472_v41 = vadd.f32 1.0, %v7421_v18  ;;  %v4039_v45 = vsel %vm4038_vm15, %v7415_v5, %v4035_v49  ;;  %v4048_v26 = vsub.f32 1.0, %v4047_v32  ;;  %v4072_v5 = vand.u32 2147483648, %v10441_v33  ;;  %5511 = vmatpush.bf16.msra.mxu1 %v6875_v9  ;;  %5566 = vmatpush.bf16.msra.mxu3 %v6882_v55 }
 0x33a   : > { %v7423_v14 = vpop.eup %7422  ;;  %7426 = vpow2.f32 %v6466_v23  ;;  %v6467_v29 = vmul.f32 -1.442695, %v3440_v24  ;;  %v4044_v40 = vsel %vm10435_vm10, %v4043_v7, %v4039_v45 }
 0x33b   : > { %v10477_v3 = vpop.eup %7424  ;;  %7428 = vrcp.f32 %v10472_v41  ;;  %v10480_v35 = vadd.f32 1.0, %v7423_v14  ;;  %v3493_v34 = vpop.f32.mrf.mxu2  ;;  %v4251_v10 = vpack.c.bf16 %v4044_v40, %v4014_v57  ;;  %v4049_v6 = vmul.f32 %v7419_v58, %v4048_v26  ;;  %v6874_v14 = vld [vmem:[%s11640_s9 + $0x10] sm:$0xff] }
 0x33c   : > { %v3441_v22 = vpop.f32.mrf.mxu3  ;;  %v4062_v31 = vmul.f32 %v10477_v3, %v10441_v33  ;;  %7430 = vpow2.f32 %v6467_v29  ;;  %v3494_v38 = vadd.f32 %v3493_v34, %v9875_v1  ;;  %vm4067_vm6 = vweird.f32 %v10477_v3 }
 0x33d   : > { %7432 = vrcp.f32 %v10480_v35  ;;  %v3387_v48 = vpop.f32.mrf.mxu1  ;;  %4490 = vmatmul.bf16.gmra.mxu1 %v4251_v10  ;;  %4598 = vmatmul.bf16.gmra.mxu2 %v4251_v10  ;;  %v4050_v15 = vadd.f32 %v7419_v58, %v4049_v6  ;;  %v4073_v8 = vor.u32 1.1754944e-38, %v4072_v5  ;;  %v4100_v54 = vand.u32 2147483647, %v10480_v35  ;;  %vm10533_vm8 = vmor %vm4066_vm5, %vm4067_vm6 }
 0x33e   : > { %v3548_v61 = vadd.f32 %v3547_v63, %v3494_v38  ;;  %v3388_v0 = vadd.f32 %v3387_v48, %v9858_v21  ;;  %v4063_v60 = vsub.f32 1.0, %v4062_v31  ;;  %v4102_v37 = vand.u32 2147483648, %v10480_v35  ;;  %5512 = vmatpush.bf16.msra.mxu1 %v6874_v14  ;;  %v3552_v5 = vpop.f32.mrf.mxu0 }
 0x33f   : > { %v4054_v43 = vsel %vm4053_vm4, %v7419_v58, %v4050_v15  ;;  %v4085_v53 = vand.u32 2147483647, %v10472_v41  ;;  %vm4096_vm9 = vweird.f32 %v10480_v35  ;;  %vm4081_vm10 = vweird.f32 %v10472_v41 }
 0x340   : > { %v7427_v28 = vpop.eup %7426  ;;  %v6468_v30 = vmul.f32 -1.442695, %v3548_v61  ;;  %v3442_v36 = vadd.f32 %v3441_v22, %v3388_v0  ;;  %v4059_v59 = vsel %vm10468_vm0, %v4058_v11, %v4054_v43  ;;  %v4064_v51 = vmul.f32 %v10477_v3, %v4063_v60 }
 0x341   : > { %v10516_v50 = vpop.eup %7428  ;;  %v10518_v42 = vadd.f32 1.0, %v7427_v28  ;;  %v4252_v20 = vpack.c.bf16 %v4059_v59, %v4029_v62  ;;  %vm10555_vm11 = vcmp.eq.f32.partialorder %v4100_v54, 8.507059e+37  ;;  %v4103_v45 = vor.u32 1.1754944e-38, %v4102_v37 }
 0x342   : > { %v7431_v7 = vpop.eup %7430  ;;  %7434 = vpow2.f32 %v6468_v30  ;;  %v6469_v44 = vmul.f32 -1.442695, %v3442_v36  ;;  %v4065_v13 = vadd.f32 %v10477_v3, %v4064_v51  ;;  %v4077_v16 = vmul.f32 %v10516_v50, %v10472_v41 }
 0x343   : > { %v10524_v12 = vpop.eup %7432  ;;  %7436 = vrcp.f32 %v10518_v42  ;;  %v10527_v17 = vadd.f32 1.0, %v7431_v7  ;;  %v3495_v46 = vpop.f32.mrf.mxu2  ;;  %4544 = vmatmul.bf16.gmra.mxu3 %v4252_v20  ;;  %4652 = vmatmul.bf16.gmra.mxu0 %v4252_v20  ;;  %vm4082_vm12 = vweird.f32 %v10516_v50  ;;  %vm10571_vm14 = vcmp.eq.f32.partialorder %v4085_v53, 8.507059e+37 }
 0x344   : > { %7438 = vpow2.f32 %v6469_v44  ;;  %v3496_v63 = vadd.f32 %v3495_v46, %v9875_v1  ;;  %v4069_v33 = vsel %vm10533_vm8, %v10477_v3, %v4065_v13  ;;  %v4092_v57 = vmul.f32 %v10524_v12, %v10480_v35  ;;  %v3444_v32 = vpop.f32.mrf.mxu3  ;;  %vm10604_vm0 = vmor %vm4081_vm10, %vm4082_vm12 }
 0x345   : > { %7440 = vrcp.f32 %v10527_v17  ;;  %v3390_v49 = vpop.f32.mrf.mxu1  ;;  %v4078_v4 = vsub.f32 1.0, %v4077_v16  ;;  %v4074_v2 = vsel %vm10509_vm7, %v4073_v8, %v4069_v33  ;;  %vm4097_vm13 = vweird.f32 %v10524_v12 }
 0x346   : > { %v3550_v18 = vadd.f32 %v3549_v52, %v3496_v63  ;;  %v3391_v23 = vadd.f32 %v3390_v49, %v9858_v21  ;;  %v4093_v24 = vsub.f32 1.0, %v4092_v57  ;;  %v4087_v31 = vand.u32 2147483648, %v10472_v41  ;;  %vm4098_vm15 = vmor %vm4096_vm9, %vm4097_vm13  ;;  %v3554_v25 = vpop.f32.mrf.mxu0 }
 0x347   : > { %v4079_v26 = vmul.f32 %v10516_v50, %v4078_v4  ;;  %vm4111_vm1 = vweird.f32 %v10518_v42  ;;  %v4115_v0 = vand.u32 2147483647, %v10518_v42  ;;  %v4117_v60 = vand.u32 2147483648, %v10518_v42 }
 0x348   : > { %v7435_v29 = vpop.eup %7434  ;;  %v6470_v40 = vmul.f32 -1.442695, %v3550_v18  ;;  %v3445_v3 = vadd.f32 %v3444_v32, %v3391_v23  ;;  %v4094_v34 = vmul.f32 %v10524_v12, %v4093_v24  ;;  %v4088_v54 = vor.u32 1.1754944e-38, %v4087_v31 }
 0x349   : > { %v10575_v10 = vpop.eup %7436  ;;  %v10577_v27 = vadd.f32 1.0, %v7435_v29  ;;  %v4080_v6 = vadd.f32 %v10516_v50, %v4079_v26  ;;  %vm10617_vm3 = vcmp.eq.f32.partialorder %v4115_v0, 8.507059e+37  ;;  %v4130_v63 = vand.u32 2147483647, %v10527_v17 }
 0x34a   : > { %v7439_v38 = vpop.eup %7438  ;;  %7442 = vpow2.f32 %v6470_v40  ;;  %v6471_v19 = vmul.f32 -1.442695, %v3445_v3  ;;  %v4095_v39 = vadd.f32 %v10524_v12, %v4094_v34  ;;  %v4107_v48 = vmul.f32 %v10575_v10, %v10518_v42 }
 0x34b   : > { %v10585_v15 = vpop.eup %7440  ;;  %7444 = vrcp.f32 %v10577_v27  ;;  %v10588_v11 = vadd.f32 1.0, %v7439_v38  ;;  %v3498_v61 = vpop.f32.mrf.mxu2  ;;  %v4084_v36 = vsel %vm10604_vm0, %v10516_v50, %v4080_v6  ;;  %vm4112_vm2 = vweird.f32 %v10575_v10 }
 0x34c   : > { %v4122_v62 = vmul.f32 %v10585_v15, %v10527_v17  ;;  %7446 = vpow2.f32 %v6471_v19  ;;  %v3499_v43 = vadd.f32 %v3498_v61, %v9875_v1  ;;  %v4099_v56 = vsel %vm4098_vm15, %v10524_v12, %v4095_v39  ;;  %v3446_v8 = vpop.f32.mrf.mxu3  ;;  %vm4113_vm5 = vmor %vm4111_vm1, %vm4112_vm2 }
 0x34d   : > { %7448 = vrcp.f32 %v10588_v11  ;;  %v3392_v35 = vpop.f32.mrf.mxu1  ;;  %v4104_v30 = vsel %vm10555_vm11, %v4103_v45, %v4099_v56  ;;  %v4108_v59 = vsub.f32 1.0, %v4107_v48  ;;  %v4118_v50 = vor.u32 1.1754944e-38, %v4117_v60 }
 0x34e   : > { %v3553_v51 = vadd.f32 %v3552_v5, %v3499_v43  ;;  %v3393_v52 = vadd.f32 %v3392_v35, %v9858_v21  ;;  %v4253_v20 = vpack.c.bf16 %v4104_v30, %v4074_v2  ;;  %v4123_v41 = vsub.f32 1.0, %v4122_v62 }
 0x34f   : > { %v4109_v7 = vmul.f32 %v10575_v10, %v4108_v59  ;;  %v4089_v37 = vsel %vm10571_vm14, %v4088_v54, %v4084_v36  ;;  %vm4127_vm4 = vweird.f32 %v10585_v15  ;;  %v4132_v33 = vand.u32 2147483648, %v10527_v17 }
 0x350   : > { %v7443_v13 = vpop.eup %7442  ;;  %v6472_v16 = vmul.f32 -1.442695, %v3553_v51  ;;  %v3447_v12 = vadd.f32 %v3446_v8, %v3393_v52  ;;  %4495 = vmatmul.bf16.gmra.mxu1 %v4253_v20  ;;  %4603 = vmatmul.bf16.gmra.mxu2 %v4253_v20  ;;  %v4124_v21 = vmul.f32 %v10585_v15, %v4123_v41  ;;  %v4160_v24 = vand.u32 2147483647, %v10588_v11 }
 0x351   : > { %v10622_v46 = vpop.eup %7444  ;;  %v10624_v58 = vadd.f32 1.0, %v7443_v13  ;;  %v4110_v53 = vadd.f32 %v10575_v10, %v4109_v7  ;;  %vm4126_vm6 = vweird.f32 %v10527_v17  ;;  %vm10654_vm8 = vcmp.eq.f32.partialorder %v4130_v63, 8.507059e+37  ;;  %v4291_v7 = vld [vmem:[#allocation13] sm:$0x3] }
 0x352   : > { %v7447_v47 = vpop.eup %7446  ;;  %7450 = vpow2.f32 %v6472_v16  ;;  %v6473_v9 = vmul.f32 -1.442695, %v3447_v12  ;;  %v4125_v18 = vadd.f32 %v10585_v15, %v4124_v21  ;;  %vm10650_vm7 = vmor %vm4126_vm6, %vm4127_vm4  ;;  %vm4156_vm9 = vweird.f32 %v10588_v11 }
 0x353   : > { %v7449_v57 = vpop.eup %7448  ;;  %7452 = vrcp.f32 %v10624_v58  ;;  %v10637_v49 = vadd.f32 1.0, %v7447_v47  ;;  %v3500_v32 = vpop.f32.mrf.mxu2  ;;  %v4114_v4 = vsel %vm4113_vm5, %v10575_v10, %v4110_v53  ;;  %v4162_v14 = vand.u32 2147483648, %v10588_v11 }
 0x354   : > { %7454 = vpow2.f32 %v6473_v9  ;;  %v3501_v23 = vadd.f32 %v3500_v32, %v9875_v1  ;;  %v4119_v42 = vsel %vm10617_vm3, %v4118_v50, %v4114_v4  ;;  %v4152_v45 = vmul.f32 %v7449_v57, %v10588_v11 }
 0x355   : > { %7456 = vrcp.f32 %v10637_v49  ;;  %v4254_v2 = vpack.c.bf16 %v4119_v42, %v4089_v37  ;;  %v4129_v17 = vsel %vm10650_vm7, %v10585_v15, %v4125_v18  ;;  %v4133_v29 = vor.u32 1.1754944e-38, %v4132_v33 }
 0x356   : > { %v3555_v26 = vadd.f32 %v3554_v25, %v3501_v23  ;;  %v4153_v40 = vsub.f32 1.0, %v4152_v45  ;;  %v4137_v3 = vmul.f32 %v10622_v46, %v10577_v27  ;;  %vm4157_vm10 = vweird.f32 %v7449_v57 }
 0x357   : > { %4549 = vmatmul.bf16.gmra.mxu3 %v4254_v2  ;;  %4657 = vmatmul.bf16.gmra.mxu0 %v4254_v2  ;;  %vm10665_vm11 = vcmp.eq.f32.partialorder %v4160_v24, 8.507059e+37  ;;  %vm4141_vm12 = vweird.f32 %v10577_v27  ;;  %vm4142_vm13 = vweird.f32 %v10622_v46  ;;  %v4163_v48 = vor.u32 1.1754944e-38, %v4162_v14  ;;  %vm4158_vm14 = vmor %vm4156_vm9, %vm4157_vm10  ;;  %v6881_v24 = vld [vmem:[%s11640_s9 + $0x48] sm:$0xff] }
 0x358   : > { %v7451_v34 = vpop.eup %7450  ;;  %v6474_v22 = vmul.f32 -1.442695, %v3555_v26  ;;  %v4154_v38 = vmul.f32 %v7449_v57, %v4153_v40  ;;  %v4138_v19 = vsub.f32 1.0, %v4137_v3  ;;  %v4145_v15 = vand.u32 2147483647, %v10577_v27  ;;  %vm10699_vm1 = vmor %vm4141_vm12, %vm4142_vm13  ;;  %5567 = vmatpush.bf16.msra.mxu3 %v6881_v24  ;;  %v6873_v3 = vld [vmem:[%s11640_s9 + $0x8] sm:$0xff] }
 0x359   : > { %v7453_v6 = vpop.eup %7452  ;;  %v10670_v31 = vadd.f32 1.0, %v7451_v34  ;;  %v4147_v43 = vand.u32 2147483648, %v10577_v27  ;;  %v4175_v35 = vand.u32 2147483647, %v10624_v58  ;;  %v4177_v51 = vand.u32 2147483648, %v10624_v58  ;;  %5513 = vmatpush.bf16.msra.mxu1 %v6873_v3 }
 0x35a   : > { %v7455_v39 = vpop.eup %7454  ;;  %7458 = vpow2.f32 %v6474_v22  ;;  %v4167_v5 = vmul.f32 %v7453_v6, %v10624_v58  ;;  %v4155_v60 = vadd.f32 %v7449_v57, %v4154_v38  ;;  %v4139_v62 = vmul.f32 %v10622_v46, %v4138_v19 }
 0x35b   : > { %v10675_v61 = vpop.eup %7456  ;;  %v10677_v0 = vadd.f32 1.0, %v7455_v39  ;;  %7460 = vrcp.f32 %v10670_v31  ;;  %v4134_v52 = vsel %vm10654_vm8, %v4133_v29, %v4129_v17  ;;  %vm4172_vm15 = vweird.f32 %v7453_v6 }
 0x35c   : > { %v4182_v56 = vmul.f32 %v10675_v61, %v10637_v49  ;;  %v4168_v28 = vsub.f32 1.0, %v4167_v5  ;;  %v4159_v36 = vsel %vm4158_vm14, %v7449_v57, %v4155_v60  ;;  %v4140_v59 = vadd.f32 %v10622_v46, %v4139_v62 }
 0x35d   : > { %v4466_v30 = vpop.f32.mrf.mxu1  ;;  %7462 = vrcp.f32 %v10677_v0  ;;  %v4164_v20 = vsel %vm10665_vm11, %v4163_v48, %v4159_v36  ;;  %vm4146_vm0 = vcmp.eq.f32.partialorder %v4145_v15, 8.507059e+37  ;;  %v4148_v16 = vor.u32 1.1754944e-38, %v4147_v43 }
 0x35e   : > { %v4169_v41 = vmul.f32 %v7453_v6, %v4168_v28  ;;  %v4255_v8 = vpack.c.bf16 %v4164_v20, %v4134_v52  ;;  %v4144_v54 = vsel %vm10699_vm1, %v10622_v46, %v4140_v59  ;;  %v4183_v44 = vsub.f32 1.0, %v4182_v56 }
 0x35f   : > { %vm4171_vm2 = vweird.f32 %v10624_v58  ;;  %vm4176_vm4 = vcmp.eq.f32.partialorder %v4175_v35, 8.507059e+37  ;;  %v4178_v21 = vor.u32 1.1754944e-38, %v4177_v51  ;;  %v4149_v46 = vsel %vm4146_vm0, %v4148_v16, %v4144_v54 }
 0x360   : > { %v7459_v13 = vpop.eup %7458  ;;  %v4170_v12 = vadd.f32 %v7453_v6, %v4169_v41  ;;  %4500 = vmatmul.bf16.gmra.mxu1 %v4255_v8  ;;  %4608 = vmatmul.bf16.gmra.mxu2 %v4255_v8  ;;  %vm4173_vm3 = vmor %vm4171_vm2, %vm4172_vm15  ;;  %v4184_v37 = vmul.f32 %v10675_v61, %v4183_v44  ;;  %v10712_v9 = vperm.slane %v4291_v7, 0  ;;  %vm4187_vm5 = vweird.f32 %v10675_v61 }
 0x361   : > { %v4628_v27 = vpop.f32.mrf.mxu0  ;;  %v10707_v50 = vadd.f32 1.0, %v7459_v13  ;;  %v10710_v53 = vpop.eup %7460  ;;  %v4192_v32 = vand.u32 2147483648, %v10637_v49  ;;  %vm4186_vm6 = vweird.f32 %v10637_v49  ;;  %v4190_v18 = vand.u32 2147483647, %v10637_v49 }
 0x362   : > { %v4174_v47 = vsel %vm4173_vm3, %v7453_v6, %v4170_v12  ;;  %v4185_v57 = vadd.f32 %v10675_v61, %v4184_v37  ;;  %vm10724_vm7 = vmor %vm4186_vm6, %vm4187_vm5  ;;  %v4220_v2 = vand.u32 2147483647, %v10677_v0  ;;  %v10729_v45 = vperm.slane %v4291_v7, 1 }
 0x363   : > { %v4574_v63 = vpop.f32.mrf.mxu2  ;;  %v7463_v58 = vpop.eup %7462  ;;  %7464 = vrcp.f32 %v10707_v50  ;;  %v4179_v33 = vsel %vm4176_vm4, %v4178_v21, %v4174_v47  ;;  %v4222_v55 = vand.u32 2147483648, %v10677_v0  ;;  %v4197_v1 = vmul.f32 %v10710_v53, %v10670_v31 }
 0x364   : > { %v4256_v4 = vpack.c.bf16 %v4179_v33, %v4149_v46  ;;  %v4212_v23 = vmul.f32 %v7463_v58, %v10677_v0  ;;  %v4189_v26 = vsel %vm10724_vm7, %v10675_v61, %v4185_v57  ;;  %v4467_v17 = vadd.f32 %v4466_v30, %v10712_v9 }
 0x365   : > { %v4468_v42 = vpop.f32.mrf.mxu1  ;;  %v4193_v29 = vor.u32 1.1754944e-38, %v4192_v32  ;;  %vm4216_vm8 = vweird.f32 %v10677_v0  ;;  %v4575_v40 = vadd.f32 %v4574_v63, %v10729_v45  ;;  %vm4191_vm9 = vcmp.eq.f32.partialorder %v4190_v18, 8.507059e+37  ;;  %v6880_v63 = vld [vmem:[%s11640_s9 + $0x40] sm:$0xff] }
 0x366   : > { %v4213_v49 = vsub.f32 1.0, %v4212_v23  ;;  %vm4217_vm10 = vweird.f32 %v7463_v58  ;;  %v4198_v22 = vsub.f32 1.0, %v4197_v1  ;;  %vm10743_vm11 = vcmp.eq.f32.partialorder %v4220_v2, 8.507059e+37  ;;  %5568 = vmatpush.bf16.msra.mxu3 %v6880_v63 }
 0x367   : > { %v4520_v14 = vpop.f32.mrf.mxu3  ;;  %4554 = vmatmul.bf16.gmra.mxu3 %v4256_v4  ;;  %4662 = vmatmul.bf16.gmra.mxu0 %v4256_v4  ;;  %v4194_v38 = vsel %vm4191_vm9, %v4193_v29, %v4189_v26  ;;  %v4629_v39 = vadd.f32 %v4628_v27, %v4575_v40  ;;  %v4469_v48 = vadd.f32 %v4468_v42, %v10712_v9  ;;  %v4223_v5 = vor.u32 1.1754944e-38, %v4222_v55  ;;  %vm4218_vm13 = vmor %vm4216_vm8, %vm4217_vm10 }
 0x368   : > { %v4214_v34 = vmul.f32 %v7463_v58, %v4213_v49  ;;  %v4199_v61 = vmul.f32 %v10710_v53, %v4198_v22  ;;  %vm4201_vm12 = vweird.f32 %v10670_v31  ;;  %vm4202_vm14 = vweird.f32 %v10710_v53 }
 0x369   : > { %v4630_v10 = vpop.f32.mrf.mxu0  ;;  %v7465_v6 = vpop.eup %7464  ;;  %v6604_v62 = vmul.f32 -1.442695, %v4629_v39  ;;  %v4205_v43 = vand.u32 2147483647, %v10670_v31  ;;  %v4207_v30 = vand.u32 2147483648, %v10670_v31  ;;  %v4521_v36 = vadd.f32 %v4520_v14, %v4467_v17  ;;  %vm10766_vm1 = vmor %vm4201_vm12, %vm4202_vm14 }
 0x36a   : > { %v4215_v15 = vadd.f32 %v7463_v58, %v4214_v34  ;;  %v4227_v56 = vmul.f32 %v7465_v6, %v10707_v50  ;;  %v4200_v35 = vadd.f32 %v10710_v53, %v4199_v61  ;;  %v4235_v11 = vand.u32 2147483647, %v10707_v50 }
 0x36b   : > { %v4576_v60 = vpop.f32.mrf.mxu2  ;;  %7466 = vpow2.f32 %v6604_v62  ;;  %v4237_v41 = vand.u32 2147483648, %v10707_v50  ;;  %v6603_v8 = vmul.f32 -1.442695, %v4521_v36  ;;  %vm4232_vm15 = vweird.f32 %v7465_v6 }
 0x36c   : > { %v4219_v28 = vsel %vm4218_vm13, %v7463_v58, %v4215_v15  ;;  %v4228_v51 = vsub.f32 1.0, %v4227_v56  ;;  %v4577_v0 = vadd.f32 %v4576_v60, %v10729_v45  ;;  %v4204_v12 = vsel %vm10766_vm1, %v10710_v53, %v4200_v35  ;;  %v6872_v53 = vld [vmem:[%s11640_s9] sm:$0xff] }
 0x36d   : > { %v4224_v59 = vsel %vm10743_vm11, %v4223_v5, %v4219_v28  ;;  %vm4231_vm0 = vweird.f32 %v10707_v50  ;;  %7468 = vpow2.f32 %v6603_v8  ;;  %v4208_v27 = vor.u32 1.1754944e-38, %v4207_v30  ;;  %5514 = vmatpush.bf16.msra.mxu1 %v6872_v53 }
 0x36e   : > { %v4471_v52 = vpop.f32.mrf.mxu1  ;;  %v4257_v20 = vpack.c.bf16 %v4224_v59, %v4194_v38  ;;  %v4229_v44 = vmul.f32 %v7465_v6, %v4228_v51  ;;  %v4631_v13 = vadd.f32 %v4630_v10, %v4577_v0  ;;  %vm4206_vm2 = vcmp.eq.f32.partialorder %v4205_v43, 8.507059e+37  ;;  %vm4233_vm3 = vmor %vm4231_vm0, %vm4232_vm15 }
 0x36f   : > { %v4522_v54 = vpop.f32.mrf.mxu3  ;;  %v4238_v46 = vor.u32 1.1754944e-38, %v4237_v41  ;;  %v4209_v58 = vsel %vm4206_vm2, %v4208_v27, %v4204_v12  ;;  %vm4236_vm4 = vcmp.eq.f32.partialorder %v4235_v11, 8.507059e+37  ;;  %v4472_v26 = vadd.f32 %v4471_v52, %v10712_v9 }
 0x370   : > { %v4523_v16 = vadd.f32 %v4522_v54, %v4469_v48  ;;  %4505 = vmatmul.bf16.gmra.mxu1 %v4257_v20  ;;  %4613 = vmatmul.bf16.gmra.mxu2 %v4257_v20  ;;  %v4230_v21 = vadd.f32 %v7465_v6, %v4229_v44  ;;  %v6606_v31 = vmul.f32 -1.442695, %v4631_v13 }
 0x371   : > { %v4633_v47 = vpop.f32.mrf.mxu0  ;;  %v7467_v50 = vpop.eup %7466 }
 0x372   : > { %v6605_v37 = vmul.f32 -1.442695, %v4523_v16  ;;  %v4234_v33 = vsel %vm4233_vm3, %v7465_v6, %v4230_v21  ;;  %7470 = vpow2.f32 %v6606_v31  ;;  %v10780_v32 = vadd.f32 1.0, %v7467_v50 }
 0x373   : > { %v4239_v4 = vsel %vm4236_vm4, %v4238_v46, %v4234_v33  ;;  %v7469_v24 = vpop.eup %7468 }
 0x374   : > { %v4579_v57 = vpop.f32.mrf.mxu2  ;;  %7472 = vpow2.f32 %v6605_v37  ;;  %v4258_v23 = vpack.c.bf16 %v4239_v4, %v4209_v58  ;;  %v10784_v2 = vadd.f32 1.0, %v7469_v24  ;;  %v4843_v14 = vand.u32 2147483648, %v10780_v32 }
 0x375   : > { %v4580_v18 = vadd.f32 %v4579_v57, %v10729_v45  ;;  %7474 = vrcp.f32 %v10780_v32  ;;  %vm4837_vm5 = vweird.f32 %v10780_v32  ;;  %v4841_v48 = vand.u32 2147483647, %v10780_v32 }
 0x376   : > { %v4473_v42 = vpop.f32.mrf.mxu1  ;;  %7476 = vrcp.f32 %v10784_v2  ;;  %v4828_v34 = vand.u32 2147483648, %v10784_v2  ;;  %v10803_v5 = vor.u32 1.1754944e-38, %v4843_v14  ;;  %vm4822_vm6 = vweird.f32 %v10784_v2 }
 0x377   : > { %v4634_v25 = vadd.f32 %v4633_v47, %v4580_v18  ;;  %4559 = vmatmul.bf16.gmra.mxu3 %v4258_v23  ;;  %4667 = vmatmul.bf16.gmra.mxu0 %v4258_v23  ;;  %v4525_v55 = vpop.f32.mrf.mxu3  ;;  %v4474_v61 = vadd.f32 %v4473_v42, %v10712_v9  ;;  %v4826_v43 = vand.u32 2147483647, %v10784_v2  ;;  %vm10817_vm8 = vcmp.eq.f32.partialorder %v4841_v48, 8.507059e+37 }
 0x378   : > { %v7471_v1 = vpop.eup %7470  ;;  %v4526_v17 = vadd.f32 %v4525_v55, %v4472_v26  ;;  %v4829_v35 = vor.u32 1.1754944e-38, %v4828_v34 }
 0x379   : > { %v6608_v49 = vmul.f32 -1.442695, %v4634_v25  ;;  %v10789_v40 = vadd.f32 1.0, %v7471_v1  ;;  %v4635_v3 = vpop.f32.mrf.mxu0  ;;  %vm10828_vm11 = vcmp.eq.f32.partialorder %v4826_v43, 8.507059e+37 }
 0x37a   : > { %v7473_v29 = vpop.eup %7472  ;;  %v6607_v10 = vmul.f32 -1.442695, %v4526_v17 }
 0x37b   : > { %7478 = vpow2.f32 %v6608_v49  ;;  %v10792_v22 = vadd.f32 1.0, %v7473_v29  ;;  %v10794_v38 = vpop.eup %7474  ;;  %v4873_v19 = vand.u32 2147483648, %v10789_v40  ;;  %v4871_v11 = vand.u32 2147483647, %v10789_v40 }
 0x37c   : > { %v4581_v6 = vpop.f32.mrf.mxu2  ;;  %7480 = vrcp.f32 %v10789_v40  ;;  %v4833_v15 = vmul.f32 %v10794_v38, %v10780_v32  ;;  %v10809_v56 = vpop.eup %7476  ;;  %vm4838_vm7 = vweird.f32 %v10794_v38  ;;  %vm4867_vm9 = vweird.f32 %v10789_v40 }
 0x37d   : > { %v4582_v39 = vadd.f32 %v4581_v6, %v10729_v45  ;;  %7482 = vrcp.f32 %v10792_v22  ;;  %v10812_v30 = vor.u32 1.1754944e-38, %v4873_v19  ;;  %v4818_v59 = vmul.f32 %v10809_v56, %v10784_v2  ;;  %vm10847_vm14 = vmor %vm4837_vm5, %vm4838_vm7 }
 0x37e   : > { %7484 = vpow2.f32 %v6607_v10  ;;  %v4834_v28 = vsub.f32 1.0, %v4833_v15  ;;  %v4858_v51 = vand.u32 2147483648, %v10792_v22  ;;  %vm4852_vm10 = vweird.f32 %v10792_v22 }
 0x37f   : > { %v4636_v60 = vadd.f32 %v4635_v3, %v4582_v39  ;;  %v4476_v62 = vpop.f32.mrf.mxu1  ;;  %v4527_v52 = vpop.f32.mrf.mxu3  ;;  %v4819_v13 = vsub.f32 1.0, %v4818_v59  ;;  %v4856_v12 = vand.u32 2147483647, %v10792_v22  ;;  %vm4823_vm12 = vweird.f32 %v10809_v56 }
 0x380   : > { %v4835_v41 = vmul.f32 %v10794_v38, %v4834_v28  ;;  %v4477_v54 = vadd.f32 %v4476_v62, %v10712_v9  ;;  %v4528_v7 = vadd.f32 %v4527_v52, %v4474_v61  ;;  %vm10839_vm13 = vcmp.eq.f32.partialorder %v4871_v11, 8.507059e+37  ;;  %vm10866_vm15 = vmor %vm4822_vm6, %vm4823_vm12 }
 0x381   : > { %v7479_v36 = vpop.eup %7478  ;;  %v6610_v0 = vmul.f32 -1.442695, %v4636_v60  ;;  %v4820_v46 = vmul.f32 %v10809_v56, %v4819_v13  ;;  %vm10858_vm1 = vcmp.eq.f32.partialorder %v4856_v12, 8.507059e+37  ;;  %v4859_v17 = vor.u32 1.1754944e-38, %v4858_v51 }
 0x382   : > { %v10824_v8 = vadd.f32 1.0, %v7479_v36  ;;  %v7481_v44 = vpop.eup %7480  ;;  %v6609_v31 = vmul.f32 -1.442695, %v4528_v7  ;;  %v4836_v50 = vadd.f32 %v10794_v38, %v4835_v41 }
 0x383   : > { %7486 = vpow2.f32 %v6610_v0  ;;  %v7483_v27 = vpop.eup %7482  ;;  %v4863_v21 = vmul.f32 %v7481_v44, %v10789_v40  ;;  %v4821_v24 = vadd.f32 %v10809_v56, %v4820_v46  ;;  %vm4868_vm0 = vweird.f32 %v7481_v44 }
 0x384   : > { %7488 = vrcp.f32 %v10824_v8  ;;  %v7485_v37 = vpop.eup %7484  ;;  %v4848_v47 = vmul.f32 %v7483_v27, %v10792_v22  ;;  %v4638_v53 = vpop.f32.mrf.mxu0  ;;  %v4840_v42 = vsel %vm10847_vm14, %v10794_v38, %v4836_v50  ;;  %vm4853_vm2 = vweird.f32 %v7483_v27  ;;  %vm10883_vm3 = vmor %vm4867_vm9, %vm4868_vm0 }
 0x385   : > { %v4584_v63 = vpop.f32.mrf.mxu2  ;;  %v4864_v57 = vsub.f32 1.0, %v4863_v21  ;;  %v10851_v4 = vadd.f32 1.0, %v7485_v37  ;;  %7490 = vpow2.f32 %v6609_v31  ;;  %v4825_v14 = vsel %vm10866_vm15, %v10809_v56, %v4821_v24  ;;  %vm4854_vm4 = vmor %vm4852_vm10, %vm4853_vm2 }
 0x386   : > { %v4585_v18 = vadd.f32 %v4584_v63, %v10729_v45  ;;  %v4849_v23 = vsub.f32 1.0, %v4848_v47  ;;  %v4845_v34 = vsel %vm10817_vm8, %v10803_v5, %v4840_v42  ;;  %v4830_v48 = vsel %vm10828_vm11, %v4829_v35, %v4825_v14 }
 0x387   : > { %v4865_v26 = vmul.f32 %v7481_v44, %v4864_v57  ;;  %7492 = vrcp.f32 %v10851_v4  ;;  %v4478_v19 = vpop.f32.mrf.mxu1  ;;  %v4901_v61 = vand.u32 2147483647, %v10824_v8  ;;  %v4903_v62 = vand.u32 2147483648, %v10824_v8 }
 0x388   : > { %v4639_v49 = vadd.f32 %v4638_v53, %v4585_v18  ;;  %v4850_v1 = vmul.f32 %v7483_v27, %v4849_v23  ;;  %vm4897_vm5 = vweird.f32 %v10824_v8  ;;  %vm4882_vm9 = vweird.f32 %v10851_v4 }
 0x389   : > { %v7487_v55 = vpop.eup %7486  ;;  %v4866_v10 = vadd.f32 %v7481_v44, %v4865_v26  ;;  %vm10916_vm7 = vcmp.eq.f32.partialorder %v4901_v61, 8.507059e+37  ;;  %v4886_v23 = vand.u32 2147483647, %v10851_v4 }
 0x38a   : > { %v10874_v29 = vpop.eup %7488  ;;  %v10876_v2 = vadd.f32 1.0, %v7487_v55  ;;  %v6612_v3 = vmul.f32 -1.442695, %v4639_v49  ;;  %v4530_v39 = vpop.f32.mrf.mxu3  ;;  %v4851_v15 = vadd.f32 %v7483_v27, %v4850_v1 }
 0x38b   : > { %v4893_v38 = vmul.f32 %v10874_v29, %v10824_v8  ;;  %v7491_v60 = vpop.eup %7490  ;;  %v4531_v5 = vadd.f32 %v4530_v39, %v4477_v54  ;;  %v4870_v40 = vsel %vm10883_vm3, %v7481_v44, %v4866_v10  ;;  %v4479_v54 = vadd.f32 %v4478_v19, %v10712_v9 }
 0x38c   : > { %7494 = vrcp.f32 %v10876_v2  ;;  %v10899_v43 = vadd.f32 1.0, %v7491_v60  ;;  %v4875_v28 = vsel %vm10839_vm13, %v10812_v30, %v4870_v40  ;;  %v4855_v35 = vsel %vm4854_vm4, %v7483_v27, %v4851_v15  ;;  %v4640_v20 = vpop.f32.mrf.mxu0 }
 0x38d   : > { %7496 = vpow2.f32 %v6612_v3  ;;  %v4586_v56 = vpop.f32.mrf.mxu2  ;;  %v10904_v36 = vpop.eup %7492  ;;  %v6611_v59 = vmul.f32 -1.442695, %v4531_v5  ;;  %v5358_v0 = vpack.c.bf16 %v4875_v28, %v4845_v34  ;;  %v4860_v22 = vsel %vm10858_vm1, %v4859_v17, %v4855_v35 }
 0x38e   : > { %v4587_v51 = vadd.f32 %v4586_v56, %v10729_v45  ;;  %v4878_v52 = vmul.f32 %v10904_v36, %v10851_v4  ;;  %7498 = vrcp.f32 %v10899_v43  ;;  %v5357_v11 = vpack.c.bf16 %v4860_v22, %v4830_v48 }
 0x38f   : > { %v4894_v41 = vsub.f32 1.0, %v4893_v38  ;;  %7500 = vpow2.f32 %v6611_v59  ;;  %5569 = vmatmul.bf16.vlgmr.msra.gmra.mxu3 %v5358_v0  ;;  %vm4898_vm6 = vweird.f32 %v10874_v29  ;;  %v4904_v27 = vor.u32 1.1754944e-38, %v4903_v62 }
 0x390   : > { %v4641_v30 = vadd.f32 %v4640_v20, %v4587_v51  ;;  %5515 = vmatmul.bf16.vlgmr.msra.gmra.mxu1 %v5357_v11  ;;  %v4879_v44 = vsub.f32 1.0, %v4878_v52  ;;  %vm4927_vm8 = vweird.f32 %v10876_v2  ;;  %v4931_v47 = vand.u32 2147483647, %v10876_v2  ;;  %vm10937_vm10 = vmor %vm4897_vm5, %vm4898_vm6 }
 0x391   : > { %v4895_v7 = vmul.f32 %v10874_v29, %v4894_v41  ;;  %v4933_v50 = vand.u32 2147483648, %v10876_v2  ;;  %vm4883_vm12 = vweird.f32 %v10904_v36  ;;  %vm10961_vm1 = vcmp.eq.f32.partialorder %v4886_v23, 8.507059e+37 }
 0x392   : > { %v7495_v13 = vpop.eup %7494  ;;  %v6614_v16 = vmul.f32 -1.442695, %v4641_v30  ;;  %v4532_v37 = vpop.f32.mrf.mxu3  ;;  %v4880_v18 = vmul.f32 %v10904_v36, %v4879_v44  ;;  %vm10948_vm13 = vcmp.eq.f32.partialorder %v4931_v47, 8.507059e+37  ;;  %vm10957_vm14 = vmor %vm4882_vm9, %vm4883_vm12  ;;  %v4888_v34 = vand.u32 2147483648, %v10851_v4 }
 0x393   : > { %v7497_v21 = vpop.eup %7496  ;;  %v4923_v31 = vmul.f32 %v7495_v13, %v10876_v2  ;;  %v4896_v46 = vadd.f32 %v10874_v29, %v4895_v7  ;;  %v4533_v53 = vadd.f32 %v4532_v37, %v4479_v54  ;;  %vm4928_vm11 = vweird.f32 %v7495_v13 }
 0x394   : > { %v10924_v63 = vadd.f32 1.0, %v7497_v21  ;;  %7502 = vpow2.f32 %v6614_v16  ;;  %v10927_v58 = vpop.eup %7498  ;;  %v4481_v33 = vpop.f32.mrf.mxu1  ;;  %v4881_v55 = vadd.f32 %v10904_v36, %v4880_v18  ;;  %v4934_v8 = vor.u32 1.1754944e-38, %v4933_v50  ;;  %vm4929_vm15 = vmor %vm4927_vm8, %vm4928_vm11 }
 0x395   : > { %v4924_v57 = vsub.f32 1.0, %v4923_v31  ;;  %v7501_v42 = vpop.eup %7500  ;;  %v6613_v24 = vmul.f32 -1.442695, %v4533_v53  ;;  %v4900_v26 = vsel %vm10937_vm10, %v10874_v29, %v4896_v46  ;;  %v4908_v14 = vmul.f32 %v10927_v58, %v10899_v43 }
 0x396   : > { %7504 = vrcp.f32 %v10924_v63  ;;  %v10942_v32 = vadd.f32 1.0, %v7501_v42  ;;  %v4482_v6 = vadd.f32 %v4481_v33, %v10712_v9  ;;  %v4905_v38 = vsel %vm10916_vm7, %v4904_v27, %v4900_v26 }
 0x397   : > { %v4925_v49 = vmul.f32 %v7495_v13, %v4924_v57  ;;  %7506 = vpow2.f32 %v6613_v24  ;;  %v4909_v19 = vsub.f32 1.0, %v4908_v14  ;;  %vm4913_vm0 = vweird.f32 %v10927_v58 }
 0x398   : > { %7508 = vrcp.f32 %v10942_v32  ;;  %v4885_v4 = vsel %vm10957_vm14, %v10904_v36, %v4881_v55  ;;  %v4918_v61 = vand.u32 2147483648, %v10899_v43  ;;  %v4916_v56 = vand.u32 2147483647, %v10899_v43 }
 0x399   : > { %v4926_v17 = vadd.f32 %v7495_v13, %v4925_v49  ;;  %v4910_v62 = vmul.f32 %v10927_v58, %v4909_v19  ;;  %v4889_v59 = vor.u32 1.1754944e-38, %v4888_v34  ;;  %vm4912_vm2 = vweird.f32 %v10899_v43 }
 0x39a   : > { %v7503_v10 = vpop.eup %7502  ;;  %v4589_v48 = vpop.f32.mrf.mxu2  ;;  %vm4957_vm3 = vweird.f32 %v10924_v63  ;;  %vm4914_vm4 = vmor %vm4912_vm2, %vm4913_vm0  ;;  %v4919_v41 = vor.u32 1.1754944e-38, %v4918_v61  ;;  %vm4917_vm5 = vcmp.eq.f32.partialorder %v4916_v56, 8.507059e+37  ;;  %v4961_v16 = vand.u32 2147483647, %v10924_v63 }
 0x39b   : > { %v10973_v39 = vadd.f32 1.0, %v7503_v10  ;;  %v4930_v15 = vsel %vm4929_vm15, %v7495_v13, %v4926_v17  ;;  %v4590_v5 = vadd.f32 %v4589_v48, %v10729_v45  ;;  %v4643_v40 = vpop.f32.mrf.mxu0  ;;  %v4911_v22 = vadd.f32 %v10927_v58, %v4910_v62 }
 0x39c   : > { %v10979_v60 = vpop.eup %7504  ;;  %v4935_v2 = vsel %vm10948_vm13, %v4934_v8, %v4930_v15  ;;  %v4483_v35 = vpop.f32.mrf.mxu1  ;;  %v4890_v11 = vsel %vm10961_vm1, %v4889_v59, %v4885_v4  ;;  %v4963_v21 = vand.u32 2147483648, %v10924_v63  ;;  %vm11022_vm8 = vcmp.eq.f32.partialorder %v4961_v16, 8.507059e+37 }
 0x39d   : > { %v4953_v28 = vmul.f32 %v10979_v60, %v10924_v63  ;;  %7510 = vrcp.f32 %v10973_v39  ;;  %v5360_v36 = vpack.c.bf16 %v4935_v2, %v4905_v38  ;;  %v7507_v51 = vpop.eup %7506  ;;  %v4644_v0 = vadd.f32 %v4643_v40, %v4590_v5 }
 0x39e   : > { %v10992_v52 = vpop.eup %7508  ;;  %v10994_v20 = vadd.f32 1.0, %v7507_v51  ;;  %v4915_v43 = vsel %vm4914_vm4, %v10927_v58, %v4911_v22  ;;  %vm4958_vm6 = vweird.f32 %v10979_v60  ;;  %v4991_v53 = vand.u32 2147483647, %v10973_v39 }
 0x39f   : > { %v4954_v30 = vsub.f32 1.0, %v4953_v28  ;;  %v4938_v54 = vmul.f32 %v10992_v52, %v10942_v32  ;;  %v6616_v7 = vmul.f32 -1.442695, %v4644_v0  ;;  %5574 = vmatmul.bf16.gmra.mxu3 %v5360_v36  ;;  %v4920_v44 = vsel %vm4917_vm5, %v4919_v41, %v4915_v43  ;;  %vm11018_vm7 = vmor %vm4957_vm3, %vm4958_vm6 }
 0x3a0   : > { %7512 = vrcp.f32 %v10994_v20  ;;  %v4535_v12 = vpop.f32.mrf.mxu3  ;;  %v5359_v27 = vpack.c.bf16 %v4920_v44, %v4890_v11  ;;  %v4484_v33 = vadd.f32 %v4483_v35, %v10712_v9  ;;  %v4993_v23 = vand.u32 2147483648, %v10973_v39 }
 0x3a1   : > { %v4955_v13 = vmul.f32 %v10979_v60, %v4954_v30  ;;  %7514 = vpow2.f32 %v6616_v7  ;;  %v4536_v37 = vadd.f32 %v4535_v12, %v4482_v6  ;;  %v4939_v50 = vsub.f32 1.0, %v4938_v54 }
 0x3a2   : > { %v4591_v46 = vpop.f32.mrf.mxu2  ;;  %5520 = vmatmul.bf16.gmra.mxu1 %v5359_v27  ;;  %vm4987_vm9 = vweird.f32 %v10973_v39  ;;  %v4964_v1 = vor.u32 1.1754944e-38, %v4963_v21  ;;  %vm11031_vm11 = vcmp.eq.f32.partialorder %v4991_v53, 8.507059e+37  ;;  %vm4942_vm12 = vweird.f32 %v10942_v32 }
 0x3a3   : > { %v7511_v31 = vpop.eup %7510  ;;  %v4956_v47 = vadd.f32 %v10979_v60, %v4955_v13  ;;  %v4592_v57 = vadd.f32 %v4591_v46, %v10729_v45  ;;  %v4645_v18 = vpop.f32.mrf.mxu0  ;;  %v6615_v42 = vmul.f32 -1.442695, %v4536_v37  ;;  %v4940_v26 = vmul.f32 %v10992_v52, %v4939_v50 }
 0x3a4   : > { %v4983_v58 = vmul.f32 %v7511_v31, %v10973_v39  ;;  %vm4988_vm10 = vweird.f32 %v7511_v31  ;;  %v4994_v10 = vor.u32 1.1754944e-38, %v4993_v23  ;;  %vm4943_vm13 = vweird.f32 %v10992_v52 }
 0x3a5   : > { %v4646_v49 = vadd.f32 %v4645_v18, %v4592_v57  ;;  %v4960_v55 = vsel %vm11018_vm7, %v10979_v60, %v4956_v47  ;;  %7516 = vpow2.f32 %v6615_v42  ;;  %v4941_v48 = vadd.f32 %v10992_v52, %v4940_v26  ;;  %vm4989_vm14 = vmor %vm4987_vm9, %vm4988_vm10 }
 0x3a6   : > { %v4984_v8 = vsub.f32 1.0, %v4983_v58  ;;  %v7513_v63 = vpop.eup %7512  ;;  %v4486_v14 = vpop.f32.mrf.mxu1  ;;  %v4965_v19 = vsel %vm11022_vm8, %v4964_v1, %v4960_v55  ;;  %v4946_v61 = vand.u32 2147483647, %v10942_v32  ;;  %v4948_v40 = vand.u32 2147483648, %v10942_v32  ;;  %vm11051_vm15 = vmor %vm4942_vm12, %vm4943_vm13 }
 0x3a7   : > { %v7515_v3 = vpop.eup %7514  ;;  %v6618_v29 = vmul.f32 -1.442695, %v4646_v49  ;;  %v4968_v6 = vmul.f32 %v7513_v63, %v10994_v20  ;;  %vm4973_vm1 = vweird.f32 %v7513_v63  ;;  %v4976_v28 = vand.u32 2147483647, %v10994_v20 }
 0x3a8   : > { %v4985_v34 = vmul.f32 %v7511_v31, %v4984_v8  ;;  %v11037_v38 = vadd.f32 1.0, %v7515_v3  ;;  %v4537_v15 = vpop.f32.mrf.mxu3  ;;  %v4978_v35 = vand.u32 2147483648, %v10994_v20  ;;  %v4945_v32 = vsel %vm11051_vm15, %v10992_v52, %v4941_v48 }
 0x3a9   : > { %7518 = vpow2.f32 %v6618_v29  ;;  %v4969_v60 = vsub.f32 1.0, %v4968_v6  ;;  %v4538_v5 = vadd.f32 %v4537_v15, %v4484_v33  ;;  %vm4972_vm0 = vweird.f32 %v10994_v20 }
 0x3aa   : > { %v4986_v4 = vadd.f32 %v7511_v31, %v4985_v34  ;;  %7520 = vrcp.f32 %v11037_v38  ;;  %vm4947_vm2 = vcmp.eq.f32.partialorder %v4946_v61, 8.507059e+37  ;;  %v4949_v54 = vor.u32 1.1754944e-38, %v4948_v40  ;;  %vm4974_vm3 = vmor %vm4972_vm0, %vm4973_vm1 }
 0x3ab   : > { %v4970_v56 = vmul.f32 %v7513_v63, %v4969_v60  ;;  %v7517_v36 = vpop.eup %7516  ;;  %v6617_v59 = vmul.f32 -1.442695, %v4538_v5  ;;  %v4979_v7 = vor.u32 1.1754944e-38, %v4978_v35  ;;  %vm4977_vm4 = vcmp.eq.f32.partialorder %v4976_v28, 8.507059e+37 }
 0x3ac   : > { %v4990_v2 = vsel %vm4989_vm14, %v7511_v31, %v4986_v4  ;;  %v4594_v51 = vpop.f32.mrf.mxu2  ;;  %v4648_v39 = vpop.f32.mrf.mxu0  ;;  %v11063_v22 = vadd.f32 1.0, %v7517_v36  ;;  %v4950_v12 = vsel %vm4947_vm2, %v4949_v54, %v4945_v32  ;;  %v4487_v31 = vadd.f32 %v4486_v14, %v10712_v9 }
 0x3ad   : > { %v4995_v0 = vsel %vm11031_vm11, %v4994_v10, %v4990_v2  ;;  %v4595_v11 = vadd.f32 %v4594_v51, %v10729_v45  ;;  %v4971_v30 = vadd.f32 %v7513_v63, %v4970_v56  ;;  %7522 = vpow2.f32 %v6617_v59 }
 0x3ae   : > { %v5362_v41 = vpack.c.bf16 %v4995_v0, %v4965_v19  ;;  %7524 = vrcp.f32 %v11063_v22  ;;  %v4488_v16 = vpop.f32.mrf.mxu1  ;;  %v5021_v58 = vand.u32 2147483647, %v11037_v38  ;;  %v5023_v55 = vand.u32 2147483648, %v11037_v38 }
 0x3af   : > { %v7519_v43 = vpop.eup %7518  ;;  %v4649_v44 = vadd.f32 %v4648_v39, %v4595_v11  ;;  %v4975_v52 = vsel %vm4974_vm3, %v7513_v63, %v4971_v30  ;;  %vm5017_vm5 = vweird.f32 %v11037_v38  ;;  %v4489_v14 = vadd.f32 %v4488_v16, %v10712_v9 }
 0x3b0   : > { %5579 = vmatmul.bf16.gmra.mxu3 %v5362_v41  ;;  %v11068_v20 = vpop.eup %7520  ;;  %v11070_v13 = vadd.f32 1.0, %v7519_v43  ;;  %v4980_v27 = vsel %vm4977_vm4, %v4979_v7, %v4975_v52  ;;  %vm11088_vm6 = vcmp.eq.f32.partialorder %v5021_v58, 8.507059e+37  ;;  %v5024_v4 = vor.u32 1.1754944e-38, %v5023_v55 }
 0x3b1   : > { %v5013_v21 = vmul.f32 %v11068_v20, %v11037_v38  ;;  %v6620_v37 = vmul.f32 -1.442695, %v4649_v44  ;;  %v5361_v46 = vpack.c.bf16 %v4980_v27, %v4950_v12  ;;  %vm5018_vm7 = vweird.f32 %v11068_v20 }
 0x3b2   : > { %7526 = vrcp.f32 %v11070_v13  ;;  %v4540_v47 = vpop.f32.mrf.mxu3  ;;  %v5051_v17 = vand.u32 2147483647, %v11070_v13  ;;  %v5053_v61 = vand.u32 2147483648, %v11070_v13  ;;  %vm5002_vm8 = vweird.f32 %v11063_v22  ;;  %vm11106_vm9 = vmor %vm5017_vm5, %vm5018_vm7 }
 0x3b3   : > { %7528 = vpow2.f32 %v6620_v37  ;;  %v4541_v53 = vadd.f32 %v4540_v47, %v4487_v31  ;;  %5525 = vmatmul.bf16.gmra.mxu1 %v5361_v46  ;;  %v5014_v50 = vsub.f32 1.0, %v5013_v21  ;;  %v7523_v33 = vpop.eup %7522  ;;  %v5006_v60 = vand.u32 2147483647, %v11063_v22 }
 0x3b4   : > { %v4596_v57 = vpop.f32.mrf.mxu2  ;;  %v11077_v18 = vpop.eup %7524  ;;  %v11079_v23 = vadd.f32 1.0, %v7523_v33  ;;  %v5008_v2 = vand.u32 2147483648, %v11063_v22  ;;  %vm5047_vm10 = vweird.f32 %v11070_v13  ;;  %vm11111_vm11 = vcmp.eq.f32.partialorder %v5051_v17, 8.507059e+37 }
 0x3b5   : > { %v6619_v42 = vmul.f32 -1.442695, %v4541_v53  ;;  %v4597_v24 = vadd.f32 %v4596_v57, %v10729_v45  ;;  %v5015_v25 = vmul.f32 %v11068_v20, %v5014_v50  ;;  %v4998_v26 = vmul.f32 %v11077_v18, %v11063_v22  ;;  %v4650_v49 = vpop.f32.mrf.mxu0 }
 0x3b6   : > { %7530 = vrcp.f32 %v11079_v23  ;;  %v5054_v39 = vor.u32 1.1754944e-38, %v5053_v61  ;;  %vm5003_vm13 = vweird.f32 %v11077_v18  ;;  %vm11120_vm14 = vcmp.eq.f32.partialorder %v5006_v60, 8.507059e+37 }
 0x3b7   : > { %v4651_v1 = vadd.f32 %v4650_v49, %v4597_v24  ;;  %7532 = vpow2.f32 %v6619_v42  ;;  %v4999_v3 = vsub.f32 1.0, %v4998_v26  ;;  %v5016_v6 = vadd.f32 %v11068_v20, %v5015_v25  ;;  %vm11148_vm0 = vmor %vm5002_vm8, %vm5003_vm13 }
 0x3b8   : > { %v7527_v63 = vpop.eup %7526  ;;  %v5009_v30 = vor.u32 1.1754944e-38, %v5008_v2  ;;  %v5038_v21 = vand.u32 2147483648, %v11079_v23  ;;  %vm5032_vm2 = vweird.f32 %v11079_v23 }
 0x3b9   : > { %v7529_v29 = vpop.eup %7528  ;;  %v5043_v34 = vmul.f32 %v7527_v63, %v11070_v13  ;;  %v6622_v10 = vmul.f32 -1.442695, %v4651_v1  ;;  %v5000_v28 = vmul.f32 %v11077_v18, %v4999_v3  ;;  %v5020_v59 = vsel %vm11106_vm9, %v11068_v20, %v5016_v6 }
 0x3ba   : > { %v11097_v19 = vadd.f32 1.0, %v7529_v29  ;;  %v4491_v48 = vpop.f32.mrf.mxu1  ;;  %v4542_v15 = vpop.f32.mrf.mxu3  ;;  %vm5048_vm12 = vweird.f32 %v7527_v63  ;;  %v5025_v43 = vsel %vm11088_vm6, %v5024_v4, %v5020_v59  ;;  %v5036_v20 = vand.u32 2147483647, %v11079_v23 }
 0x3bb   : > { %7534 = vpow2.f32 %v6622_v10  ;;  %v4543_v5 = vadd.f32 %v4542_v15, %v4489_v14  ;;  %v5044_v40 = vsub.f32 1.0, %v5043_v34  ;;  %vm5049_vm1 = vmor %vm5047_vm10, %vm5048_vm12  ;;  %v5001_v44 = vadd.f32 %v11077_v18, %v5000_v28 }
 0x3bc   : > { %7536 = vrcp.f32 %v11097_v19  ;;  %v7531_v35 = vpop.eup %7530  ;;  %vm11157_vm3 = vcmp.eq.f32.partialorder %v5036_v20, 8.507059e+37  ;;  %v4492_v22 = vadd.f32 %v4491_v48, %v10712_v9  ;;  %v5039_v49 = vor.u32 1.1754944e-38, %v5038_v21 }
 0x3bd   : > { %v6621_v36 = vmul.f32 -1.442695, %v4543_v5  ;;  %v5045_v51 = vmul.f32 %v7527_v63, %v5044_v40  ;;  %v7533_v38 = vpop.eup %7532  ;;  %v5028_v32 = vmul.f32 %v7531_v35, %v11079_v23  ;;  %vm5033_vm15 = vweird.f32 %v7531_v35 }
 0x3be   : > { %v11125_v11 = vadd.f32 1.0, %v7533_v38  ;;  %v5005_v57 = vsel %vm11148_vm0, %v11077_v18, %v5001_v44  ;;  %vm5034_vm4 = vmor %vm5032_vm2, %vm5033_vm15  ;;  %v5081_v18 = vand.u32 2147483647, %v11097_v19  ;;  %vm5077_vm5 = vweird.f32 %v11097_v19 }
 0x3bf   : > { %7538 = vpow2.f32 %v6621_v36  ;;  %v5046_v41 = vadd.f32 %v7527_v63, %v5045_v51  ;;  %v5029_v52 = vsub.f32 1.0, %v5028_v32  ;;  %v5010_v3 = vsel %vm11120_vm14, %v5009_v30, %v5005_v57 }
 0x3c0   : > { %v4599_v54 = vpop.f32.mrf.mxu2  ;;  %v4653_v7 = vpop.f32.mrf.mxu0  ;;  %7540 = vrcp.f32 %v11125_v11  ;;  %vm11180_vm6 = vcmp.eq.f32.partialorder %v5081_v18, 8.507059e+37  ;;  %vm5062_vm7 = vweird.f32 %v11125_v11  ;;  %v5066_v28 = vand.u32 2147483647, %v11125_v11 }
 0x3c1   : > { %v7535_v16 = vpop.eup %7534  ;;  %v4600_v12 = vadd.f32 %v4599_v54, %v10729_v45  ;;  %v5050_v27 = vsel %vm5049_vm1, %v7527_v63, %v5046_v41  ;;  %v5030_v46 = vmul.f32 %v7531_v35, %v5029_v52  ;;  %v5083_v63 = vand.u32 2147483648, %v11097_v19 }
 0x3c2   : > { %v11136_v31 = vpop.eup %7536  ;;  %v11138_v37 = vadd.f32 1.0, %v7535_v16  ;;  %v5055_v13 = vsel %vm11111_vm11, %v5054_v39, %v5050_v27  ;;  %v4493_v50 = vpop.f32.mrf.mxu1  ;;  %vm11204_vm12 = vcmp.eq.f32.partialorder %v5066_v28, 8.507059e+37 }
 0x3c3   : > { %v5073_v47 = vmul.f32 %v11136_v31, %v11097_v19  ;;  %v4654_v53 = vadd.f32 %v4653_v7, %v4600_v12  ;;  %v5364_v58 = vpack.c.bf16 %v5055_v13, %v5025_v43  ;;  %v5031_v42 = vadd.f32 %v7531_v35, %v5030_v46 }
 0x3c4   : > { %7542 = vrcp.f32 %v11138_v37  ;;  %v5084_v5 = vor.u32 1.1754944e-38, %v5083_v63  ;;  %vm5078_vm8 = vweird.f32 %v11136_v31  ;;  %v5111_v59 = vand.u32 2147483647, %v11138_v37 }
 0x3c5   : > { %v7539_v25 = vpop.eup %7538  ;;  %v6624_v26 = vmul.f32 -1.442695, %v4654_v53  ;;  %5584 = vmatmul.bf16.gmra.mxu3 %v5364_v58  ;;  %v5074_v23 = vsub.f32 1.0, %v5073_v47  ;;  %v5035_v8 = vsel %vm5034_vm4, %v7531_v35, %v5031_v42  ;;  %v4494_v35 = vadd.f32 %v4493_v50, %v10712_v9  ;;  %vm11200_vm11 = vmor %vm5077_vm5, %vm5078_vm8 }
 0x3c6   : > { %v11163_v55 = vadd.f32 1.0, %v7539_v25  ;;  %v4545_v1 = vpop.f32.mrf.mxu3  ;;  %v11167_v14 = vpop.eup %7540  ;;  %v5040_v29 = vsel %vm11157_vm3, %v5039_v49, %v5035_v8  ;;  %vm5107_vm9 = vweird.f32 %v11138_v37  ;;  %v5113_v7 = vand.u32 2147483648, %v11138_v37 }
 0x3c7   : > { %7544 = vpow2.f32 %v6624_v26  ;;  %v4546_v17 = vadd.f32 %v4545_v1, %v4492_v22  ;;  %v5058_v34 = vmul.f32 %v11167_v14, %v11125_v11  ;;  %v5363_v6 = vpack.c.bf16 %v5040_v29, %v5010_v3 }
 0x3c8   : > { %7546 = vrcp.f32 %v11163_v55  ;;  %v4601_v10 = vpop.f32.mrf.mxu2  ;;  %v5075_v48 = vmul.f32 %v11136_v31, %v5074_v23  ;;  %v4655_v60 = vpop.f32.mrf.mxu0  ;;  %v5068_v43 = vand.u32 2147483648, %v11125_v11  ;;  %vm11213_vm13 = vcmp.eq.f32.partialorder %v5111_v59, 8.507059e+37 }
 0x3c9   : > { %v6623_v15 = vmul.f32 -1.442695, %v4546_v17  ;;  %v4602_v4 = vadd.f32 %v4601_v10, %v10729_v45  ;;  %5530 = vmatmul.bf16.gmra.mxu1 %v5363_v6  ;;  %v5059_v40 = vsub.f32 1.0, %v5058_v34  ;;  %vm5063_vm14 = vweird.f32 %v11167_v14 }
 0x3ca   : > { %v7543_v61 = vpop.eup %7542  ;;  %v5076_v36 = vadd.f32 %v11136_v31, %v5075_v48  ;;  %v5114_v58 = vor.u32 1.1754944e-38, %v5113_v7  ;;  %v5098_v33 = vand.u32 2147483648, %v11163_v55  ;;  %vm11236_vm0 = vmor %vm5062_vm7, %vm5063_vm14  ;;  %vm5092_vm2 = vweird.f32 %v11163_v55 }
 0x3cb   : > { %v5103_v2 = vmul.f32 %v7543_v61, %v11138_v37  ;;  %7548 = vpow2.f32 %v6623_v15  ;;  %v4656_v62 = vadd.f32 %v4655_v60, %v4602_v4  ;;  %v5060_v32 = vmul.f32 %v11167_v14, %v5059_v40 }
 0x3cc   : > { %vm5108_vm10 = vweird.f32 %v7543_v61  ;;  %v5080_v27 = vsel %vm11200_vm11, %v11136_v31, %v5076_v36  ;;  %v5096_v31 = vand.u32 2147483647, %v11163_v55  ;;  %v5069_v11 = vor.u32 1.1754944e-38, %v5068_v43 }
 0x3cd   : > { %v7545_v51 = vpop.eup %7544  ;;  %v6626_v38 = vmul.f32 -1.442695, %v4656_v62  ;;  %v4496_v39 = vpop.f32.mrf.mxu1  ;;  %v5104_v0 = vsub.f32 1.0, %v5103_v2  ;;  %v5061_v47 = vadd.f32 %v11167_v14, %v5060_v32  ;;  %vm5109_vm1 = vmor %vm5107_vm9, %vm5108_vm10  ;;  %v5085_v26 = vsel %vm11180_vm6, %v5084_v5, %v5080_v27 }
 0x3ce   : > { %v7547_v41 = vpop.eup %7546  ;;  %v11192_v30 = vadd.f32 1.0, %v7545_v51  ;;  %v4547_v54 = vpop.f32.mrf.mxu3  ;;  %v5099_v34 = vor.u32 1.1754944e-38, %v5098_v33  ;;  %v4497_v6 = vadd.f32 %v4496_v39, %v10712_v9  ;;  %vm5097_vm4 = vcmp.eq.f32.partialorder %v5096_v31, 8.507059e+37 }
 0x3cf   : > { %7550 = vpow2.f32 %v6626_v38  ;;  %v4548_v44 = vadd.f32 %v4547_v54, %v4494_v35  ;;  %v5105_v20 = vmul.f32 %v7543_v61, %v5104_v0  ;;  %v5088_v12 = vmul.f32 %v7547_v41, %v11163_v55 }
 0x3d0   : > { %7552 = vrcp.f32 %v11192_v30  ;;  %vm5093_vm15 = vweird.f32 %v7547_v41  ;;  %v5065_v18 = vsel %vm11236_vm0, %v11167_v14, %v5061_v47  ;;  %v5141_v5 = vand.u32 2147483647, %v11192_v30 }
 0x3d1   : > { %v7549_v19 = vpop.eup %7548  ;;  %v6625_v13 = vmul.f32 -1.442695, %v4548_v44  ;;  %v5106_v46 = vadd.f32 %v7543_v61, %v5105_v20  ;;  %v5089_v53 = vsub.f32 1.0, %v5088_v12  ;;  %vm5094_vm3 = vmor %vm5092_vm2, %vm5093_vm15  ;;  %v5070_v14 = vsel %vm11204_vm12, %v5069_v11, %v5065_v18 }
 0x3d2   : > { %v11219_v50 = vadd.f32 1.0, %v7549_v19  ;;  %v5143_v40 = vand.u32 2147483648, %v11192_v30  ;;  %vm5137_vm5 = vweird.f32 %v11192_v30  ;;  %vm11267_vm6 = vcmp.eq.f32.partialorder %v5141_v5, 8.507059e+37 }
 0x3d3   : > { %7554 = vpow2.f32 %v6625_v13  ;;  %v4604_v57 = vpop.f32.mrf.mxu2  ;;  %v5110_v42 = vsel %vm5109_vm1, %v7543_v61, %v5106_v46  ;;  %v5090_v24 = vmul.f32 %v7547_v41, %v5089_v53 }
 0x3d4   : > { %7556 = vrcp.f32 %v11219_v50  ;;  %v4605_v25 = vadd.f32 %v4604_v57, %v10729_v45  ;;  %v4658_v22 = vpop.f32.mrf.mxu0  ;;  %v5115_v37 = vsel %vm11213_vm13, %v5114_v58, %v5110_v42  ;;  %v5144_v32 = vor.u32 1.1754944e-38, %v5143_v40 }
 0x3d5   : > { %v7551_v23 = vpop.eup %7550  ;;  %v4498_v1 = vpop.f32.mrf.mxu1  ;;  %v5366_v8 = vpack.c.bf16 %v5115_v37, %v5085_v26  ;;  %v5091_v63 = vadd.f32 %v7547_v41, %v5090_v24  ;;  %vm5122_vm7 = vweird.f32 %v11219_v50  ;;  %v5126_v52 = vand.u32 2147483647, %v11219_v50 }
 0x3d6   : > { %v11244_v17 = vpop.eup %7552  ;;  %v11246_v3 = vadd.f32 1.0, %v7551_v23  ;;  %v4659_v29 = vadd.f32 %v4658_v22, %v4605_v25  ;;  %v4499_v16 = vadd.f32 %v4498_v1, %v10712_v9  ;;  %v5128_v12 = vand.u32 2147483648, %v11219_v50 }
 0x3d7   : > { %v5133_v10 = vmul.f32 %v11244_v17, %v11192_v30  ;;  %5589 = vmatmul.bf16.gmra.mxu3 %v5366_v8  ;;  %v5095_v48 = vsel %vm5094_vm3, %v7547_v41, %v5091_v63  ;;  %vm5138_vm8 = vweird.f32 %v11244_v17  ;;  %vm11297_vm13 = vcmp.eq.f32.partialorder %v5126_v52, 8.507059e+37 }
 0x3d8   : > { %7558 = vrcp.f32 %v11246_v3  ;;  %v6628_v55 = vmul.f32 -1.442695, %v4659_v29  ;;  %v5100_v15 = vsel %vm5097_vm4, %v5099_v34, %v5095_v48  ;;  %v5171_v19 = vand.u32 2147483647, %v11246_v3  ;;  %vm11285_vm9 = vmor %vm5137_vm5, %vm5138_vm8 }
 0x3d9   : > { %v7555_v4 = vpop.eup %7554  ;;  %v5365_v61 = vpack.c.bf16 %v5100_v15, %v5070_v14  ;;  %v5134_v60 = vsub.f32 1.0, %v5133_v10  ;;  %v5173_v13 = vand.u32 2147483648, %v11246_v3  ;;  %vm5167_vm10 = vweird.f32 %v11246_v3 }
 0x3da   : > { %v11257_v2 = vpop.eup %7556  ;;  %v11259_v62 = vadd.f32 1.0, %v7555_v4  ;;  %7560 = vpow2.f32 %v6628_v55  ;;  %v4550_v56 = vpop.f32.mrf.mxu3  ;;  %vm11304_vm14 = vcmp.eq.f32.partialorder %v5171_v19, 8.507059e+37  ;;  %v5129_v1 = vor.u32 1.1754944e-38, %v5128_v12 }
 0x3db   : > { %v5118_v28 = vmul.f32 %v11257_v2, %v11219_v50  ;;  %v4551_v35 = vadd.f32 %v4550_v56, %v4497_v6  ;;  %v4606_v36 = vpop.f32.mrf.mxu2  ;;  %5535 = vmatmul.bf16.gmra.mxu1 %v5365_v61  ;;  %v5135_v59 = vmul.f32 %v11244_v17, %v5134_v60  ;;  %vm5123_vm11 = vweird.f32 %v11257_v2 }
 0x3dc   : > { %7562 = vrcp.f32 %v11259_v62  ;;  %v4607_v51 = vadd.f32 %v4606_v36, %v10729_v45  ;;  %v4660_v38 = vpop.f32.mrf.mxu0  ;;  %v5174_v23 = vor.u32 1.1754944e-38, %v5173_v13  ;;  %vm5152_vm1 = vweird.f32 %v11259_v62  ;;  %vm11314_vm15 = vmor %vm5122_vm7, %vm5123_vm11 }
 0x3dd   : > { %v6627_v39 = vmul.f32 -1.442695, %v4551_v35  ;;  %v5119_v41 = vsub.f32 1.0, %v5118_v28  ;;  %v4501_v43 = vpop.f32.mrf.mxu1  ;;  %v5136_v44 = vadd.f32 %v11244_v17, %v5135_v59  ;;  %v5156_v11 = vand.u32 2147483647, %v11259_v62 }
 0x3de   : > { %v7559_v54 = vpop.eup %7558  ;;  %v4661_v7 = vadd.f32 %v4660_v38, %v4607_v51  ;;  %v5158_v55 = vand.u32 2147483648, %v11259_v62  ;;  %v4502_v40 = vadd.f32 %v4501_v43, %v10712_v9 }
 0x3df   : > { %v5163_v20 = vmul.f32 %v7559_v54, %v11246_v3  ;;  %7564 = vpow2.f32 %v6627_v39  ;;  %v5120_v46 = vmul.f32 %v11257_v2, %v5119_v41  ;;  %v5140_v57 = vsel %vm11285_vm9, %v11244_v17, %v5136_v44 }
 0x3e0   : > { %v7561_v27 = vpop.eup %7560  ;;  %v6630_v21 = vmul.f32 -1.442695, %v4661_v7  ;;  %vm5168_vm12 = vweird.f32 %v7559_v54  ;;  %v5145_v6 = vsel %vm11267_vm6, %v5144_v32, %v5140_v57  ;;  %vm11343_vm3 = vcmp.eq.f32.partialorder %v5156_v11, 8.507059e+37 }
 0x3e1   : > { %v11281_v47 = vadd.f32 1.0, %v7561_v27  ;;  %v5164_v58 = vsub.f32 1.0, %v5163_v20  ;;  %v5121_v30 = vadd.f32 %v11257_v2, %v5120_v46  ;;  %vm5169_vm0 = vmor %vm5167_vm10, %vm5168_vm12  ;;  %v5159_v51 = vor.u32 1.1754944e-38, %v5158_v55 }
 0x3e2   : > { %v11291_v31 = vpop.eup %7562  ;;  %7566 = vpow2.f32 %v6630_v21  ;;  %v4552_v33 = vpop.f32.mrf.mxu3 }
 0x3e3   : > { %7568 = vrcp.f32 %v11281_v47  ;;  %v4553_v24 = vadd.f32 %v4552_v33, %v4499_v16  ;;  %v5165_v25 = vmul.f32 %v7559_v54, %v5164_v58  ;;  %v5148_v22 = vmul.f32 %v11291_v31, %v11259_v62  ;;  %v4609_v26 = vpop.f32.mrf.mxu2 }
 0x3e4   : > { %v4663_v37 = vpop.f32.mrf.mxu0  ;;  %v4610_v63 = vadd.f32 %v4609_v26, %v10729_v45  ;;  %v5125_v15 = vsel %vm11314_vm15, %v11257_v2, %v5121_v30  ;;  %vm5153_vm2 = vweird.f32 %v11291_v31  ;;  %vm5197_vm5 = vweird.f32 %v11281_v47 }
 0x3e5   : > { %v7565_v8 = vpop.eup %7564  ;;  %v6629_v18 = vmul.f32 -1.442695, %v4553_v24  ;;  %v5166_v17 = vadd.f32 %v7559_v54, %v5165_v25  ;;  %v4503_v10 = vpop.f32.mrf.mxu1  ;;  %v5149_v48 = vsub.f32 1.0, %v5148_v22  ;;  %v5130_v39 = vsel %vm11297_vm13, %v5129_v1, %v5125_v15  ;;  %vm5154_vm4 = vmor %vm5152_vm1, %vm5153_vm2 }
 0x3e6   : > { %v11319_v34 = vadd.f32 1.0, %v7565_v8  ;;  %v4664_v50 = vadd.f32 %v4663_v37, %v4610_v63  ;;  %v5201_v0 = vand.u32 2147483647, %v11281_v47  ;;  %v5203_v43 = vand.u32 2147483648, %v11281_v47 }
 0x3e7   : > { %7570 = vpow2.f32 %v6629_v18  ;;  %v5170_v14 = vsel %vm5169_vm0, %v7559_v54, %v5166_v17  ;;  %v5150_v60 = vmul.f32 %v11291_v31, %v5149_v48  ;;  %v4504_v53 = vadd.f32 %v4503_v10, %v10712_v9 }
 0x3e8   : > { %v7567_v4 = vpop.eup %7566  ;;  %7572 = vrcp.f32 %v11319_v34  ;;  %v5175_v61 = vsel %vm11304_vm14, %v5174_v23, %v5170_v14  ;;  %v6632_v56 = vmul.f32 -1.442695, %v4664_v50  ;;  %vm11371_vm6 = vcmp.eq.f32.partialorder %v5201_v0, 8.507059e+37 }
 0x3e9   : > { %v11335_v3 = vpop.eup %7568  ;;  %v11337_v5 = vadd.f32 1.0, %v7567_v4  ;;  %v5368_v28 = vpack.c.bf16 %v5175_v61, %v5145_v6  ;;  %v5151_v36 = vadd.f32 %v11291_v31, %v5150_v60  ;;  %v5204_v57 = vor.u32 1.1754944e-38, %v5203_v43 }
 0x3ea   : > { %v5193_v2 = vmul.f32 %v11335_v3, %v11281_v47  ;;  %v4555_v35 = vpop.f32.mrf.mxu3  ;;  %vm5198_vm7 = vweird.f32 %v11335_v3  ;;  %vm5182_vm8 = vweird.f32 %v11319_v34  ;;  %v5186_v22 = vand.u32 2147483647, %v11319_v34 }
 0x3eb   : > { %7574 = vrcp.f32 %v11337_v5  ;;  %v4556_v38 = vadd.f32 %v4555_v35, %v4502_v40  ;;  %5594 = vmatmul.bf16.gmra.mxu3 %v5368_v28  ;;  %v4611_v32 = vpop.f32.mrf.mxu2  ;;  %v5155_v54 = vsel %vm5154_vm4, %v11291_v31, %v5151_v36  ;;  %v5231_v16 = vand.u32 2147483647, %v11337_v5  ;;  %vm11393_vm11 = vmor %vm5197_vm5, %vm5198_vm7 }
 0x3ec   : > { %7576 = vpow2.f32 %v6632_v56  ;;  %v4665_v41 = vpop.f32.mrf.mxu0  ;;  %v5194_v7 = vsub.f32 1.0, %v5193_v2  ;;  %v4612_v20 = vadd.f32 %v4611_v32, %v10729_v45  ;;  %v5160_v62 = vsel %vm11343_vm3, %v5159_v51, %v5155_v54 }
 0x3ed   : > { %v7571_v44 = vpop.eup %7570  ;;  %v6631_v52 = vmul.f32 -1.442695, %v4556_v38  ;;  %v5367_v21 = vpack.c.bf16 %v5160_v62, %v5130_v39  ;;  %v5233_v13 = vand.u32 2147483648, %v11337_v5  ;;  %v4506_v33 = vpop.f32.mrf.mxu1  ;;  %vm5227_vm9 = vweird.f32 %v11337_v5 }
 0x3ee   : > { %v11362_v12 = vpop.eup %7572  ;;  %v11364_v27 = vadd.f32 1.0, %v7571_v44  ;;  %v5195_v19 = vmul.f32 %v11335_v3, %v5194_v7  ;;  %v4666_v58 = vadd.f32 %v4665_v41, %v4612_v20  ;;  %vm11382_vm10 = vcmp.eq.f32.partialorder %v5231_v16, 8.507059e+37 }
 0x3ef   : > { %v5178_v46 = vmul.f32 %v11362_v12, %v11319_v34  ;;  %7578 = vpow2.f32 %v6631_v52  ;;  %5540 = vmatmul.bf16.gmra.mxu1 %v5367_v21  ;;  %v5234_v1 = vor.u32 1.1754944e-38, %v5233_v13  ;;  %v4507_v18 = vadd.f32 %v4506_v33, %v10712_v9 }
 0x3f0   : > { %7580 = vrcp.f32 %v11364_v27  ;;  %v6634_v42 = vmul.f32 -1.442695, %v4666_v58  ;;  %v5196_v24 = vadd.f32 %v11335_v3, %v5195_v19  ;;  %vm5183_vm12 = vweird.f32 %v11362_v12 }
 0x3f1   : > { %v7575_v30 = vpop.eup %7574  ;;  %v5179_v25 = vsub.f32 1.0, %v5178_v46  ;;  %v5188_v48 = vand.u32 2147483648, %v11319_v34  ;;  %vm11405_vm13 = vcmp.eq.f32.partialorder %v5186_v22, 8.507059e+37  ;;  %vm5212_vm1 = vweird.f32 %v11364_v27  ;;  %vm11421_vm15 = vmor %vm5182_vm8, %vm5183_vm12 }
 0x3f2   : > { %v7577_v26 = vpop.eup %7576  ;;  %v5223_v37 = vmul.f32 %v7575_v30, %v11337_v5  ;;  %v4557_v49 = vpop.f32.mrf.mxu3  ;;  %7582 = vpow2.f32 %v6634_v42  ;;  %v5200_v47 = vsel %vm11393_vm11, %v11335_v3, %v5196_v24  ;;  %vm5228_vm14 = vweird.f32 %v7575_v30 }
 0x3f3   : > { %v11386_v8 = vadd.f32 1.0, %v7577_v26  ;;  %v4558_v63 = vadd.f32 %v4557_v49, %v4504_v53  ;;  %v4614_v17 = vpop.f32.mrf.mxu2  ;;  %v5180_v6 = vmul.f32 %v11362_v12, %v5179_v25  ;;  %v5205_v3 = vsel %vm11371_vm6, %v5204_v57, %v5200_v47  ;;  %vm5229_vm0 = vmor %vm5227_vm9, %vm5228_vm14 }
 0x3f4   : > { %v4668_v29 = vpop.f32.mrf.mxu0  ;;  %v5224_v10 = vsub.f32 1.0, %v5223_v37  ;;  %v4615_v14 = vadd.f32 %v4614_v17, %v10729_v45  ;;  %v5216_v36 = vand.u32 2147483647, %v11364_v27  ;;  %v5189_v38 = vor.u32 1.1754944e-38, %v5188_v48 }
 0x3f5   : > { %v7579_v55 = vpop.eup %7578  ;;  %7584 = vrcp.f32 %v11386_v8  ;;  %v6633_v50 = vmul.f32 -1.442695, %v4558_v63  ;;  %v5181_v40 = vadd.f32 %v11362_v12, %v5180_v6  ;;  %v5218_v0 = vand.u32 2147483648, %v11364_v27  ;;  %v4508_v41 = vpop.f32.mrf.mxu1 }
 0x3f6   : > { %v7581_v4 = vpop.eup %7580  ;;  %v11409_v61 = vadd.f32 1.0, %v7579_v55  ;;  %v5225_v60 = vmul.f32 %v7575_v30, %v5224_v10  ;;  %v4669_v28 = vadd.f32 %v4668_v29, %v4615_v14  ;;  %vm11441_vm3 = vcmp.eq.f32.partialorder %v5216_v36, 8.507059e+37 }
 0x3f7   : > { %v5208_v56 = vmul.f32 %v7581_v4, %v11364_v27  ;;  %7586 = vpow2.f32 %v6633_v50  ;;  %v5185_v7 = vsel %vm11421_vm15, %v11362_v12, %v5181_v40  ;;  %vm5213_vm2 = vweird.f32 %v7581_v4 }
 0x3f8   : > { %7588 = vrcp.f32 %v11409_v61  ;;  %v5226_v2 = vadd.f32 %v7575_v30, %v5225_v60  ;;  %v7583_v59 = vpop.eup %7582  ;;  %v6636_v51 = vmul.f32 -1.442695, %v4669_v28  ;;  %v4509_v19 = vadd.f32 %v4508_v41, %v10712_v9  ;;  %vm5214_vm4 = vmor %vm5212_vm1, %vm5213_vm2 }
 0x3f9   : > { %v5209_v39 = vsub.f32 1.0, %v5208_v56  ;;  %v11429_v32 = vadd.f32 1.0, %v7583_v59  ;;  %v5190_v57 = vsel %vm11405_vm13, %v5189_v38, %v5185_v7  ;;  %v5261_v26 = vand.u32 2147483647, %v11386_v8 }
 0x3fa   : > { %v4560_v54 = vpop.f32.mrf.mxu3  ;;  %v5230_v34 = vsel %vm5229_vm0, %v7575_v30, %v5226_v2  ;;  %7590 = vpow2.f32 %v6636_v51  ;;  %v5219_v30 = vor.u32 1.1754944e-38, %v5218_v0  ;;  %v5263_v23 = vand.u32 2147483648, %v11386_v8 }
 0x3fb   : > { %v11434_v43 = vpop.eup %7584  ;;  %v4561_v44 = vadd.f32 %v4560_v54, %v4507_v18  ;;  %v5235_v5 = vsel %vm11382_vm10, %v5234_v1, %v5230_v34  ;;  %v5210_v52 = vmul.f32 %v7581_v4, %v5209_v39  ;;  %7592 = vrcp.f32 %v11429_v32  ;;  %v4616_v62 = vpop.f32.mrf.mxu2 }
 0x3fc   : > { %v5253_v20 = vmul.f32 %v11434_v43, %v11386_v8  ;;  %v5370_v16 = vpack.c.bf16 %v5235_v5, %v5205_v3  ;;  %v4617_v46 = vadd.f32 %v4616_v62, %v10729_v45  ;;  %v4670_v33 = vpop.f32.mrf.mxu0  ;;  %vm5257_vm5 = vweird.f32 %v11386_v8 }
 0x3fd   : > { %v7587_v12 = vpop.eup %7586  ;;  %v6635_v13 = vmul.f32 -1.442695, %v4561_v44  ;;  %v5211_v53 = vadd.f32 %v7581_v4, %v5210_v52  ;;  %v5291_v29 = vand.u32 2147483647, %v11429_v32  ;;  %vm5258_vm6 = vweird.f32 %v11434_v43 }
 0x3fe   : > { %v11447_v58 = vpop.eup %7588  ;;  %v11449_v31 = vadd.f32 1.0, %v7587_v12  ;;  %5599 = vmatmul.bf16.gmra.mxu3 %v5370_v16  ;;  %v5254_v42 = vsub.f32 1.0, %v5253_v20  ;;  %v4671_v45 = vadd.f32 %v4670_v33, %v4617_v46  ;;  %vm11472_vm7 = vcmp.eq.f32.partialorder %v5261_v26, 8.507059e+37  ;;  %vm11491_vm11 = vmor %vm5257_vm5, %vm5258_vm6 }
 0x3ff   : > { %v5238_v9 = vmul.f32 %v11447_v58, %v11409_v61  ;;  %7594 = vpow2.f32 %v6635_v13  ;;  %v5215_v24 = vsel %vm5214_vm4, %v7581_v4, %v5211_v53  ;;  %v5293_v55 = vand.u32 2147483648, %v11429_v32 }
 0x400   : > { %7596 = vrcp.f32 %v11449_v31  ;;  %v5220_v25 = vsel %vm11441_vm3, %v5219_v30, %v5215_v24  ;;  %v5255_v22 = vmul.f32 %v11434_v43, %v5254_v42  ;;  %v7591_v37 = vpop.eup %7590  ;;  %v6638_v27 = vmul.f32 -1.442695, %v4671_v45  ;;  %v11542_v45 = vld [vmem:[%s11641_s10] ss:$0 sm:$0xff] }
 0x401   : > { %v5369_v49 = vpack.c.bf16 %v5220_v25, %v5190_v57  ;;  %v5239_v1 = vsub.f32 1.0, %v5238_v9  ;;  %v7593_v18 = vpop.eup %7592  ;;  %v11464_v63 = vadd.f32 1.0, %v7591_v37  ;;  %v5264_v47 = vor.u32 1.1754944e-38, %v5263_v23 }
 0x402   : > { %v4562_v17 = vpop.f32.mrf.mxu3  ;;  %v5283_v11 = vmul.f32 %v7593_v18, %v11429_v32  ;;  %7598 = vpow2.f32 %v6638_v27  ;;  %v5256_v6 = vadd.f32 %v11434_v43, %v5255_v22  ;;  %vm5287_vm8 = vweird.f32 %v11429_v32 }
 0x403   : > { %v4563_v10 = vadd.f32 %v4562_v17, %v4509_v19  ;;  %5545 = vmatmul.bf16.gmra.mxu1 %v5369_v49  ;;  %7600 = vrcp.f32 %v11464_v63  ;;  %v5240_v4 = vmul.f32 %v11447_v58, %v5239_v1  ;;  %vm11481_vm9 = vcmp.eq.f32.partialorder %v5291_v29, 8.507059e+37 }
 0x404   : > { %v5284_v15 = vsub.f32 1.0, %v5283_v11  ;;  %vm5242_vm10 = vweird.f32 %v11409_v61  ;;  %vm5288_vm12 = vweird.f32 %v7593_v18  ;;  %v5260_v35 = vsel %vm11491_vm11, %v11434_v43, %v5256_v6 }
 0x405   : > { %v7595_v50 = vpop.eup %7594  ;;  %v6637_v14 = vmul.f32 -1.442695, %v4563_v10  ;;  %v5294_v36 = vor.u32 1.1754944e-38, %v5293_v55  ;;  %vm5243_vm13 = vweird.f32 %v11447_v58  ;;  %v5241_v38 = vadd.f32 %v11447_v58, %v5240_v4  ;;  %vm5289_vm14 = vmor %vm5287_vm8, %vm5288_vm12 }
 0x406   : > { %v7597_v60 = vpop.eup %7596  ;;  %v11478_v40 = vadd.f32 1.0, %v7595_v50  ;;  %v5285_v2 = vmul.f32 %v7593_v18, %v5284_v15  ;;  %v5246_v8 = vand.u32 2147483647, %v11409_v61  ;;  %v5248_v54 = vand.u32 2147483648, %v11409_v61  ;;  %vm11522_vm15 = vmor %vm5242_vm10, %vm5243_vm13 }
 0x407   : > { %v5268_v28 = vmul.f32 %v7597_v60, %v11449_v31  ;;  %7602 = vpow2.f32 %v6637_v14  ;;  %vm5273_vm1 = vweird.f32 %v7597_v60  ;;  %v5278_v34 = vand.u32 2147483648, %v11449_v31 }
 0x408   : > { %7604 = vrcp.f32 %v11478_v40  ;;  %v7599_v59 = vpop.eup %7598  ;;  %v5286_v51 = vadd.f32 %v7593_v18, %v5285_v2  ;;  %v5276_v5 = vand.u32 2147483647, %v11449_v31  ;;  %v5265_v52 = vsel %vm11472_vm7, %v5264_v47, %v5260_v35 }
 0x409   : > { %v5269_v39 = vsub.f32 1.0, %v5268_v28  ;;  %v11502_v0 = vpop.eup %7600  ;;  %v11504_v41 = vadd.f32 1.0, %v7599_v59  ;;  %vm5272_vm0 = vweird.f32 %v11449_v31  ;;  %v5245_v21 = vsel %vm11522_vm15, %v11447_v58, %v5241_v38 }
 0x40a   : > { %v5313_v7 = vmul.f32 %v11502_v0, %v11464_v63  ;;  %v5290_v43 = vsel %vm5289_vm14, %v7593_v18, %v5286_v51  ;;  %v5249_v61 = vor.u32 1.1754944e-38, %v5248_v54  ;;  %vm5274_vm2 = vmor %vm5272_vm0, %vm5273_vm1  ;;  %v5279_v33 = vor.u32 1.1754944e-38, %v5278_v34 }
 0x40b   : > { %v5270_v44 = vmul.f32 %v7597_v60, %v5269_v39  ;;  %7606 = vrcp.f32 %v11504_v41  ;;  %v5295_v32 = vsel %vm11481_vm9, %v5294_v36, %v5290_v43  ;;  %vm5247_vm3 = vcmp.eq.f32.partialorder %v5246_v8, 8.507059e+37 }
 0x40c   : > { %v5372_v16 = vpack.c.bf16 %v5295_v32, %v5265_v52  ;;  %v5314_v19 = vsub.f32 1.0, %v5313_v7  ;;  %vm5277_vm4 = vcmp.eq.f32.partialorder %v5276_v5, 8.507059e+37  ;;  %v5250_v58 = vsel %vm5247_vm3, %v5249_v61, %v5245_v21 }
 0x40d   : > { %v7603_v62 = vpop.eup %7602  ;;  %v5271_v12 = vadd.f32 %v7597_v60, %v5270_v44  ;;  %v5516_v13 = vpop.f32.mrf.mxu1  ;;  %v5321_v25 = vand.u32 2147483647, %v11464_v63  ;;  %v5323_v22 = vand.u32 2147483648, %v11464_v63  ;;  %v5351_v26 = vand.u32 2147483647, %v11504_v41 }
 0x40e   : > { %v11530_v46 = vpop.eup %7604  ;;  %v11532_v53 = vadd.f32 1.0, %v7603_v62  ;;  %5604 = vmatmul.bf16.gmra.mxu3 %v5372_v16  ;;  %v5315_v42 = vmul.f32 %v11502_v0, %v5314_v19  ;;  %vm5317_vm5 = vweird.f32 %v11464_v63  ;;  %vm5318_vm6 = vweird.f32 %v11502_v0 }
 0x40f   : > { %v5298_v31 = vmul.f32 %v11530_v46, %v11478_v40  ;;  %v5275_v57 = vsel %vm5274_vm2, %v7597_v60, %v5271_v12  ;;  %vm5347_vm7 = vweird.f32 %v11504_v41  ;;  %v5353_v18 = vand.u32 2147483648, %v11504_v41  ;;  %vm11564_vm10 = vmor %vm5317_vm5, %vm5318_vm6 }
 0x410   : > { %7608 = vrcp.f32 %v11532_v53  ;;  %v5280_v30 = vsel %vm5277_vm4, %v5279_v33, %v5275_v57  ;;  %v5316_v23 = vadd.f32 %v11502_v0, %v5315_v42  ;;  %vm11554_vm8 = vcmp.eq.f32.partialorder %v5321_v25, 8.507059e+37 }
 0x411   : > { %v5371_v9 = vpack.c.bf16 %v5280_v30, %v5250_v58  ;;  %v7607_v24 = vpop.eup %7606  ;;  %v5299_v27 = vsub.f32 1.0, %v5298_v31  ;;  %v5324_v6 = vor.u32 1.1754944e-38, %v5323_v22  ;;  %vm11558_vm9 = vcmp.eq.f32.partialorder %v5351_v26, 8.507059e+37 }
 0x412   : > { %v5570_v37 = vpop.f32.mrf.mxu3  ;;  %v5343_v49 = vmul.f32 %v7607_v24, %v11504_v41  ;;  %v5517_v63 = vadd.f32 %v11542_v45, %v5516_v13  ;;  %vm5348_vm11 = vweird.f32 %v7607_v24  ;;  %v5320_v15 = vsel %vm11564_vm10, %v11502_v0, %v5316_v23 }
 0x413   : > { %5550 = vmatmul.bf16.gmra.mxu1 %v5371_v9  ;;  %v5300_v17 = vmul.f32 %v11530_v46, %v5299_v27  ;;  %vm5302_vm12 = vweird.f32 %v11478_v40  ;;  %vm5303_vm13 = vweird.f32 %v11530_v46  ;;  %v5306_v4 = vand.u32 2147483647, %v11478_v40  ;;  %vm5349_vm14 = vmor %vm5347_vm7, %vm5348_vm11 }
 0x414   : > { %v5344_v1 = vsub.f32 1.0, %v5343_v49  ;;  %v5354_v56 = vor.u32 1.1754944e-38, %v5353_v18  ;;  %v5571_v2 = vadd.f32 %v5570_v37, %v5517_v63  ;;  %v5308_v35 = vand.u32 2147483648, %v11478_v40  ;;  %vm11590_vm15 = vmor %vm5302_vm12, %vm5303_vm13 }
 0x415   : > { %v5518_v29 = vpop.f32.mrf.mxu1  ;;  %v5301_v28 = vadd.f32 %v11530_v46, %v5300_v17  ;;  %v5336_v36 = vand.u32 2147483647, %v11532_v53  ;;  %v5338_v59 = vand.u32 2147483648, %v11532_v53  ;;  %v5325_v0 = vsel %vm11554_vm8, %v5324_v6, %v5320_v15 }
 0x416   : > { %v7609_v11 = vpop.eup %7608  ;;  %v5345_v14 = vmul.f32 %v7607_v24, %v5344_v1  ;;  %v5519_v47 = vadd.f32 %v11542_v45, %v5518_v29  ;;  %vm5332_vm0 = vweird.f32 %v11532_v53  ;;  %v5309_v40 = vor.u32 1.1754944e-38, %v5308_v35 }
 0x417   : > { %v5328_v55 = vmul.f32 %v7609_v11, %v11532_v53  ;;  %vm5333_vm1 = vweird.f32 %v7609_v11  ;;  %v5305_v7 = vsel %vm11590_vm15, %v11530_v46, %v5301_v28  ;;  %v5339_v5 = vor.u32 1.1754944e-38, %v5338_v59 }
 0x418   : > { %v5346_v60 = vadd.f32 %v7607_v24, %v5345_v14  ;;  %vm5334_vm2 = vmor %vm5332_vm0, %vm5333_vm1  ;;  %vm5307_vm3 = vcmp.eq.f32.partialorder %v5306_v4, 8.507059e+37  ;;  %vm5337_vm4 = vcmp.eq.f32.partialorder %v5336_v36, 8.507059e+37 }
 0x419   : > { %v5329_v3 = vsub.f32 1.0, %v5328_v55  ;;  %v5310_v32 = vsel %vm5307_vm3, %v5309_v40, %v5305_v7 }
 0x41a   : > { %v5572_v51 = vpop.f32.mrf.mxu3  ;;  %v5350_v38 = vsel %vm5349_vm14, %v7607_v24, %v5346_v60 }
 0x41b   : > { %v5330_v8 = vmul.f32 %v7609_v11, %v5329_v3  ;;  %v5573_v39 = vadd.f32 %v5572_v51, %v5519_v47  ;;  %v5355_v54 = vsel %vm11558_vm9, %v5354_v56, %v5350_v38 }
 0x41c   : > { %v5374_v34 = vpack.c.bf16 %v5355_v54, %v5325_v0 }
 0x41d   : > { %v5331_v43 = vadd.f32 %v7609_v11, %v5330_v8  ;;  %v6891_v44 = vpack.c.bf16 %v5573_v39, %v5571_v2 }
 0x41e   : > { %5609 = vmatmul.bf16.gmra.mxu3 %v5374_v34 }
 0x41f   : > { %v5335_v52 = vsel %vm5334_vm2, %v7609_v11, %v5331_v43  ;;  %6892 = vst [vmem:[%s11598_s27] sm:$0xff] %v6891_v44   ;;  %v5521_v62 = vpop.f32.mrf.mxu1 }
 0x420   : > { %v5340_v20 = vsel %vm5337_vm4, %v5339_v5, %v5335_v52  ;;  %v5522_v12 = vadd.f32 %v11542_v45, %v5521_v62 }
 0x421   : > { %v5373_v16 = vpack.c.bf16 %v5340_v20, %v5310_v32 }
 0x422   : > { %v5575_v21 = vpop.f32.mrf.mxu3 }
 0x423   : > { %5555 = vmatmul.bf16.gmra.mxu1 %v5373_v16  ;;  %v5576_v53 = vadd.f32 %v5575_v21, %v5522_v12 }
 0x427   : > { %v5523_v19 = vpop.f32.mrf.mxu1 }
 0x428   : > { %v5524_v13 = vadd.f32 %v11542_v45, %v5523_v19 }
 0x42a   : > { %v5577_v46 = vpop.f32.mrf.mxu3 }
 0x42b   : > { %v5578_v61 = vadd.f32 %v5577_v46, %v5524_v13 }
 0x42d   : > { %v6896_v33 = vpack.c.bf16 %v5578_v61, %v5576_v53 }
 0x42f   : > { %6933 = vst [vmem:[%s11598_s27 + $0x8] sm:$0xff] %v6896_v33  }
 0x430   : > { %v5526_v31 = vpop.f32.mrf.mxu1 }
 0x431   : > { %v5527_v58 = vadd.f32 %v11542_v45, %v5526_v31 }
 0x433   : > { %v5580_v57 = vpop.f32.mrf.mxu3 }
 0x434   : > { %v5581_v24 = vadd.f32 %v5580_v57, %v5527_v58 }
 0x438   : > { %v5528_v30 = vpop.f32.mrf.mxu1 }
 0x439   : > { %v5529_v42 = vadd.f32 %v11542_v45, %v5528_v30 }
 0x43b   : > { %v5582_v9 = vpop.f32.mrf.mxu3 }
 0x43c   : > { %v5583_v25 = vadd.f32 %v5582_v9, %v5529_v42 }
 0x43e   : > { %v6901_v22 = vpack.c.bf16 %v5583_v25, %v5581_v24 }
 0x440   : > { %6934 = vst [vmem:[%s11598_s27 + $0x10] sm:$0xff] %v6901_v22  }
 0x446   : > { %v5531_v26 = vpop.f32.mrf.mxu1 }
 0x447   : > { %v5532_v27 = vadd.f32 %v11542_v45, %v5531_v26 }
 0x448   : > { %v5585_v37 = vpop.f32.mrf.mxu3 }
 0x449   : > { %v5586_v18 = vadd.f32 %v5585_v37, %v5532_v27 }
 0x44e   : > { %v5533_v49 = vpop.f32.mrf.mxu1 }
 0x44f   : > { %v5534_v23 = vadd.f32 %v11542_v45, %v5533_v49 }
 0x450   : > { %v5587_v1 = vpop.f32.mrf.mxu3 }
 0x451   : > { %v5588_v17 = vadd.f32 %v5587_v1, %v5534_v23 }
 0x453   : > { %v6906_v29 = vpack.c.bf16 %v5588_v17, %v5586_v18 }
 0x455   : > { %6935 = vst [vmem:[%s11598_s27 + $0x18] sm:$0xff] %v6906_v29  }
 0x458   : > { %v5536_v11 = vpop.f32.mrf.mxu1 }
 0x459   : > { %v5537_v6 = vadd.f32 %v11542_v45, %v5536_v11 }
 0x45a   : > { %v5590_v10 = vpop.f32.mrf.mxu3 }
 0x45b   : > { %v5591_v50 = vadd.f32 %v5590_v10, %v5537_v6 }
 0x460   : > { %v5538_v48 = vpop.f32.mrf.mxu1 }
 0x461   : > { %v5539_v63 = vadd.f32 %v11542_v45, %v5538_v48 }
 0x462   : > { %v5592_v55 = vpop.f32.mrf.mxu3 }
 0x463   : > { %v5593_v14 = vadd.f32 %v5592_v55, %v5539_v63 }
 0x465   : > { %v6911_v47 = vpack.c.bf16 %v5593_v14, %v5591_v50 }
 0x467   : > { %6936 = vst [vmem:[%s11598_s27 + $0x20] sm:$0xff] %v6911_v47  }
 0x46c   : > { %v5541_v15 = vpop.f32.mrf.mxu1 }
 0x46d   : > { %v5542_v60 = vadd.f32 %v11542_v45, %v5541_v15 }
 0x46e   : > { %v5595_v4 = vpop.f32.mrf.mxu3 }
 0x46f   : > { %v5596_v2 = vadd.f32 %v5595_v4, %v5542_v60 }
 0x474   : > { %v5543_v56 = vpop.f32.mrf.mxu1 }
 0x475   : > { %v5544_v28 = vadd.f32 %v11542_v45, %v5543_v56 }
 0x476   : > { %v5597_v3 = vpop.f32.mrf.mxu3 }
 0x477   : > { %v5598_v35 = vadd.f32 %v5597_v3, %v5544_v28 }
 0x479   : > { %v6916_v36 = vpack.c.bf16 %v5598_v35, %v5596_v2 }
 0x47b   : > { %6937 = vst [vmem:[%s11598_s27 + $0x28] sm:$0xff] %v6916_v36  }
 0x480   : > { %v5546_v59 = vpop.f32.mrf.mxu1 }
 0x481   : > { %v5600_v51 = vpop.f32.mrf.mxu3  ;;  %v5547_v38 = vadd.f32 %v11542_v45, %v5546_v59 }
 0x483   : > { %v5601_v54 = vadd.f32 %v5600_v51, %v5547_v38 }
 0x488   : > { %v5548_v8 = vpop.f32.mrf.mxu1 }
 0x489   : > { %v5549_v39 = vadd.f32 %v11542_v45, %v5548_v8  ;;  %v5602_v0 = vpop.f32.mrf.mxu3 }
 0x48b   : > { %v5603_v41 = vadd.f32 %v5602_v0, %v5549_v39 }
 0x48d   : > { %v6921_v34 = vpack.c.bf16 %v5603_v41, %v5601_v54 }
 0x48f   : > { %6938 = vst [vmem:[%s11598_s27 + $0x30] sm:$0xff] %v6921_v34  }
 0x490   : > { %v5551_v7 = vpop.f32.mrf.mxu1 }
 0x491   : > { %v5605_v43 = vpop.f32.mrf.mxu3  ;;  %v5552_v44 = vadd.f32 %v11542_v45, %v5551_v7 }
 0x493   : > { %v5606_v32 = vadd.f32 %v5605_v43, %v5552_v44 }
 0x498   : > { %v5553_v40 = vpop.f32.mrf.mxu1 }
 0x499   : > { %v5554_v5 = vadd.f32 %v11542_v45, %v5553_v40  ;;  %v5607_v52 = vpop.f32.mrf.mxu3 }
 0x49b   : > { %v5608_v20 = vadd.f32 %v5607_v52, %v5554_v5 }
 0x49d   : > { %v6926_v62 = vpack.c.bf16 %v5608_v20, %v5606_v32 }
 0x49f   : > { %6939 = vst [vmem:[%s11598_s27 + $0x38] sm:$0xff] %v6926_v62  }
 0x4a0   : > { %v5556_v16 = vpop.f32.mrf.mxu1 }
 0x4a1   : > { %v5610_v21 = vpop.f32.mrf.mxu3  ;;  %v5557_v12 = vadd.f32 %v11542_v45, %v5556_v16 }
 0x4a3   : > { %v5611_v53 = vadd.f32 %v5610_v21, %v5557_v12 }
 0x4a8   : > { %v5558_v19 = vpop.f32.mrf.mxu1 }
 0x4a9   : > { %v5559_v13 = vadd.f32 %v11542_v45, %v5558_v19  ;;  %v5612_v46 = vpop.f32.mrf.mxu3 }
 0x4ab   : > { %v5613_v61 = vadd.f32 %v5612_v46, %v5559_v13 }
 0x4ad   : > { %v6931_v33 = vpack.c.bf16 %v5613_v61, %v5611_v53 }
 0x4af   : > { %6940 = vst [vmem:[%s11598_s27 + $0x40] sm:$0xff] %v6931_v33  }
 0x4b0 PF: > { %s26_s17 = sadd.s32 1, %s7877_s17  }
 0x4b1   : > { %p23_p7 = scmp.ge.s32.totalorder %s26_s17, 4  }
 0x4b3   :  { %25 = sbr.rel (!%p23_p7) target bundleno = 5 (0x5), region = 127 }
 0x4b8   :  { %5673 = vsyncpa [#allocation3], 1 }
 0x4b9   :  { %5675 = vsyncpa [#allocation3 + $0x1], 1 }
 0x4ba   :  { %5676 = vsyncpa [#allocation5], 1 }
 0x4bb   :  { %5677 = vsyncpa [#allocation8], 1 }
 0x4bc   :  { %5678 = vsyncpa [#allocation11], 1 }
 0x4bd   :  { %5679 = vsyncpa [#allocation14], 1 }

// kernel: word_nn_temp_combine_forward.3
= control target key start
LH: loop header
LB: loop body
LE: loop exit
PB: predicated region body
PF: predicated region fallthrough
CT: control target
= control target key end

     0   :  { %14 = vsyncpa [#allocation4], 0  ;;  %s8270_s30 = smov 0   ;;  %s9882_s0 = inlined_call_operand.vmem [shape: bf16[2,6144], index: 0, kind: input, shape index: {}]   ;;  %s9883_s1 = inlined_call_operand.vmem [shape: bf16[6144,512], index: 1, kind: input, shape index: {}]   ;;  %s9884_s2 = inlined_call_operand.vmem [shape: f32[1,512], index: 2, kind: input, shape index: {}]   ;;  %s9885_s3 = inlined_call_operand.vmem [shape: bf16[512,256], index: 3, kind: input, shape index: {}]   ;;  %s9886_s4 = inlined_call_operand.vmem [shape: f32[1,256], index: 4, kind: input, shape index: {}]   ;;  %s9887_s5 = inlined_call_operand.vmem [shape: bf16[256,64], index: 5, kind: input, shape index: {}]   ;;  %s9888_s6 = inlined_call_operand.vmem [shape: f32[1,64], index: 6, kind: input, shape index: {}]   ;;  %s9889_s7 = inlined_call_operand.vmem [shape: bf16[64,2], index: 7, kind: input, shape index: {}]   ;;  %s9890_s8 = inlined_call_operand.vmem [shape: f32[1,2], index: 8, kind: input, shape index: {}]   ;;  %s9891_s9 = inlined_call_operand.hbm [shape: f32[2,2], index: 9, kind: output, shape index: {}]  }
   0x1 LB: > { %s8276_s10 = sadd.s32 4294967295, %s8216_s30   ;;  %p5139_p0 = scmp.ge.s32.totalorder %s8216_s30, 1  ;;  %s8216_s30 = sphi %s8270_s30, %s20_s30  }
   0x2   : > { %p295_p1 = scmp.lt.s32.totalorder %s8216_s30, 4 }
   0x4   : > { %p296_p2 = pnand %p5139_p0, %p295_p1 }
   0x5   : > { %s5140_s11 = sshll.u32 (!%p296_p2), %s8276_s10, 4  ;;  %s5141_s12 = sshll.u32 (!%p296_p2), %s8276_s10, 8 }
   0x6   : > { %299 = sbr.rel (%p296_p2) target bundleno = 1429 (0x595), region = 56  ;;  %p332_p3 = scmp.lt.s32.totalorder (!%p296_p2), %s5140_s11, 47 }
   0x7   : > { %p337_p4 = scmp.lt.s32.totalorder (!%p296_p2), %s5141_s12, 767  ;;  %p5144_p5 = scmp.ne.s32.totalorder (!%p296_p2), %s8276_s10, 0 }
   0xb   : > { %s9893_s11 = smov (!%p332_p3, %s5140_s11), 47  ;;  %s9895_s12 = smov (!%p337_p4, %s5141_s12), 767 }
   0xc   : > { %s8285_s15 = scalar_lea.vmem %s9882_s0, %s9893_s11  ;;  %s7535_s16 = sshll.u32 %s9895_s12, 4 }
   0xd   : > { %s8290_s19 = scalar_lea.vmem %s9883_s1, %s7535_s16  ;;  %347 = sbr.rel (%p5144_p5) target bundleno = 20 (0x14), region = 60 }
  0x12   : > { %v8218_v0 = vmov 0.0  }
  0x13   : > { %348 = vst [vmem:[#allocation2] sm:$0xff] %v8218_v0 }
  0x14 PF: > { %v5259_v1 = vld [vmem:[%s8290_s19 + $0xe0] sm:$0xf]  ;;  %v7566_v2 = vld [vmem:[%s8290_s19 + $0xec] sm:$0xf0]  ;;  %vm4299_vm0 = vcmask 1041408   ;;  %vm4301_vm1 = vcmask 1045508  }
  0x15   : > { %v5387_v3 = vld [vmem:[%s8290_s19 + $0x1e0] sm:$0xf]  ;;  %v5260_v4 = vor.u32 %v7566_v2, %v5259_v1  ;;  %v7598_v5 = vld [vmem:[%s8290_s19 + $0x1ec] sm:$0xf0]  ;;  %vm4303_vm2 = vcmask 1043456   ;;  %p7193_p6 = scmp.ne.s32.totalorder %s8276_s10, 2 }
  0x16   : > { %v5515_v6 = vld [vmem:[%s8290_s19 + $0x2e0] sm:$0xf]  ;;  %v7630_v7 = vld [vmem:[%s8290_s19 + $0x2ec] sm:$0xf0]  ;;  %v5388_v8 = vor.u32 %v7598_v5, %v5387_v3 }
  0x17   : > { %v5516_v9 = vor.u32 %v7630_v7, %v5515_v6  ;;  %v5643_v10 = vld [vmem:[%s8290_s19 + $0x3e0] sm:$0xf]  ;;  %v7662_v11 = vld [vmem:[%s8290_s19 + $0x3ec] sm:$0xf0]  ;;  %3460 = vmatpush.bf16.msra.mxu0 %v5260_v4 }
  0x18   : > { %v5243_v12 = vld [vmem:[%s8290_s19 + $0xc0] sm:$0xf]  ;;  %v5644_v13 = vor.u32 %v7662_v11, %v5643_v10  ;;  %v7562_v14 = vld [vmem:[%s8290_s19 + $0xcc] sm:$0xf0]  ;;  %3473 = vmatpush.bf16.msra.mxu1 %v5388_v8 }
  0x19   : > { %v5371_v15 = vld [vmem:[%s8290_s19 + $0x1c0] sm:$0xf]  ;;  %v7594_v16 = vld [vmem:[%s8290_s19 + $0x1cc] sm:$0xf0]  ;;  %3486 = vmatpush.bf16.msra.mxu2 %v5516_v9  ;;  %v5244_v17 = vor.u32 %v7562_v14, %v5243_v12 }
  0x1a   : > { %v5372_v18 = vor.u32 %v7594_v16, %v5371_v15  ;;  %v5499_v19 = vld [vmem:[%s8290_s19 + $0x2c0] sm:$0xf]  ;;  %v7626_v20 = vld [vmem:[%s8290_s19 + $0x2cc] sm:$0xf0]  ;;  %3499 = vmatpush.bf16.msra.mxu3 %v5644_v13 }
  0x1b   : > { %v5627_v21 = vld [vmem:[%s8290_s19 + $0x3c0] sm:$0xf]  ;;  %v5500_v22 = vor.u32 %v7626_v20, %v5499_v19  ;;  %v7658_v23 = vld [vmem:[%s8290_s19 + $0x3cc] sm:$0xf0]  ;;  %3461 = vmatpush.bf16.msra.mxu0 %v5244_v17 }
  0x1c   : > { %v5227_v24 = vld [vmem:[%s8290_s19 + $0xa0] sm:$0xf]  ;;  %v7558_v25 = vld [vmem:[%s8290_s19 + $0xac] sm:$0xf0]  ;;  %v5628_v26 = vor.u32 %v7658_v23, %v5627_v21  ;;  %3474 = vmatpush.bf16.msra.mxu1 %v5372_v18 }
  0x1d   : > { %v5355_v27 = vld [vmem:[%s8290_s19 + $0x1a0] sm:$0xf]  ;;  %v7590_v28 = vld [vmem:[%s8290_s19 + $0x1ac] sm:$0xf0]  ;;  %v5228_v30 = vor.u32 %v7558_v25, %v5227_v24  ;;  %3487 = vmatpush.bf16.msra.mxu2 %v5500_v22 }
  0x1e   : > { %v5483_v29 = vld [vmem:[%s8290_s19 + $0x2a0] sm:$0xf]  ;;  %v7622_v31 = vld [vmem:[%s8290_s19 + $0x2ac] sm:$0xf0]  ;;  %v5356_v34 = vor.u32 %v7590_v28, %v5355_v27  ;;  %3500 = vmatpush.bf16.msra.mxu3 %v5628_v26 }
  0x1f   : > { %v5611_v32 = vld [vmem:[%s8290_s19 + $0x3a0] sm:$0xf]  ;;  %v7654_v33 = vld [vmem:[%s8290_s19 + $0x3ac] sm:$0xf0]  ;;  %v5484_v35 = vor.u32 %v7622_v31, %v5483_v29  ;;  %3462 = vmatpush.bf16.msra.mxu0 %v5228_v30 }
  0x20   : > { %v5211_v36 = vld [vmem:[%s8290_s19 + $0x80] sm:$0xf]  ;;  %v7554_v37 = vld [vmem:[%s8290_s19 + $0x8c] sm:$0xf0]  ;;  %v5612_v39 = vor.u32 %v7654_v33, %v5611_v32  ;;  %3475 = vmatpush.bf16.msra.mxu1 %v5356_v34 }
  0x21   : > { %v5339_v38 = vld [vmem:[%s8290_s19 + $0x180] sm:$0xf]  ;;  %v7586_v40 = vld [vmem:[%s8290_s19 + $0x18c] sm:$0xf0]  ;;  %v5212_v45 = vor.u32 %v7554_v37, %v5211_v36  ;;  %3488 = vmatpush.bf16.msra.mxu2 %v5484_v35 }
  0x22   : > { %v5467_v41 = vld [vmem:[%s8290_s19 + $0x280] sm:$0xf]  ;;  %v7618_v42 = vld [vmem:[%s8290_s19 + $0x28c] sm:$0xf0]  ;;  %v5340_v46 = vor.u32 %v7586_v40, %v5339_v38  ;;  %3501 = vmatpush.bf16.msra.mxu3 %v5612_v39 }
  0x23   : > { %v5595_v43 = vld [vmem:[%s8290_s19 + $0x380] sm:$0xf]  ;;  %v7650_v44 = vld [vmem:[%s8290_s19 + $0x38c] sm:$0xf0]  ;;  %v5468_v47 = vor.u32 %v7618_v42, %v5467_v41  ;;  %3463 = vmatpush.bf16.msra.mxu0 %v5212_v45 }
  0x24   : > { %v5195_v48 = vld [vmem:[%s8290_s19 + $0x60] sm:$0xf]  ;;  %v7550_v49 = vld [vmem:[%s8290_s19 + $0x6c] sm:$0xf0]  ;;  %v5596_v51 = vor.u32 %v7650_v44, %v5595_v43  ;;  %3476 = vmatpush.bf16.msra.mxu1 %v5340_v46 }
  0x25   : > { %v5323_v50 = vld [vmem:[%s8290_s19 + $0x160] sm:$0xf]  ;;  %v7582_v52 = vld [vmem:[%s8290_s19 + $0x16c] sm:$0xf0]  ;;  %v5196_v57 = vor.u32 %v7550_v49, %v5195_v48  ;;  %3489 = vmatpush.bf16.msra.mxu2 %v5468_v47 }
  0x26   : > { %v5451_v53 = vld [vmem:[%s8290_s19 + $0x260] sm:$0xf]  ;;  %v7614_v54 = vld [vmem:[%s8290_s19 + $0x26c] sm:$0xf0]  ;;  %v5324_v58 = vor.u32 %v7582_v52, %v5323_v50  ;;  %3502 = vmatpush.bf16.msra.mxu3 %v5596_v51 }
  0x27   : > { %v5579_v55 = vld [vmem:[%s8290_s19 + $0x360] sm:$0xf]  ;;  %v7646_v56 = vld [vmem:[%s8290_s19 + $0x36c] sm:$0xf0]  ;;  %v5452_v59 = vor.u32 %v7614_v54, %v5451_v53  ;;  %3464 = vmatpush.bf16.msra.mxu0 %v5196_v57 }
  0x28   : > { %v5179_v60 = vld [vmem:[%s8290_s19 + $0x40] sm:$0xf]  ;;  %v7546_v61 = vld [vmem:[%s8290_s19 + $0x4c] sm:$0xf0]  ;;  %v5580_v63 = vor.u32 %v7646_v56, %v5579_v55  ;;  %3477 = vmatpush.bf16.msra.mxu1 %v5324_v58 }
  0x29   : > { %v5307_v62 = vld [vmem:[%s8290_s19 + $0x140] sm:$0xf]  ;;  %v7578_v0 = vld [vmem:[%s8290_s19 + $0x14c] sm:$0xf0]  ;;  %v5180_v5 = vor.u32 %v7546_v61, %v5179_v60  ;;  %3490 = vmatpush.bf16.msra.mxu2 %v5452_v59 }
  0x2a   : > { %v5435_v1 = vld [vmem:[%s8290_s19 + $0x240] sm:$0xf]  ;;  %v7610_v2 = vld [vmem:[%s8290_s19 + $0x24c] sm:$0xf0]  ;;  %v5308_v6 = vor.u32 %v7578_v0, %v5307_v62  ;;  %3503 = vmatpush.bf16.msra.mxu3 %v5580_v63 }
  0x2b   : > { %v5563_v3 = vld [vmem:[%s8290_s19 + $0x340] sm:$0xf]  ;;  %v7642_v4 = vld [vmem:[%s8290_s19 + $0x34c] sm:$0xf0]  ;;  %v5436_v7 = vor.u32 %v7610_v2, %v5435_v1  ;;  %3465 = vmatpush.bf16.msra.mxu0 %v5180_v5 }
  0x2c   : > { %v5163_v8 = vld [vmem:[%s8290_s19 + $0x20] sm:$0xf]  ;;  %v7542_v9 = vld [vmem:[%s8290_s19 + $0x2c] sm:$0xf0]  ;;  %v5564_v11 = vor.u32 %v7642_v4, %v5563_v3  ;;  %3478 = vmatpush.bf16.msra.mxu1 %v5308_v6 }
  0x2d   : > { %v5291_v10 = vld [vmem:[%s8290_s19 + $0x120] sm:$0xf]  ;;  %v7574_v12 = vld [vmem:[%s8290_s19 + $0x12c] sm:$0xf0]  ;;  %v5164_v17 = vor.u32 %v7542_v9, %v5163_v8  ;;  %3491 = vmatpush.bf16.msra.mxu2 %v5436_v7 }
  0x2e   : > { %v5419_v13 = vld [vmem:[%s8290_s19 + $0x220] sm:$0xf]  ;;  %v7606_v14 = vld [vmem:[%s8290_s19 + $0x22c] sm:$0xf0]  ;;  %v5292_v20 = vor.u32 %v7574_v12, %v5291_v10  ;;  %3504 = vmatpush.bf16.msra.mxu3 %v5564_v11 }
  0x2f   : > { %v5547_v15 = vld [vmem:[%s8290_s19 + $0x320] sm:$0xf]  ;;  %v7638_v16 = vld [vmem:[%s8290_s19 + $0x32c] sm:$0xf0]  ;;  %v5420_v21 = vor.u32 %v7606_v14, %v5419_v13  ;;  %3466 = vmatpush.bf16.msra.mxu0 %v5164_v17 }
  0x30   : > { %v5147_v18 = vld [vmem:[%s8290_s19] sm:$0xf]  ;;  %v7538_v19 = vld [vmem:[%s8290_s19 + $0xc] sm:$0xf0]  ;;  %v5548_v25 = vor.u32 %v7638_v16, %v5547_v15  ;;  %3479 = vmatpush.bf16.msra.mxu1 %v5292_v20 }
  0x31   : > { %v5275_v22 = vld [vmem:[%s8290_s19 + $0x100] sm:$0xf]  ;;  %v7570_v23 = vld [vmem:[%s8290_s19 + $0x10c] sm:$0xf0]  ;;  %v5148_v32 = vor.u32 %v7538_v19, %v5147_v18  ;;  %3492 = vmatpush.bf16.msra.mxu2 %v5420_v21 }
  0x32   : > { %v5403_v24 = vld [vmem:[%s8290_s19 + $0x200] sm:$0xf]  ;;  %v7602_v26 = vld [vmem:[%s8290_s19 + $0x20c] sm:$0xf0]  ;;  %v5276_v36 = vor.u32 %v7570_v23, %v5275_v22  ;;  %3505 = vmatpush.bf16.msra.mxu3 %v5548_v25 }
  0x33   : > { %v5531_v27 = vld [vmem:[%s8290_s19 + $0x300] sm:$0xf]  ;;  %v7634_v28 = vld [vmem:[%s8290_s19 + $0x30c] sm:$0xf0]  ;;  %v5404_v37 = vor.u32 %v7602_v26, %v5403_v24  ;;  %3467 = vmatpush.bf16.msra.mxu0 %v5148_v32 }
  0x34   : > { %v5771_v29 = vld [vmem:[%s8290_s19 + $0x4e0] sm:$0xf]  ;;  %v7694_v30 = vld [vmem:[%s8290_s19 + $0x4ec] sm:$0xf0]  ;;  %v5532_v40 = vor.u32 %v7634_v28, %v5531_v27  ;;  %3480 = vmatpush.bf16.msra.mxu1 %v5276_v36 }
  0x35   : > { %v5899_v31 = vld [vmem:[%s8290_s19 + $0x5e0] sm:$0xf]  ;;  %v7726_v33 = vld [vmem:[%s8290_s19 + $0x5ec] sm:$0xf0]  ;;  %v5772_v41 = vor.u32 %v7694_v30, %v5771_v29  ;;  %3493 = vmatpush.bf16.msra.mxu2 %v5404_v37 }
  0x36   : > { %v6027_v34 = vld [vmem:[%s8290_s19 + $0x6e0] sm:$0xf]  ;;  %v7758_v35 = vld [vmem:[%s8290_s19 + $0x6ec] sm:$0xf0]  ;;  %v5900_v42 = vor.u32 %v7726_v33, %v5899_v31  ;;  %3506 = vmatpush.bf16.msra.mxu3 %v5532_v40 }
  0x37   : > { %v6155_v38 = vld [vmem:[%s8290_s19 + $0x7e0] sm:$0xf]  ;;  %v7790_v39 = vld [vmem:[%s8290_s19 + $0x7ec] sm:$0xf0]  ;;  %v6028_v43 = vor.u32 %v7758_v35, %v6027_v34  ;;  %3512 = vmatpush.bf16.msrb.mxu0 %v5772_v41 }
  0x38   : > { %v5755_v44 = vld [vmem:[%s8290_s19 + $0x4c0] sm:$0xf]  ;;  %v7690_v45 = vld [vmem:[%s8290_s19 + $0x4cc] sm:$0xf0]  ;;  %v6156_v47 = vor.u32 %v7790_v39, %v6155_v38  ;;  %3525 = vmatpush.bf16.msrb.mxu1 %v5900_v42 }
  0x39   : > { %v5883_v46 = vld [vmem:[%s8290_s19 + $0x5c0] sm:$0xf]  ;;  %v7722_v48 = vld [vmem:[%s8290_s19 + $0x5cc] sm:$0xf0]  ;;  %v5756_v53 = vor.u32 %v7690_v45, %v5755_v44  ;;  %3538 = vmatpush.bf16.msrb.mxu2 %v6028_v43 }
  0x3a   : > { %v6011_v49 = vld [vmem:[%s8290_s19 + $0x6c0] sm:$0xf]  ;;  %v7754_v50 = vld [vmem:[%s8290_s19 + $0x6cc] sm:$0xf0]  ;;  %v5884_v56 = vor.u32 %v7722_v48, %v5883_v46  ;;  %3551 = vmatpush.bf16.msrb.mxu3 %v6156_v47 }
  0x3b   : > { %v6139_v51 = vld [vmem:[%s8290_s19 + $0x7c0] sm:$0xf]  ;;  %v7786_v52 = vld [vmem:[%s8290_s19 + $0x7cc] sm:$0xf0]  ;;  %v6012_v57 = vor.u32 %v7754_v50, %v6011_v49  ;;  %3513 = vmatpush.bf16.msrb.mxu0 %v5756_v53 }
  0x3c   : > { %v5739_v54 = vld [vmem:[%s8290_s19 + $0x4a0] sm:$0xf]  ;;  %v7686_v55 = vld [vmem:[%s8290_s19 + $0x4ac] sm:$0xf0]  ;;  %v6140_v61 = vor.u32 %v7786_v52, %v6139_v51  ;;  %3526 = vmatpush.bf16.msrb.mxu1 %v5884_v56 }
  0x3d   : > { %v5867_v58 = vld [vmem:[%s8290_s19 + $0x5a0] sm:$0xf]  ;;  %v7718_v59 = vld [vmem:[%s8290_s19 + $0x5ac] sm:$0xf0]  ;;  %v5740_v2 = vor.u32 %v7686_v55, %v5739_v54  ;;  %3539 = vmatpush.bf16.msrb.mxu2 %v6012_v57 }
  0x3e   : > { %v350_v60 = vld [vmem:[%s8285_s15] sm:$0xff]  ;;  %v7750_v63 = vld [vmem:[%s8290_s19 + $0x6ac] sm:$0xf0]  ;;  %v5868_v3 = vor.u32 %v7718_v59, %v5867_v58  ;;  %3552 = vmatpush.bf16.msrb.mxu3 %v6140_v61 }
  0x3f   : > { %v5995_v62 = vld [vmem:[%s8290_s19 + $0x6a0] sm:$0xf]  ;;  %865 = vst [vmem:[#allocation1] ss:$9 sm:$0xff] %v350_v60  ;;  %v7782_v1 = vld [vmem:[%s8290_s19 + $0x7ac] sm:$0xf0]  ;;  %3514 = vmatpush.bf16.msrb.mxu0 %v5740_v2 }
  0x40   : > { %v6123_v0 = vld [vmem:[%s8290_s19 + $0x7a0] sm:$0xf]  ;;  %v5996_v4 = vor.u32 %v7750_v63, %v5995_v62  ;;  %v7682_v6 = vld [vmem:[%s8290_s19 + $0x48c] sm:$0xf0]  ;;  %3527 = vmatpush.bf16.msrb.mxu1 %v5868_v3  ;;  %v351_v62 = vld [vmem:[%s8285_s15 + $0x8] sm:$0xff] }
  0x41   : > { %v5723_v5 = vld [vmem:[%s8290_s19 + $0x480] sm:$0xf]  ;;  %v6124_v8 = vor.u32 %v7782_v1, %v6123_v0  ;;  %v7714_v9 = vld [vmem:[%s8290_s19 + $0x58c] sm:$0xf0] }
  0x42   : > { %v5851_v7 = vld [vmem:[%s8290_s19 + $0x580] sm:$0xf]  ;;  %v7746_v11 = vld [vmem:[%s8290_s19 + $0x68c] sm:$0xf0]  ;;  %v5724_v15 = vor.u32 %v7682_v6, %v5723_v5  ;;  %3540 = vmatpush.bf16.msrb.mxu2 %v5996_v4 }
  0x43   : > { %v5979_v10 = vld [vmem:[%s8290_s19 + $0x680] sm:$0xf]  ;;  %v7778_v13 = vld [vmem:[%s8290_s19 + $0x78c] sm:$0xf0]  ;;  %v5852_v19 = vor.u32 %v7714_v9, %v5851_v7  ;;  %3553 = vmatpush.bf16.msrb.mxu3 %v6124_v8 }
  0x44   : > { %v6107_v12 = vld [vmem:[%s8290_s19 + $0x780] sm:$0xf]  ;;  %v7678_v16 = vld [vmem:[%s8290_s19 + $0x46c] sm:$0xf0]  ;;  %v5980_v20 = vor.u32 %v7746_v11, %v5979_v10  ;;  %3515 = vmatpush.bf16.msrb.mxu0 %v5724_v15 }
  0x45   : > { %v5707_v14 = vld [vmem:[%s8290_s19 + $0x460] sm:$0xf]  ;;  %v7710_v18 = vld [vmem:[%s8290_s19 + $0x56c] sm:$0xf0]  ;;  %v6108_v24 = vor.u32 %v7778_v13, %v6107_v12  ;;  %3528 = vmatpush.bf16.msrb.mxu1 %v5852_v19 }
  0x46   : > { %v5835_v17 = vld [vmem:[%s8290_s19 + $0x560] sm:$0xf]  ;;  %v8394_v21 = vld [vmem:[#allocation1 + $0x12] sm:$0xff]  ;;  %v8403_v27 = vld [vmem:[#allocation1 + $0x9] sm:$0xff]  ;;  %v5708_v30 = vor.u32 %v7678_v16, %v5707_v14  ;;  %3541 = vmatpush.bf16.msrb.mxu2 %v5980_v20 }
  0x47   : > { %v8396_v22 = vld [vmem:[#allocation1] sm:$0xff]  ;;  %v7742_v26 = vld [vmem:[%s8290_s19 + $0x66c] sm:$0xf0]  ;;  %3494 = vmatmul.bf16.vlgmr.msra.gmra.mxu2 %v8394_v21  ;;  %3481 = vmatmul.bf16.vlgmr.msra.gmra.mxu1 %v8403_v27  ;;  %v5836_v31 = vor.u32 %v7710_v18, %v5835_v17  ;;  %v8432_v61 = vld [vmem:[#allocation1 + $0x36] sm:$0xff] }
  0x48   : > { %v8398_v23 = vld [vmem:[#allocation1 + $0x1b] sm:$0xff]  ;;  %v7774_v29 = vld [vmem:[%s8290_s19 + $0x76c] sm:$0xf0]  ;;  %3468 = vmatmul.bf16.vlgmr.msra.gmra.mxu0 %v8396_v22  ;;  %3554 = vmatpush.bf16.msrb.mxu3 %v6108_v24  ;;  %v8435_v1 = vld [vmem:[#allocation1 + $0x24] sm:$0xff] }
  0x49   : > { %v5963_v25 = vld [vmem:[%s8290_s19 + $0x660] sm:$0xf]  ;;  %3507 = vmatmul.bf16.vlgmr.msra.gmra.mxu3 %v8398_v23  ;;  %v7674_v34 = vld [vmem:[%s8290_s19 + $0x44c] sm:$0xf0]  ;;  %3516 = vmatpush.bf16.msrb.mxu0 %v5708_v30 }
  0x4a   : > { %v6091_v28 = vld [vmem:[%s8290_s19 + $0x760] sm:$0xf]  ;;  %v5964_v32 = vor.u32 %v7742_v26, %v5963_v25  ;;  %v7706_v37 = vld [vmem:[%s8290_s19 + $0x54c] sm:$0xf0]  ;;  %3529 = vmatpush.bf16.msrb.mxu1 %v5836_v31 }
  0x4b   : > { %v5691_v33 = vld [vmem:[%s8290_s19 + $0x440] sm:$0xf]  ;;  %v6092_v36 = vor.u32 %v7774_v29, %v6091_v28  ;;  %v7738_v39 = vld [vmem:[%s8290_s19 + $0x64c] sm:$0xf0] }
  0x4c   : > { %v5819_v35 = vld [vmem:[%s8290_s19 + $0x540] sm:$0xf]  ;;  %v7770_v41 = vld [vmem:[%s8290_s19 + $0x74c] sm:$0xf0]  ;;  %v5692_v42 = vor.u32 %v7674_v34, %v5691_v33  ;;  %3542 = vmatpush.bf16.msrb.mxu2 %v5964_v32 }
  0x4d   : > { %v5947_v38 = vld [vmem:[%s8290_s19 + $0x640] sm:$0xf]  ;;  %v5820_v44 = vor.u32 %v7706_v37, %v5819_v35  ;;  %v7670_v46 = vld [vmem:[%s8290_s19 + $0x42c] sm:$0xf0]  ;;  %3555 = vmatpush.bf16.msrb.mxu3 %v6092_v36 }
  0x4e   : > { %v6075_v40 = vld [vmem:[%s8290_s19 + $0x740] sm:$0xf]  ;;  %v5948_v45 = vor.u32 %v7738_v39, %v5947_v38  ;;  %v7702_v48 = vld [vmem:[%s8290_s19 + $0x52c] sm:$0xf0]  ;;  %3517 = vmatpush.bf16.msrb.mxu0 %v5692_v42 }
  0x4f   : > { %v5675_v43 = vld [vmem:[%s8290_s19 + $0x420] sm:$0xf]  ;;  %v6076_v49 = vor.u32 %v7770_v41, %v6075_v40  ;;  %v7734_v51 = vld [vmem:[%s8290_s19 + $0x62c] sm:$0xf0]  ;;  %3530 = vmatpush.bf16.msrb.mxu1 %v5820_v44 }
  0x50   : > { %v5803_v47 = vld [vmem:[%s8290_s19 + $0x520] sm:$0xf]  ;;  %v7766_v53 = vld [vmem:[%s8290_s19 + $0x72c] sm:$0xf0]  ;;  %v5676_v56 = vor.u32 %v7670_v46, %v5675_v43  ;;  %3543 = vmatpush.bf16.msrb.mxu2 %v5948_v45 }
  0x51   : > { %v5931_v50 = vld [vmem:[%s8290_s19 + $0x620] sm:$0xf]  ;;  %v7666_v55 = vld [vmem:[%s8290_s19 + $0x40c] sm:$0xf0]  ;;  %v5804_v63 = vor.u32 %v7702_v48, %v5803_v47  ;;  %3556 = vmatpush.bf16.msrb.mxu3 %v6076_v49 }
  0x52   : > { %v6059_v52 = vld [vmem:[%s8290_s19 + $0x720] sm:$0xf]  ;;  %v7698_v58 = vld [vmem:[%s8290_s19 + $0x50c] sm:$0xf0]  ;;  %v5932_v0 = vor.u32 %v7734_v51, %v5931_v50  ;;  %3518 = vmatpush.bf16.msrb.mxu0 %v5676_v56 }
  0x53   : > { %v5659_v54 = vld [vmem:[%s8290_s19 + $0x400] sm:$0xf]  ;;  %v7730_v60 = vld [vmem:[%s8290_s19 + $0x60c] sm:$0xf0]  ;;  %v6060_v4 = vor.u32 %v7766_v53, %v6059_v52  ;;  %3531 = vmatpush.bf16.msrb.mxu1 %v5804_v63 }
  0x54   : > { %v5787_v57 = vld [vmem:[%s8290_s19 + $0x500] sm:$0xf]  ;;  %v8439_v3 = vld [vmem:[#allocation1 + $0x2d] sm:$0xff]  ;;  %v5660_v10 = vor.u32 %v7666_v55, %v5659_v54  ;;  %3544 = vmatpush.bf16.msrb.mxu2 %v5932_v0 }
  0x55   : > { %v5915_v59 = vld [vmem:[%s8290_s19 + $0x600] sm:$0xf]  ;;  %v7762_v6 = vld [vmem:[%s8290_s19 + $0x70c] sm:$0xf0]  ;;  %v5788_v14 = vor.u32 %v7698_v58, %v5787_v57  ;;  %3557 = vmatpush.bf16.msrb.mxu3 %v6060_v4 }
  0x56   : > { %v8437_v2 = vld [vmem:[#allocation1 + $0x3f] sm:$0xff]  ;;  %v7822_v8 = vld [vmem:[%s8290_s19 + $0x8ec] sm:$0xf0]  ;;  %v5916_v15 = vor.u32 %v7730_v60, %v5915_v59  ;;  %3519 = vmatpush.bf16.msrb.mxu0 %v5660_v10 }
  0x57   : > { %v6043_v5 = vld [vmem:[%s8290_s19 + $0x700] sm:$0xf]  ;;  %875 = vst [vmem:[#allocation1] ss:$9 sm:$0xff] %v351_v62  ;;  %v7854_v11 = vld [vmem:[%s8290_s19 + $0x9ec] sm:$0xf0]  ;;  %3532 = vmatpush.bf16.msrb.mxu1 %v5788_v14 }
  0x58   : > { %v6283_v7 = vld [vmem:[%s8290_s19 + $0x8e0] sm:$0xf]  ;;  %v7886_v13 = vld [vmem:[%s8290_s19 + $0xaec] sm:$0xf0]  ;;  %v6044_v18 = vor.u32 %v7762_v6, %v6043_v5  ;;  %3545 = vmatpush.bf16.msrb.mxu2 %v5916_v15 }
  0x59   : > { %v6411_v9 = vld [vmem:[%s8290_s19 + $0x9e0] sm:$0xf]  ;;  %v7918_v17 = vld [vmem:[%s8290_s19 + $0xbec] sm:$0xf0]  ;;  %v6284_v19 = vor.u32 %v7822_v8, %v6283_v7  ;;  %3520 = vmatmul.bf16.vlgmr.msrb.gmra.mxu0 %v8435_v1 }
  0x5a   : > { %v6539_v12 = vld [vmem:[%s8290_s19 + $0xae0] sm:$0xf]  ;;  %v6412_v20 = vor.u32 %v7854_v11, %v6411_v9  ;;  %v7818_v26 = vld [vmem:[%s8290_s19 + $0x8cc] sm:$0xf0]  ;;  %3558 = vmatpush.bf16.msrb.mxu3 %v6044_v18  ;;  %3533 = vmatmul.bf16.vlgmr.msrb.gmra.mxu1 %v8439_v3 }
  0x5b   : > { %v6667_v16 = vld [vmem:[%s8290_s19 + $0xbe0] sm:$0xf]  ;;  %v6540_v24 = vor.u32 %v7886_v13, %v6539_v12  ;;  %v7850_v30 = vld [vmem:[%s8290_s19 + $0x9cc] sm:$0xf0]  ;;  %3564 = vmatpush.bf16.msra.mxu0 %v6284_v19  ;;  %3546 = vmatmul.bf16.vlgmr.msrb.gmra.mxu2 %v8432_v61 }
  0x5c   : > { %v6267_v25 = vld [vmem:[%s8290_s19 + $0x8c0] sm:$0xf]  ;;  %v6668_v29 = vor.u32 %v7918_v17, %v6667_v16  ;;  %v7882_v32 = vld [vmem:[%s8290_s19 + $0xacc] sm:$0xf0]  ;;  %3577 = vmatpush.bf16.msra.mxu1 %v6412_v20 }
  0x5d   : > { %v6395_v28 = vld [vmem:[%s8290_s19 + $0x9c0] sm:$0xf]  ;;  %v7914_v34 = vld [vmem:[%s8290_s19 + $0xbcc] sm:$0xf0]  ;;  %v6268_v35 = vor.u32 %v7818_v26, %v6267_v25  ;;  %3590 = vmatpush.bf16.msra.mxu2 %v6540_v24  ;;  %3559 = vmatmul.bf16.vlgmr.msrb.gmra.mxu3 %v8437_v2 }
  0x5e   : > { %v6523_v31 = vld [vmem:[%s8290_s19 + $0xac0] sm:$0xf]  ;;  %v6396_v36 = vor.u32 %v7850_v30, %v6395_v28  ;;  %v7814_v39 = vld [vmem:[%s8290_s19 + $0x8ac] sm:$0xf0]  ;;  %3603 = vmatpush.bf16.msra.mxu3 %v6668_v29 }
  0x5f   : > { %v6651_v33 = vld [vmem:[%s8290_s19 + $0xbc0] sm:$0xf]  ;;  %v6524_v37 = vor.u32 %v7882_v32, %v6523_v31  ;;  %v7846_v42 = vld [vmem:[%s8290_s19 + $0x9ac] sm:$0xf0]  ;;  %3565 = vmatpush.bf16.msra.mxu0 %v6268_v35 }
  0x60   : > { %v6251_v38 = vld [vmem:[%s8290_s19 + $0x8a0] sm:$0xf]  ;;  %v6652_v41 = vor.u32 %v7914_v34, %v6651_v33  ;;  %v7878_v44 = vld [vmem:[%s8290_s19 + $0xaac] sm:$0xf0]  ;;  %3578 = vmatpush.bf16.msra.mxu1 %v6396_v36 }
  0x61   : > { %v6379_v40 = vld [vmem:[%s8290_s19 + $0x9a0] sm:$0xf]  ;;  %v7910_v46 = vld [vmem:[%s8290_s19 + $0xbac] sm:$0xf0]  ;;  %v6252_v47 = vor.u32 %v7814_v39, %v6251_v38  ;;  %3591 = vmatpush.bf16.msra.mxu2 %v6524_v37 }
  0x62   : > { %v6507_v43 = vld [vmem:[%s8290_s19 + $0xaa0] sm:$0xf]  ;;  %v6380_v48 = vor.u32 %v7846_v42, %v6379_v40  ;;  %v7810_v51 = vld [vmem:[%s8290_s19 + $0x88c] sm:$0xf0]  ;;  %3604 = vmatpush.bf16.msra.mxu3 %v6652_v41 }
  0x63   : > { %v6635_v45 = vld [vmem:[%s8290_s19 + $0xba0] sm:$0xf]  ;;  %v6508_v49 = vor.u32 %v7878_v44, %v6507_v43  ;;  %v7842_v54 = vld [vmem:[%s8290_s19 + $0x98c] sm:$0xf0]  ;;  %3566 = vmatpush.bf16.msra.mxu0 %v6252_v47 }
  0x64   : > { %v6235_v50 = vld [vmem:[%s8290_s19 + $0x880] sm:$0xf]  ;;  %v6636_v53 = vor.u32 %v7910_v46, %v6635_v45  ;;  %v7874_v56 = vld [vmem:[%s8290_s19 + $0xa8c] sm:$0xf0]  ;;  %3579 = vmatpush.bf16.msra.mxu1 %v6380_v48 }
  0x65   : > { %v6363_v52 = vld [vmem:[%s8290_s19 + $0x980] sm:$0xf]  ;;  %v7906_v58 = vld [vmem:[%s8290_s19 + $0xb8c] sm:$0xf0]  ;;  %v6236_v59 = vor.u32 %v7810_v51, %v6235_v50  ;;  %3592 = vmatpush.bf16.msra.mxu2 %v6508_v49 }
  0x66   : > { %v6491_v55 = vld [vmem:[%s8290_s19 + $0xa80] sm:$0xf]  ;;  %v6364_v60 = vor.u32 %v7842_v54, %v6363_v52  ;;  %v7806_v0 = vld [vmem:[%s8290_s19 + $0x86c] sm:$0xf0]  ;;  %3605 = vmatpush.bf16.msra.mxu3 %v6636_v53 }
  0x67   : > { %v6619_v57 = vld [vmem:[%s8290_s19 + $0xb80] sm:$0xf]  ;;  %v6492_v62 = vor.u32 %v7874_v56, %v6491_v55  ;;  %v7838_v6 = vld [vmem:[%s8290_s19 + $0x96c] sm:$0xf0]  ;;  %3567 = vmatpush.bf16.msra.mxu0 %v6236_v59 }
  0x68   : > { %v6219_v63 = vld [vmem:[%s8290_s19 + $0x860] sm:$0xf]  ;;  %v6620_v5 = vor.u32 %v7906_v58, %v6619_v57  ;;  %v7870_v8 = vld [vmem:[%s8290_s19 + $0xa6c] sm:$0xf0]  ;;  %3580 = vmatpush.bf16.msra.mxu1 %v6364_v60 }
  0x69   : > { %v6347_v4 = vld [vmem:[%s8290_s19 + $0x960] sm:$0xf]  ;;  %v7902_v10 = vld [vmem:[%s8290_s19 + $0xb6c] sm:$0xf0]  ;;  %v6220_v11 = vor.u32 %v7806_v0, %v6219_v63  ;;  %3593 = vmatpush.bf16.msra.mxu2 %v6492_v62 }
  0x6a   : > { %v6475_v7 = vld [vmem:[%s8290_s19 + $0xa60] sm:$0xf]  ;;  %v6348_v12 = vor.u32 %v7838_v6, %v6347_v4  ;;  %v7802_v15 = vld [vmem:[%s8290_s19 + $0x84c] sm:$0xf0]  ;;  %3606 = vmatpush.bf16.msra.mxu3 %v6620_v5 }
  0x6b   : > { %v6603_v9 = vld [vmem:[%s8290_s19 + $0xb60] sm:$0xf]  ;;  %v6476_v13 = vor.u32 %v7870_v8, %v6475_v7  ;;  %v7834_v18 = vld [vmem:[%s8290_s19 + $0x94c] sm:$0xf0]  ;;  %3568 = vmatpush.bf16.msra.mxu0 %v6220_v11 }
  0x6c   : > { %v6203_v14 = vld [vmem:[%s8290_s19 + $0x840] sm:$0xf]  ;;  %v6604_v17 = vor.u32 %v7902_v10, %v6603_v9  ;;  %v7866_v20 = vld [vmem:[%s8290_s19 + $0xa4c] sm:$0xf0]  ;;  %3581 = vmatpush.bf16.msra.mxu1 %v6348_v12 }
  0x6d   : > { %v6331_v16 = vld [vmem:[%s8290_s19 + $0x940] sm:$0xf]  ;;  %v7898_v25 = vld [vmem:[%s8290_s19 + $0xb4c] sm:$0xf0]  ;;  %v6204_v26 = vor.u32 %v7802_v15, %v6203_v14  ;;  %3594 = vmatpush.bf16.msra.mxu2 %v6476_v13 }
  0x6e   : > { %v6459_v19 = vld [vmem:[%s8290_s19 + $0xa40] sm:$0xf]  ;;  %v6332_v28 = vor.u32 %v7834_v18, %v6331_v16  ;;  %v7798_v31 = vld [vmem:[%s8290_s19 + $0x82c] sm:$0xf0]  ;;  %3607 = vmatpush.bf16.msra.mxu3 %v6604_v17 }
  0x6f   : > { %v6587_v24 = vld [vmem:[%s8290_s19 + $0xb40] sm:$0xf]  ;;  %v6460_v29 = vor.u32 %v7866_v20, %v6459_v19  ;;  %v7830_v34 = vld [vmem:[%s8290_s19 + $0x92c] sm:$0xf0]  ;;  %3569 = vmatpush.bf16.msra.mxu0 %v6204_v26 }
  0x70   : > { %v6187_v30 = vld [vmem:[%s8290_s19 + $0x820] sm:$0xf]  ;;  %v6588_v33 = vor.u32 %v7898_v25, %v6587_v24  ;;  %v7862_v36 = vld [vmem:[%s8290_s19 + $0xa2c] sm:$0xf0]  ;;  %3582 = vmatpush.bf16.msra.mxu1 %v6332_v28 }
  0x71   : > { %v6315_v32 = vld [vmem:[%s8290_s19 + $0x920] sm:$0xf]  ;;  %v7894_v38 = vld [vmem:[%s8290_s19 + $0xb2c] sm:$0xf0]  ;;  %v6188_v39 = vor.u32 %v7798_v31, %v6187_v30  ;;  %3595 = vmatpush.bf16.msra.mxu2 %v6460_v29 }
  0x72   : > { %v6443_v35 = vld [vmem:[%s8290_s19 + $0xa20] sm:$0xf]  ;;  %v7794_v41 = vld [vmem:[%s8290_s19 + $0x80c] sm:$0xf0]  ;;  %v6316_v42 = vor.u32 %v7830_v34, %v6315_v32  ;;  %3608 = vmatpush.bf16.msra.mxu3 %v6588_v33 }
  0x73   : > { %v6571_v37 = vld [vmem:[%s8290_s19 + $0xb20] sm:$0xf]  ;;  %v6444_v43 = vor.u32 %v7862_v36, %v6443_v35  ;;  %v7826_v45 = vld [vmem:[%s8290_s19 + $0x90c] sm:$0xf0]  ;;  %3570 = vmatpush.bf16.msra.mxu0 %v6188_v39 }
  0x74   : > { %v6171_v40 = vld [vmem:[%s8290_s19 + $0x800] sm:$0xf]  ;;  %v6572_v47 = vor.u32 %v7894_v38, %v6571_v37  ;;  %v7858_v48 = vld [vmem:[%s8290_s19 + $0xa0c] sm:$0xf0]  ;;  %3583 = vmatpush.bf16.msra.mxu1 %v6316_v42 }
  0x75   : > { %v6299_v44 = vld [vmem:[%s8290_s19 + $0x900] sm:$0xf]  ;;  %v7890_v50 = vld [vmem:[%s8290_s19 + $0xb0c] sm:$0xf0]  ;;  %v6172_v54 = vor.u32 %v7794_v41, %v6171_v40  ;;  %3596 = vmatpush.bf16.msra.mxu2 %v6444_v43 }
  0x76   : > { %v6427_v46 = vld [vmem:[%s8290_s19 + $0xa00] sm:$0xf]  ;;  %v7950_v52 = vld [vmem:[%s8290_s19 + $0xcec] sm:$0xf0]  ;;  %v6300_v58 = vor.u32 %v7826_v45, %v6299_v44  ;;  %3609 = vmatpush.bf16.msra.mxu3 %v6572_v47 }
  0x77   : > { %v6555_v49 = vld [vmem:[%s8290_s19 + $0xb00] sm:$0xf]  ;;  %v7982_v55 = vld [vmem:[%s8290_s19 + $0xdec] sm:$0xf0]  ;;  %v6428_v59 = vor.u32 %v7858_v48, %v6427_v46  ;;  %3571 = vmatpush.bf16.msra.mxu0 %v6172_v54 }
  0x78   : > { %v6795_v51 = vld [vmem:[%s8290_s19 + $0xce0] sm:$0xf]  ;;  %v8014_v57 = vld [vmem:[%s8290_s19 + $0xeec] sm:$0xf0]  ;;  %v6556_v63 = vor.u32 %v7890_v50, %v6555_v49  ;;  %3584 = vmatpush.bf16.msra.mxu1 %v6300_v58 }
  0x79   : > { %v6923_v53 = vld [vmem:[%s8290_s19 + $0xde0] sm:$0xf]  ;;  %v8046_v62 = vld [vmem:[%s8290_s19 + $0xfec] sm:$0xf0]  ;;  %v6796_v0 = vor.u32 %v7950_v52, %v6795_v51  ;;  %3597 = vmatpush.bf16.msra.mxu2 %v6428_v59 }
  0x7a   : > { %v7051_v56 = vld [vmem:[%s8290_s19 + $0xee0] sm:$0xf]  ;;  %v6924_v4 = vor.u32 %v7982_v55, %v6923_v53  ;;  %v7946_v7 = vld [vmem:[%s8290_s19 + $0xccc] sm:$0xf0]  ;;  %3610 = vmatpush.bf16.msra.mxu3 %v6556_v63 }
  0x7b   : > { %v7179_v60 = vld [vmem:[%s8290_s19 + $0xfe0] sm:$0xf]  ;;  %v7052_v5 = vor.u32 %v8014_v57, %v7051_v56  ;;  %v7978_v10 = vld [vmem:[%s8290_s19 + $0xdcc] sm:$0xf0]  ;;  %3616 = vmatpush.bf16.msrb.mxu0 %v6796_v0 }
  0x7c   : > { %v6779_v6 = vld [vmem:[%s8290_s19 + $0xcc0] sm:$0xf]  ;;  %v7180_v9 = vor.u32 %v8046_v62, %v7179_v60  ;;  %v8010_v12 = vld [vmem:[%s8290_s19 + $0xecc] sm:$0xf0]  ;;  %3629 = vmatpush.bf16.msrb.mxu1 %v6924_v4 }
  0x7d   : > { %v6907_v8 = vld [vmem:[%s8290_s19 + $0xdc0] sm:$0xf]  ;;  %v8042_v15 = vld [vmem:[%s8290_s19 + $0xfcc] sm:$0xf0]  ;;  %v6780_v19 = vor.u32 %v7946_v7, %v6779_v6  ;;  %3642 = vmatpush.bf16.msrb.mxu2 %v7052_v5 }
  0x7e   : > { %v7035_v11 = vld [vmem:[%s8290_s19 + $0xec0] sm:$0xf]  ;;  %v878_v16 = vld [vmem:[#allocation1 + $0x12] sm:$0xff]  ;;  %v877_v17 = vld [vmem:[#allocation1 + $0x9] sm:$0xff]  ;;  %v6908_v20 = vor.u32 %v7978_v10, %v6907_v8  ;;  %3655 = vmatpush.bf16.msrb.mxu3 %v7180_v9 }
  0x7f   : > { %v876_v13 = vld [vmem:[#allocation1] sm:$0xff]  ;;  %v7036_v24 = vor.u32 %v8010_v12, %v7035_v11  ;;  %v7942_v26 = vld [vmem:[%s8290_s19 + $0xcac] sm:$0xf0]  ;;  %3598 = vmatmul.bf16.vlgmr.msra.gmra.mxu2 %v878_v16  ;;  %3585 = vmatmul.bf16.vlgmr.msra.gmra.mxu1 %v877_v17 }
  0x80   : > { %v7163_v14 = vld [vmem:[%s8290_s19 + $0xfc0] sm:$0xf]  ;;  %3572 = vmatmul.bf16.vlgmr.msra.gmra.mxu0 %v876_v13  ;;  %v7974_v30 = vld [vmem:[%s8290_s19 + $0xdac] sm:$0xf0]  ;;  %3630 = vmatpush.bf16.msrb.mxu1 %v6908_v20 }
  0x81   : > { %v879_v18 = vld [vmem:[#allocation1 + $0x1b] sm:$0xff]  ;;  %v7164_v29 = vor.u32 %v8042_v15, %v7163_v14  ;;  %v8006_v32 = vld [vmem:[%s8290_s19 + $0xeac] sm:$0xf0]  ;;  %3617 = vmatpush.bf16.msrb.mxu0 %v6780_v19  ;;  %3643 = vmatpush.bf16.msrb.mxu2 %v7036_v24 }
  0x82   : > { %v6763_v25 = vld [vmem:[%s8290_s19 + $0xca0] sm:$0xf]  ;;  %v8038_v34 = vld [vmem:[%s8290_s19 + $0xfac] sm:$0xf0]  ;;  %3611 = vmatmul.bf16.vlgmr.msra.gmra.mxu3 %v879_v18 }
  0x83   : > { %v6891_v28 = vld [vmem:[%s8290_s19 + $0xda0] sm:$0xf]  ;;  %v6764_v35 = vor.u32 %v7942_v26, %v6763_v25  ;;  %v7938_v39 = vld [vmem:[%s8290_s19 + $0xc8c] sm:$0xf0]  ;;  %3656 = vmatpush.bf16.msrb.mxu3 %v7164_v29 }
  0x84   : > { %v7019_v31 = vld [vmem:[%s8290_s19 + $0xea0] sm:$0xf]  ;;  %v6892_v36 = vor.u32 %v7974_v30, %v6891_v28  ;;  %v7970_v42 = vld [vmem:[%s8290_s19 + $0xd8c] sm:$0xf0] }
  0x85   : > { %v7147_v33 = vld [vmem:[%s8290_s19 + $0xfa0] sm:$0xf]  ;;  %v7020_v37 = vor.u32 %v8006_v32, %v7019_v31  ;;  %v8002_v44 = vld [vmem:[%s8290_s19 + $0xe8c] sm:$0xf0]  ;;  %3618 = vmatpush.bf16.msrb.mxu0 %v6764_v35 }
  0x86   : > { %v6747_v38 = vld [vmem:[%s8290_s19 + $0xc80] sm:$0xf]  ;;  %v7148_v41 = vor.u32 %v8038_v34, %v7147_v33  ;;  %v8034_v46 = vld [vmem:[%s8290_s19 + $0xf8c] sm:$0xf0]  ;;  %3631 = vmatpush.bf16.msrb.mxu1 %v6892_v36 }
  0x87   : > { %v6875_v40 = vld [vmem:[%s8290_s19 + $0xd80] sm:$0xf]  ;;  %v6748_v47 = vor.u32 %v7938_v39, %v6747_v38  ;;  %3644 = vmatpush.bf16.msrb.mxu2 %v7020_v37  ;;  %v7934_v51 = vld [vmem:[%s8290_s19 + $0xc6c] sm:$0xf0]  ;;  %v7564_v39 = vld [vmem:[%s8290_s19 + $0xe4] sm:$0xf] }
  0x88   : > { %v7003_v43 = vld [vmem:[%s8290_s19 + $0xe80] sm:$0xf]  ;;  %v6876_v48 = vor.u32 %v7970_v42, %v6875_v40  ;;  %3657 = vmatpush.bf16.msrb.mxu3 %v7148_v41  ;;  %v7966_v54 = vld [vmem:[%s8290_s19 + $0xd6c] sm:$0xf0]  ;;  %v5261_v40 = vld [vmem:[%s8290_s19 + $0xf0] sm:$0xf0] }
  0x89   : > { %v7131_v45 = vld [vmem:[%s8290_s19 + $0xf80] sm:$0xf]  ;;  %v7004_v49 = vor.u32 %v8002_v44, %v7003_v43  ;;  %v7998_v56 = vld [vmem:[%s8290_s19 + $0xe6c] sm:$0xf0]  ;;  %3619 = vmatpush.bf16.msrb.mxu0 %v6748_v47  ;;  %v7596_v41 = vld [vmem:[%s8290_s19 + $0x1e4] sm:$0xf] }
  0x8a   : > { %v6731_v50 = vld [vmem:[%s8290_s19 + $0xc60] sm:$0xf]  ;;  %v7132_v53 = vor.u32 %v8034_v46, %v7131_v45  ;;  %v8030_v58 = vld [vmem:[%s8290_s19 + $0xf6c] sm:$0xf0]  ;;  %3632 = vmatpush.bf16.msrb.mxu1 %v6876_v48  ;;  %v5389_v43 = vld [vmem:[%s8290_s19 + $0x1f0] sm:$0xf0] }
  0x8b   : > { %v6859_v52 = vld [vmem:[%s8290_s19 + $0xd60] sm:$0xf]  ;;  %v6732_v59 = vor.u32 %v7934_v51, %v6731_v50  ;;  %3645 = vmatpush.bf16.msrb.mxu2 %v7004_v49  ;;  %v7930_v0 = vld [vmem:[%s8290_s19 + $0xc4c] sm:$0xf0]  ;;  %v7628_v44 = vld [vmem:[%s8290_s19 + $0x2e4] sm:$0xf]  ;;  %v5264_v51 = vor.u32 %v7564_v39, %v5261_v40 }
  0x8c   : > { %v6987_v55 = vld [vmem:[%s8290_s19 + $0xe60] sm:$0xf]  ;;  %v6860_v60 = vor.u32 %v7966_v54, %v6859_v52  ;;  %3658 = vmatpush.bf16.msrb.mxu3 %v7132_v53  ;;  %v7962_v6 = vld [vmem:[%s8290_s19 + $0xd4c] sm:$0xf0]  ;;  %v5517_v45 = vld [vmem:[%s8290_s19 + $0x2f0] sm:$0xf0]  ;;  %v5392_v52 = vor.u32 %v7596_v41, %v5389_v43 }
  0x8d   : > { %v7115_v57 = vld [vmem:[%s8290_s19 + $0xf60] sm:$0xf]  ;;  %v6988_v62 = vor.u32 %v7998_v56, %v6987_v55  ;;  %v7994_v8 = vld [vmem:[%s8290_s19 + $0xe4c] sm:$0xf0]  ;;  %3620 = vmatpush.bf16.msrb.mxu0 %v6732_v59  ;;  %v7660_v48 = vld [vmem:[%s8290_s19 + $0x3e4] sm:$0xf]  ;;  %v5520_v53 = vor.u32 %v7628_v44, %v5517_v45 }
  0x8e   : > { %v6715_v63 = vld [vmem:[%s8290_s19 + $0xc40] sm:$0xf]  ;;  %v7116_v5 = vor.u32 %v8030_v58, %v7115_v57  ;;  %v8026_v10 = vld [vmem:[%s8290_s19 + $0xf4c] sm:$0xf0]  ;;  %3633 = vmatpush.bf16.msrb.mxu1 %v6860_v60  ;;  %v5645_v49 = vld [vmem:[%s8290_s19 + $0x3f0] sm:$0xf0] }
  0x8f   : > { %v6843_v4 = vld [vmem:[%s8290_s19 + $0xd40] sm:$0xf]  ;;  %v6716_v11 = vor.u32 %v7930_v0, %v6715_v63  ;;  %3646 = vmatpush.bf16.msrb.mxu2 %v6988_v62  ;;  %v7926_v15 = vld [vmem:[%s8290_s19 + $0xc2c] sm:$0xf0]  ;;  %v7560_v54 = vld [vmem:[%s8290_s19 + $0xc4] sm:$0xf]  ;;  %v5648_v57 = vor.u32 %v7660_v48, %v5645_v49 }
  0x90   : > { %v6971_v7 = vld [vmem:[%s8290_s19 + $0xe40] sm:$0xf]  ;;  %v6844_v12 = vor.u32 %v7962_v6, %v6843_v4  ;;  %3659 = vmatpush.bf16.msrb.mxu3 %v7116_v5  ;;  %v7958_v18 = vld [vmem:[%s8290_s19 + $0xd2c] sm:$0xf0]  ;;  %v5245_v55 = vld [vmem:[%s8290_s19 + $0xd0] sm:$0xf0] }
  0x91   : > { %v7099_v9 = vld [vmem:[%s8290_s19 + $0xf40] sm:$0xf]  ;;  %v6972_v13 = vor.u32 %v7994_v8, %v6971_v7  ;;  %v7990_v20 = vld [vmem:[%s8290_s19 + $0xe2c] sm:$0xf0]  ;;  %3621 = vmatpush.bf16.msrb.mxu0 %v6716_v11  ;;  %v7592_v56 = vld [vmem:[%s8290_s19 + $0x1c4] sm:$0xf]  ;;  %v5248_v7 = vor.u32 %v7560_v54, %v5245_v55 }
  0x92   : > { %v6699_v14 = vld [vmem:[%s8290_s19 + $0xc20] sm:$0xf]  ;;  %v7100_v17 = vor.u32 %v8026_v10, %v7099_v9  ;;  %v8022_v25 = vld [vmem:[%s8290_s19 + $0xf2c] sm:$0xf0]  ;;  %3634 = vmatpush.bf16.msrb.mxu1 %v6844_v12  ;;  %v5373_v58 = vld [vmem:[%s8290_s19 + $0x1d0] sm:$0xf0] }
  0x93   : > { %v6827_v16 = vld [vmem:[%s8290_s19 + $0xd20] sm:$0xf]  ;;  %v6700_v26 = vor.u32 %v7926_v15, %v6699_v14  ;;  %v7922_v29 = vld [vmem:[%s8290_s19 + $0xc0c] sm:$0xf0]  ;;  %3647 = vmatpush.bf16.msrb.mxu2 %v6972_v13  ;;  %v7624_v59 = vld [vmem:[%s8290_s19 + $0x2c4] sm:$0xf]  ;;  %v5376_v8 = vor.u32 %v7592_v56, %v5373_v58 }
  0x94   : > { %v6955_v19 = vld [vmem:[%s8290_s19 + $0xe20] sm:$0xf]  ;;  %v6828_v30 = vor.u32 %v7958_v18, %v6827_v16  ;;  %v7954_v33 = vld [vmem:[%s8290_s19 + $0xd0c] sm:$0xf0]  ;;  %3660 = vmatpush.bf16.msrb.mxu3 %v7100_v17  ;;  %v5501_v60 = vld [vmem:[%s8290_s19 + $0x2d0] sm:$0xf0] }
  0x95   : > { %v7083_v24 = vld [vmem:[%s8290_s19 + $0xf20] sm:$0xf]  ;;  %v6956_v31 = vor.u32 %v7990_v20, %v6955_v19  ;;  %v7986_v36 = vld [vmem:[%s8290_s19 + $0xe0c] sm:$0xf0]  ;;  %3622 = vmatpush.bf16.msrb.mxu0 %v6700_v26  ;;  %v880_v62 = vld [vmem:[#allocation1 + $0x24] sm:$0xff]  ;;  %v5504_v9 = vor.u32 %v7624_v59, %v5501_v60 }
  0x96   : > { %v6683_v28 = vld [vmem:[%s8290_s19 + $0xc00] sm:$0xf]  ;;  %v7084_v35 = vor.u32 %v8022_v25, %v7083_v24  ;;  %v8018_v38 = vld [vmem:[%s8290_s19 + $0xf0c] sm:$0xf0]  ;;  %3635 = vmatpush.bf16.msrb.mxu1 %v6828_v30  ;;  %v7656_v63 = vld [vmem:[%s8290_s19 + $0x3c4] sm:$0xf] }
  0x97   : > { %v6811_v32 = vld [vmem:[%s8290_s19 + $0xd00] sm:$0xf]  ;;  %v6684_v42 = vor.u32 %v7922_v29, %v6683_v28  ;;  %3648 = vmatpush.bf16.msrb.mxu2 %v6956_v31  ;;  %v5629_v0 = vld [vmem:[%s8290_s19 + $0x3d0] sm:$0xf0]  ;;  %v7556_v10 = vld [vmem:[%s8290_s19 + $0xa4] sm:$0xf] }
  0x98   : > { %v6939_v34 = vld [vmem:[%s8290_s19 + $0xe00] sm:$0xf]  ;;  %v6812_v46 = vor.u32 %v7954_v33, %v6811_v32  ;;  %3661 = vmatpush.bf16.msrb.mxu3 %v7084_v35  ;;  %v882_v4 = vld [vmem:[#allocation1 + $0x36] sm:$0xff]  ;;  %v881_v5 = vld [vmem:[#allocation1 + $0x2d] sm:$0xff]  ;;  %v5632_v13 = vor.u32 %v7656_v63, %v5629_v0 }
  0x99   : > { %v7067_v37 = vld [vmem:[%s8290_s19 + $0xf00] sm:$0xf]  ;;  %v6940_v47 = vor.u32 %v7986_v36, %v6939_v34  ;;  %3623 = vmatpush.bf16.msrb.mxu0 %v6684_v42  ;;  %v5229_v11 = vld [vmem:[%s8290_s19 + $0xb0] sm:$0xf0]  ;;  %v7588_v12 = vld [vmem:[%s8290_s19 + $0x1a4] sm:$0xf] }
  0x9a   : > { %v7068_v50 = vor.u32 %v8018_v38, %v7067_v37  ;;  %3636 = vmatpush.bf16.msrb.mxu1 %v6812_v46  ;;  %v883_v6 = vld [vmem:[#allocation1 + $0x3f] sm:$0xff]  ;;  %v5357_v14 = vld [vmem:[%s8290_s19 + $0x1b0] sm:$0xf0]  ;;  %v5232_v19 = vor.u32 %v7556_v10, %v5229_v11 }
  0x9b   : > { %3649 = vmatpush.bf16.msrb.mxu2 %v6940_v47  ;;  %v7620_v15 = vld [vmem:[%s8290_s19 + $0x2a4] sm:$0xf]  ;;  %v5485_v16 = vld [vmem:[%s8290_s19 + $0x2b0] sm:$0xf0]  ;;  %v5360_v20 = vor.u32 %v7588_v12, %v5357_v14 }
  0x9c   : > { %3662 = vmatpush.bf16.msrb.mxu3 %v7068_v50  ;;  %3624 = vmatmul.bf16.vlgmr.msrb.gmra.mxu0 %v880_v62  ;;  %v7652_v17 = vld [vmem:[%s8290_s19 + $0x3a4] sm:$0xf]  ;;  %v5613_v18 = vld [vmem:[%s8290_s19 + $0x3b0] sm:$0xf0]  ;;  %v5488_v24 = vor.u32 %v7620_v15, %v5485_v16 }
  0x9d   : > { %3668 = vmatpush.bf16.msra.mxu0 %v5264_v51  ;;  %3637 = vmatmul.bf16.vlgmr.msrb.gmra.mxu1 %v881_v5  ;;  %v7552_v25 = vld [vmem:[%s8290_s19 + $0x84] sm:$0xf]  ;;  %v5213_v26 = vld [vmem:[%s8290_s19 + $0x90] sm:$0xf0]  ;;  %v5616_v29 = vor.u32 %v7652_v17, %v5613_v18 }
  0x9e   : > { %3681 = vmatpush.bf16.msra.mxu1 %v5392_v52  ;;  %3650 = vmatmul.bf16.vlgmr.msrb.gmra.mxu2 %v882_v4  ;;  %v7584_v28 = vld [vmem:[%s8290_s19 + $0x184] sm:$0xf]  ;;  %v5341_v30 = vld [vmem:[%s8290_s19 + $0x190] sm:$0xf0]  ;;  %v5216_v35 = vor.u32 %v7552_v25, %v5213_v26 }
  0x9f   : > { %3694 = vmatpush.bf16.msra.mxu2 %v5520_v53  ;;  %3663 = vmatmul.bf16.vlgmr.msrb.gmra.mxu3 %v883_v6  ;;  %v7616_v31 = vld [vmem:[%s8290_s19 + $0x284] sm:$0xf]  ;;  %v5469_v32 = vld [vmem:[%s8290_s19 + $0x290] sm:$0xf0]  ;;  %v5344_v36 = vor.u32 %v7584_v28, %v5341_v30 }
  0xa0   : > { %3707 = vmatpush.bf16.msra.mxu3 %v5648_v57  ;;  %v7648_v33 = vld [vmem:[%s8290_s19 + $0x384] sm:$0xf]  ;;  %v5597_v34 = vld [vmem:[%s8290_s19 + $0x390] sm:$0xf0]  ;;  %v5472_v37 = vor.u32 %v7616_v31, %v5469_v32 }
  0xa1   : > { %3669 = vmatpush.bf16.msra.mxu0 %v5248_v7  ;;  %v7548_v38 = vld [vmem:[%s8290_s19 + $0x64] sm:$0xf]  ;;  %v5197_v39 = vld [vmem:[%s8290_s19 + $0x70] sm:$0xf0]  ;;  %v5600_v41 = vor.u32 %v7648_v33, %v5597_v34 }
  0xa2   : > { %3682 = vmatpush.bf16.msra.mxu1 %v5376_v8  ;;  %v7580_v40 = vld [vmem:[%s8290_s19 + $0x164] sm:$0xf]  ;;  %v5325_v42 = vld [vmem:[%s8290_s19 + $0x170] sm:$0xf0]  ;;  %v5200_v47 = vor.u32 %v7548_v38, %v5197_v39 }
  0xa3   : > { %3695 = vmatpush.bf16.msra.mxu2 %v5504_v9  ;;  %v7612_v43 = vld [vmem:[%s8290_s19 + $0x264] sm:$0xf]  ;;  %v5453_v44 = vld [vmem:[%s8290_s19 + $0x270] sm:$0xf0]  ;;  %v5328_v48 = vor.u32 %v7580_v40, %v5325_v42 }
  0xa4   : > { %3708 = vmatpush.bf16.msra.mxu3 %v5632_v13  ;;  %v7644_v45 = vld [vmem:[%s8290_s19 + $0x364] sm:$0xf]  ;;  %v5581_v46 = vld [vmem:[%s8290_s19 + $0x370] sm:$0xf0]  ;;  %v5456_v49 = vor.u32 %v7612_v43, %v5453_v44 }
  0xa5   : > { %3670 = vmatpush.bf16.msra.mxu0 %v5232_v19  ;;  %v7544_v50 = vld [vmem:[%s8290_s19 + $0x44] sm:$0xf]  ;;  %v5181_v51 = vld [vmem:[%s8290_s19 + $0x50] sm:$0xf0]  ;;  %v5584_v53 = vor.u32 %v7644_v45, %v5581_v46 }
  0xa6   : > { %3683 = vmatpush.bf16.msra.mxu1 %v5360_v20  ;;  %v7576_v52 = vld [vmem:[%s8290_s19 + $0x144] sm:$0xf]  ;;  %v5309_v54 = vld [vmem:[%s8290_s19 + $0x150] sm:$0xf0]  ;;  %v5184_v59 = vor.u32 %v7544_v50, %v5181_v51 }
  0xa7   : > { %3696 = vmatpush.bf16.msra.mxu2 %v5488_v24  ;;  %v7608_v55 = vld [vmem:[%s8290_s19 + $0x244] sm:$0xf]  ;;  %v5437_v56 = vld [vmem:[%s8290_s19 + $0x250] sm:$0xf0]  ;;  %v5312_v60 = vor.u32 %v7576_v52, %v5309_v54 }
  0xa8   : > { %3709 = vmatpush.bf16.msra.mxu3 %v5616_v29  ;;  %v7640_v57 = vld [vmem:[%s8290_s19 + $0x344] sm:$0xf]  ;;  %v5565_v58 = vld [vmem:[%s8290_s19 + $0x350] sm:$0xf0]  ;;  %v5440_v62 = vor.u32 %v7608_v55, %v5437_v56 }
  0xa9   : > { %3671 = vmatpush.bf16.msra.mxu0 %v5216_v35  ;;  %v7540_v63 = vld [vmem:[%s8290_s19 + $0x24] sm:$0xf]  ;;  %v5165_v0 = vld [vmem:[%s8290_s19 + $0x30] sm:$0xf0]  ;;  %v5568_v5 = vor.u32 %v7640_v57, %v5565_v58 }
  0xaa   : > { %3684 = vmatpush.bf16.msra.mxu1 %v5344_v36  ;;  %v7572_v4 = vld [vmem:[%s8290_s19 + $0x124] sm:$0xf]  ;;  %v5293_v6 = vld [vmem:[%s8290_s19 + $0x130] sm:$0xf0]  ;;  %v5168_v11 = vor.u32 %v7540_v63, %v5165_v0 }
  0xab   : > { %3697 = vmatpush.bf16.msra.mxu2 %v5472_v37  ;;  %v7604_v7 = vld [vmem:[%s8290_s19 + $0x224] sm:$0xf]  ;;  %v5421_v8 = vld [vmem:[%s8290_s19 + $0x230] sm:$0xf0]  ;;  %v5296_v14 = vor.u32 %v7572_v4, %v5293_v6 }
  0xac   : > { %3710 = vmatpush.bf16.msra.mxu3 %v5600_v41  ;;  %v7636_v9 = vld [vmem:[%s8290_s19 + $0x324] sm:$0xf]  ;;  %v5549_v10 = vld [vmem:[%s8290_s19 + $0x330] sm:$0xf0]  ;;  %v5424_v15 = vor.u32 %v7604_v7, %v5421_v8 }
  0xad   : > { %3672 = vmatpush.bf16.msra.mxu0 %v5200_v47  ;;  %v7536_v12 = vld [vmem:[%s8290_s19 + $0x4] sm:$0xf]  ;;  %v5149_v13 = vld [vmem:[%s8290_s19 + $0x10] sm:$0xf0]  ;;  %v5552_v19 = vor.u32 %v7636_v9, %v5549_v10 }
  0xae   : > { %3685 = vmatpush.bf16.msra.mxu1 %v5328_v48  ;;  %v7568_v16 = vld [vmem:[%s8290_s19 + $0x104] sm:$0xf]  ;;  %v5277_v17 = vld [vmem:[%s8290_s19 + $0x110] sm:$0xf0]  ;;  %v5152_v30 = vor.u32 %v7536_v12, %v5149_v13 }
  0xaf   : > { %3698 = vmatpush.bf16.msra.mxu2 %v5456_v49  ;;  %v7600_v18 = vld [vmem:[%s8290_s19 + $0x204] sm:$0xf]  ;;  %v5405_v20 = vld [vmem:[%s8290_s19 + $0x210] sm:$0xf0]  ;;  %v5280_v34 = vor.u32 %v7568_v16, %v5277_v17 }
  0xb0   : > { %3711 = vmatpush.bf16.msra.mxu3 %v5584_v53  ;;  %v7632_v24 = vld [vmem:[%s8290_s19 + $0x304] sm:$0xf]  ;;  %v5533_v25 = vld [vmem:[%s8290_s19 + $0x310] sm:$0xf0]  ;;  %v5408_v35 = vor.u32 %v7600_v18, %v5405_v20 }
  0xb1   : > { %3673 = vmatpush.bf16.msra.mxu0 %v5184_v59  ;;  %v7692_v26 = vld [vmem:[%s8290_s19 + $0x4e4] sm:$0xf]  ;;  %v5773_v28 = vld [vmem:[%s8290_s19 + $0x4f0] sm:$0xf0]  ;;  %v5536_v38 = vor.u32 %v7632_v24, %v5533_v25 }
  0xb2   : > { %3686 = vmatpush.bf16.msra.mxu1 %v5312_v60  ;;  %v7724_v29 = vld [vmem:[%s8290_s19 + $0x5e4] sm:$0xf]  ;;  %v5901_v31 = vld [vmem:[%s8290_s19 + $0x5f0] sm:$0xf0]  ;;  %v5776_v39 = vor.u32 %v7692_v26, %v5773_v28 }
  0xb3   : > { %3699 = vmatpush.bf16.msra.mxu2 %v5440_v62  ;;  %v7756_v32 = vld [vmem:[%s8290_s19 + $0x6e4] sm:$0xf]  ;;  %v6029_v33 = vld [vmem:[%s8290_s19 + $0x6f0] sm:$0xf0]  ;;  %v5904_v40 = vor.u32 %v7724_v29, %v5901_v31 }
  0xb4   : > { %3712 = vmatpush.bf16.msra.mxu3 %v5568_v5  ;;  %v7788_v36 = vld [vmem:[%s8290_s19 + $0x7e4] sm:$0xf]  ;;  %v6157_v37 = vld [vmem:[%s8290_s19 + $0x7f0] sm:$0xf0]  ;;  %v6032_v41 = vor.u32 %v7756_v32, %v6029_v33 }
  0xb5   : > { %3674 = vmatpush.bf16.msra.mxu0 %v5168_v11  ;;  %v7688_v42 = vld [vmem:[%s8290_s19 + $0x4c4] sm:$0xf]  ;;  %v5757_v43 = vld [vmem:[%s8290_s19 + $0x4d0] sm:$0xf0]  ;;  %v6160_v45 = vor.u32 %v7788_v36, %v6157_v37 }
  0xb6   : > { %3687 = vmatpush.bf16.msra.mxu1 %v5296_v14  ;;  %v7720_v44 = vld [vmem:[%s8290_s19 + $0x5c4] sm:$0xf]  ;;  %v5885_v46 = vld [vmem:[%s8290_s19 + $0x5d0] sm:$0xf0]  ;;  %v5760_v51 = vor.u32 %v7688_v42, %v5757_v43 }
  0xb7   : > { %3700 = vmatpush.bf16.msra.mxu2 %v5424_v15  ;;  %v7752_v47 = vld [vmem:[%s8290_s19 + $0x6c4] sm:$0xf]  ;;  %v6013_v48 = vld [vmem:[%s8290_s19 + $0x6d0] sm:$0xf0]  ;;  %v5888_v52 = vor.u32 %v7720_v44, %v5885_v46 }
  0xb8   : > { %3713 = vmatpush.bf16.msra.mxu3 %v5552_v19  ;;  %v7784_v49 = vld [vmem:[%s8290_s19 + $0x7c4] sm:$0xf]  ;;  %v6141_v50 = vld [vmem:[%s8290_s19 + $0x7d0] sm:$0xf0]  ;;  %v6016_v53 = vor.u32 %v7752_v47, %v6013_v48 }
  0xb9   : > { %3675 = vmatpush.bf16.msra.mxu0 %v5152_v30  ;;  %v7684_v54 = vld [vmem:[%s8290_s19 + $0x4a4] sm:$0xf]  ;;  %v5741_v55 = vld [vmem:[%s8290_s19 + $0x4b0] sm:$0xf0]  ;;  %v6144_v57 = vor.u32 %v7784_v49, %v6141_v50 }
  0xba   : > { %3688 = vmatpush.bf16.msra.mxu1 %v5280_v34  ;;  %v7716_v56 = vld [vmem:[%s8290_s19 + $0x5a4] sm:$0xf]  ;;  %v5869_v58 = vld [vmem:[%s8290_s19 + $0x5b0] sm:$0xf0]  ;;  %v5744_v0 = vor.u32 %v7684_v54, %v5741_v55 }
  0xbb   : > { %3701 = vmatpush.bf16.msra.mxu2 %v5408_v35  ;;  %v7748_v59 = vld [vmem:[%s8290_s19 + $0x6a4] sm:$0xf]  ;;  %v5997_v60 = vld [vmem:[%s8290_s19 + $0x6b0] sm:$0xf0]  ;;  %v5872_v4 = vor.u32 %v7716_v56, %v5869_v58 }
  0xbc   : > { %3714 = vmatpush.bf16.msra.mxu3 %v5536_v38  ;;  %v7780_v62 = vld [vmem:[%s8290_s19 + $0x7a4] sm:$0xf]  ;;  %v6125_v63 = vld [vmem:[%s8290_s19 + $0x7b0] sm:$0xf0]  ;;  %3676 = vmatmul.bf16.vlgmr.msra.gmra.mxu0 %v8396_v22  ;;  %v6000_v5 = vor.u32 %v7748_v59, %v5997_v60 }
  0xbd   : > { %3720 = vmatpush.bf16.msrb.mxu0 %v5776_v39  ;;  %3689 = vmatmul.bf16.vlgmr.msra.gmra.mxu1 %v8403_v27  ;;  %v7680_v6 = vld [vmem:[%s8290_s19 + $0x484] sm:$0xf]  ;;  %v5725_v7 = vld [vmem:[%s8290_s19 + $0x490] sm:$0xf0]  ;;  %v6128_v9 = vor.u32 %v7780_v62, %v6125_v63 }
  0xbe   : > { %3733 = vmatpush.bf16.msrb.mxu1 %v5904_v40  ;;  %3702 = vmatmul.bf16.vlgmr.msra.gmra.mxu2 %v8394_v21  ;;  %v7712_v8 = vld [vmem:[%s8290_s19 + $0x584] sm:$0xf]  ;;  %v5853_v10 = vld [vmem:[%s8290_s19 + $0x590] sm:$0xf0]  ;;  %v5728_v15 = vor.u32 %v7680_v6, %v5725_v7 }
  0xbf   : > { %3746 = vmatpush.bf16.msrb.mxu2 %v6032_v41  ;;  %3715 = vmatmul.bf16.vlgmr.msra.gmra.mxu3 %v8398_v23  ;;  %v7744_v11 = vld [vmem:[%s8290_s19 + $0x684] sm:$0xf]  ;;  %v5981_v12 = vld [vmem:[%s8290_s19 + $0x690] sm:$0xf0]  ;;  %v5856_v16 = vor.u32 %v7712_v8, %v5853_v10 }
  0xc0   : > { %3759 = vmatpush.bf16.msrb.mxu3 %v6160_v45  ;;  %v7776_v13 = vld [vmem:[%s8290_s19 + $0x784] sm:$0xf]  ;;  %v6109_v14 = vld [vmem:[%s8290_s19 + $0x790] sm:$0xf0]  ;;  %v5984_v17 = vor.u32 %v7744_v11, %v5981_v12 }
  0xc1   : > { %3721 = vmatpush.bf16.msrb.mxu0 %v5760_v51  ;;  %v7676_v18 = vld [vmem:[%s8290_s19 + $0x464] sm:$0xf]  ;;  %v5709_v19 = vld [vmem:[%s8290_s19 + $0x470] sm:$0xf0]  ;;  %v6112_v24 = vor.u32 %v7776_v13, %v6109_v14 }
  0xc2   : > { %3734 = vmatpush.bf16.msrb.mxu1 %v5888_v52  ;;  %v7708_v20 = vld [vmem:[%s8290_s19 + $0x564] sm:$0xf]  ;;  %v5837_v25 = vld [vmem:[%s8290_s19 + $0x570] sm:$0xf0]  ;;  %v5712_v31 = vor.u32 %v7676_v18, %v5709_v19 }
  0xc3   : > { %3747 = vmatpush.bf16.msrb.mxu2 %v6016_v53  ;;  %v7740_v26 = vld [vmem:[%s8290_s19 + $0x664] sm:$0xf]  ;;  %v5965_v28 = vld [vmem:[%s8290_s19 + $0x670] sm:$0xf0]  ;;  %v5840_v32 = vor.u32 %v7708_v20, %v5837_v25 }
  0xc4   : > { %3760 = vmatpush.bf16.msrb.mxu3 %v6144_v57  ;;  %v7772_v29 = vld [vmem:[%s8290_s19 + $0x764] sm:$0xf]  ;;  %v6093_v30 = vld [vmem:[%s8290_s19 + $0x770] sm:$0xf0]  ;;  %v5968_v33 = vor.u32 %v7740_v26, %v5965_v28  ;;  %v3482_v50 = vpop.f32.mrf.mxu1 }
  0xc5   : > { %3722 = vmatpush.bf16.msrb.mxu0 %v5744_v0  ;;  %v7672_v34 = vld [vmem:[%s8290_s19 + $0x444] sm:$0xf]  ;;  %v5693_v35 = vld [vmem:[%s8290_s19 + $0x450] sm:$0xf0]  ;;  %v6096_v37 = vor.u32 %v7772_v29, %v6093_v30  ;;  %v3469_v44 = vpop.f32.mrf.mxu0 }
  0xc6   : > { %3735 = vmatpush.bf16.msrb.mxu1 %v5872_v4  ;;  %v7704_v36 = vld [vmem:[%s8290_s19 + $0x544] sm:$0xf]  ;;  %v5821_v38 = vld [vmem:[%s8290_s19 + $0x550] sm:$0xf0]  ;;  %v5696_v43 = vor.u32 %v7672_v34, %v5693_v35  ;;  %v3483_v55 = vadd.f32 %v3482_v50, %v3469_v44 }
  0xc7   : > { %3748 = vmatpush.bf16.msrb.mxu2 %v6000_v5  ;;  %v7736_v39 = vld [vmem:[%s8290_s19 + $0x644] sm:$0xf]  ;;  %v5949_v40 = vld [vmem:[%s8290_s19 + $0x650] sm:$0xf0]  ;;  %v5824_v45 = vor.u32 %v7704_v36, %v5821_v38 }
  0xc8   : > { %3761 = vmatpush.bf16.msrb.mxu3 %v6128_v9  ;;  %v7768_v41 = vld [vmem:[%s8290_s19 + $0x744] sm:$0xf]  ;;  %v6077_v42 = vld [vmem:[%s8290_s19 + $0x750] sm:$0xf0]  ;;  %v5952_v46 = vor.u32 %v7736_v39, %v5949_v40 }
  0xc9   : > { %3723 = vmatpush.bf16.msrb.mxu0 %v5728_v15  ;;  %v7668_v47 = vld [vmem:[%s8290_s19 + $0x424] sm:$0xf]  ;;  %v5677_v48 = vld [vmem:[%s8290_s19 + $0x430] sm:$0xf0]  ;;  %v6080_v51 = vor.u32 %v7768_v41, %v6077_v42 }
  0xca   : > { %3736 = vmatpush.bf16.msrb.mxu1 %v5856_v16  ;;  %v7700_v49 = vld [vmem:[%s8290_s19 + $0x524] sm:$0xf]  ;;  %v5805_v52 = vld [vmem:[%s8290_s19 + $0x530] sm:$0xf0]  ;;  %v5680_v58 = vor.u32 %v7668_v47, %v5677_v48  ;;  %v3495_v6 = vpop.f32.mrf.mxu2 }
  0xcb   : > { %3749 = vmatpush.bf16.msrb.mxu2 %v5984_v17  ;;  %v7732_v53 = vld [vmem:[%s8290_s19 + $0x624] sm:$0xf]  ;;  %v5933_v54 = vld [vmem:[%s8290_s19 + $0x630] sm:$0xf0]  ;;  %v5808_v62 = vor.u32 %v7700_v49, %v5805_v52  ;;  %v3496_v11 = vadd.f32 %v3495_v6, %v3483_v55 }
  0xcc   : > { %3762 = vmatpush.bf16.msrb.mxu3 %v6112_v24  ;;  %v7764_v56 = vld [vmem:[%s8290_s19 + $0x724] sm:$0xf]  ;;  %v6061_v57 = vld [vmem:[%s8290_s19 + $0x730] sm:$0xf0]  ;;  %v5936_v63 = vor.u32 %v7732_v53, %v5933_v54  ;;  %v3508_v12 = vpop.f32.mrf.mxu3  ;;  %v3484_v30 = vpop.f32.mrf.mxu1 }
  0xcd   : > { %3724 = vmatpush.bf16.msrb.mxu0 %v5712_v31  ;;  %v7664_v59 = vld [vmem:[%s8290_s19 + $0x404] sm:$0xf]  ;;  %v5661_v60 = vld [vmem:[%s8290_s19 + $0x410] sm:$0xf0]  ;;  %v6064_v7 = vor.u32 %v7764_v56, %v6061_v57  ;;  %v8713_v20 = vadd.f32 %v3508_v12, %v3496_v11  ;;  %v3471_v24 = vpop.f32.mrf.mxu0 }
  0xce   : > { %3737 = vmatpush.bf16.msrb.mxu1 %v5840_v32  ;;  %v7696_v0 = vld [vmem:[%s8290_s19 + $0x504] sm:$0xf]  ;;  %v5789_v4 = vld [vmem:[%s8290_s19 + $0x510] sm:$0xf0]  ;;  %v5664_v16 = vor.u32 %v7664_v59, %v5661_v60 }
  0xcf   : > { %3750 = vmatpush.bf16.msrb.mxu2 %v5968_v33  ;;  %v7728_v5 = vld [vmem:[%s8290_s19 + $0x604] sm:$0xf]  ;;  %v5917_v8 = vld [vmem:[%s8290_s19 + $0x610] sm:$0xf0]  ;;  %v5792_v25 = vor.u32 %v7696_v0, %v5789_v4 }
  0xd0   : > { %3763 = vmatpush.bf16.msrb.mxu3 %v6096_v37  ;;  %v7760_v9 = vld [vmem:[%s8290_s19 + $0x704] sm:$0xf]  ;;  %v6045_v10 = vld [vmem:[%s8290_s19 + $0x710] sm:$0xf0]  ;;  %v5920_v26 = vor.u32 %v7728_v5, %v5917_v8 }
  0xd1   : > { %3725 = vmatpush.bf16.msrb.mxu0 %v5696_v43  ;;  %v7820_v13 = vld [vmem:[%s8290_s19 + $0x8e4] sm:$0xf]  ;;  %v6285_v14 = vld [vmem:[%s8290_s19 + $0x8f0] sm:$0xf0]  ;;  %v6048_v31 = vor.u32 %v7760_v9, %v6045_v10 }
  0xd2   : > { %3738 = vmatpush.bf16.msrb.mxu1 %v5824_v45  ;;  %v7852_v15 = vld [vmem:[%s8290_s19 + $0x9e4] sm:$0xf]  ;;  %v6413_v17 = vld [vmem:[%s8290_s19 + $0x9f0] sm:$0xf0]  ;;  %v6288_v32 = vor.u32 %v7820_v13, %v6285_v14  ;;  %v3497_v44 = vpop.f32.mrf.mxu2 }
  0xd3   : > { %3751 = vmatpush.bf16.msrb.mxu2 %v5952_v46  ;;  %v7884_v18 = vld [vmem:[%s8290_s19 + $0xae4] sm:$0xf]  ;;  %v6541_v19 = vld [vmem:[%s8290_s19 + $0xaf0] sm:$0xf0]  ;;  %v6416_v33 = vor.u32 %v7852_v15, %v6413_v17 }
  0xd4   : > { %3764 = vmatpush.bf16.msrb.mxu3 %v6080_v51  ;;  %v7916_v28 = vld [vmem:[%s8290_s19 + $0xbe4] sm:$0xf]  ;;  %v6669_v29 = vld [vmem:[%s8290_s19 + $0xbf0] sm:$0xf0]  ;;  %v6544_v34 = vor.u32 %v7884_v18, %v6541_v19  ;;  %v3510_v46 = vpop.f32.mrf.mxu3 }
  0xd5   : > { %3726 = vmatpush.bf16.msrb.mxu0 %v5680_v58  ;;  %v7816_v35 = vld [vmem:[%s8290_s19 + $0x8c4] sm:$0xf]  ;;  %v6269_v36 = vld [vmem:[%s8290_s19 + $0x8d0] sm:$0xf0]  ;;  %v6672_v38 = vor.u32 %v7916_v28, %v6669_v29 }
  0xd6   : > { %3739 = vmatpush.bf16.msrb.mxu1 %v5808_v62  ;;  %v7848_v37 = vld [vmem:[%s8290_s19 + $0x9c4] sm:$0xf]  ;;  %v6397_v39 = vld [vmem:[%s8290_s19 + $0x9d0] sm:$0xf0]  ;;  %v6272_v45 = vor.u32 %v7816_v35, %v6269_v36  ;;  %v3521_v11 = vpop.f32.mrf.mxu0 }
  0xd7   : > { %3752 = vmatpush.bf16.msrb.mxu2 %v5936_v63  ;;  %v7880_v40 = vld [vmem:[%s8290_s19 + $0xac4] sm:$0xf]  ;;  %v6525_v41 = vld [vmem:[%s8290_s19 + $0xad0] sm:$0xf0]  ;;  %v6400_v47 = vor.u32 %v7848_v37, %v6397_v39  ;;  %v3522_v17 = vadd.f32 %v3521_v11, %v8713_v20  ;;  %v3534_v18 = vpop.f32.mrf.mxu1 }
  0xd8   : > { %3765 = vmatpush.bf16.msrb.mxu3 %v6064_v7  ;;  %v7912_v42 = vld [vmem:[%s8290_s19 + $0xbc4] sm:$0xf]  ;;  %v6653_v43 = vld [vmem:[%s8290_s19 + $0xbd0] sm:$0xf0]  ;;  %v6528_v48 = vor.u32 %v7880_v40, %v6525_v41 }
  0xd9   : > { %3727 = vmatpush.bf16.msrb.mxu0 %v5664_v16  ;;  %v7812_v49 = vld [vmem:[%s8290_s19 + $0x8a4] sm:$0xf]  ;;  %v6253_v50 = vld [vmem:[%s8290_s19 + $0x8b0] sm:$0xf0]  ;;  %v6656_v52 = vor.u32 %v7912_v42, %v6653_v43  ;;  %v3535_v30 = vadd.f32 %v3534_v18, %v3522_v17 }
  0xda   : > { %3740 = vmatpush.bf16.msrb.mxu1 %v5792_v25  ;;  %v7844_v51 = vld [vmem:[%s8290_s19 + $0x9a4] sm:$0xf]  ;;  %v6381_v53 = vld [vmem:[%s8290_s19 + $0x9b0] sm:$0xf0]  ;;  %v6256_v58 = vor.u32 %v7812_v49, %v6253_v50 }
  0xdb   : > { %3753 = vmatpush.bf16.msrb.mxu2 %v5920_v26  ;;  %v7876_v54 = vld [vmem:[%s8290_s19 + $0xaa4] sm:$0xf]  ;;  %v6509_v55 = vld [vmem:[%s8290_s19 + $0xab0] sm:$0xf0]  ;;  %v6384_v59 = vor.u32 %v7844_v51, %v6381_v53 }
  0xdc   : > { %3766 = vmatpush.bf16.msrb.mxu3 %v6048_v31  ;;  %3728 = vmatmul.bf16.vlgmr.msrb.gmra.mxu0 %v8435_v1  ;;  %v7908_v56 = vld [vmem:[%s8290_s19 + $0xba4] sm:$0xf]  ;;  %v6637_v57 = vld [vmem:[%s8290_s19 + $0xbb0] sm:$0xf0]  ;;  %v6512_v60 = vor.u32 %v7876_v54, %v6509_v55 }
  0xdd   : > { %3772 = vmatpush.bf16.msra.mxu0 %v6288_v32  ;;  %3741 = vmatmul.bf16.vlgmr.msrb.gmra.mxu1 %v8439_v3  ;;  %v7808_v62 = vld [vmem:[%s8290_s19 + $0x884] sm:$0xf]  ;;  %v6237_v63 = vld [vmem:[%s8290_s19 + $0x890] sm:$0xf0]  ;;  %v6640_v4 = vor.u32 %v7908_v56, %v6637_v57 }
  0xde   : > { %3785 = vmatpush.bf16.msra.mxu1 %v6416_v33  ;;  %3754 = vmatmul.bf16.vlgmr.msrb.gmra.mxu2 %v8432_v61  ;;  %v7840_v0 = vld [vmem:[%s8290_s19 + $0x984] sm:$0xf]  ;;  %v6365_v5 = vld [vmem:[%s8290_s19 + $0x990] sm:$0xf0]  ;;  %v6240_v10 = vor.u32 %v7808_v62, %v6237_v63  ;;  %v3547_v36 = vpop.f32.mrf.mxu2 }
  0xdf   : > { %3798 = vmatpush.bf16.msra.mxu2 %v6544_v34  ;;  %3767 = vmatmul.bf16.vlgmr.msrb.gmra.mxu3 %v8437_v2  ;;  %v7872_v6 = vld [vmem:[%s8290_s19 + $0xa84] sm:$0xf]  ;;  %v6493_v7 = vld [vmem:[%s8290_s19 + $0xa90] sm:$0xf0]  ;;  %v6368_v12 = vor.u32 %v7840_v0, %v6365_v5  ;;  %v3548_v41 = vadd.f32 %v3547_v36, %v3535_v30  ;;  %v3536_v53 = vpop.f32.mrf.mxu1 }
  0xe0   : > { %3811 = vmatpush.bf16.msra.mxu3 %v6672_v38  ;;  %v7904_v8 = vld [vmem:[%s8290_s19 + $0xb84] sm:$0xf]  ;;  %v6621_v9 = vld [vmem:[%s8290_s19 + $0xb90] sm:$0xf0]  ;;  %v6496_v13 = vor.u32 %v7872_v6, %v6493_v7  ;;  %v3560_v42 = vpop.f32.mrf.mxu3 }
  0xe1   : > { %3773 = vmatpush.bf16.msra.mxu0 %v6272_v45  ;;  %v7804_v14 = vld [vmem:[%s8290_s19 + $0x864] sm:$0xf]  ;;  %v6221_v15 = vld [vmem:[%s8290_s19 + $0x870] sm:$0xf0]  ;;  %v6624_v19 = vor.u32 %v7904_v8, %v6621_v9  ;;  %v8762_v46 = vadd.f32 %v3560_v42, %v3548_v41 }
  0xe2   : > { %3786 = vmatpush.bf16.msra.mxu1 %v6400_v47  ;;  %v7836_v16 = vld [vmem:[%s8290_s19 + $0x964] sm:$0xf]  ;;  %v6349_v24 = vld [vmem:[%s8290_s19 + $0x970] sm:$0xf0]  ;;  %v6224_v31 = vor.u32 %v7804_v14, %v6221_v15  ;;  %v3523_v47 = vpop.f32.mrf.mxu0 }
  0xe3   : > { %3799 = vmatpush.bf16.msra.mxu2 %v6528_v48  ;;  %v7868_v25 = vld [vmem:[%s8290_s19 + $0xa64] sm:$0xf]  ;;  %v6477_v26 = vld [vmem:[%s8290_s19 + $0xa70] sm:$0xf0]  ;;  %v6352_v20 = vor.u32 %v7836_v16, %v6349_v24 }
  0xe4   : > { %3812 = vmatpush.bf16.msra.mxu3 %v6656_v52  ;;  %v7900_v28 = vld [vmem:[%s8290_s19 + $0xb64] sm:$0xf]  ;;  %v6605_v29 = vld [vmem:[%s8290_s19 + $0xb70] sm:$0xf0]  ;;  %v6480_v32 = vor.u32 %v7868_v25, %v6477_v26 }
  0xe5   : > { %3774 = vmatpush.bf16.msra.mxu0 %v6256_v58  ;;  %v7800_v33 = vld [vmem:[%s8290_s19 + $0x844] sm:$0xf]  ;;  %v6205_v34 = vld [vmem:[%s8290_s19 + $0x850] sm:$0xf0]  ;;  %v6608_v37 = vor.u32 %v7900_v28, %v6605_v29 }
  0xe6   : > { %3787 = vmatpush.bf16.msra.mxu1 %v6384_v59  ;;  %v7832_v35 = vld [vmem:[%s8290_s19 + $0x944] sm:$0xf]  ;;  %v6333_v38 = vld [vmem:[%s8290_s19 + $0x950] sm:$0xf0]  ;;  %v6208_v45 = vor.u32 %v7800_v33, %v6205_v34  ;;  %v3549_v8 = vpop.f32.mrf.mxu2 }
  0xe7   : > { %3800 = vmatpush.bf16.msra.mxu2 %v6512_v60  ;;  %v7864_v39 = vld [vmem:[%s8290_s19 + $0xa44] sm:$0xf]  ;;  %v6461_v40 = vld [vmem:[%s8290_s19 + $0xa50] sm:$0xf0]  ;;  %v6336_v48 = vor.u32 %v7832_v35, %v6333_v38 }
  0xe8   : > { %3813 = vmatpush.bf16.msra.mxu3 %v6640_v4  ;;  %v7896_v43 = vld [vmem:[%s8290_s19 + $0xb44] sm:$0xf]  ;;  %v6589_v44 = vld [vmem:[%s8290_s19 + $0xb50] sm:$0xf0]  ;;  %v6464_v49 = vor.u32 %v7864_v39, %v6461_v40 }
  0xe9   : > { %3775 = vmatpush.bf16.msra.mxu0 %v6240_v10  ;;  %v7796_v50 = vld [vmem:[%s8290_s19 + $0x824] sm:$0xf]  ;;  %v6189_v51 = vld [vmem:[%s8290_s19 + $0x830] sm:$0xf0]  ;;  %v6592_v54 = vor.u32 %v7896_v43, %v6589_v44 }
  0xea   : > { %3788 = vmatpush.bf16.msra.mxu1 %v6368_v12  ;;  %v7828_v52 = vld [vmem:[%s8290_s19 + $0x924] sm:$0xf]  ;;  %v6317_v55 = vld [vmem:[%s8290_s19 + $0x930] sm:$0xf0]  ;;  %v6192_v60 = vor.u32 %v7796_v50, %v6189_v51 }
  0xeb   : > { %3801 = vmatpush.bf16.msra.mxu2 %v6496_v13  ;;  %v7860_v56 = vld [vmem:[%s8290_s19 + $0xa24] sm:$0xf]  ;;  %v6445_v57 = vld [vmem:[%s8290_s19 + $0xa30] sm:$0xf0]  ;;  %v6320_v0 = vor.u32 %v7828_v52, %v6317_v55  ;;  %v3562_v13 = vpop.f32.mrf.mxu3  ;;  %v8150_v55 = vld [vmem:[#allocation1 + $0x9] sm:$0xff] }
  0xec   : > { %3814 = vmatpush.bf16.msra.mxu3 %v6624_v19  ;;  %v7892_v58 = vld [vmem:[%s8290_s19 + $0xb24] sm:$0xf]  ;;  %v6573_v59 = vld [vmem:[%s8290_s19 + $0xb30] sm:$0xf0]  ;;  %v6448_v4 = vor.u32 %v7860_v56, %v6445_v57 }
  0xed   : > { %3776 = vmatpush.bf16.msra.mxu0 %v6224_v31  ;;  %v7792_v62 = vld [vmem:[%s8290_s19 + $0x804] sm:$0xf]  ;;  %v6173_v63 = vld [vmem:[%s8290_s19 + $0x810] sm:$0xf0]  ;;  %v6576_v9 = vor.u32 %v7892_v58, %v6573_v59  ;;  %v8151_v58 = vld [vmem:[#allocation1 + $0x1b] sm:$0xff] }
  0xee   : > { %3789 = vmatpush.bf16.msra.mxu1 %v6352_v20  ;;  %v7824_v5 = vld [vmem:[%s8290_s19 + $0x904] sm:$0xf]  ;;  %v6301_v6 = vld [vmem:[%s8290_s19 + $0x910] sm:$0xf0]  ;;  %v6176_v17 = vor.u32 %v7792_v62, %v6173_v63 }
  0xef   : > { %3802 = vmatpush.bf16.msra.mxu2 %v6480_v32  ;;  %v7856_v7 = vld [vmem:[%s8290_s19 + $0xa04] sm:$0xf]  ;;  %v6429_v10 = vld [vmem:[%s8290_s19 + $0xa10] sm:$0xf0]  ;;  %v6304_v25 = vor.u32 %v7824_v5, %v6301_v6 }
  0xf0   : > { %3815 = vmatpush.bf16.msra.mxu3 %v6608_v37  ;;  %v7888_v11 = vld [vmem:[%s8290_s19 + $0xb04] sm:$0xf]  ;;  %v6557_v12 = vld [vmem:[%s8290_s19 + $0xb10] sm:$0xf0]  ;;  %v6432_v26 = vor.u32 %v7856_v7, %v6429_v10 }
  0xf1   : > { %3777 = vmatpush.bf16.msra.mxu0 %v6208_v45  ;;  %v7948_v14 = vld [vmem:[%s8290_s19 + $0xce4] sm:$0xf]  ;;  %v6797_v15 = vld [vmem:[%s8290_s19 + $0xcf0] sm:$0xf0]  ;;  %v6560_v30 = vor.u32 %v7888_v11, %v6557_v12 }
  0xf2   : > { %3790 = vmatpush.bf16.msra.mxu1 %v6336_v48  ;;  %v7980_v16 = vld [vmem:[%s8290_s19 + $0xde4] sm:$0xf]  ;;  %v6925_v18 = vld [vmem:[%s8290_s19 + $0xdf0] sm:$0xf0]  ;;  %v6800_v31 = vor.u32 %v7948_v14, %v6797_v15 }
  0xf3   : > { %3803 = vmatpush.bf16.msra.mxu2 %v6464_v49  ;;  %v8012_v19 = vld [vmem:[%s8290_s19 + $0xee4] sm:$0xf]  ;;  %v7053_v24 = vld [vmem:[%s8290_s19 + $0xef0] sm:$0xf0]  ;;  %v6928_v20 = vor.u32 %v7980_v16, %v6925_v18 }
  0xf4   : > { %3816 = vmatpush.bf16.msra.mxu3 %v6592_v54  ;;  %v8044_v28 = vld [vmem:[%s8290_s19 + $0xfe4] sm:$0xf]  ;;  %v7181_v29 = vld [vmem:[%s8290_s19 + $0xff0] sm:$0xf0]  ;;  %v7056_v32 = vor.u32 %v8012_v19, %v7053_v24 }
  0xf5   : > { %3778 = vmatpush.bf16.msra.mxu0 %v6192_v60  ;;  %v7944_v33 = vld [vmem:[%s8290_s19 + $0xcc4] sm:$0xf]  ;;  %v6781_v34 = vld [vmem:[%s8290_s19 + $0xcd0] sm:$0xf0]  ;;  %v7184_v36 = vor.u32 %v8044_v28, %v7181_v29 }
  0xf6   : > { %3791 = vmatpush.bf16.msra.mxu1 %v6320_v0  ;;  %v7976_v35 = vld [vmem:[%s8290_s19 + $0xdc4] sm:$0xf]  ;;  %v6909_v37 = vld [vmem:[%s8290_s19 + $0xdd0] sm:$0xf0]  ;;  %v6784_v42 = vor.u32 %v7944_v33, %v6781_v34 }
  0xf7   : > { %3804 = vmatpush.bf16.msra.mxu2 %v6448_v4  ;;  %v8008_v38 = vld [vmem:[%s8290_s19 + $0xec4] sm:$0xf]  ;;  %v7037_v39 = vld [vmem:[%s8290_s19 + $0xed0] sm:$0xf0]  ;;  %v6912_v43 = vor.u32 %v7976_v35, %v6909_v37 }
  0xf8   : > { %3817 = vmatpush.bf16.msra.mxu3 %v6576_v9  ;;  %v8040_v40 = vld [vmem:[%s8290_s19 + $0xfc4] sm:$0xf]  ;;  %v7165_v41 = vld [vmem:[%s8290_s19 + $0xfd0] sm:$0xf0]  ;;  %v7040_v44 = vor.u32 %v8008_v38, %v7037_v39 }
  0xf9   : > { %3779 = vmatpush.bf16.msra.mxu0 %v6176_v17  ;;  %v7940_v45 = vld [vmem:[%s8290_s19 + $0xca4] sm:$0xf]  ;;  %v6765_v47 = vld [vmem:[%s8290_s19 + $0xcb0] sm:$0xf0]  ;;  %v7168_v50 = vor.u32 %v8040_v40, %v7165_v41 }
  0xfa   : > { %3792 = vmatpush.bf16.msra.mxu1 %v6304_v25  ;;  %v7972_v48 = vld [vmem:[%s8290_s19 + $0xda4] sm:$0xf]  ;;  %v6893_v51 = vld [vmem:[%s8290_s19 + $0xdb0] sm:$0xf0]  ;;  %v6768_v59 = vor.u32 %v7940_v45, %v6765_v47 }
  0xfb   : > { %3805 = vmatpush.bf16.msra.mxu2 %v6432_v26  ;;  %v8148_v49 = vld [vmem:[#allocation1] sm:$0xff]  ;;  %v7021_v53 = vld [vmem:[%s8290_s19 + $0xeb0] sm:$0xf0]  ;;  %v6896_v60 = vor.u32 %v7972_v48, %v6893_v51 }
  0xfc   : > { %3818 = vmatpush.bf16.msra.mxu3 %v6560_v30  ;;  %3780 = vmatmul.bf16.vlgmr.msra.gmra.mxu0 %v8148_v49  ;;  %v8004_v52 = vld [vmem:[%s8290_s19 + $0xea4] sm:$0xf]  ;;  %v8149_v54 = vld [vmem:[#allocation1 + $0x12] sm:$0xff]  ;;  %v3586_v14 = vpop.f32.mrf.mxu1 }
  0xfd   : > { %3824 = vmatpush.bf16.msrb.mxu0 %v6800_v31  ;;  %3793 = vmatmul.bf16.vlgmr.msra.gmra.mxu1 %v8150_v55  ;;  %v8036_v56 = vld [vmem:[%s8290_s19 + $0xfa4] sm:$0xf]  ;;  %v7149_v57 = vld [vmem:[%s8290_s19 + $0xfb0] sm:$0xf0]  ;;  %v7024_v62 = vor.u32 %v8004_v52, %v7021_v53  ;;  %v3573_v9 = vpop.f32.mrf.mxu0 }
  0xfe   : > { %3837 = vmatpush.bf16.msrb.mxu1 %v6928_v20  ;;  %3806 = vmatmul.bf16.vlgmr.msra.gmra.mxu2 %v8149_v54  ;;  %v7936_v63 = vld [vmem:[%s8290_s19 + $0xc84] sm:$0xf]  ;;  %v6749_v0 = vld [vmem:[%s8290_s19 + $0xc90] sm:$0xf0]  ;;  %v7152_v5 = vor.u32 %v8036_v56, %v7149_v57  ;;  %v3574_v12 = vadd.f32 %v3573_v9, %v8762_v46 }
  0xff   : > { %3850 = vmatpush.bf16.msrb.mxu2 %v7056_v32  ;;  %3819 = vmatmul.bf16.vlgmr.msra.gmra.mxu3 %v8151_v58  ;;  %v7968_v4 = vld [vmem:[%s8290_s19 + $0xd84] sm:$0xf]  ;;  %v6877_v6 = vld [vmem:[%s8290_s19 + $0xd90] sm:$0xf0]  ;;  %v6752_v13 = vor.u32 %v7936_v63, %v6749_v0 }
 0x100   : > { %3863 = vmatpush.bf16.msrb.mxu3 %v7184_v36  ;;  %v8000_v7 = vld [vmem:[%s8290_s19 + $0xe84] sm:$0xf]  ;;  %v7005_v8 = vld [vmem:[%s8290_s19 + $0xe90] sm:$0xf0]  ;;  %v6880_v15 = vor.u32 %v7968_v4, %v6877_v6  ;;  %v3587_v25 = vadd.f32 %v3586_v14, %v3574_v12  ;;  %v5267_v14 = vld [vmem:[%s8290_s19 + $0xe8] sm:$0xf] }
 0x101   : > { %3825 = vmatpush.bf16.msrb.mxu0 %v6784_v42  ;;  %v8032_v10 = vld [vmem:[%s8290_s19 + $0xf84] sm:$0xf]  ;;  %v7133_v11 = vld [vmem:[%s8290_s19 + $0xf90] sm:$0xf0]  ;;  %v7008_v16 = vor.u32 %v8000_v7, %v7005_v8 }
 0x102   : > { %3838 = vmatpush.bf16.msrb.mxu1 %v6912_v43  ;;  %v7932_v17 = vld [vmem:[%s8290_s19 + $0xc64] sm:$0xf]  ;;  %v6733_v18 = vld [vmem:[%s8290_s19 + $0xc70] sm:$0xf0]  ;;  %v7136_v24 = vor.u32 %v8032_v10, %v7133_v11  ;;  %v3599_v37 = vpop.f32.mrf.mxu2 }
 0x103   : > { %3851 = vmatpush.bf16.msrb.mxu2 %v7040_v44  ;;  %v7964_v19 = vld [vmem:[%s8290_s19 + $0xd64] sm:$0xf]  ;;  %v6861_v26 = vld [vmem:[%s8290_s19 + $0xd70] sm:$0xf0]  ;;  %v6736_v31 = vor.u32 %v7932_v17, %v6733_v18  ;;  %v3600_v41 = vadd.f32 %v3599_v37, %v3587_v25  ;;  %v7631_v25 = vld [vmem:[%s8290_s19 + $0x2f4] sm:$0xf0] }
 0x104   : > { %3864 = vmatpush.bf16.msrb.mxu3 %v7168_v50  ;;  %v7996_v28 = vld [vmem:[%s8290_s19 + $0xe64] sm:$0xf]  ;;  %v6989_v46 = vld [vmem:[%s8290_s19 + $0xe70] sm:$0xf0]  ;;  %v6864_v20 = vor.u32 %v7964_v19, %v6861_v26  ;;  %v3588_v48 = vpop.f32.mrf.mxu1  ;;  %v7599_v19 = vld [vmem:[%s8290_s19 + $0x1f4] sm:$0xf0] }
 0x105   : > { %3826 = vmatpush.bf16.msrb.mxu0 %v6768_v59  ;;  %v8028_v29 = vld [vmem:[%s8290_s19 + $0xf64] sm:$0xf]  ;;  %v7117_v30 = vld [vmem:[%s8290_s19 + $0xf70] sm:$0xf0]  ;;  %v6992_v32 = vor.u32 %v7996_v28, %v6989_v46  ;;  %v3612_v42 = vpop.f32.mrf.mxu3  ;;  %v3575_v45 = vpop.f32.mrf.mxu0  ;;  %v5651_v46 = vld [vmem:[%s8290_s19 + $0x3e8] sm:$0xf] }
 0x106   : > { %3839 = vmatpush.bf16.msrb.mxu1 %v6896_v60  ;;  %v7928_v33 = vld [vmem:[%s8290_s19 + $0xc44] sm:$0xf]  ;;  %v6717_v34 = vld [vmem:[%s8290_s19 + $0xc50] sm:$0xf0]  ;;  %v7120_v36 = vor.u32 %v8028_v29, %v7117_v30  ;;  %v8829_v49 = vadd.f32 %v3612_v42, %v3600_v41  ;;  %v7663_v29 = vld [vmem:[%s8290_s19 + $0x3f4] sm:$0xf0] }
 0x107   : > { %3852 = vmatpush.bf16.msrb.mxu2 %v7024_v62  ;;  %v7960_v35 = vld [vmem:[%s8290_s19 + $0xd44] sm:$0xf]  ;;  %v6845_v38 = vld [vmem:[%s8290_s19 + $0xd50] sm:$0xf0]  ;;  %v6720_v47 = vor.u32 %v7928_v33, %v6717_v34  ;;  %v5251_v33 = vld [vmem:[%s8290_s19 + $0xc8] sm:$0xf] }
 0x108   : > { %3865 = vmatpush.bf16.msrb.mxu3 %v7152_v5  ;;  %v7992_v39 = vld [vmem:[%s8290_s19 + $0xe44] sm:$0xf]  ;;  %v6973_v40 = vld [vmem:[%s8290_s19 + $0xe50] sm:$0xf0]  ;;  %v6848_v50 = vor.u32 %v7960_v35, %v6845_v38  ;;  %v7563_v34 = vld [vmem:[%s8290_s19 + $0xd4] sm:$0xf0] }
 0x109   : > { %3827 = vmatpush.bf16.msrb.mxu0 %v6752_v13  ;;  %v8024_v43 = vld [vmem:[%s8290_s19 + $0xf44] sm:$0xf]  ;;  %v7101_v44 = vld [vmem:[%s8290_s19 + $0xf50] sm:$0xf0]  ;;  %v6976_v51 = vor.u32 %v7992_v39, %v6973_v40  ;;  %v5379_v35 = vld [vmem:[%s8290_s19 + $0x1c8] sm:$0xf]  ;;  %v5252_v42 = vor.u32 %v7563_v34, %v5251_v33 }
 0x10a   : > { %3840 = vmatpush.bf16.msrb.mxu1 %v6880_v15  ;;  %v7924_v52 = vld [vmem:[%s8290_s19 + $0xc24] sm:$0xf]  ;;  %v6701_v53 = vld [vmem:[%s8290_s19 + $0xc30] sm:$0xf0]  ;;  %v7104_v55 = vor.u32 %v8024_v43, %v7101_v44  ;;  %v3601_v13 = vpop.f32.mrf.mxu2  ;;  %v7567_v15 = vld [vmem:[%s8290_s19 + $0xf4] sm:$0xf0] }
 0x10b   : > { %3853 = vmatpush.bf16.msrb.mxu2 %v7008_v16  ;;  %v7956_v54 = vld [vmem:[%s8290_s19 + $0xd24] sm:$0xf]  ;;  %v6829_v56 = vld [vmem:[%s8290_s19 + $0xd30] sm:$0xf0]  ;;  %v6704_v62 = vor.u32 %v7924_v52, %v6701_v53  ;;  %v5395_v16 = vld [vmem:[%s8290_s19 + $0x1e8] sm:$0xf] }
 0x10c   : > { %3866 = vmatpush.bf16.msrb.mxu3 %v7136_v24  ;;  %v7988_v57 = vld [vmem:[%s8290_s19 + $0xe24] sm:$0xf]  ;;  %v6957_v58 = vld [vmem:[%s8290_s19 + $0xe30] sm:$0xf0]  ;;  %v6832_v4 = vor.u32 %v7956_v54, %v6829_v56  ;;  %v5523_v24 = vld [vmem:[%s8290_s19 + $0x2e8] sm:$0xf] }
 0x10d   : > { %3828 = vmatpush.bf16.msrb.mxu0 %v6736_v31  ;;  %v8020_v59 = vld [vmem:[%s8290_s19 + $0xf24] sm:$0xf]  ;;  %v7085_v60 = vld [vmem:[%s8290_s19 + $0xf30] sm:$0xf0]  ;;  %v6960_v5 = vor.u32 %v7988_v57, %v6957_v58  ;;  %v3614_v17 = vpop.f32.mrf.mxu3  ;;  %v5268_v31 = vor.u32 %v7567_v15, %v5267_v14  ;;  %v7595_v37 = vld [vmem:[%s8290_s19 + $0x1d4] sm:$0xf0] }
 0x10e   : > { %3841 = vmatpush.bf16.msrb.mxu1 %v6864_v20  ;;  %v7920_v63 = vld [vmem:[%s8290_s19 + $0xc04] sm:$0xf]  ;;  %v6685_v0 = vld [vmem:[%s8290_s19 + $0xc10] sm:$0xf0]  ;;  %v7088_v9 = vor.u32 %v8020_v59, %v7085_v60  ;;  %v5396_v20 = vor.u32 %v7599_v19, %v5395_v16  ;;  %v5507_v38 = vld [vmem:[%s8290_s19 + $0x2c8] sm:$0xf]  ;;  %v5380_v43 = vor.u32 %v7595_v37, %v5379_v35 }
 0x10f   : > { %3854 = vmatpush.bf16.msrb.mxu2 %v6992_v32  ;;  %v7952_v6 = vld [vmem:[%s8290_s19 + $0xd04] sm:$0xf]  ;;  %v6813_v7 = vld [vmem:[%s8290_s19 + $0xd10] sm:$0xf0]  ;;  %v6688_v18 = vor.u32 %v7920_v63, %v6685_v0  ;;  %v5524_v32 = vor.u32 %v7631_v25, %v5523_v24  ;;  %v7627_v39 = vld [vmem:[%s8290_s19 + $0x2d4] sm:$0xf0] }
 0x110   : > { %3867 = vmatpush.bf16.msrb.mxu3 %v7120_v36  ;;  %v7984_v8 = vld [vmem:[%s8290_s19 + $0xe04] sm:$0xf]  ;;  %v6941_v10 = vld [vmem:[%s8290_s19 + $0xe10] sm:$0xf0]  ;;  %v6816_v26 = vor.u32 %v7952_v6, %v6813_v7  ;;  %v5652_v36 = vor.u32 %v7663_v29, %v5651_v46  ;;  %v5635_v40 = vld [vmem:[%s8290_s19 + $0x3c8] sm:$0xf]  ;;  %v5508_v44 = vor.u32 %v7627_v39, %v5507_v38 }
 0x111   : > { %3829 = vmatpush.bf16.msrb.mxu0 %v6720_v47  ;;  %v8016_v11 = vld [vmem:[%s8290_s19 + $0xf04] sm:$0xf]  ;;  %v7069_v12 = vld [vmem:[%s8290_s19 + $0xf10] sm:$0xf0]  ;;  %v6944_v28 = vor.u32 %v7984_v8, %v6941_v10  ;;  %v7659_v41 = vld [vmem:[%s8290_s19 + $0x3d4] sm:$0xf0] }
 0x112   : > { %3842 = vmatpush.bf16.msrb.mxu1 %v6848_v50  ;;  %v7072_v30 = vor.u32 %v8016_v11, %v7069_v12  ;;  %v5235_v45 = vld [vmem:[%s8290_s19 + $0xa8] sm:$0xf]  ;;  %v7559_v47 = vld [vmem:[%s8290_s19 + $0xb4] sm:$0xf0]  ;;  %v8154_v56 = vld [vmem:[#allocation1 + $0x2d] sm:$0xff] }
 0x113   : > { %3855 = vmatpush.bf16.msrb.mxu2 %v6976_v51  ;;  %v5363_v48 = vld [vmem:[%s8290_s19 + $0x1a8] sm:$0xf]  ;;  %v5636_v51 = vor.u32 %v7659_v41, %v5635_v40  ;;  %v7591_v52 = vld [vmem:[%s8290_s19 + $0x1b4] sm:$0xf0]  ;;  %v8155_v59 = vld [vmem:[#allocation1 + $0x3f] sm:$0xff]  ;;  %v5236_v60 = vor.u32 %v7559_v47, %v5235_v45 }
 0x114   : > { %3868 = vmatpush.bf16.msrb.mxu3 %v7104_v55  ;;  %v8152_v50 = vld [vmem:[#allocation1 + $0x24] sm:$0xff]  ;;  %v7623_v54 = vld [vmem:[%s8290_s19 + $0x2b4] sm:$0xf0] }
 0x115   : > { %3830 = vmatpush.bf16.msrb.mxu0 %v6704_v62  ;;  %v5491_v53 = vld [vmem:[%s8290_s19 + $0x2a8] sm:$0xf]  ;;  %v8153_v55 = vld [vmem:[#allocation1 + $0x36] sm:$0xff]  ;;  %v5364_v62 = vor.u32 %v7591_v52, %v5363_v48 }
 0x116   : > { %3843 = vmatpush.bf16.msrb.mxu1 %v6832_v4  ;;  %v5619_v57 = vld [vmem:[%s8290_s19 + $0x3a8] sm:$0xf]  ;;  %v7655_v58 = vld [vmem:[%s8290_s19 + $0x3b4] sm:$0xf0]  ;;  %v5492_v63 = vor.u32 %v7623_v54, %v5491_v53 }
 0x117   : > { %3856 = vmatpush.bf16.msrb.mxu2 %v6960_v5  ;;  %v5219_v0 = vld [vmem:[%s8290_s19 + $0x88] sm:$0xf]  ;;  %v7555_v4 = vld [vmem:[%s8290_s19 + $0x94] sm:$0xf0]  ;;  %v5620_v6 = vor.u32 %v7655_v58, %v5619_v57 }
 0x118   : > { %3869 = vmatpush.bf16.msrb.mxu3 %v7088_v9  ;;  %v5347_v5 = vld [vmem:[%s8290_s19 + $0x188] sm:$0xf]  ;;  %v7587_v7 = vld [vmem:[%s8290_s19 + $0x194] sm:$0xf0]  ;;  %v5220_v14 = vor.u32 %v7555_v4, %v5219_v0 }
 0x119   : > { %3831 = vmatpush.bf16.msrb.mxu0 %v6688_v18  ;;  %v5475_v8 = vld [vmem:[%s8290_s19 + $0x288] sm:$0xf]  ;;  %v7619_v9 = vld [vmem:[%s8290_s19 + $0x294] sm:$0xf0]  ;;  %v3625_v10 = vpop.f32.mrf.mxu0  ;;  %v5348_v16 = vor.u32 %v7587_v7, %v5347_v5 }
 0x11a   : > { %3844 = vmatpush.bf16.msrb.mxu1 %v6816_v26  ;;  %v5603_v11 = vld [vmem:[%s8290_s19 + $0x388] sm:$0xf]  ;;  %v7651_v12 = vld [vmem:[%s8290_s19 + $0x394] sm:$0xf0]  ;;  %v3626_v13 = vadd.f32 %v3625_v10, %v8829_v49  ;;  %v3638_v15 = vpop.f32.mrf.mxu1  ;;  %v5476_v17 = vor.u32 %v7619_v9, %v5475_v8 }
 0x11b   : > { %3857 = vmatpush.bf16.msrb.mxu2 %v6944_v28  ;;  %v5203_v18 = vld [vmem:[%s8290_s19 + $0x68] sm:$0xf]  ;;  %v7551_v19 = vld [vmem:[%s8290_s19 + $0x74] sm:$0xf0]  ;;  %v5604_v25 = vor.u32 %v7651_v12, %v5603_v11 }
 0x11c   : > { %3870 = vmatpush.bf16.msrb.mxu3 %v7072_v30  ;;  %3832 = vmatmul.bf16.vlgmr.msrb.gmra.mxu0 %v8152_v50  ;;  %v5331_v24 = vld [vmem:[%s8290_s19 + $0x168] sm:$0xf]  ;;  %v3639_v26 = vadd.f32 %v3638_v15, %v3626_v13  ;;  %v7583_v28 = vld [vmem:[%s8290_s19 + $0x174] sm:$0xf0] }
 0x11d   : > { %3876 = vmatpush.bf16.msra.mxu0 %v5268_v31  ;;  %3845 = vmatmul.bf16.vlgmr.msrb.gmra.mxu1 %v8154_v56  ;;  %v5459_v46 = vld [vmem:[%s8290_s19 + $0x268] sm:$0xf]  ;;  %v7615_v49 = vld [vmem:[%s8290_s19 + $0x274] sm:$0xf0]  ;;  %v5204_v31 = vor.u32 %v7551_v19, %v5203_v18 }
 0x11e   : > { %3889 = vmatpush.bf16.msra.mxu1 %v5396_v20  ;;  %3858 = vmatmul.bf16.vlgmr.msrb.gmra.mxu2 %v8153_v55  ;;  %v5587_v29 = vld [vmem:[%s8290_s19 + $0x368] sm:$0xf]  ;;  %v7647_v30 = vld [vmem:[%s8290_s19 + $0x374] sm:$0xf0]  ;;  %v5332_v20 = vor.u32 %v7583_v28, %v5331_v24 }
 0x11f   : > { %3902 = vmatpush.bf16.msra.mxu2 %v5524_v32  ;;  %3871 = vmatmul.bf16.vlgmr.msrb.gmra.mxu3 %v8155_v59  ;;  %v5460_v32 = vor.u32 %v7615_v49, %v5459_v46  ;;  %v5187_v33 = vld [vmem:[%s8290_s19 + $0x48] sm:$0xf]  ;;  %v7547_v34 = vld [vmem:[%s8290_s19 + $0x54] sm:$0xf0] }
 0x120   : > { %3915 = vmatpush.bf16.msra.mxu3 %v5652_v36  ;;  %v5315_v35 = vld [vmem:[%s8290_s19 + $0x148] sm:$0xf]  ;;  %v5588_v36 = vor.u32 %v7647_v30, %v5587_v29  ;;  %v7579_v38 = vld [vmem:[%s8290_s19 + $0x154] sm:$0xf0]  ;;  %v5188_v47 = vor.u32 %v7547_v34, %v5187_v33 }
 0x121   : > { %3877 = vmatpush.bf16.msra.mxu0 %v5252_v42  ;;  %v3651_v37 = vpop.f32.mrf.mxu2  ;;  %v5443_v39 = vld [vmem:[%s8290_s19 + $0x248] sm:$0xf]  ;;  %v7611_v40 = vld [vmem:[%s8290_s19 + $0x254] sm:$0xf0]  ;;  %v3627_v45 = vpop.f32.mrf.mxu0 }
 0x122   : > { %3890 = vmatpush.bf16.msra.mxu1 %v5380_v43  ;;  %v3652_v41 = vadd.f32 %v3651_v37, %v3639_v26  ;;  %v3664_v42 = vpop.f32.mrf.mxu3  ;;  %v5571_v43 = vld [vmem:[%s8290_s19 + $0x348] sm:$0xf]  ;;  %v3640_v48 = vpop.f32.mrf.mxu1  ;;  %v5444_v52 = vor.u32 %v7611_v40, %v5443_v39  ;;  %v7543_v54 = vld [vmem:[%s8290_s19 + $0x34] sm:$0xf0] }
 0x123   : > { %3903 = vmatpush.bf16.msra.mxu2 %v5508_v44  ;;  %v7643_v44 = vld [vmem:[%s8290_s19 + $0x354] sm:$0xf0]  ;;  %v5171_v53 = vld [vmem:[%s8290_s19 + $0x28] sm:$0xf] }
 0x124   : > { %3916 = vmatpush.bf16.msra.mxu3 %v5636_v51  ;;  %v8896_v50 = vadd.f32 %v3664_v42, %v3652_v41  ;;  %v5316_v51 = vor.u32 %v7579_v38, %v5315_v35  ;;  %v5299_v55 = vld [vmem:[%s8290_s19 + $0x128] sm:$0xf]  ;;  %v5572_v56 = vor.u32 %v7643_v44, %v5571_v43  ;;  %v7575_v57 = vld [vmem:[%s8290_s19 + $0x134] sm:$0xf0] }
 0x125   : > { %3878 = vmatpush.bf16.msra.mxu0 %v5236_v60  ;;  %v5427_v58 = vld [vmem:[%s8290_s19 + $0x228] sm:$0xf]  ;;  %v7607_v59 = vld [vmem:[%s8290_s19 + $0x234] sm:$0xf0]  ;;  %v5300_v5 = vor.u32 %v7575_v57, %v5299_v55 }
 0x126   : > { %3891 = vmatpush.bf16.msra.mxu1 %v5364_v62  ;;  %v5555_v60 = vld [vmem:[%s8290_s19 + $0x328] sm:$0xf]  ;;  %v7639_v62 = vld [vmem:[%s8290_s19 + $0x334] sm:$0xf0] }
 0x127   : > { %3904 = vmatpush.bf16.msra.mxu2 %v5492_v63  ;;  %v5172_v63 = vor.u32 %v7543_v54, %v5171_v53  ;;  %v5155_v0 = vld [vmem:[%s8290_s19 + $0x8] sm:$0xf]  ;;  %v7539_v4 = vld [vmem:[%s8290_s19 + $0x14] sm:$0xf0]  ;;  %v5556_v10 = vor.u32 %v7639_v62, %v5555_v60 }
 0x128   : > { %3917 = vmatpush.bf16.msra.mxu3 %v5620_v6  ;;  %v5428_v6 = vor.u32 %v7607_v59, %v5427_v58  ;;  %v5283_v7 = vld [vmem:[%s8290_s19 + $0x108] sm:$0xf]  ;;  %v7571_v8 = vld [vmem:[%s8290_s19 + $0x114] sm:$0xf0]  ;;  %v5156_v19 = vor.u32 %v7539_v4, %v5155_v0 }
 0x129   : > { %3879 = vmatpush.bf16.msra.mxu0 %v5220_v14  ;;  %v5411_v9 = vld [vmem:[%s8290_s19 + $0x208] sm:$0xf]  ;;  %v7603_v11 = vld [vmem:[%s8290_s19 + $0x214] sm:$0xf0]  ;;  %v3653_v14 = vpop.f32.mrf.mxu2  ;;  %v5284_v28 = vor.u32 %v7571_v8, %v5283_v7 }
 0x12a   : > { %3892 = vmatpush.bf16.msra.mxu1 %v5348_v16  ;;  %v5539_v12 = vld [vmem:[%s8290_s19 + $0x308] sm:$0xf]  ;;  %v7635_v13 = vld [vmem:[%s8290_s19 + $0x314] sm:$0xf0]  ;;  %v3666_v18 = vpop.f32.mrf.mxu3  ;;  %v5412_v46 = vor.u32 %v7603_v11, %v5411_v9 }
 0x12b   : > { %3905 = vmatpush.bf16.msra.mxu2 %v5476_v17  ;;  %v5779_v15 = vld [vmem:[%s8290_s19 + $0x4e8] sm:$0xf]  ;;  %v7695_v16 = vld [vmem:[%s8290_s19 + $0x4f4] sm:$0xf0]  ;;  %v5540_v30 = vor.u32 %v7635_v13, %v5539_v12 }
 0x12c   : > { %3918 = vmatpush.bf16.msra.mxu3 %v5604_v25  ;;  %v5907_v17 = vld [vmem:[%s8290_s19 + $0x5e8] sm:$0xf]  ;;  %v7727_v24 = vld [vmem:[%s8290_s19 + $0x5f4] sm:$0xf0] }
 0x12d   : > { %3880 = vmatpush.bf16.msra.mxu0 %v5204_v31  ;;  %v6035_v25 = vld [vmem:[%s8290_s19 + $0x6e8] sm:$0xf]  ;;  %v7759_v26 = vld [vmem:[%s8290_s19 + $0x6f4] sm:$0xf0]  ;;  %v5780_v31 = vor.u32 %v7695_v16, %v5779_v15 }
 0x12e   : > { %3893 = vmatpush.bf16.msra.mxu1 %v5332_v20  ;;  %v6163_v49 = vld [vmem:[%s8290_s19 + $0x7e8] sm:$0xf]  ;;  %v7791_v29 = vld [vmem:[%s8290_s19 + $0x7f4] sm:$0xf0]  ;;  %v5908_v20 = vor.u32 %v7727_v24, %v5907_v17 }
 0x12f   : > { %3906 = vmatpush.bf16.msra.mxu2 %v5460_v32  ;;  %v6036_v32 = vor.u32 %v7759_v26, %v6035_v25  ;;  %v5763_v33 = vld [vmem:[%s8290_s19 + $0x4c8] sm:$0xf]  ;;  %v7691_v34 = vld [vmem:[%s8290_s19 + $0x4d4] sm:$0xf0] }
 0x130   : > { %3919 = vmatpush.bf16.msra.mxu3 %v5588_v36  ;;  %v5891_v35 = vld [vmem:[%s8290_s19 + $0x5c8] sm:$0xf]  ;;  %v6164_v36 = vor.u32 %v7791_v29, %v6163_v49  ;;  %v7723_v37 = vld [vmem:[%s8290_s19 + $0x5d4] sm:$0xf0]  ;;  %v5764_v42 = vor.u32 %v7691_v34, %v5763_v33 }
 0x131   : > { %3881 = vmatpush.bf16.msra.mxu0 %v5188_v47  ;;  %v6019_v38 = vld [vmem:[%s8290_s19 + $0x6c8] sm:$0xf]  ;;  %v7755_v39 = vld [vmem:[%s8290_s19 + $0x6d4] sm:$0xf0]  ;;  %v5892_v43 = vor.u32 %v7723_v37, %v5891_v35 }
 0x132   : > { %3894 = vmatpush.bf16.msra.mxu1 %v5316_v51  ;;  %v6147_v40 = vld [vmem:[%s8290_s19 + $0x7c8] sm:$0xf]  ;;  %v7787_v41 = vld [vmem:[%s8290_s19 + $0x7d4] sm:$0xf0]  ;;  %v6020_v44 = vor.u32 %v7755_v39, %v6019_v38 }
 0x133   : > { %3907 = vmatpush.bf16.msra.mxu2 %v5444_v52  ;;  %v5747_v45 = vld [vmem:[%s8290_s19 + $0x4a8] sm:$0xf]  ;;  %v7687_v47 = vld [vmem:[%s8290_s19 + $0x4b4] sm:$0xf0]  ;;  %v6148_v51 = vor.u32 %v7787_v41, %v6147_v40 }
 0x134   : > { %3920 = vmatpush.bf16.msra.mxu3 %v5572_v56  ;;  %v5875_v48 = vld [vmem:[%s8290_s19 + $0x5a8] sm:$0xf]  ;;  %v7719_v52 = vld [vmem:[%s8290_s19 + $0x5b4] sm:$0xf0]  ;;  %v5748_v57 = vor.u32 %v7687_v47, %v5747_v45 }
 0x135   : > { %3882 = vmatpush.bf16.msra.mxu0 %v5172_v63  ;;  %v6003_v53 = vld [vmem:[%s8290_s19 + $0x6a8] sm:$0xf]  ;;  %v7751_v54 = vld [vmem:[%s8290_s19 + $0x6b4] sm:$0xf0]  ;;  %v5876_v58 = vor.u32 %v7719_v52, %v5875_v48 }
 0x136   : > { %3895 = vmatpush.bf16.msra.mxu1 %v5300_v5  ;;  %v6131_v55 = vld [vmem:[%s8290_s19 + $0x7a8] sm:$0xf]  ;;  %v7783_v56 = vld [vmem:[%s8290_s19 + $0x7b4] sm:$0xf0]  ;;  %v6004_v59 = vor.u32 %v7751_v54, %v6003_v53 }
 0x137   : > { %3908 = vmatpush.bf16.msra.mxu2 %v5428_v6  ;;  %v5731_v60 = vld [vmem:[%s8290_s19 + $0x488] sm:$0xf]  ;;  %v7683_v62 = vld [vmem:[%s8290_s19 + $0x494] sm:$0xf0]  ;;  %v6132_v0 = vor.u32 %v7783_v56, %v6131_v55 }
 0x138   : > { %3921 = vmatpush.bf16.msra.mxu3 %v5556_v10  ;;  %v5859_v63 = vld [vmem:[%s8290_s19 + $0x588] sm:$0xf]  ;;  %v7715_v4 = vld [vmem:[%s8290_s19 + $0x594] sm:$0xf0]  ;;  %v5732_v9 = vor.u32 %v7683_v62, %v5731_v60 }
 0x139   : > { %3883 = vmatpush.bf16.msra.mxu0 %v5156_v19  ;;  %v5987_v5 = vld [vmem:[%s8290_s19 + $0x688] sm:$0xf]  ;;  %v7747_v6 = vld [vmem:[%s8290_s19 + $0x694] sm:$0xf0]  ;;  %v3677_v10 = vpop.f32.mrf.mxu0  ;;  %v5860_v11 = vor.u32 %v7715_v4, %v5859_v63 }
 0x13a   : > { %3896 = vmatpush.bf16.msra.mxu1 %v5284_v28  ;;  %v6115_v7 = vld [vmem:[%s8290_s19 + $0x788] sm:$0xf]  ;;  %v7779_v8 = vld [vmem:[%s8290_s19 + $0x794] sm:$0xf0]  ;;  %v5988_v12 = vor.u32 %v7747_v6, %v5987_v5  ;;  %v3690_v16 = vpop.f32.mrf.mxu1 }
 0x13b   : > { %3909 = vmatpush.bf16.msra.mxu2 %v5412_v46  ;;  %v5715_v13 = vld [vmem:[%s8290_s19 + $0x468] sm:$0xf]  ;;  %v7679_v14 = vld [vmem:[%s8290_s19 + $0x474] sm:$0xf0]  ;;  %v6116_v17 = vor.u32 %v7779_v8, %v6115_v7  ;;  %v3691_v25 = vadd.f32 %v3690_v16, %v3677_v10 }
 0x13c   : > { %3922 = vmatpush.bf16.msra.mxu3 %v5540_v30  ;;  %3884 = vmatmul.bf16.vlgmr.msra.gmra.mxu0 %v8396_v22  ;;  %v5843_v15 = vld [vmem:[%s8290_s19 + $0x568] sm:$0xf]  ;;  %v7711_v18 = vld [vmem:[%s8290_s19 + $0x574] sm:$0xf0]  ;;  %v5716_v46 = vor.u32 %v7679_v14, %v5715_v13 }
 0x13d   : > { %3928 = vmatpush.bf16.msrb.mxu0 %v5780_v31  ;;  %3897 = vmatmul.bf16.vlgmr.msra.gmra.mxu1 %v8403_v27  ;;  %v5971_v19 = vld [vmem:[%s8290_s19 + $0x668] sm:$0xf]  ;;  %v7743_v24 = vld [vmem:[%s8290_s19 + $0x674] sm:$0xf0]  ;;  %v5844_v49 = vor.u32 %v7711_v18, %v5843_v15 }
 0x13e   : > { %3941 = vmatpush.bf16.msrb.mxu1 %v5908_v20  ;;  %3910 = vmatmul.bf16.vlgmr.msra.gmra.mxu2 %v8394_v21  ;;  %v6099_v26 = vld [vmem:[%s8290_s19 + $0x768] sm:$0xf]  ;;  %v7775_v28 = vld [vmem:[%s8290_s19 + $0x774] sm:$0xf0]  ;;  %v5972_v29 = vor.u32 %v7743_v24, %v5971_v19 }
 0x13f   : > { %3954 = vmatpush.bf16.msrb.mxu2 %v6036_v32  ;;  %3923 = vmatmul.bf16.vlgmr.msra.gmra.mxu3 %v8398_v23  ;;  %v5699_v30 = vld [vmem:[%s8290_s19 + $0x448] sm:$0xf]  ;;  %v7675_v31 = vld [vmem:[%s8290_s19 + $0x454] sm:$0xf0]  ;;  %v6100_v33 = vor.u32 %v7775_v28, %v6099_v26 }
 0x140   : > { %3967 = vmatpush.bf16.msrb.mxu3 %v6164_v36  ;;  %v5827_v20 = vld [vmem:[%s8290_s19 + $0x548] sm:$0xf]  ;;  %v7707_v34 = vld [vmem:[%s8290_s19 + $0x554] sm:$0xf0]  ;;  %v5700_v41 = vor.u32 %v7675_v31, %v5699_v30 }
 0x141   : > { %3929 = vmatpush.bf16.msrb.mxu0 %v5764_v42  ;;  %v3703_v32 = vpop.f32.mrf.mxu2  ;;  %v5955_v35 = vld [vmem:[%s8290_s19 + $0x648] sm:$0xf]  ;;  %v7739_v36 = vld [vmem:[%s8290_s19 + $0x654] sm:$0xf0] }
 0x142   : > { %3942 = vmatpush.bf16.msrb.mxu1 %v5892_v43  ;;  %v3704_v37 = vadd.f32 %v3703_v32, %v3691_v25  ;;  %v3716_v38 = vpop.f32.mrf.mxu3  ;;  %v6083_v39 = vld [vmem:[%s8290_s19 + $0x748] sm:$0xf]  ;;  %v7771_v40 = vld [vmem:[%s8290_s19 + $0x754] sm:$0xf0]  ;;  %v3679_v43 = vpop.f32.mrf.mxu0  ;;  %v5956_v45 = vor.u32 %v7739_v36, %v5955_v35 }
 0x143   : > { %3955 = vmatpush.bf16.msrb.mxu2 %v6020_v44  ;;  %v5828_v44 = vor.u32 %v7707_v34, %v5827_v20  ;;  %v5683_v47 = vld [vmem:[%s8290_s19 + $0x428] sm:$0xf]  ;;  %v7671_v48 = vld [vmem:[%s8290_s19 + $0x434] sm:$0xf0]  ;;  %v3692_v52 = vpop.f32.mrf.mxu1  ;;  %v6084_v53 = vor.u32 %v7771_v40, %v6083_v39 }
 0x144   : > { %3968 = vmatpush.bf16.msrb.mxu3 %v6148_v51  ;;  %v8966_v42 = vadd.f32 %v3716_v38, %v3704_v37  ;;  %v5811_v51 = vld [vmem:[%s8290_s19 + $0x528] sm:$0xf]  ;;  %v7703_v54 = vld [vmem:[%s8290_s19 + $0x534] sm:$0xf0] }
 0x145   : > { %3930 = vmatpush.bf16.msrb.mxu0 %v5748_v57  ;;  %v5939_v55 = vld [vmem:[%s8290_s19 + $0x628] sm:$0xf]  ;;  %v7735_v56 = vld [vmem:[%s8290_s19 + $0x634] sm:$0xf0]  ;;  %v5812_v63 = vor.u32 %v7703_v54, %v5811_v51 }
 0x146   : > { %3943 = vmatpush.bf16.msrb.mxu1 %v5876_v58  ;;  %v6067_v57 = vld [vmem:[%s8290_s19 + $0x728] sm:$0xf]  ;;  %v7767_v58 = vld [vmem:[%s8290_s19 + $0x734] sm:$0xf0] }
 0x147   : > { %3956 = vmatpush.bf16.msrb.mxu2 %v6004_v59  ;;  %v5684_v59 = vor.u32 %v7671_v48, %v5683_v47  ;;  %v5667_v60 = vld [vmem:[%s8290_s19 + $0x408] sm:$0xf]  ;;  %v7667_v62 = vld [vmem:[%s8290_s19 + $0x414] sm:$0xf0]  ;;  %v6068_v8 = vor.u32 %v7767_v58, %v6067_v57 }
 0x148   : > { %3969 = vmatpush.bf16.msrb.mxu3 %v6132_v0  ;;  %v5940_v0 = vor.u32 %v7735_v56, %v5939_v55  ;;  %v5795_v4 = vld [vmem:[%s8290_s19 + $0x508] sm:$0xf]  ;;  %v7699_v5 = vld [vmem:[%s8290_s19 + $0x514] sm:$0xf0]  ;;  %v5668_v16 = vor.u32 %v7667_v62, %v5667_v60 }
 0x149   : > { %3931 = vmatpush.bf16.msrb.mxu0 %v5732_v9  ;;  %v5923_v6 = vld [vmem:[%s8290_s19 + $0x608] sm:$0xf]  ;;  %v3705_v7 = vpop.f32.mrf.mxu2  ;;  %v7731_v9 = vld [vmem:[%s8290_s19 + $0x614] sm:$0xf0]  ;;  %v5796_v24 = vor.u32 %v7699_v5, %v5795_v4 }
 0x14a   : > { %3944 = vmatpush.bf16.msrb.mxu1 %v5860_v11  ;;  %v6051_v10 = vld [vmem:[%s8290_s19 + $0x708] sm:$0xf]  ;;  %v7763_v11 = vld [vmem:[%s8290_s19 + $0x714] sm:$0xf0]  ;;  %v5924_v25 = vor.u32 %v7731_v9, %v5923_v6 }
 0x14b   : > { %3957 = vmatpush.bf16.msrb.mxu2 %v5988_v12  ;;  %v3718_v12 = vpop.f32.mrf.mxu3  ;;  %v6291_v13 = vld [vmem:[%s8290_s19 + $0x8e8] sm:$0xf]  ;;  %v7823_v14 = vld [vmem:[%s8290_s19 + $0x8f4] sm:$0xf0] }
 0x14c   : > { %3970 = vmatpush.bf16.msrb.mxu3 %v6116_v17  ;;  %v6419_v15 = vld [vmem:[%s8290_s19 + $0x9e8] sm:$0xf]  ;;  %v7855_v17 = vld [vmem:[%s8290_s19 + $0x9f4] sm:$0xf0] }
 0x14d   : > { %3932 = vmatpush.bf16.msrb.mxu0 %v5716_v46  ;;  %v6547_v18 = vld [vmem:[%s8290_s19 + $0xae8] sm:$0xf]  ;;  %v7887_v19 = vld [vmem:[%s8290_s19 + $0xaf4] sm:$0xf0]  ;;  %v6052_v46 = vor.u32 %v7763_v11, %v6051_v10 }
 0x14e   : > { %3945 = vmatpush.bf16.msrb.mxu1 %v5844_v49  ;;  %v6675_v26 = vld [vmem:[%s8290_s19 + $0xbe8] sm:$0xf]  ;;  %v7919_v28 = vld [vmem:[%s8290_s19 + $0xbf4] sm:$0xf0]  ;;  %v6292_v49 = vor.u32 %v7823_v14, %v6291_v13  ;;  %v6548_v30 = vor.u32 %v7887_v19, %v6547_v18 }
 0x14f   : > { %3958 = vmatpush.bf16.msrb.mxu2 %v5972_v29  ;;  %v6420_v29 = vor.u32 %v7855_v17, %v6419_v15  ;;  %v6275_v31 = vld [vmem:[%s8290_s19 + $0x8c8] sm:$0xf]  ;;  %v7819_v20 = vld [vmem:[%s8290_s19 + $0x8d4] sm:$0xf0] }
 0x150   : > { %3971 = vmatpush.bf16.msrb.mxu3 %v6100_v33  ;;  %v6403_v32 = vld [vmem:[%s8290_s19 + $0x9c8] sm:$0xf]  ;;  %v6676_v33 = vor.u32 %v7919_v28, %v6675_v26  ;;  %v7851_v34 = vld [vmem:[%s8290_s19 + $0x9d4] sm:$0xf0]  ;;  %v6276_v39 = vor.u32 %v7819_v20, %v6275_v31 }
 0x151   : > { %3933 = vmatpush.bf16.msrb.mxu0 %v5700_v41  ;;  %v6531_v35 = vld [vmem:[%s8290_s19 + $0xac8] sm:$0xf]  ;;  %v7883_v36 = vld [vmem:[%s8290_s19 + $0xad4] sm:$0xf0]  ;;  %v6404_v40 = vor.u32 %v7851_v34, %v6403_v32 }
 0x152   : > { %3946 = vmatpush.bf16.msrb.mxu1 %v5828_v44  ;;  %v6659_v37 = vld [vmem:[%s8290_s19 + $0xbc8] sm:$0xf]  ;;  %v7915_v38 = vld [vmem:[%s8290_s19 + $0xbd4] sm:$0xf0]  ;;  %v6532_v41 = vor.u32 %v7883_v36, %v6531_v35 }
 0x153   : > { %3959 = vmatpush.bf16.msrb.mxu2 %v5956_v45  ;;  %v6259_v43 = vld [vmem:[%s8290_s19 + $0x8a8] sm:$0xf]  ;;  %v7815_v44 = vld [vmem:[%s8290_s19 + $0x8b4] sm:$0xf0]  ;;  %v6660_v47 = vor.u32 %v7915_v38, %v6659_v37 }
 0x154   : > { %3972 = vmatpush.bf16.msrb.mxu3 %v6084_v53  ;;  %v6387_v45 = vld [vmem:[%s8290_s19 + $0x9a8] sm:$0xf]  ;;  %v7847_v48 = vld [vmem:[%s8290_s19 + $0x9b4] sm:$0xf0]  ;;  %v6260_v55 = vor.u32 %v7815_v44, %v6259_v43 }
 0x155   : > { %3934 = vmatpush.bf16.msrb.mxu0 %v5684_v59  ;;  %v6515_v51 = vld [vmem:[%s8290_s19 + $0xaa8] sm:$0xf]  ;;  %v7879_v52 = vld [vmem:[%s8290_s19 + $0xab4] sm:$0xf0]  ;;  %v6388_v56 = vor.u32 %v7847_v48, %v6387_v45 }
 0x156   : > { %3947 = vmatpush.bf16.msrb.mxu1 %v5812_v63  ;;  %v6643_v53 = vld [vmem:[%s8290_s19 + $0xba8] sm:$0xf]  ;;  %v7911_v54 = vld [vmem:[%s8290_s19 + $0xbb4] sm:$0xf0]  ;;  %v6516_v57 = vor.u32 %v7879_v52, %v6515_v51 }
 0x157   : > { %3960 = vmatpush.bf16.msrb.mxu2 %v5940_v0  ;;  %v6243_v58 = vld [vmem:[%s8290_s19 + $0x888] sm:$0xf]  ;;  %v7811_v59 = vld [vmem:[%s8290_s19 + $0x894] sm:$0xf0]  ;;  %v6644_v62 = vor.u32 %v7911_v54, %v6643_v53 }
 0x158   : > { %3973 = vmatpush.bf16.msrb.mxu3 %v6068_v8  ;;  %v6371_v60 = vld [vmem:[%s8290_s19 + $0x988] sm:$0xf]  ;;  %v7843_v63 = vld [vmem:[%s8290_s19 + $0x994] sm:$0xf0]  ;;  %v6244_v7 = vor.u32 %v7811_v59, %v6243_v58 }
 0x159   : > { %3935 = vmatpush.bf16.msrb.mxu0 %v5668_v16  ;;  %v6499_v0 = vld [vmem:[%s8290_s19 + $0xa88] sm:$0xf]  ;;  %v7875_v4 = vld [vmem:[%s8290_s19 + $0xa94] sm:$0xf0]  ;;  %v3729_v8 = vpop.f32.mrf.mxu0  ;;  %v6372_v9 = vor.u32 %v7843_v63, %v6371_v60 }
 0x15a   : > { %3948 = vmatpush.bf16.msrb.mxu1 %v5796_v24  ;;  %v6627_v5 = vld [vmem:[%s8290_s19 + $0xb88] sm:$0xf]  ;;  %v7907_v6 = vld [vmem:[%s8290_s19 + $0xb94] sm:$0xf0]  ;;  %v6500_v10 = vor.u32 %v7875_v4, %v6499_v0  ;;  %v3730_v14 = vadd.f32 %v3729_v8, %v8966_v42  ;;  %v3742_v15 = vpop.f32.mrf.mxu1 }
 0x15b   : > { %3961 = vmatpush.bf16.msrb.mxu2 %v5924_v25  ;;  %v6227_v11 = vld [vmem:[%s8290_s19 + $0x868] sm:$0xf]  ;;  %v7807_v12 = vld [vmem:[%s8290_s19 + $0x874] sm:$0xf0]  ;;  %v6628_v16 = vor.u32 %v7907_v6, %v6627_v5 }
 0x15c   : > { %3974 = vmatpush.bf16.msrb.mxu3 %v6052_v46  ;;  %3936 = vmatmul.bf16.vlgmr.msrb.gmra.mxu0 %v8435_v1  ;;  %v6355_v13 = vld [vmem:[%s8290_s19 + $0x968] sm:$0xf]  ;;  %v7839_v17 = vld [vmem:[%s8290_s19 + $0x974] sm:$0xf0]  ;;  %v3743_v26 = vadd.f32 %v3742_v15, %v3730_v14  ;;  %v6228_v28 = vor.u32 %v7807_v12, %v6227_v11 }
 0x15d   : > { %3980 = vmatpush.bf16.msra.mxu0 %v6292_v49  ;;  %3949 = vmatmul.bf16.vlgmr.msrb.gmra.mxu1 %v8439_v3  ;;  %v6483_v18 = vld [vmem:[%s8290_s19 + $0xa68] sm:$0xf]  ;;  %v7871_v19 = vld [vmem:[%s8290_s19 + $0xa74] sm:$0xf0]  ;;  %v6356_v42 = vor.u32 %v7839_v17, %v6355_v13 }
 0x15e   : > { %3993 = vmatpush.bf16.msra.mxu1 %v6420_v29  ;;  %3962 = vmatmul.bf16.vlgmr.msrb.gmra.mxu2 %v8432_v61  ;;  %v6611_v24 = vld [vmem:[%s8290_s19 + $0xb68] sm:$0xf]  ;;  %v7903_v25 = vld [vmem:[%s8290_s19 + $0xb74] sm:$0xf0]  ;;  %v6484_v46 = vor.u32 %v7871_v19, %v6483_v18 }
 0x15f   : > { %4006 = vmatpush.bf16.msra.mxu2 %v6548_v30  ;;  %3975 = vmatmul.bf16.vlgmr.msrb.gmra.mxu3 %v8437_v2  ;;  %v6211_v49 = vld [vmem:[%s8290_s19 + $0x848] sm:$0xf]  ;;  %v7803_v29 = vld [vmem:[%s8290_s19 + $0x854] sm:$0xf0]  ;;  %v6612_v20 = vor.u32 %v7903_v25, %v6611_v24 }
 0x160   : > { %4019 = vmatpush.bf16.msra.mxu3 %v6676_v33  ;;  %v6339_v30 = vld [vmem:[%s8290_s19 + $0x948] sm:$0xf]  ;;  %v7835_v32 = vld [vmem:[%s8290_s19 + $0x954] sm:$0xf0] }
 0x161   : > { %3981 = vmatpush.bf16.msra.mxu0 %v6276_v39  ;;  %v3755_v31 = vpop.f32.mrf.mxu2  ;;  %v6467_v33 = vld [vmem:[%s8290_s19 + $0xa48] sm:$0xf]  ;;  %v7867_v34 = vld [vmem:[%s8290_s19 + $0xa54] sm:$0xf0]  ;;  %v6212_v39 = vor.u32 %v7803_v29, %v6211_v49  ;;  %v6340_v43 = vor.u32 %v7835_v32, %v6339_v30 }
 0x162   : > { %3994 = vmatpush.bf16.msra.mxu1 %v6404_v40  ;;  %v3756_v35 = vadd.f32 %v3755_v31, %v3743_v26  ;;  %v3768_v36 = vpop.f32.mrf.mxu3  ;;  %v6595_v37 = vld [vmem:[%s8290_s19 + $0xb48] sm:$0xf]  ;;  %v7899_v38 = vld [vmem:[%s8290_s19 + $0xb54] sm:$0xf0]  ;;  %v6468_v44 = vor.u32 %v7867_v34, %v6467_v33  ;;  %v3744_v51 = vpop.f32.mrf.mxu1 }
 0x163   : > { %4007 = vmatpush.bf16.msra.mxu2 %v6532_v41  ;;  %v3731_v41 = vpop.f32.mrf.mxu0  ;;  %v6195_v45 = vld [vmem:[%s8290_s19 + $0x828] sm:$0xf]  ;;  %v6596_v52 = vor.u32 %v7899_v38, %v6595_v37  ;;  %v7831_v53 = vld [vmem:[%s8290_s19 + $0x934] sm:$0xf0] }
 0x164   : > { %4020 = vmatpush.bf16.msra.mxu3 %v6660_v47  ;;  %v9037_v40 = vadd.f32 %v3768_v36, %v3756_v35  ;;  %v7799_v47 = vld [vmem:[%s8290_s19 + $0x834] sm:$0xf0]  ;;  %v6323_v48 = vld [vmem:[%s8290_s19 + $0x928] sm:$0xf] }
 0x165   : > { %3982 = vmatpush.bf16.msra.mxu0 %v6260_v55  ;;  %v6451_v54 = vld [vmem:[%s8290_s19 + $0xa28] sm:$0xf]  ;;  %v7863_v55 = vld [vmem:[%s8290_s19 + $0xa34] sm:$0xf0]  ;;  %v6196_v58 = vor.u32 %v7799_v47, %v6195_v45  ;;  %v8156_v45 = vld [vmem:[#allocation1] sm:$0xff] }
 0x166   : > { %3995 = vmatpush.bf16.msra.mxu1 %v6388_v56  ;;  %v6579_v56 = vld [vmem:[%s8290_s19 + $0xb28] sm:$0xf]  ;;  %v7795_v60 = vld [vmem:[%s8290_s19 + $0x814] sm:$0xf0]  ;;  %v6452_v63 = vor.u32 %v7863_v55, %v6451_v54 }
 0x167   : > { %4008 = vmatpush.bf16.msra.mxu2 %v6516_v57  ;;  %v7895_v57 = vld [vmem:[%s8290_s19 + $0xb34] sm:$0xf0]  ;;  %v6179_v59 = vld [vmem:[%s8290_s19 + $0x808] sm:$0xf] }
 0x168   : > { %4021 = vmatpush.bf16.msra.mxu3 %v6644_v62  ;;  %v6324_v62 = vor.u32 %v7831_v53, %v6323_v48  ;;  %v6307_v0 = vld [vmem:[%s8290_s19 + $0x908] sm:$0xf]  ;;  %v7827_v4 = vld [vmem:[%s8290_s19 + $0x914] sm:$0xf0]  ;;  %v6180_v15 = vor.u32 %v7795_v60, %v6179_v59 }
 0x169   : > { %3983 = vmatpush.bf16.msra.mxu0 %v6244_v7  ;;  %v6435_v5 = vld [vmem:[%s8290_s19 + $0xa08] sm:$0xf]  ;;  %v3757_v6 = vpop.f32.mrf.mxu2  ;;  %v6580_v7 = vor.u32 %v7895_v57, %v6579_v56  ;;  %v7859_v8 = vld [vmem:[%s8290_s19 + $0xa14] sm:$0xf0]  ;;  %v6308_v19 = vor.u32 %v7827_v4, %v6307_v0 }
 0x16a   : > { %3996 = vmatpush.bf16.msra.mxu1 %v6372_v9  ;;  %v6563_v9 = vld [vmem:[%s8290_s19 + $0xb08] sm:$0xf]  ;;  %v3770_v11 = vpop.f32.mrf.mxu3  ;;  %v7951_v13 = vld [vmem:[%s8290_s19 + $0xcf4] sm:$0xf0]  ;;  %v6436_v24 = vor.u32 %v7859_v8, %v6435_v5 }
 0x16b   : > { %4009 = vmatpush.bf16.msra.mxu2 %v6500_v10  ;;  %v7891_v10 = vld [vmem:[%s8290_s19 + $0xb14] sm:$0xf0]  ;;  %v6803_v12 = vld [vmem:[%s8290_s19 + $0xce8] sm:$0xf] }
 0x16c   : > { %4022 = vmatpush.bf16.msra.mxu3 %v6628_v16  ;;  %v6931_v14 = vld [vmem:[%s8290_s19 + $0xde8] sm:$0xf]  ;;  %v7983_v16 = vld [vmem:[%s8290_s19 + $0xdf4] sm:$0xf0] }
 0x16d   : > { %3984 = vmatpush.bf16.msra.mxu0 %v6228_v28  ;;  %v7059_v17 = vld [vmem:[%s8290_s19 + $0xee8] sm:$0xf]  ;;  %v8015_v18 = vld [vmem:[%s8290_s19 + $0xef4] sm:$0xf0]  ;;  %v6564_v28 = vor.u32 %v7891_v10, %v6563_v9 }
 0x16e   : > { %3997 = vmatpush.bf16.msra.mxu1 %v6356_v42  ;;  %v7187_v25 = vld [vmem:[%s8290_s19 + $0xfe8] sm:$0xf]  ;;  %v8047_v26 = vld [vmem:[%s8290_s19 + $0xff4] sm:$0xf0]  ;;  %v6804_v42 = vor.u32 %v7951_v13, %v6803_v12  ;;  %v7060_v49 = vor.u32 %v8015_v18, %v7059_v17 }
 0x16f   : > { %4010 = vmatpush.bf16.msra.mxu2 %v6484_v46  ;;  %v6932_v46 = vor.u32 %v7983_v16, %v6931_v14  ;;  %v6787_v29 = vld [vmem:[%s8290_s19 + $0xcc8] sm:$0xf]  ;;  %v7947_v30 = vld [vmem:[%s8290_s19 + $0xcd4] sm:$0xf0] }
 0x170   : > { %4023 = vmatpush.bf16.msra.mxu3 %v6612_v20  ;;  %v6915_v31 = vld [vmem:[%s8290_s19 + $0xdc8] sm:$0xf]  ;;  %v7188_v20 = vor.u32 %v8047_v26, %v7187_v25  ;;  %v7979_v32 = vld [vmem:[%s8290_s19 + $0xdd4] sm:$0xf0]  ;;  %v6788_v37 = vor.u32 %v7947_v30, %v6787_v29 }
 0x171   : > { %3985 = vmatpush.bf16.msra.mxu0 %v6212_v39  ;;  %v7043_v33 = vld [vmem:[%s8290_s19 + $0xec8] sm:$0xf]  ;;  %v8011_v34 = vld [vmem:[%s8290_s19 + $0xed4] sm:$0xf0]  ;;  %v6916_v38 = vor.u32 %v7979_v32, %v6915_v31 }
 0x172   : > { %3998 = vmatpush.bf16.msra.mxu1 %v6340_v43  ;;  %v7171_v35 = vld [vmem:[%s8290_s19 + $0xfc8] sm:$0xf]  ;;  %v8043_v36 = vld [vmem:[%s8290_s19 + $0xfd4] sm:$0xf0]  ;;  %v7044_v39 = vor.u32 %v8011_v34, %v7043_v33 }
 0x173   : > { %4011 = vmatpush.bf16.msra.mxu2 %v6468_v44  ;;  %v6771_v41 = vld [vmem:[%s8290_s19 + $0xca8] sm:$0xf]  ;;  %v7943_v43 = vld [vmem:[%s8290_s19 + $0xcb4] sm:$0xf0]  ;;  %v7172_v47 = vor.u32 %v8043_v36, %v7171_v35 }
 0x174   : > { %4024 = vmatpush.bf16.msra.mxu3 %v6596_v52  ;;  %v6899_v44 = vld [vmem:[%s8290_s19 + $0xda8] sm:$0xf]  ;;  %v7975_v48 = vld [vmem:[%s8290_s19 + $0xdb4] sm:$0xf0] }
 0x175   : > { %3986 = vmatpush.bf16.msra.mxu0 %v6196_v58  ;;  %v7027_v51 = vld [vmem:[%s8290_s19 + $0xea8] sm:$0xf]  ;;  %v8007_v52 = vld [vmem:[%s8290_s19 + $0xeb4] sm:$0xf0]  ;;  %v6772_v58 = vor.u32 %v7943_v43, %v6771_v41  ;;  %v6900_v59 = vor.u32 %v7975_v48, %v6899_v44 }
 0x176   : > { %3999 = vmatpush.bf16.msra.mxu1 %v6324_v62  ;;  %v8157_v53 = vld [vmem:[#allocation1 + $0x12] sm:$0xff]  ;;  %v8158_v54 = vld [vmem:[#allocation1 + $0x9] sm:$0xff]  ;;  %v8159_v57 = vld [vmem:[#allocation1 + $0x1b] sm:$0xff]  ;;  %v7028_v60 = vor.u32 %v8007_v52, %v7027_v51 }
 0x177   : > { %4012 = vmatpush.bf16.msra.mxu2 %v6452_v63  ;;  %v7155_v55 = vld [vmem:[%s8290_s19 + $0xfa8] sm:$0xf]  ;;  %v8039_v56 = vld [vmem:[%s8290_s19 + $0xfb4] sm:$0xf0] }
 0x178   : > { %4025 = vmatpush.bf16.msra.mxu3 %v6580_v7  ;;  %v6755_v62 = vld [vmem:[%s8290_s19 + $0xc88] sm:$0xf]  ;;  %v7939_v63 = vld [vmem:[%s8290_s19 + $0xc94] sm:$0xf0]  ;;  %v7156_v4 = vor.u32 %v8039_v56, %v7155_v55 }
 0x179   : > { %3987 = vmatpush.bf16.msra.mxu0 %v6180_v15  ;;  %v6883_v0 = vld [vmem:[%s8290_s19 + $0xd88] sm:$0xf]  ;;  %v7971_v5 = vld [vmem:[%s8290_s19 + $0xd94] sm:$0xf0]  ;;  %v3781_v8 = vpop.f32.mrf.mxu0  ;;  %v6756_v12 = vor.u32 %v7939_v63, %v6755_v62 }
 0x17a   : > { %4000 = vmatpush.bf16.msra.mxu1 %v6308_v19  ;;  %v7011_v6 = vld [vmem:[%s8290_s19 + $0xe88] sm:$0xf]  ;;  %v8003_v7 = vld [vmem:[%s8290_s19 + $0xe94] sm:$0xf0]  ;;  %v3782_v11 = vadd.f32 %v3781_v8, %v9037_v40  ;;  %v3794_v13 = vpop.f32.mrf.mxu1  ;;  %v6884_v14 = vor.u32 %v7971_v5, %v6883_v0 }
 0x17b   : > { %4013 = vmatpush.bf16.msra.mxu2 %v6436_v24  ;;  %v7139_v9 = vld [vmem:[%s8290_s19 + $0xf88] sm:$0xf]  ;;  %v8035_v10 = vld [vmem:[%s8290_s19 + $0xf94] sm:$0xf0]  ;;  %v7012_v15 = vor.u32 %v8003_v7, %v7011_v6 }
 0x17c   : > { %4026 = vmatpush.bf16.msra.mxu3 %v6564_v28  ;;  %3988 = vmatmul.bf16.vlgmr.msra.gmra.mxu0 %v8156_v45  ;;  %v6739_v16 = vld [vmem:[%s8290_s19 + $0xc68] sm:$0xf]  ;;  %v7935_v17 = vld [vmem:[%s8290_s19 + $0xc74] sm:$0xf0]  ;;  %v7140_v19 = vor.u32 %v8035_v10, %v7139_v9  ;;  %v3795_v24 = vadd.f32 %v3794_v13, %v3782_v11 }
 0x17d   : > { %4032 = vmatpush.bf16.msrb.mxu0 %v6804_v42  ;;  %4001 = vmatmul.bf16.vlgmr.msra.gmra.mxu1 %v8158_v54  ;;  %v6867_v18 = vld [vmem:[%s8290_s19 + $0xd68] sm:$0xf]  ;;  %v7967_v25 = vld [vmem:[%s8290_s19 + $0xd74] sm:$0xf0] }
 0x17e   : > { %4045 = vmatpush.bf16.msrb.mxu1 %v6932_v46  ;;  %4014 = vmatmul.bf16.vlgmr.msra.gmra.mxu2 %v8157_v53  ;;  %v6995_v26 = vld [vmem:[%s8290_s19 + $0xe68] sm:$0xf]  ;;  %v7999_v40 = vld [vmem:[%s8290_s19 + $0xe74] sm:$0xf0]  ;;  %v6740_v46 = vor.u32 %v7935_v17, %v6739_v16  ;;  %v7597_v16 = vld [vmem:[%s8290_s19 + $0x1ec] sm:$0xf] }
 0x17f   : > { %4058 = vmatpush.bf16.msrb.mxu2 %v7060_v49  ;;  %4027 = vmatmul.bf16.vlgmr.msra.gmra.mxu3 %v8159_v57  ;;  %v7123_v28 = vld [vmem:[%s8290_s19 + $0xf68] sm:$0xf]  ;;  %v8031_v42 = vld [vmem:[%s8290_s19 + $0xf74] sm:$0xf0]  ;;  %v6868_v49 = vor.u32 %v7967_v25, %v6867_v18  ;;  %v6996_v29 = vor.u32 %v7999_v40, %v6995_v26  ;;  %v5525_v25 = vld [vmem:[%s8290_s19 + $0x2f8] sm:$0xf0] }
 0x180   : > { %4071 = vmatpush.bf16.msrb.mxu3 %v7188_v20  ;;  %v6723_v30 = vld [vmem:[%s8290_s19 + $0xc48] sm:$0xf]  ;;  %v7931_v31 = vld [vmem:[%s8290_s19 + $0xc54] sm:$0xf0]  ;;  %v7124_v32 = vor.u32 %v8031_v42, %v7123_v28  ;;  %v7661_v28 = vld [vmem:[%s8290_s19 + $0x3ec] sm:$0xf] }
 0x181   : > { %4033 = vmatpush.bf16.msrb.mxu0 %v6788_v37  ;;  %v6851_v20 = vld [vmem:[%s8290_s19 + $0xd48] sm:$0xf]  ;;  %v3807_v33 = vpop.f32.mrf.mxu2  ;;  %v7963_v34 = vld [vmem:[%s8290_s19 + $0xd54] sm:$0xf0]  ;;  %v3783_v43 = vpop.f32.mrf.mxu0  ;;  %v6724_v44 = vor.u32 %v7931_v31, %v6723_v30  ;;  %v5653_v42 = vld [vmem:[%s8290_s19 + $0x3f8] sm:$0xf0] }
 0x182   : > { %4046 = vmatpush.bf16.msrb.mxu1 %v6916_v38  ;;  %v6979_v35 = vld [vmem:[%s8290_s19 + $0xe48] sm:$0xf]  ;;  %v7995_v36 = vld [vmem:[%s8290_s19 + $0xe54] sm:$0xf0]  ;;  %v3808_v37 = vadd.f32 %v3807_v33, %v3795_v24  ;;  %v3820_v38 = vpop.f32.mrf.mxu3  ;;  %v3796_v45 = vpop.f32.mrf.mxu1  ;;  %v6852_v48 = vor.u32 %v7963_v34, %v6851_v20  ;;  %v7629_v24 = vld [vmem:[%s8290_s19 + $0x2ec] sm:$0xf]  ;;  %v5656_v33 = vor.u32 %v7661_v28, %v5653_v42 }
 0x183   : > { %4059 = vmatpush.bf16.msrb.mxu2 %v7044_v39  ;;  %v7107_v39 = vld [vmem:[%s8290_s19 + $0xf48] sm:$0xf]  ;;  %v8027_v41 = vld [vmem:[%s8290_s19 + $0xf54] sm:$0xf0]  ;;  %v6980_v51 = vor.u32 %v7995_v36, %v6979_v35  ;;  %v5528_v30 = vor.u32 %v7629_v24, %v5525_v25  ;;  %v7561_v31 = vld [vmem:[%s8290_s19 + $0xcc] sm:$0xf] }
 0x184   : > { %4072 = vmatpush.bf16.msrb.mxu3 %v7172_v47  ;;  %v9104_v47 = vadd.f32 %v3820_v38, %v3808_v37  ;;  %v6707_v52 = vld [vmem:[%s8290_s19 + $0xc28] sm:$0xf]  ;;  %v7927_v53 = vld [vmem:[%s8290_s19 + $0xc34] sm:$0xf0]  ;;  %v7108_v55 = vor.u32 %v8027_v41, %v7107_v39  ;;  %v5253_v20 = vld [vmem:[%s8290_s19 + $0xd8] sm:$0xf0] }
 0x185   : > { %4034 = vmatpush.bf16.msrb.mxu0 %v6772_v58  ;;  %v6835_v54 = vld [vmem:[%s8290_s19 + $0xd28] sm:$0xf]  ;;  %v7959_v56 = vld [vmem:[%s8290_s19 + $0xd34] sm:$0xf0]  ;;  %v6708_v62 = vor.u32 %v7927_v53, %v6707_v52  ;;  %v5381_v34 = vld [vmem:[%s8290_s19 + $0x1d8] sm:$0xf0]  ;;  %v5256_v39 = vor.u32 %v7561_v31, %v5253_v20 }
 0x186   : > { %4047 = vmatpush.bf16.msrb.mxu1 %v6900_v59  ;;  %v6963_v57 = vld [vmem:[%s8290_s19 + $0xe28] sm:$0xf]  ;;  %v7991_v58 = vld [vmem:[%s8290_s19 + $0xe34] sm:$0xf0]  ;;  %v7625_v35 = vld [vmem:[%s8290_s19 + $0x2cc] sm:$0xf] }
 0x187   : > { %4060 = vmatpush.bf16.msrb.mxu2 %v7028_v60  ;;  %v7091_v59 = vld [vmem:[%s8290_s19 + $0xf28] sm:$0xf]  ;;  %v8023_v60 = vld [vmem:[%s8290_s19 + $0xf34] sm:$0xf0]  ;;  %v6964_v5 = vor.u32 %v7991_v58, %v6963_v57  ;;  %v5509_v36 = vld [vmem:[%s8290_s19 + $0x2d8] sm:$0xf0] }
 0x188   : > { %4073 = vmatpush.bf16.msrb.mxu3 %v7156_v4  ;;  %v6691_v63 = vld [vmem:[%s8290_s19 + $0xc08] sm:$0xf]  ;;  %v7923_v0 = vld [vmem:[%s8290_s19 + $0xc14] sm:$0xf0]  ;;  %v6836_v4 = vor.u32 %v7959_v56, %v6835_v54  ;;  %v7092_v9 = vor.u32 %v8023_v60, %v7091_v59  ;;  %v7657_v37 = vld [vmem:[%s8290_s19 + $0x3cc] sm:$0xf]  ;;  %v5512_v43 = vor.u32 %v7625_v35, %v5509_v36 }
 0x189   : > { %4035 = vmatpush.bf16.msrb.mxu0 %v6756_v12  ;;  %v6819_v6 = vld [vmem:[%s8290_s19 + $0xd08] sm:$0xf]  ;;  %v7955_v7 = vld [vmem:[%s8290_s19 + $0xd14] sm:$0xf0]  ;;  %v3809_v13 = vpop.f32.mrf.mxu2  ;;  %v6692_v18 = vor.u32 %v7923_v0, %v6691_v63  ;;  %v5637_v38 = vld [vmem:[%s8290_s19 + $0x3d8] sm:$0xf0] }
 0x18a   : > { %4048 = vmatpush.bf16.msrb.mxu1 %v6884_v14  ;;  %v6947_v8 = vld [vmem:[%s8290_s19 + $0xe08] sm:$0xf]  ;;  %v7987_v10 = vld [vmem:[%s8290_s19 + $0xe14] sm:$0xf0]  ;;  %v7565_v14 = vld [vmem:[%s8290_s19 + $0xec] sm:$0xf]  ;;  %v3822_v17 = vpop.f32.mrf.mxu3  ;;  %v6820_v26 = vor.u32 %v7955_v7, %v6819_v6  ;;  %v5640_v52 = vor.u32 %v7657_v37, %v5637_v38 }
 0x18b   : > { %4061 = vmatpush.bf16.msrb.mxu2 %v7012_v15  ;;  %v7075_v11 = vld [vmem:[%s8290_s19 + $0xf08] sm:$0xf]  ;;  %v8019_v12 = vld [vmem:[%s8290_s19 + $0xf14] sm:$0xf0]  ;;  %v5269_v15 = vld [vmem:[%s8290_s19 + $0xf8] sm:$0xf0]  ;;  %v6948_v40 = vor.u32 %v7987_v10, %v6947_v8 }
 0x18c   : > { %4074 = vmatpush.bf16.msrb.mxu3 %v7140_v19  ;;  %v5397_v19 = vld [vmem:[%s8290_s19 + $0x1f8] sm:$0xf0]  ;;  %v7621_v54 = vld [vmem:[%s8290_s19 + $0x2ac] sm:$0xf] }
 0x18d   : > { %4036 = vmatpush.bf16.msrb.mxu0 %v6740_v46  ;;  %v7076_v46 = vor.u32 %v8019_v12, %v7075_v11  ;;  %v5237_v45 = vld [vmem:[%s8290_s19 + $0xb8] sm:$0xf0]  ;;  %v8162_v57 = vld [vmem:[#allocation1 + $0x2d] sm:$0xff] }
 0x18e   : > { %4049 = vmatpush.bf16.msrb.mxu1 %v6868_v49  ;;  %v5272_v49 = vor.u32 %v7565_v14, %v5269_v15  ;;  %v5365_v53 = vld [vmem:[%s8290_s19 + $0x1b8] sm:$0xf0]  ;;  %v7653_v58 = vld [vmem:[%s8290_s19 + $0x3ac] sm:$0xf] }
 0x18f   : > { %4062 = vmatpush.bf16.msrb.mxu2 %v6996_v29  ;;  %v5400_v29 = vor.u32 %v7597_v16, %v5397_v19  ;;  %v8161_v56 = vld [vmem:[#allocation1 + $0x36] sm:$0xff]  ;;  %v8163_v60 = vld [vmem:[#allocation1 + $0x3f] sm:$0xff]  ;;  %v7585_v6 = vld [vmem:[%s8290_s19 + $0x18c] sm:$0xf] }
 0x190   : > { %4075 = vmatpush.bf16.msrb.mxu3 %v7124_v32  ;;  %v7593_v32 = vld [vmem:[%s8290_s19 + $0x1cc] sm:$0xf]  ;;  %v5621_v59 = vld [vmem:[%s8290_s19 + $0x3b8] sm:$0xf0] }
 0x191   : > { %4037 = vmatpush.bf16.msrb.mxu0 %v6724_v44  ;;  %v5384_v41 = vor.u32 %v7593_v32, %v5381_v34  ;;  %v7557_v44 = vld [vmem:[%s8290_s19 + $0xac] sm:$0xf]  ;;  %v5624_v7 = vor.u32 %v7653_v58, %v5621_v59  ;;  %v5349_v8 = vld [vmem:[%s8290_s19 + $0x198] sm:$0xf0] }
 0x192   : > { %4050 = vmatpush.bf16.msrb.mxu1 %v6852_v48  ;;  %v7589_v48 = vld [vmem:[%s8290_s19 + $0x1ac] sm:$0xf]  ;;  %v5477_v10 = vld [vmem:[%s8290_s19 + $0x298] sm:$0xf0]  ;;  %v5352_v17 = vor.u32 %v7585_v6, %v5349_v8 }
 0x193   : > { %4063 = vmatpush.bf16.msrb.mxu2 %v6980_v51  ;;  %v8160_v51 = vld [vmem:[#allocation1 + $0x24] sm:$0xff]  ;;  %v5368_v63 = vor.u32 %v7589_v48, %v5365_v53  ;;  %v7649_v12 = vld [vmem:[%s8290_s19 + $0x38c] sm:$0xf]  ;;  %v5605_v13 = vld [vmem:[%s8290_s19 + $0x398] sm:$0xf0] }
 0x194   : > { %4076 = vmatpush.bf16.msrb.mxu3 %v7108_v55  ;;  %v5493_v55 = vld [vmem:[%s8290_s19 + $0x2b8] sm:$0xf0]  ;;  %v7549_v19 = vld [vmem:[%s8290_s19 + $0x6c] sm:$0xf] }
 0x195   : > { %4038 = vmatpush.bf16.msrb.mxu0 %v6708_v62  ;;  %v5240_v62 = vor.u32 %v7557_v44, %v5237_v45  ;;  %v5496_v0 = vor.u32 %v7621_v54, %v5493_v55  ;;  %v5205_v24 = vld [vmem:[%s8290_s19 + $0x78] sm:$0xf0]  ;;  %v7581_v25 = vld [vmem:[%s8290_s19 + $0x16c] sm:$0xf] }
 0x196   : > { %4051 = vmatpush.bf16.msrb.mxu1 %v6836_v4  ;;  %v7553_v4 = vld [vmem:[%s8290_s19 + $0x8c] sm:$0xf]  ;;  %v5333_v28 = vld [vmem:[%s8290_s19 + $0x178] sm:$0xf0] }
 0x197   : > { %4064 = vmatpush.bf16.msrb.mxu2 %v6964_v5  ;;  %v5221_v5 = vld [vmem:[%s8290_s19 + $0x98] sm:$0xf0]  ;;  %v7613_v42 = vld [vmem:[%s8290_s19 + $0x26c] sm:$0xf] }
 0x198   : > { %4077 = vmatpush.bf16.msrb.mxu3 %v7092_v9  ;;  %v7617_v9 = vld [vmem:[%s8290_s19 + $0x28c] sm:$0xf]  ;;  %v5224_v15 = vor.u32 %v7553_v4, %v5221_v5  ;;  %v5189_v32 = vld [vmem:[%s8290_s19 + $0x58] sm:$0xf0] }
 0x199   : > { %4039 = vmatpush.bf16.msrb.mxu0 %v6692_v18  ;;  %v3833_v11 = vpop.f32.mrf.mxu0  ;;  %v5480_v18 = vor.u32 %v7617_v9, %v5477_v10  ;;  %v7545_v20 = vld [vmem:[%s8290_s19 + $0x4c] sm:$0xf]  ;;  %v5317_v36 = vld [vmem:[%s8290_s19 + $0x158] sm:$0xf0] }
 0x19a   : > { %4052 = vmatpush.bf16.msrb.mxu1 %v6820_v26  ;;  %v3834_v14 = vadd.f32 %v3833_v11, %v9104_v47  ;;  %v3846_v16 = vpop.f32.mrf.mxu1  ;;  %v5608_v26 = vor.u32 %v7649_v12, %v5605_v13  ;;  %v5461_v47 = vld [vmem:[%s8290_s19 + $0x278] sm:$0xf0]  ;;  %v7609_v37 = vld [vmem:[%s8290_s19 + $0x24c] sm:$0xf]  ;;  %v5192_v48 = vor.u32 %v7545_v20, %v5189_v32 }
 0x19b   : > { %4065 = vmatpush.bf16.msrb.mxu2 %v6948_v40  ;;  %v5464_v31 = vor.u32 %v7613_v42, %v5461_v47  ;;  %v5445_v38 = vld [vmem:[%s8290_s19 + $0x258] sm:$0xf0]  ;;  %v7541_v55 = vld [vmem:[%s8290_s19 + $0x2c] sm:$0xf] }
 0x19c   : > { %4078 = vmatpush.bf16.msrb.mxu3 %v7076_v46  ;;  %4040 = vmatmul.bf16.vlgmr.msrb.gmra.mxu0 %v8160_v51  ;;  %v3847_v40 = vadd.f32 %v3846_v16, %v3834_v14  ;;  %v7645_v46 = vld [vmem:[%s8290_s19 + $0x36c] sm:$0xf]  ;;  %v5573_v44 = vld [vmem:[%s8290_s19 + $0x358] sm:$0xf0]  ;;  %v5448_v54 = vor.u32 %v7609_v37, %v5445_v38 }
 0x19d   : > { %4084 = vmatpush.bf16.msra.mxu0 %v5272_v49  ;;  %4053 = vmatmul.bf16.vlgmr.msrb.gmra.mxu1 %v8162_v57  ;;  %v5589_v49 = vld [vmem:[%s8290_s19 + $0x378] sm:$0xf0]  ;;  %v7573_v57 = vld [vmem:[%s8290_s19 + $0x12c] sm:$0xf] }
 0x19e   : > { %4097 = vmatpush.bf16.msra.mxu1 %v5400_v29  ;;  %4066 = vmatmul.bf16.vlgmr.msrb.gmra.mxu2 %v8161_v56  ;;  %v5208_v29 = vor.u32 %v7549_v19, %v5205_v24  ;;  %v5592_v34 = vor.u32 %v7645_v46, %v5589_v49  ;;  %v5173_v56 = vld [vmem:[%s8290_s19 + $0x38] sm:$0xf0]  ;;  %v7537_v6 = vld [vmem:[%s8290_s19 + $0xc] sm:$0xf] }
 0x19f   : > { %4110 = vmatpush.bf16.msra.mxu2 %v5528_v30  ;;  %4079 = vmatmul.bf16.vlgmr.msrb.gmra.mxu3 %v8163_v60  ;;  %v5336_v30 = vor.u32 %v7581_v25, %v5333_v28  ;;  %v5301_v59 = vld [vmem:[%s8290_s19 + $0x138] sm:$0xf0]  ;;  %v7605_v60 = vld [vmem:[%s8290_s19 + $0x22c] sm:$0xf]  ;;  %v5176_v5 = vor.u32 %v7541_v55, %v5173_v56 }
 0x1a0   : > { %4123 = vmatpush.bf16.msra.mxu3 %v5656_v33  ;;  %v7577_v33 = vld [vmem:[%s8290_s19 + $0x14c] sm:$0xf]  ;;  %v5557_v4 = vld [vmem:[%s8290_s19 + $0x338] sm:$0xf0]  ;;  %v5304_v9 = vor.u32 %v7573_v57, %v5301_v59 }
 0x1a1   : > { %4085 = vmatpush.bf16.msra.mxu0 %v5256_v39  ;;  %v3859_v35 = vpop.f32.mrf.mxu2  ;;  %v3835_v45 = vpop.f32.mrf.mxu0  ;;  %v5320_v53 = vor.u32 %v7577_v33, %v5317_v36  ;;  %v7569_v11 = vld [vmem:[%s8290_s19 + $0x10c] sm:$0xf]  ;;  %v5285_v12 = vld [vmem:[%s8290_s19 + $0x118] sm:$0xf0] }
 0x1a2   : > { %4098 = vmatpush.bf16.msra.mxu1 %v5384_v41  ;;  %v3860_v39 = vadd.f32 %v3859_v35, %v3847_v40  ;;  %v3872_v41 = vpop.f32.mrf.mxu3  ;;  %v3848_v51 = vpop.f32.mrf.mxu1  ;;  %v7601_v13 = vld [vmem:[%s8290_s19 + $0x20c] sm:$0xf]  ;;  %v5781_v19 = vld [vmem:[%s8290_s19 + $0x4f8] sm:$0xf0]  ;;  %v5288_v47 = vor.u32 %v7569_v11, %v5285_v12 }
 0x1a3   : > { %4111 = vmatpush.bf16.msra.mxu2 %v5512_v43  ;;  %v7641_v43 = vld [vmem:[%s8290_s19 + $0x34c] sm:$0xf]  ;;  %v5909_v40 = vld [vmem:[%s8290_s19 + $0x5f8] sm:$0xf0] }
 0x1a4   : > { %4124 = vmatpush.bf16.msra.mxu3 %v5640_v52  ;;  %v3873_v52 = vadd.f32 %v3872_v41, %v3860_v39  ;;  %v5576_v58 = vor.u32 %v7641_v43, %v5573_v44  ;;  %v7633_v16 = vld [vmem:[%s8290_s19 + $0x30c] sm:$0xf]  ;;  %v6037_v42 = vld [vmem:[%s8290_s19 + $0x6f8] sm:$0xf0] }
 0x1a5   : > { %4086 = vmatpush.bf16.msra.mxu0 %v5240_v62  ;;  %v5429_v62 = vld [vmem:[%s8290_s19 + $0x238] sm:$0xf0]  ;;  %v7725_v24 = vld [vmem:[%s8290_s19 + $0x5ec] sm:$0xf] }
 0x1a6   : > { %4099 = vmatpush.bf16.msra.mxu1 %v5368_v63  ;;  %v4296_v63 = vrot.slane %v3873_v52, 6  ;;  %v5432_v10 = vor.u32 %v7605_v60, %v5429_v62  ;;  %v7757_v28 = vld [vmem:[%s8290_s19 + $0x6ec] sm:$0xf]  ;;  %v5912_v20 = vor.u32 %v7725_v24, %v5909_v40  ;;  %v5893_v37 = vld [vmem:[%s8290_s19 + $0x5d8] sm:$0xf0] }
 0x1a7   : > { %4112 = vmatpush.bf16.msra.mxu2 %v5496_v0  ;;  %v7637_v0 = vld [vmem:[%s8290_s19 + $0x32c] sm:$0xf]  ;;  %v6040_v32 = vor.u32 %v7757_v28, %v6037_v42  ;;  %v6021_v39 = vld [vmem:[%s8290_s19 + $0x6d8] sm:$0xf0] }
 0x1a8   : > { %4125 = vmatpush.bf16.msra.mxu3 %v5624_v7  ;;  %v5157_v7 = vld [vmem:[%s8290_s19 + $0x18] sm:$0xf0]  ;;  %v9183_v8 = vsel %vm4299_vm0, %v8896_v50, %v4296_v63  ;;  %v5560_v14 = vor.u32 %v7637_v0, %v5557_v4  ;;  %v7789_v49 = vld [vmem:[%s8290_s19 + $0x7ec] sm:$0xf] }
 0x1a9   : > { %4087 = vmatpush.bf16.msra.mxu0 %v5224_v15  ;;  %v5413_v15 = vld [vmem:[%s8290_s19 + $0x218] sm:$0xf0]  ;;  %v3861_v50 = vpop.f32.mrf.mxu2  ;;  %v7689_v33 = vld [vmem:[%s8290_s19 + $0x4cc] sm:$0xf] }
 0x1aa   : > { %4100 = vmatpush.bf16.msra.mxu1 %v5352_v17  ;;  %v5541_v17 = vld [vmem:[%s8290_s19 + $0x318] sm:$0xf0]  ;;  %v3874_v25 = vpop.f32.mrf.mxu3  ;;  %v5416_v46 = vor.u32 %v7601_v13, %v5413_v15  ;;  %v7721_v35 = vld [vmem:[%s8290_s19 + $0x5cc] sm:$0xf] }
 0x1ab   : > { %4113 = vmatpush.bf16.msra.mxu2 %v5480_v18  ;;  %v7693_v18 = vld [vmem:[%s8290_s19 + $0x4ec] sm:$0xf]  ;;  %v6149_v43 = vld [vmem:[%s8290_s19 + $0x7d8] sm:$0xf0]  ;;  %v5896_v45 = vor.u32 %v7721_v35, %v5893_v37 }
 0x1ac   : > { %4126 = vmatpush.bf16.msra.mxu3 %v5608_v26  ;;  %v5160_v26 = vor.u32 %v7537_v6, %v5157_v7  ;;  %v7753_v38 = vld [vmem:[%s8290_s19 + $0x6cc] sm:$0xf]  ;;  %v5749_v52 = vld [vmem:[%s8290_s19 + $0x4b8] sm:$0xf0] }
 0x1ad   : > { %4088 = vmatpush.bf16.msra.mxu0 %v5208_v29  ;;  %v6165_v29 = vld [vmem:[%s8290_s19 + $0x7f8] sm:$0xf0]  ;;  %v7785_v41 = vld [vmem:[%s8290_s19 + $0x7cc] sm:$0xf] }
 0x1ae   : > { %4101 = vmatpush.bf16.msra.mxu1 %v5336_v30  ;;  %v5544_v30 = vor.u32 %v7633_v16, %v5541_v17  ;;  %v6168_v36 = vor.u32 %v7789_v49, %v6165_v29  ;;  %v7685_v51 = vld [vmem:[%s8290_s19 + $0x4ac] sm:$0xf]  ;;  %v5877_v55 = vld [vmem:[%s8290_s19 + $0x5b8] sm:$0xf0] }
 0x1af   : > { %4114 = vmatpush.bf16.msra.mxu2 %v5464_v31  ;;  %v5784_v31 = vor.u32 %v7693_v18, %v5781_v19  ;;  %v7749_v56 = vld [vmem:[%s8290_s19 + $0x6ac] sm:$0xf]  ;;  %v6005_v57 = vld [vmem:[%s8290_s19 + $0x6b8] sm:$0xf0]  ;;  %v5752_v60 = vor.u32 %v7685_v51, %v5749_v52 }
 0x1b0   : > { %4127 = vmatpush.bf16.msra.mxu3 %v5592_v34  ;;  %v5765_v34 = vld [vmem:[%s8290_s19 + $0x4d8] sm:$0xf0]  ;;  %v6008_v63 = vor.u32 %v7749_v56, %v6005_v57  ;;  %v7713_v4 = vld [vmem:[%s8290_s19 + $0x58c] sm:$0xf] }
 0x1b1   : > { %4089 = vmatpush.bf16.msra.mxu0 %v5192_v48  ;;  %v5768_v44 = vor.u32 %v7689_v33, %v5765_v34  ;;  %v6024_v48 = vor.u32 %v7753_v38, %v6021_v39  ;;  %v6133_v59 = vld [vmem:[%s8290_s19 + $0x7b8] sm:$0xf0]  ;;  %v7777_v7 = vld [vmem:[%s8290_s19 + $0x78c] sm:$0xf] }
 0x1b2   : > { %4102 = vmatpush.bf16.msra.mxu1 %v5320_v53  ;;  %v7717_v53 = vld [vmem:[%s8290_s19 + $0x5ac] sm:$0xf]  ;;  %v5733_v0 = vld [vmem:[%s8290_s19 + $0x498] sm:$0xf0] }
 0x1b3   : > { %4115 = vmatpush.bf16.msra.mxu2 %v5448_v54  ;;  %v6152_v54 = vor.u32 %v7785_v41, %v6149_v43  ;;  %v5880_v62 = vor.u32 %v7717_v53, %v5877_v55  ;;  %v5989_v6 = vld [vmem:[%s8290_s19 + $0x698] sm:$0xf0]  ;;  %v7677_v13 = vld [vmem:[%s8290_s19 + $0x46c] sm:$0xf] }
 0x1b4   : > { %4128 = vmatpush.bf16.msra.mxu3 %v5576_v58  ;;  %v7781_v58 = vld [vmem:[%s8290_s19 + $0x7ac] sm:$0xf]  ;;  %v5845_v50 = vld [vmem:[%s8290_s19 + $0x578] sm:$0xf0] }
 0x1b5   : > { %4090 = vmatpush.bf16.msra.mxu0 %v5176_v5  ;;  %v5861_v5 = vld [vmem:[%s8290_s19 + $0x598] sm:$0xf0]  ;;  %v7709_v15 = vld [vmem:[%s8290_s19 + $0x56c] sm:$0xf] }
 0x1b6   : > { %4103 = vmatpush.bf16.msra.mxu1 %v5304_v9  ;;  %v6117_v9 = vld [vmem:[%s8290_s19 + $0x798] sm:$0xf0]  ;;  %v5864_v11 = vor.u32 %v7713_v4, %v5861_v5  ;;  %v7741_v18 = vld [vmem:[%s8290_s19 + $0x66c] sm:$0xf]  ;;  %v5848_v28 = vor.u32 %v7709_v15, %v5845_v50 }
 0x1b7   : > { %4116 = vmatpush.bf16.msra.mxu2 %v5432_v10  ;;  %v6120_v17 = vor.u32 %v7777_v7, %v6117_v9  ;;  %v5973_v19 = vld [vmem:[%s8290_s19 + $0x678] sm:$0xf0]  ;;  %v7773_v25 = vld [vmem:[%s8290_s19 + $0x76c] sm:$0xf] }
 0x1b8   : > { %4129 = vmatpush.bf16.msra.mxu3 %v5560_v14  ;;  %v5717_v14 = vld [vmem:[%s8290_s19 + $0x478] sm:$0xf0]  ;;  %v5976_v42 = vor.u32 %v7741_v18, %v5973_v19  ;;  %v7705_v49 = vld [vmem:[%s8290_s19 + $0x54c] sm:$0xf] }
 0x1b9   : > { %4091 = vmatpush.bf16.msra.mxu0 %v5160_v26  ;;  %v3885_v10 = vpop.f32.mrf.mxu0  ;;  %v6101_v26 = vld [vmem:[%s8290_s19 + $0x778] sm:$0xf0]  ;;  %v5720_v40 = vor.u32 %v7677_v13, %v5717_v14  ;;  %v7769_v35 = vld [vmem:[%s8290_s19 + $0x74c] sm:$0xf] }
 0x1ba   : > { %4104 = vmatpush.bf16.msra.mxu1 %v5288_v47  ;;  %v3898_v16 = vpop.f32.mrf.mxu1  ;;  %v7673_v47 = vld [vmem:[%s8290_s19 + $0x44c] sm:$0xf]  ;;  %v5813_v53 = vld [vmem:[%s8290_s19 + $0x538] sm:$0xf0] }
 0x1bb   : > { %4117 = vmatpush.bf16.msra.mxu2 %v5416_v46  ;;  %v3899_v24 = vadd.f32 %v3898_v16, %v3885_v10  ;;  %v5701_v46 = vld [vmem:[%s8290_s19 + $0x458] sm:$0xf0]  ;;  %v7765_v56 = vld [vmem:[%s8290_s19 + $0x72c] sm:$0xf] }
 0x1bc   : > { %4130 = vmatpush.bf16.msra.mxu3 %v5544_v30  ;;  %4092 = vmatmul.bf16.vlgmr.msra.gmra.mxu0 %v8396_v22  ;;  %v6136_v22 = vor.u32 %v7781_v58, %v6133_v59  ;;  %v6104_v30 = vor.u32 %v7773_v25, %v6101_v26  ;;  %v5704_v37 = vor.u32 %v7673_v47, %v5701_v46  ;;  %v5941_v55 = vld [vmem:[%s8290_s19 + $0x638] sm:$0xf0]  ;;  %v7665_v59 = vld [vmem:[%s8290_s19 + $0x40c] sm:$0xf] }
 0x1bd   : > { %4136 = vmatpush.bf16.msrb.mxu0 %v5784_v31  ;;  %4105 = vmatmul.bf16.vlgmr.msra.gmra.mxu1 %v8403_v27  ;;  %v5829_v31 = vld [vmem:[%s8290_s19 + $0x558] sm:$0xf0]  ;;  %v7729_v4 = vld [vmem:[%s8290_s19 + $0x60c] sm:$0xf] }
 0x1be   : > { %4149 = vmatpush.bf16.msrb.mxu1 %v5912_v20  ;;  %4118 = vmatmul.bf16.vlgmr.msra.gmra.mxu2 %v8394_v21  ;;  %v7681_v21 = vld [vmem:[%s8290_s19 + $0x48c] sm:$0xf]  ;;  %v5832_v41 = vor.u32 %v7705_v49, %v5829_v31  ;;  %v6069_v57 = vld [vmem:[%s8290_s19 + $0x738] sm:$0xf0] }
 0x1bf   : > { %4162 = vmatpush.bf16.msrb.mxu2 %v6040_v32  ;;  %4131 = vmatmul.bf16.vlgmr.msra.gmra.mxu3 %v8398_v23  ;;  %v7745_v23 = vld [vmem:[%s8290_s19 + $0x68c] sm:$0xf]  ;;  %v5736_v27 = vor.u32 %v7681_v21, %v5733_v0  ;;  %v5957_v32 = vld [vmem:[%s8290_s19 + $0x658] sm:$0xf0]  ;;  %v6072_v5 = vor.u32 %v7765_v56, %v6069_v57 }
 0x1c0   : > { %4175 = vmatpush.bf16.msrb.mxu3 %v6168_v36  ;;  %v5992_v12 = vor.u32 %v7745_v23, %v5989_v6  ;;  %v7737_v20 = vld [vmem:[%s8290_s19 + $0x64c] sm:$0xf]  ;;  %v6085_v36 = vld [vmem:[%s8290_s19 + $0x758] sm:$0xf0] }
 0x1c1   : > { %4137 = vmatpush.bf16.msrb.mxu0 %v5768_v44  ;;  %v3911_v29 = vpop.f32.mrf.mxu2  ;;  %v3887_v39 = vpop.f32.mrf.mxu0  ;;  %v5960_v43 = vor.u32 %v7737_v20, %v5957_v32  ;;  %v7669_v44 = vld [vmem:[%s8290_s19 + $0x42c] sm:$0xf]  ;;  %v6088_v52 = vor.u32 %v7769_v35, %v6085_v36  ;;  %v5797_v0 = vld [vmem:[%s8290_s19 + $0x518] sm:$0xf0] }
 0x1c2   : > { %4150 = vmatpush.bf16.msrb.mxu1 %v5896_v45  ;;  %v3912_v33 = vadd.f32 %v3911_v29, %v3899_v24  ;;  %v3924_v34 = vpop.f32.mrf.mxu3  ;;  %v5685_v45 = vld [vmem:[%s8290_s19 + $0x438] sm:$0xf0]  ;;  %v3900_v51 = vpop.f32.mrf.mxu1  ;;  %v7697_v21 = vld [vmem:[%s8290_s19 + $0x50c] sm:$0xf] }
 0x1c3   : > { %4163 = vmatpush.bf16.msrb.mxu2 %v6024_v48  ;;  %v7701_v48 = vld [vmem:[%s8290_s19 + $0x52c] sm:$0xf]  ;;  %v5688_v58 = vor.u32 %v7669_v44, %v5685_v45  ;;  %v5925_v23 = vld [vmem:[%s8290_s19 + $0x618] sm:$0xf0]  ;;  %v5800_v16 = vor.u32 %v7697_v21, %v5797_v0 }
 0x1c4   : > { %4176 = vmatpush.bf16.msrb.mxu3 %v6152_v54  ;;  %v9243_v38 = vadd.f32 %v3924_v34, %v3912_v33  ;;  %v7733_v54 = vld [vmem:[%s8290_s19 + $0x62c] sm:$0xf]  ;;  %v6053_v7 = vld [vmem:[%s8290_s19 + $0x718] sm:$0xf0] }
 0x1c5   : > { %4138 = vmatpush.bf16.msrb.mxu0 %v5752_v60  ;;  %v5669_v60 = vld [vmem:[%s8290_s19 + $0x418] sm:$0xf0]  ;;  %v7761_v6 = vld [vmem:[%s8290_s19 + $0x70c] sm:$0xf] }
 0x1c6   : > { %4151 = vmatpush.bf16.msrb.mxu1 %v5880_v62  ;;  %v5816_v62 = vor.u32 %v7701_v48, %v5813_v53  ;;  %v6293_v10 = vld [vmem:[%s8290_s19 + $0x8f8] sm:$0xf0]  ;;  %v7885_v14 = vld [vmem:[%s8290_s19 + $0xaec] sm:$0xf]  ;;  %v6056_v19 = vor.u32 %v7761_v6, %v6053_v7 }
 0x1c7   : > { %4164 = vmatpush.bf16.msrb.mxu2 %v6008_v63  ;;  %v5944_v63 = vor.u32 %v7733_v54, %v5941_v55  ;;  %v6421_v13 = vld [vmem:[%s8290_s19 + $0x9f8] sm:$0xf0]  ;;  %v7917_v50 = vld [vmem:[%s8290_s19 + $0xbec] sm:$0xf] }
 0x1c8   : > { %4177 = vmatpush.bf16.msrb.mxu3 %v6136_v22  ;;  %v6549_v15 = vld [vmem:[%s8290_s19 + $0xaf8] sm:$0xf0]  ;;  %v7881_v49 = vld [vmem:[%s8290_s19 + $0xacc] sm:$0xf] }
 0x1c9   : > { %4139 = vmatpush.bf16.msrb.mxu0 %v5736_v27  ;;  %v3913_v22 = vpop.f32.mrf.mxu2  ;;  %v7821_v27 = vld [vmem:[%s8290_s19 + $0x8ec] sm:$0xf]  ;;  %v6677_v18 = vld [vmem:[%s8290_s19 + $0xbf8] sm:$0xf0]  ;;  %v6552_v26 = vor.u32 %v7885_v14, %v6549_v15 }
 0x1ca   : > { %4152 = vmatpush.bf16.msrb.mxu1 %v5864_v11  ;;  %v3926_v9 = vpop.f32.mrf.mxu3  ;;  %v7853_v11 = vld [vmem:[%s8290_s19 + $0x9ec] sm:$0xf]  ;;  %v6296_v24 = vor.u32 %v7821_v27, %v6293_v10  ;;  %v6680_v47 = vor.u32 %v7917_v50, %v6677_v18  ;;  %v6405_v46 = vld [vmem:[%s8290_s19 + $0x9d8] sm:$0xf0] }
 0x1cb   : > { %4165 = vmatpush.bf16.msrb.mxu2 %v5992_v12  ;;  %v5672_v12 = vor.u32 %v7665_v59, %v5669_v60  ;;  %v6424_v25 = vor.u32 %v7853_v11, %v6421_v13  ;;  %v6533_v29 = vld [vmem:[%s8290_s19 + $0xad8] sm:$0xf0]  ;;  %v7813_v34 = vld [vmem:[%s8290_s19 + $0x8ac] sm:$0xf] }
 0x1cc   : > { %4178 = vmatpush.bf16.msrb.mxu3 %v6120_v17  ;;  %v5928_v17 = vor.u32 %v7729_v4, %v5925_v23  ;;  %v6661_v31 = vld [vmem:[%s8290_s19 + $0xbd8] sm:$0xf0]  ;;  %v6536_v33 = vor.u32 %v7881_v49, %v6533_v29  ;;  %v7845_v36 = vld [vmem:[%s8290_s19 + $0x9ac] sm:$0xf] }
 0x1cd   : > { %4140 = vmatpush.bf16.msrb.mxu0 %v5720_v40  ;;  %v7817_v40 = vld [vmem:[%s8290_s19 + $0x8cc] sm:$0xf]  ;;  %v6261_v35 = vld [vmem:[%s8290_s19 + $0x8b8] sm:$0xf0] }
 0x1ce   : > { %4153 = vmatpush.bf16.msrb.mxu1 %v5848_v28  ;;  %v6277_v28 = vld [vmem:[%s8290_s19 + $0x8d8] sm:$0xf0]  ;;  %v7909_v44 = vld [vmem:[%s8290_s19 + $0xbac] sm:$0xf]  ;;  %v6264_v48 = vor.u32 %v7813_v34, %v6261_v35 }
 0x1cf   : > { %4166 = vmatpush.bf16.msrb.mxu2 %v5976_v42  ;;  %v7849_v42 = vld [vmem:[%s8290_s19 + $0x9cc] sm:$0xf]  ;;  %v6280_v20 = vor.u32 %v7817_v40, %v6277_v28  ;;  %v6389_v39 = vld [vmem:[%s8290_s19 + $0x9b8] sm:$0xf0] }
 0x1d0   : > { %4179 = vmatpush.bf16.msrb.mxu3 %v6104_v30  ;;  %v7913_v30 = vld [vmem:[%s8290_s19 + $0xbcc] sm:$0xf]  ;;  %v6408_v32 = vor.u32 %v7849_v42, %v6405_v46  ;;  %v6645_v45 = vld [vmem:[%s8290_s19 + $0xbb8] sm:$0xf0] }
 0x1d1   : > { %4141 = vmatpush.bf16.msrb.mxu0 %v5704_v37  ;;  %v6664_v37 = vor.u32 %v7913_v30, %v6661_v31  ;;  %v6245_v53 = vld [vmem:[%s8290_s19 + $0x898] sm:$0xf0]  ;;  %v7873_v55 = vld [vmem:[%s8290_s19 + $0xa8c] sm:$0xf] }
 0x1d2   : > { %4154 = vmatpush.bf16.msrb.mxu1 %v5832_v41  ;;  %v7877_v41 = vld [vmem:[%s8290_s19 + $0xaac] sm:$0xf]  ;;  %v6373_v54 = vld [vmem:[%s8290_s19 + $0x998] sm:$0xf0] }
 0x1d3   : > { %4167 = vmatpush.bf16.msrb.mxu2 %v5960_v43  ;;  %v6517_v43 = vld [vmem:[%s8290_s19 + $0xab8] sm:$0xf0]  ;;  %v7905_v57 = vld [vmem:[%s8290_s19 + $0xb8c] sm:$0xf] }
 0x1d4   : > { %4180 = vmatpush.bf16.msrb.mxu3 %v6088_v52  ;;  %v6520_v51 = vor.u32 %v7877_v41, %v6517_v43  ;;  %v7809_v52 = vld [vmem:[%s8290_s19 + $0x88c] sm:$0xf]  ;;  %v6501_v56 = vld [vmem:[%s8290_s19 + $0xa98] sm:$0xf0] }
 0x1d5   : > { %4142 = vmatpush.bf16.msrb.mxu0 %v5688_v58  ;;  %v6629_v58 = vld [vmem:[%s8290_s19 + $0xb98] sm:$0xf0]  ;;  %v7837_v0 = vld [vmem:[%s8290_s19 + $0x96c] sm:$0xf] }
 0x1d6   : > { %4155 = vmatpush.bf16.msrb.mxu1 %v5816_v62  ;;  %v6504_v62 = vor.u32 %v7873_v55, %v6501_v56  ;;  %v6229_v21 = vld [vmem:[%s8290_s19 + $0x878] sm:$0xf0]  ;;  %v7869_v6 = vld [vmem:[%s8290_s19 + $0xa6c] sm:$0xf] }
 0x1d7   : > { %4168 = vmatpush.bf16.msrb.mxu2 %v5944_v63  ;;  %v7805_v63 = vld [vmem:[%s8290_s19 + $0x86c] sm:$0xf]  ;;  %v6357_v23 = vld [vmem:[%s8290_s19 + $0x978] sm:$0xf0] }
 0x1d8   : > { %4181 = vmatpush.bf16.msrb.mxu3 %v6072_v5  ;;  %v6632_v5 = vor.u32 %v7905_v57, %v6629_v58  ;;  %v6485_v7 = vld [vmem:[%s8290_s19 + $0xa78] sm:$0xf0]  ;;  %v7901_v9 = vld [vmem:[%s8290_s19 + $0xb6c] sm:$0xf]  ;;  %v6232_v11 = vor.u32 %v7805_v63, %v6229_v21 }
 0x1d9   : > { %4143 = vmatpush.bf16.msrb.mxu0 %v5672_v12  ;;  %v3937_v59 = vpop.f32.mrf.mxu0  ;;  %v6613_v27 = vld [vmem:[%s8290_s19 + $0xb78] sm:$0xf0]  ;;  %v6488_v12 = vor.u32 %v7869_v6, %v6485_v7  ;;  %v7801_v13 = vld [vmem:[%s8290_s19 + $0x84c] sm:$0xf] }
 0x1da   : > { %4156 = vmatpush.bf16.msrb.mxu1 %v5800_v16  ;;  %v3938_v4 = vadd.f32 %v3937_v59, %v9243_v38  ;;  %v3950_v22 = vpop.f32.mrf.mxu1  ;;  %v6360_v38 = vor.u32 %v7837_v0, %v6357_v23  ;;  %v6213_v14 = vld [vmem:[%s8290_s19 + $0x858] sm:$0xf0]  ;;  %v7833_v15 = vld [vmem:[%s8290_s19 + $0x94c] sm:$0xf] }
 0x1db   : > { %4169 = vmatpush.bf16.msrb.mxu2 %v5928_v17  ;;  %v6616_v17 = vor.u32 %v7901_v9, %v6613_v27  ;;  %v6341_v50 = vld [vmem:[%s8290_s19 + $0x958] sm:$0xf0]  ;;  %v7865_v18 = vld [vmem:[%s8290_s19 + $0xa4c] sm:$0xf]  ;;  %v6216_v28 = vor.u32 %v7801_v13, %v6213_v14 }
 0x1dc   : > { %4182 = vmatpush.bf16.msrb.mxu3 %v6056_v19  ;;  %4144 = vmatmul.bf16.vlgmr.msrb.gmra.mxu0 %v8435_v1  ;;  %v7841_v1 = vld [vmem:[%s8290_s19 + $0x98c] sm:$0xf]  ;;  %v3951_v10 = vadd.f32 %v3950_v22, %v3938_v4  ;;  %v6469_v19 = vld [vmem:[%s8290_s19 + $0xa58] sm:$0xf0]  ;;  %v6344_v46 = vor.u32 %v7833_v15, %v6341_v50 }
 0x1dd   : > { %4188 = vmatpush.bf16.msra.mxu0 %v6296_v24  ;;  %4157 = vmatmul.bf16.vlgmr.msrb.gmra.mxu1 %v8439_v3  ;;  %v6248_v3 = vor.u32 %v7809_v52, %v6245_v53  ;;  %v6376_v60 = vor.u32 %v7841_v1, %v6373_v54  ;;  %v6597_v40 = vld [vmem:[%s8290_s19 + $0xb58] sm:$0xf0]  ;;  %v6472_v49 = vor.u32 %v7865_v18, %v6469_v19  ;;  %v7797_v29 = vld [vmem:[%s8290_s19 + $0x82c] sm:$0xf] }
 0x1de   : > { %4201 = vmatpush.bf16.msra.mxu1 %v6424_v25  ;;  %4170 = vmatmul.bf16.vlgmr.msrb.gmra.mxu2 %v8432_v61  ;;  %v6392_v61 = vor.u32 %v7845_v36, %v6389_v39  ;;  %v6197_v30 = vld [vmem:[%s8290_s19 + $0x838] sm:$0xf0]  ;;  %v7829_v31 = vld [vmem:[%s8290_s19 + $0x92c] sm:$0xf] }
 0x1df   : > { %4214 = vmatpush.bf16.msra.mxu2 %v6552_v26  ;;  %4183 = vmatmul.bf16.vlgmr.msrb.gmra.mxu3 %v8437_v2  ;;  %v6648_v2 = vor.u32 %v7909_v44, %v6645_v45  ;;  %v7897_v26 = vld [vmem:[%s8290_s19 + $0xb4c] sm:$0xf]  ;;  %v6453_v35 = vld [vmem:[%s8290_s19 + $0xa38] sm:$0xf0]  ;;  %v6200_v39 = vor.u32 %v7797_v29, %v6197_v30 }
 0x1e0   : > { %4227 = vmatpush.bf16.msra.mxu3 %v6680_v47  ;;  %v7861_v34 = vld [vmem:[%s8290_s19 + $0xa2c] sm:$0xf]  ;;  %v6181_v43 = vld [vmem:[%s8290_s19 + $0x818] sm:$0xf0] }
 0x1e1   : > { %4189 = vmatpush.bf16.msra.mxu0 %v6280_v20  ;;  %v3963_v16 = vpop.f32.mrf.mxu2  ;;  %v3939_v47 = vpop.f32.mrf.mxu0  ;;  %v7893_v36 = vld [vmem:[%s8290_s19 + $0xb2c] sm:$0xf]  ;;  %v6456_v45 = vor.u32 %v7861_v34, %v6453_v35  ;;  %v6437_v1 = vld [vmem:[%s8290_s19 + $0xa18] sm:$0xf0] }
 0x1e2   : > { %4202 = vmatpush.bf16.msra.mxu1 %v6408_v32  ;;  %v3964_v24 = vadd.f32 %v3963_v16, %v3951_v10  ;;  %v3976_v25 = vpop.f32.mrf.mxu3  ;;  %v3952_v20 = vpop.f32.mrf.mxu1  ;;  %v6600_v32 = vor.u32 %v7897_v26, %v6597_v40  ;;  %v7793_v41 = vld [vmem:[%s8290_s19 + $0x80c] sm:$0xf]  ;;  %v6565_v54 = vld [vmem:[%s8290_s19 + $0xb18] sm:$0xf0]  ;;  %v8165_v47 = vld [vmem:[#allocation1 + $0x12] sm:$0xff] }
 0x1e3   : > { %4215 = vmatpush.bf16.msra.mxu2 %v6536_v33  ;;  %v6325_v33 = vld [vmem:[%s8290_s19 + $0x938] sm:$0xf0]  ;;  %v7949_v56 = vld [vmem:[%s8290_s19 + $0xcec] sm:$0xf] }
 0x1e4   : > { %4228 = vmatpush.bf16.msra.mxu3 %v6664_v37  ;;  %v9314_v42 = vadd.f32 %v3976_v25, %v3964_v24  ;;  %v6581_v37 = vld [vmem:[%s8290_s19 + $0xb38] sm:$0xf0]  ;;  %v6328_v44 = vor.u32 %v7829_v31, %v6325_v33  ;;  %v7981_v58 = vld [vmem:[%s8290_s19 + $0xdec] sm:$0xf]  ;;  %v8164_v24 = vld [vmem:[#allocation1] sm:$0xff] }
 0x1e5   : > { %4190 = vmatpush.bf16.msra.mxu0 %v6264_v48  ;;  %v7825_v48 = vld [vmem:[%s8290_s19 + $0x90c] sm:$0xf]  ;;  %v6584_v53 = vor.u32 %v7893_v36, %v6581_v37  ;;  %v6805_v57 = vld [vmem:[%s8290_s19 + $0xcf8] sm:$0xf0] }
 0x1e6   : > { %4203 = vmatpush.bf16.msra.mxu1 %v6392_v61  ;;  %v6309_v61 = vld [vmem:[%s8290_s19 + $0x918] sm:$0xf0]  ;;  %v8045_v0 = vld [vmem:[%s8290_s19 + $0xfec] sm:$0xf] }
 0x1e7   : > { %4216 = vmatpush.bf16.msra.mxu2 %v6520_v51  ;;  %v7857_v51 = vld [vmem:[%s8290_s19 + $0xa0c] sm:$0xf]  ;;  %v6933_v59 = vld [vmem:[%s8290_s19 + $0xdf8] sm:$0xf0]  ;;  %v6312_v63 = vor.u32 %v7825_v48, %v6309_v61 }
 0x1e8   : > { %4229 = vmatpush.bf16.msra.mxu3 %v6648_v2  ;;  %v7889_v2 = vld [vmem:[%s8290_s19 + $0xb0c] sm:$0xf]  ;;  %v6440_v21 = vor.u32 %v7857_v51, %v6437_v1  ;;  %v7189_v4 = vld [vmem:[%s8290_s19 + $0xff8] sm:$0xf0]  ;;  %v6936_v23 = vor.u32 %v7981_v58, %v6933_v59 }
 0x1e9   : > { %4191 = vmatpush.bf16.msra.mxu0 %v6248_v3  ;;  %v3965_v52 = vpop.f32.mrf.mxu2  ;;  %v6184_v3 = vor.u32 %v7793_v41, %v6181_v43  ;;  %v6568_v22 = vor.u32 %v7889_v2, %v6565_v54  ;;  %v7945_v7 = vld [vmem:[%s8290_s19 + $0xccc] sm:$0xf]  ;;  %v6789_v9 = vld [vmem:[%s8290_s19 + $0xcd8] sm:$0xf0]  ;;  %v7192_v10 = vor.u32 %v8045_v0, %v7189_v4 }
 0x1ea   : > { %4204 = vmatpush.bf16.msra.mxu1 %v6376_v60  ;;  %v3978_v55 = vpop.f32.mrf.mxu3  ;;  %v8013_v60 = vld [vmem:[%s8290_s19 + $0xeec] sm:$0xf]  ;;  %v7173_v14 = vld [vmem:[%s8290_s19 + $0xfd8] sm:$0xf0]  ;;  %v6792_v15 = vor.u32 %v7945_v7, %v6789_v9 }
 0x1eb   : > { %4217 = vmatpush.bf16.msra.mxu2 %v6504_v62  ;;  %v7061_v62 = vld [vmem:[%s8290_s19 + $0xef8] sm:$0xf0]  ;;  %v7977_v27 = vld [vmem:[%s8290_s19 + $0xdcc] sm:$0xf] }
 0x1ec   : > { %4230 = vmatpush.bf16.msra.mxu3 %v6632_v5  ;;  %v6808_v5 = vor.u32 %v7949_v56, %v6805_v57  ;;  %v7064_v6 = vor.u32 %v8013_v60, %v7061_v62  ;;  %v8041_v13 = vld [vmem:[%s8290_s19 + $0xfcc] sm:$0xf]  ;;  %v6773_v18 = vld [vmem:[%s8290_s19 + $0xcb8] sm:$0xf0] }
 0x1ed   : > { %4192 = vmatpush.bf16.msra.mxu0 %v6232_v11  ;;  %v6917_v11 = vld [vmem:[%s8290_s19 + $0xdd8] sm:$0xf0]  ;;  %v7941_v50 = vld [vmem:[%s8290_s19 + $0xcac] sm:$0xf]  ;;  %v7176_v25 = vor.u32 %v8041_v13, %v7173_v14 }
 0x1ee   : > { %4205 = vmatpush.bf16.msra.mxu1 %v6360_v38  ;;  %v8009_v38 = vld [vmem:[%s8290_s19 + $0xecc] sm:$0xf]  ;;  %v6920_v16 = vor.u32 %v7977_v27, %v6917_v11  ;;  %v6901_v26 = vld [vmem:[%s8290_s19 + $0xdb8] sm:$0xf0]  ;;  %v6776_v31 = vor.u32 %v7941_v50, %v6773_v18 }
 0x1ef   : > { %4218 = vmatpush.bf16.msra.mxu2 %v6488_v12  ;;  %v7045_v12 = vld [vmem:[%s8290_s19 + $0xed8] sm:$0xf0]  ;;  %v7973_v19 = vld [vmem:[%s8290_s19 + $0xdac] sm:$0xf] }
 0x1f0   : > { %4231 = vmatpush.bf16.msra.mxu3 %v6616_v17  ;;  %v7048_v17 = vor.u32 %v8009_v38, %v7045_v12  ;;  %v8005_v40 = vld [vmem:[%s8290_s19 + $0xeac] sm:$0xf]  ;;  %v7157_v29 = vld [vmem:[%s8290_s19 + $0xfb8] sm:$0xf0]  ;;  %v6904_v20 = vor.u32 %v7973_v19, %v6901_v26 }
 0x1f1   : > { %4193 = vmatpush.bf16.msra.mxu0 %v6216_v28  ;;  %v7029_v28 = vld [vmem:[%s8290_s19 + $0xeb8] sm:$0xf0]  ;;  %v7937_v33 = vld [vmem:[%s8290_s19 + $0xc8c] sm:$0xf] }
 0x1f2   : > { %4206 = vmatpush.bf16.msra.mxu1 %v6344_v46  ;;  %v8166_v46 = vld [vmem:[#allocation1 + $0x9] sm:$0xff]  ;;  %v8167_v30 = vld [vmem:[#allocation1 + $0x1b] sm:$0xff] }
 0x1f3   : > { %4219 = vmatpush.bf16.msra.mxu2 %v6472_v49  ;;  %v8037_v49 = vld [vmem:[%s8290_s19 + $0xfac] sm:$0xf]  ;;  %v6757_v34 = vld [vmem:[%s8290_s19 + $0xc98] sm:$0xf0] }
 0x1f4   : > { %4232 = vmatpush.bf16.msra.mxu3 %v6600_v32  ;;  %v7032_v32 = vor.u32 %v8005_v40, %v7029_v28  ;;  %v7969_v35 = vld [vmem:[%s8290_s19 + $0xd8c] sm:$0xf]  ;;  %v7160_v36 = vor.u32 %v8037_v49, %v7157_v29  ;;  %v6885_v37 = vld [vmem:[%s8290_s19 + $0xd98] sm:$0xf0]  ;;  %v6760_v61 = vor.u32 %v7937_v33, %v6757_v34 }
 0x1f5   : > { %4194 = vmatpush.bf16.msra.mxu0 %v6200_v39  ;;  %v8001_v39 = vld [vmem:[%s8290_s19 + $0xe8c] sm:$0xf]  ;;  %v7013_v41 = vld [vmem:[%s8290_s19 + $0xe98] sm:$0xf0]  ;;  %v6888_v52 = vor.u32 %v7969_v35, %v6885_v37 }
 0x1f6   : > { %4207 = vmatpush.bf16.msra.mxu1 %v6328_v44  ;;  %v8033_v44 = vld [vmem:[%s8290_s19 + $0xf8c] sm:$0xf]  ;;  %v6741_v2 = vld [vmem:[%s8290_s19 + $0xc78] sm:$0xf0] }
 0x1f7   : > { %4220 = vmatpush.bf16.msra.mxu2 %v6456_v45  ;;  %v7141_v45 = vld [vmem:[%s8290_s19 + $0xf98] sm:$0xf0]  ;;  %v7933_v1 = vld [vmem:[%s8290_s19 + $0xc6c] sm:$0xf] }
 0x1f8   : > { %4233 = vmatpush.bf16.msra.mxu3 %v6584_v53  ;;  %v7016_v53 = vor.u32 %v8001_v39, %v7013_v41  ;;  %v7965_v54 = vld [vmem:[%s8290_s19 + $0xd6c] sm:$0xf]  ;;  %v7144_v55 = vor.u32 %v8033_v44, %v7141_v45  ;;  %v6869_v57 = vld [vmem:[%s8290_s19 + $0xd78] sm:$0xf0]  ;;  %v6744_v60 = vor.u32 %v7933_v1, %v6741_v2 }
 0x1f9   : > { %4195 = vmatpush.bf16.msra.mxu0 %v6184_v3  ;;  %v3989_v43 = vpop.f32.mrf.mxu0  ;;  %v7997_v58 = vld [vmem:[%s8290_s19 + $0xe6c] sm:$0xf]  ;;  %v7125_v59 = vld [vmem:[%s8290_s19 + $0xf78] sm:$0xf0]  ;;  %v6872_v62 = vor.u32 %v7965_v54, %v6869_v57 }
 0x1fa   : > { %4208 = vmatpush.bf16.msra.mxu1 %v6312_v63  ;;  %v3990_v48 = vadd.f32 %v3989_v43, %v9314_v42  ;;  %v4002_v51 = vpop.f32.mrf.mxu1  ;;  %v6997_v42 = vld [vmem:[%s8290_s19 + $0xe78] sm:$0xf0]  ;;  %v8029_v3 = vld [vmem:[%s8290_s19 + $0xf6c] sm:$0xf] }
 0x1fb   : > { %4221 = vmatpush.bf16.msra.mxu2 %v6440_v21  ;;  %v7000_v63 = vor.u32 %v7997_v58, %v6997_v42  ;;  %v7929_v21 = vld [vmem:[%s8290_s19 + $0xc4c] sm:$0xf]  ;;  %v6725_v0 = vld [vmem:[%s8290_s19 + $0xc58] sm:$0xf0] }
 0x1fc   : > { %4234 = vmatpush.bf16.msra.mxu3 %v6568_v22  ;;  %4196 = vmatmul.bf16.vlgmr.msra.gmra.mxu0 %v8164_v24  ;;  %v4003_v56 = vadd.f32 %v4002_v51, %v3990_v48  ;;  %v7961_v4 = vld [vmem:[%s8290_s19 + $0xd4c] sm:$0xf]  ;;  %v7128_v22 = vor.u32 %v8029_v3, %v7125_v59  ;;  %v6981_v7 = vld [vmem:[%s8290_s19 + $0xe58] sm:$0xf0]  ;;  %v6728_v12 = vor.u32 %v7929_v21, %v6725_v0  ;;  %v8168_v48 = vld [vmem:[#allocation1 + $0x24] sm:$0xff] }
 0x1fd   : > { %4240 = vmatpush.bf16.msrb.mxu0 %v6808_v5  ;;  %4209 = vmatmul.bf16.vlgmr.msra.gmra.mxu1 %v8166_v46  ;;  %v7109_v11 = vld [vmem:[%s8290_s19 + $0xf58] sm:$0xf0]  ;;  %v7957_v18 = vld [vmem:[%s8290_s19 + $0xd2c] sm:$0xf] }
 0x1fe   : > { %4253 = vmatpush.bf16.msrb.mxu1 %v6936_v23  ;;  %4222 = vmatmul.bf16.vlgmr.msra.gmra.mxu2 %v8165_v47  ;;  %v6853_v23 = vld [vmem:[%s8290_s19 + $0xd58] sm:$0xf0]  ;;  %v8021_v40 = vld [vmem:[%s8290_s19 + $0xf2c] sm:$0xf] }
 0x1ff   : > { %4266 = vmatpush.bf16.msrb.mxu2 %v7064_v6  ;;  %4235 = vmatmul.bf16.vlgmr.msra.gmra.mxu3 %v8167_v30  ;;  %v7993_v6 = vld [vmem:[%s8290_s19 + $0xe4c] sm:$0xf]  ;;  %v6709_v50 = vld [vmem:[%s8290_s19 + $0xc38] sm:$0xf0] }
 0x200   : > { %4279 = vmatpush.bf16.msrb.mxu3 %v7192_v10  ;;  %v8025_v10 = vld [vmem:[%s8290_s19 + $0xf4c] sm:$0xf]  ;;  %v6837_v24 = vld [vmem:[%s8290_s19 + $0xd38] sm:$0xf0] }
 0x201   : > { %4241 = vmatpush.bf16.msrb.mxu0 %v6792_v15  ;;  %v4015_v5 = vpop.f32.mrf.mxu2  ;;  %v3991_v38 = vpop.f32.mrf.mxu0  ;;  %v6856_v15 = vor.u32 %v7961_v4, %v6853_v23  ;;  %v7112_v19 = vor.u32 %v8025_v10, %v7109_v11  ;;  %v6965_v26 = vld [vmem:[%s8290_s19 + $0xe38] sm:$0xf0]  ;;  %v6840_v46 = vor.u32 %v7957_v18, %v6837_v24  ;;  %v7921_v29 = vld [vmem:[%s8290_s19 + $0xc0c] sm:$0xf] }
 0x202   : > { %4254 = vmatpush.bf16.msrb.mxu1 %v6920_v16  ;;  %v4016_v9 = vadd.f32 %v4015_v5, %v4003_v56  ;;  %v4028_v27 = vpop.f32.mrf.mxu3  ;;  %v4004_v13 = vpop.f32.mrf.mxu1  ;;  %v6984_v16 = vor.u32 %v7993_v6, %v6981_v7  ;;  %v7093_v28 = vld [vmem:[%s8290_s19 + $0xf38] sm:$0xf0]  ;;  %v7985_v33 = vld [vmem:[%s8290_s19 + $0xe0c] sm:$0xf] }
 0x203   : > { %4267 = vmatpush.bf16.msrb.mxu2 %v7048_v17  ;;  %v7925_v17 = vld [vmem:[%s8290_s19 + $0xc2c] sm:$0xf]  ;;  %v6693_v30 = vld [vmem:[%s8290_s19 + $0xc18] sm:$0xf0] }
 0x204   : > { %4280 = vmatpush.bf16.msrb.mxu3 %v7176_v25  ;;  %v4029_v14 = vadd.f32 %v4028_v27, %v4016_v9  ;;  %v7989_v25 = vld [vmem:[%s8290_s19 + $0xe2c] sm:$0xf]  ;;  %v6712_v47 = vor.u32 %v7925_v17, %v6709_v50  ;;  %v6949_v34 = vld [vmem:[%s8290_s19 + $0xe18] sm:$0xf0]  ;;  %v6696_v41 = vor.u32 %v7921_v29, %v6693_v30 }
 0x205   : > { %4242 = vmatpush.bf16.msrb.mxu0 %v6776_v31  ;;  %v6968_v49 = vor.u32 %v7989_v25, %v6965_v26  ;;  %v7953_v31 = vld [vmem:[%s8290_s19 + $0xd0c] sm:$0xf]  ;;  %v7077_v37 = vld [vmem:[%s8290_s19 + $0xf18] sm:$0xf0]  ;;  %v6952_v44 = vor.u32 %v7985_v33, %v6949_v34 }
 0x206   : > { %4255 = vmatpush.bf16.msrb.mxu1 %v6904_v20  ;;  %v7096_v20 = vor.u32 %v8021_v40, %v7093_v28  ;;  %v8170_v51 = vld [vmem:[#allocation1 + $0x36] sm:$0xff] }
 0x207   : > { %4268 = vmatpush.bf16.msrb.mxu2 %v7032_v32  ;;  %v6821_v32 = vld [vmem:[%s8290_s19 + $0xd18] sm:$0xf0] }
 0x208   : > { %4281 = vmatpush.bf16.msrb.mxu3 %v7160_v36  ;;  %v8017_v36 = vld [vmem:[%s8290_s19 + $0xf0c] sm:$0xf]  ;;  %v6824_v43 = vor.u32 %v7953_v31, %v6821_v32 }
 0x209   : > { %4243 = vmatpush.bf16.msrb.mxu0 %v6760_v61  ;;  %v4017_v35 = vpop.f32.mrf.mxu2  ;;  %v7080_v45 = vor.u32 %v8017_v36, %v7077_v37  ;;  %v8169_v61 = vld [vmem:[#allocation1 + $0x2d] sm:$0xff] }
 0x20a   : > { %4256 = vmatpush.bf16.msrb.mxu1 %v6888_v52  ;;  %v4030_v39 = vpop.f32.mrf.mxu3  ;;  %v8171_v52 = vld [vmem:[#allocation1 + $0x3f] sm:$0xff] }
 0x20b   : > { %4269 = vmatpush.bf16.msrb.mxu2 %v7016_v53 }
 0x20c   : > { %4282 = vmatpush.bf16.msrb.mxu3 %v7144_v55 }
 0x20d   : > { %4244 = vmatpush.bf16.msrb.mxu0 %v6744_v60 }
 0x20e   : > { %4257 = vmatpush.bf16.msrb.mxu1 %v6872_v62 }
 0x20f   : > { %4270 = vmatpush.bf16.msrb.mxu2 %v7000_v63 }
 0x210   : > { %4283 = vmatpush.bf16.msrb.mxu3 %v7128_v22 }
 0x211   : > { %4245 = vmatpush.bf16.msrb.mxu0 %v6728_v12 }
 0x212   : > { %4258 = vmatpush.bf16.msrb.mxu1 %v6856_v15 }
 0x213   : > { %4271 = vmatpush.bf16.msrb.mxu2 %v6984_v16 }
 0x214   : > { %4284 = vmatpush.bf16.msrb.mxu3 %v7112_v19 }
 0x215   : > { %4246 = vmatpush.bf16.msrb.mxu0 %v6712_v47 }
 0x216   : > { %4259 = vmatpush.bf16.msrb.mxu1 %v6840_v46 }
 0x217   : > { %4272 = vmatpush.bf16.msrb.mxu2 %v6968_v49 }
 0x218   : > { %4285 = vmatpush.bf16.msrb.mxu3 %v7096_v20 }
 0x219   : > { %4247 = vmatpush.bf16.msrb.mxu0 %v6696_v41  ;;  %v4041_v53 = vpop.f32.mrf.mxu0 }
 0x21a   : > { %4260 = vmatpush.bf16.msrb.mxu1 %v6824_v43  ;;  %v4042_v1 = vadd.f32 %v4041_v53, %v4029_v14  ;;  %v4054_v2 = vpop.f32.mrf.mxu1 }
 0x21b   : > { %4273 = vmatpush.bf16.msrb.mxu2 %v6952_v44 }
 0x21c   : > { %4286 = vmatpush.bf16.msrb.mxu3 %v7080_v45  ;;  %4248 = vmatmul.bf16.vlgmr.msrb.gmra.mxu0 %v8168_v48  ;;  %v4055_v54 = vadd.f32 %v4054_v2, %v4042_v1  ;;  %v349_v48 = vld [vmem:[#allocation2] sm:$0xff] }
 0x21d   : > { %4261 = vmatmul.bf16.vlgmr.msrb.gmra.mxu1 %v8169_v61 }
 0x21e   : > { %4274 = vmatmul.bf16.vlgmr.msrb.gmra.mxu2 %v8170_v51 }
 0x21f   : > { %4287 = vmatmul.bf16.vlgmr.msrb.gmra.mxu3 %v8171_v52 }
 0x221   : > { %v4067_v55 = vpop.f32.mrf.mxu2  ;;  %v4043_v58 = vpop.f32.mrf.mxu0 }
 0x222   : > { %v4068_v56 = vadd.f32 %v4067_v55, %v4055_v54  ;;  %v4080_v57 = vpop.f32.mrf.mxu3  ;;  %v4056_v42 = vpop.f32.mrf.mxu1 }
 0x224   : > { %v4081_v3 = vadd.f32 %v4080_v57, %v4068_v56 }
 0x226   : > { %v4297_v44 = vrot.slane %v4081_v3, 4 }
 0x229   : > { %v4069_v59 = vpop.f32.mrf.mxu2 }
 0x22a   : > { %v4082_v60 = vpop.f32.mrf.mxu3 }
 0x239   : > { %v4093_v62 = vpop.f32.mrf.mxu0 }
 0x23a   : > { %v4106_v63 = vpop.f32.mrf.mxu1 }
 0x23b   : > { %v4107_v21 = vadd.f32 %v4106_v63, %v4093_v62 }
 0x241   : > { %v4119_v0 = vpop.f32.mrf.mxu2  ;;  %v4095_v23 = vpop.f32.mrf.mxu0 }
 0x242   : > { %v4120_v4 = vadd.f32 %v4119_v0, %v4107_v21  ;;  %v4132_v22 = vpop.f32.mrf.mxu3  ;;  %v4108_v6 = vpop.f32.mrf.mxu1 }
 0x244   : > { %v4133_v5 = vadd.f32 %v4132_v22, %v4120_v4 }
 0x249   : > { %v4121_v7 = vpop.f32.mrf.mxu2 }
 0x24a   : > { %v4134_v9 = vpop.f32.mrf.mxu3 }
 0x259   : > { %v4145_v27 = vpop.f32.mrf.mxu0 }
 0x25a   : > { %v4158_v10 = vpop.f32.mrf.mxu1  ;;  %v4146_v50 = vadd.f32 %v4145_v27, %v4133_v5 }
 0x25c   : > { %v4159_v25 = vadd.f32 %v4158_v10, %v4146_v50 }
 0x261   : > { %v4171_v11 = vpop.f32.mrf.mxu2  ;;  %v4147_v12 = vpop.f32.mrf.mxu0 }
 0x262   : > { %v4184_v38 = vpop.f32.mrf.mxu3  ;;  %v4160_v13 = vpop.f32.mrf.mxu1  ;;  %v4172_v40 = vadd.f32 %v4171_v11, %v4159_v25 }
 0x264   : > { %v4185_v46 = vadd.f32 %v4184_v38, %v4172_v40 }
 0x269   : > { %v4173_v14 = vpop.f32.mrf.mxu2 }
 0x26a   : > { %v4186_v15 = vpop.f32.mrf.mxu3 }
 0x279   : > { %v4197_v16 = vpop.f32.mrf.mxu0 }
 0x27a   : > { %v4210_v17 = vpop.f32.mrf.mxu1  ;;  %v4198_v49 = vadd.f32 %v4197_v16, %v4185_v46 }
 0x27c   : > { %v4211_v29 = vadd.f32 %v4210_v17, %v4198_v49 }
 0x281   : > { %v4223_v18 = vpop.f32.mrf.mxu2  ;;  %v4199_v24 = vpop.f32.mrf.mxu0 }
 0x282   : > { %v4236_v19 = vpop.f32.mrf.mxu3  ;;  %v4212_v26 = vpop.f32.mrf.mxu1  ;;  %v4224_v30 = vadd.f32 %v4223_v18, %v4211_v29 }
 0x284   : > { %v4237_v31 = vadd.f32 %v4236_v19, %v4224_v30 }
 0x289   : > { %v4225_v28 = vpop.f32.mrf.mxu2 }
 0x28a   : > { %v4238_v47 = vpop.f32.mrf.mxu3 }
 0x299   : > { %v4249_v20 = vpop.f32.mrf.mxu0 }
 0x29a   : > { %v4262_v32 = vpop.f32.mrf.mxu1  ;;  %v4250_v33 = vadd.f32 %v4249_v20, %v4237_v31 }
 0x29c   : > { %v4263_v34 = vadd.f32 %v4262_v32, %v4250_v33 }
 0x2a1   : > { %v4275_v35 = vpop.f32.mrf.mxu2  ;;  %v4251_v39 = vpop.f32.mrf.mxu0 }
 0x2a2   : > { %v4276_v36 = vadd.f32 %v4275_v35, %v4263_v34  ;;  %v4288_v37 = vpop.f32.mrf.mxu3  ;;  %v4264_v41 = vpop.f32.mrf.mxu1 }
 0x2a4   : > { %v4289_v43 = vadd.f32 %v4288_v37, %v4276_v36 }
 0x2a6   : > { %v4298_v45 = vrot.slane %v4289_v43, 2 }
 0x2a8   : > { %v4302_v61 = vsel %vm4301_vm1, %v4297_v44, %v4298_v45  ;;  %4311 = sbr.rel (%p7193_p6) target bundleno = 1424 (0x590), region = 64 }
 0x2a9   : > { %v4304_v51 = vsel %vm4303_vm2, %v9183_v8, %v4302_v61  ;;  %v4277_v52 = vpop.f32.mrf.mxu2 }
 0x2aa   : > { %v4306_v53 = vadd.f32 %v4304_v51, %v349_v48  ;;  %v4290_v1 = vpop.f32.mrf.mxu3 }
 0x2ac   : > { %4307 = vst [vmem:[#allocation2] sm:$0xff] %v4306_v53 }
 0x2ad   : > { %v7252_v2 = vld [vmem:[%s9885_s3 + $0x70] sm:$0xf]  ;;  %v8063_v54 = vld [vmem:[%s9885_s3 + $0x74] sm:$0xf0]  ;;  %v7244_v62 = vld [vmem:[%s9885_s3 + $0x60] sm:$0xf] }
 0x2ae   : > { %v7316_v55 = vld [vmem:[%s9885_s3 + $0xf0] sm:$0xf]  ;;  %v7253_v8 = vor.u32 %v8063_v54, %v7252_v2  ;;  %v8079_v56 = vld [vmem:[%s9885_s3 + $0xf4] sm:$0xf0]  ;;  %v8061_v21 = vld [vmem:[%s9885_s3 + $0x64] sm:$0xf0] }
 0x2af   : > { %v7380_v57 = vld [vmem:[%s9885_s3 + $0x170] sm:$0xf]  ;;  %v8095_v58 = vld [vmem:[%s9885_s3 + $0x174] sm:$0xf0]  ;;  %v7317_v42 = vor.u32 %v8079_v56, %v7316_v55  ;;  %v7308_v0 = vld [vmem:[%s9885_s3 + $0xe0] sm:$0xf]  ;;  %v7245_v22 = vor.u32 %v8061_v21, %v7244_v62 }
 0x2b0   : > { %v7381_v3 = vor.u32 %v8095_v58, %v7380_v57  ;;  %v7444_v59 = vld [vmem:[%s9885_s3 + $0x1f0] sm:$0xf]  ;;  %v8111_v60 = vld [vmem:[%s9885_s3 + $0x1f4] sm:$0xf0]  ;;  %4732 = vmatpush.bf16.msra.mxu0 %v7253_v8  ;;  %v8077_v4 = vld [vmem:[%s9885_s3 + $0xe4] sm:$0xf0] }
 0x2b1   : > { %v7445_v63 = vor.u32 %v8111_v60, %v7444_v59  ;;  %4745 = vmatpush.bf16.msra.mxu1 %v7317_v42  ;;  %v7309_v5 = vor.u32 %v8077_v4, %v7308_v0  ;;  %v7372_v23 = vld [vmem:[%s9885_s3 + $0x160] sm:$0xf]  ;;  %v8093_v6 = vld [vmem:[%s9885_s3 + $0x164] sm:$0xf0]  ;;  %v7236_v10 = vld [vmem:[%s9885_s3 + $0x50] sm:$0xf] }
 0x2b2   : > { %4758 = vmatpush.bf16.msra.mxu2 %v7381_v3  ;;  %v7436_v7 = vld [vmem:[%s9885_s3 + $0x1e0] sm:$0xf]  ;;  %v7373_v9 = vor.u32 %v8093_v6, %v7372_v23  ;;  %v8109_v27 = vld [vmem:[%s9885_s3 + $0x1e4] sm:$0xf0]  ;;  %v8059_v11 = vld [vmem:[%s9885_s3 + $0x54] sm:$0xf0] }
 0x2b3   : > { %4771 = vmatpush.bf16.msra.mxu3 %v7445_v63  ;;  %v7437_v38 = vor.u32 %v8109_v27, %v7436_v7  ;;  %v7300_v12 = vld [vmem:[%s9885_s3 + $0xd0] sm:$0xf]  ;;  %v8075_v13 = vld [vmem:[%s9885_s3 + $0xd4] sm:$0xf0]  ;;  %v7237_v15 = vor.u32 %v8059_v11, %v7236_v10  ;;  %v7228_v24 = vld [vmem:[%s9885_s3 + $0x40] sm:$0xf] }
 0x2b4   : > { %v7364_v14 = vld [vmem:[%s9885_s3 + $0x150] sm:$0xf]  ;;  %4733 = vmatpush.bf16.msra.mxu0 %v7245_v22  ;;  %v8091_v16 = vld [vmem:[%s9885_s3 + $0x154] sm:$0xf0]  ;;  %v7301_v18 = vor.u32 %v8075_v13, %v7300_v12  ;;  %v8057_v25 = vld [vmem:[%s9885_s3 + $0x44] sm:$0xf0] }
 0x2b5   : > { %v7428_v17 = vld [vmem:[%s9885_s3 + $0x1d0] sm:$0xf]  ;;  %v8107_v50 = vld [vmem:[%s9885_s3 + $0x1d4] sm:$0xf0]  ;;  %4746 = vmatpush.bf16.msra.mxu1 %v7309_v5  ;;  %v7365_v19 = vor.u32 %v8091_v16, %v7364_v14  ;;  %v7292_v26 = vld [vmem:[%s9885_s3 + $0xc0] sm:$0xf]  ;;  %v7229_v30 = vor.u32 %v8057_v25, %v7228_v24 }
 0x2b6   : > { %4759 = vmatpush.bf16.msra.mxu2 %v7373_v9  ;;  %v7429_v40 = vor.u32 %v8107_v50, %v7428_v17  ;;  %v8073_v28 = vld [vmem:[%s9885_s3 + $0xc4] sm:$0xf0]  ;;  %v7356_v47 = vld [vmem:[%s9885_s3 + $0x140] sm:$0xf]  ;;  %v7220_v32 = vld [vmem:[%s9885_s3 + $0x30] sm:$0xf] }
 0x2b7   : > { %4772 = vmatpush.bf16.msra.mxu3 %v7437_v38  ;;  %v8089_v46 = vld [vmem:[%s9885_s3 + $0x144] sm:$0xf0]  ;;  %v7420_v49 = vld [vmem:[%s9885_s3 + $0x1c0] sm:$0xf]  ;;  %v7293_v31 = vor.u32 %v8073_v28, %v7292_v26  ;;  %v8055_v33 = vld [vmem:[%s9885_s3 + $0x34] sm:$0xf0] }
 0x2b8   : > { %v8105_v29 = vld [vmem:[%s9885_s3 + $0x1c4] sm:$0xf0]  ;;  %4734 = vmatpush.bf16.msra.mxu0 %v7237_v15  ;;  %v7357_v20 = vor.u32 %v8089_v46, %v7356_v47  ;;  %v7284_v34 = vld [vmem:[%s9885_s3 + $0xb0] sm:$0xf]  ;;  %v8071_v36 = vld [vmem:[%s9885_s3 + $0xb4] sm:$0xf0]  ;;  %v7221_v44 = vor.u32 %v8055_v33, %v7220_v32 }
 0x2b9   : > { %4747 = vmatpush.bf16.msra.mxu1 %v7301_v18  ;;  %v7421_v35 = vor.u32 %v8105_v29, %v7420_v49  ;;  %v7348_v37 = vld [vmem:[%s9885_s3 + $0x130] sm:$0xf]  ;;  %v8087_v39 = vld [vmem:[%s9885_s3 + $0x134] sm:$0xf0]  ;;  %v7285_v45 = vor.u32 %v8071_v36, %v7284_v34  ;;  %v7212_v61 = vld [vmem:[%s9885_s3 + $0x20] sm:$0xf] }
 0x2ba   : > { %4760 = vmatpush.bf16.msra.mxu2 %v7365_v19  ;;  %v7412_v41 = vld [vmem:[%s9885_s3 + $0x1b0] sm:$0xf]  ;;  %v8103_v43 = vld [vmem:[%s9885_s3 + $0x1b4] sm:$0xf0]  ;;  %v7349_v48 = vor.u32 %v8087_v39, %v7348_v37  ;;  %v8053_v51 = vld [vmem:[%s9885_s3 + $0x24] sm:$0xf0] }
 0x2bb   : > { %4773 = vmatpush.bf16.msra.mxu3 %v7429_v40  ;;  %v7276_v52 = vld [vmem:[%s9885_s3 + $0xa0] sm:$0xf]  ;;  %v7413_v53 = vor.u32 %v8103_v43, %v7412_v41  ;;  %v8069_v1 = vld [vmem:[%s9885_s3 + $0xa4] sm:$0xf0]  ;;  %v7213_v56 = vor.u32 %v8053_v51, %v7212_v61  ;;  %v7204_v42 = vld [vmem:[%s9885_s3 + $0x10] sm:$0xf] }
 0x2bc   : > { %4735 = vmatpush.bf16.msra.mxu0 %v7229_v30  ;;  %v7340_v2 = vld [vmem:[%s9885_s3 + $0x120] sm:$0xf]  ;;  %v8085_v54 = vld [vmem:[%s9885_s3 + $0x124] sm:$0xf0]  ;;  %v7277_v57 = vor.u32 %v8069_v1, %v7276_v52  ;;  %v8051_v3 = vld [vmem:[%s9885_s3 + $0x14] sm:$0xf0] }
 0x2bd   : > { %4748 = vmatpush.bf16.msra.mxu1 %v7293_v31  ;;  %v7404_v55 = vld [vmem:[%s9885_s3 + $0x1a0] sm:$0xf]  ;;  %v8101_v8 = vld [vmem:[%s9885_s3 + $0x1a4] sm:$0xf0]  ;;  %v7341_v58 = vor.u32 %v8085_v54, %v7340_v2  ;;  %v7268_v59 = vld [vmem:[%s9885_s3 + $0x90] sm:$0xf]  ;;  %v7205_v5 = vor.u32 %v8051_v3, %v7204_v42 }
 0x2be   : > { %4761 = vmatpush.bf16.msra.mxu2 %v7357_v20  ;;  %v7405_v60 = vor.u32 %v8101_v8, %v7404_v55  ;;  %v8067_v62 = vld [vmem:[%s9885_s3 + $0x94] sm:$0xf0]  ;;  %v7332_v63 = vld [vmem:[%s9885_s3 + $0x110] sm:$0xf]  ;;  %v7196_v22 = vld [vmem:[%s9885_s3] sm:$0xf] }
 0x2bf   : > { %4774 = vmatpush.bf16.msra.mxu3 %v7421_v35  ;;  %v8083_v21 = vld [vmem:[%s9885_s3 + $0x114] sm:$0xf0]  ;;  %v7396_v0 = vld [vmem:[%s9885_s3 + $0x190] sm:$0xf]  ;;  %v8049_v23 = vld [vmem:[%s9885_s3 + $0x4] sm:$0xf0]  ;;  %v7269_v9 = vor.u32 %v8067_v62, %v7268_v59 }
 0x2c0   : > { %4736 = vmatpush.bf16.msra.mxu0 %v7221_v44  ;;  %v8099_v4 = vld [vmem:[%s9885_s3 + $0x194] sm:$0xf0]  ;;  %v7260_v6 = vld [vmem:[%s9885_s3 + $0x80] sm:$0xf]  ;;  %v8065_v7 = vld [vmem:[%s9885_s3 + $0x84] sm:$0xf0]  ;;  %v7333_v27 = vor.u32 %v8083_v21, %v7332_v63  ;;  %v7197_v18 = vor.u32 %v8049_v23, %v7196_v22 }
 0x2c1   : > { %4749 = vmatpush.bf16.msra.mxu1 %v7285_v45  ;;  %v7324_v10 = vld [vmem:[%s9885_s3 + $0x100] sm:$0xf]  ;;  %v8081_v11 = vld [vmem:[%s9885_s3 + $0x104] sm:$0xf0]  ;;  %v7397_v12 = vor.u32 %v8099_v4, %v7396_v0  ;;  %v8062_v14 = vld [vmem:[%s9885_s3 + $0x74] sm:$0xf]  ;;  %v7261_v19 = vor.u32 %v8065_v7, %v7260_v6 }
 0x2c2   : > { %4762 = vmatpush.bf16.msra.mxu2 %v7349_v48  ;;  %v7388_v38 = vld [vmem:[%s9885_s3 + $0x180] sm:$0xf]  ;;  %v8097_v13 = vld [vmem:[%s9885_s3 + $0x184] sm:$0xf0]  ;;  %v7254_v15 = vld [vmem:[%s9885_s3 + $0x78] sm:$0xf0]  ;;  %v7325_v24 = vor.u32 %v8081_v11, %v7324_v10 }
 0x2c3   : > { %4775 = vmatpush.bf16.msra.mxu3 %v7413_v53  ;;  %v8078_v16 = vld [vmem:[%s9885_s3 + $0xf4] sm:$0xf]  ;;  %v7318_v17 = vld [vmem:[%s9885_s3 + $0xf8] sm:$0xf0]  ;;  %v4313_v40 = vld [vmem:[%s9884_s2] sm:$0xf]  ;;  %v7389_v30 = vor.u32 %v8097_v13, %v7388_v38  ;;  %v7257_v31 = vor.u32 %v8062_v14, %v7254_v15 }
 0x2c4   : > { %4737 = vmatpush.bf16.msra.mxu0 %v7213_v56  ;;  %v8094_v50 = vld [vmem:[%s9885_s3 + $0x174] sm:$0xf]  ;;  %v7382_v25 = vld [vmem:[%s9885_s3 + $0x178] sm:$0xf0]  ;;  %v4315_v47 = vperm.slane %v4313_v40, 0  ;;  %v4316_v46 = vperm.slane %v4313_v40, 1  ;;  %v7321_v20 = vor.u32 %v8078_v16, %v7318_v17 }
 0x2c5   : > { %4750 = vmatpush.bf16.msra.mxu1 %v7277_v57  ;;  %v8110_v26 = vld [vmem:[%s9885_s3 + $0x1f4] sm:$0xf]  ;;  %v7446_v28 = vld [vmem:[%s9885_s3 + $0x1f8] sm:$0xf0]  ;;  %v4317_v49 = vperm.slane %v4313_v40, 2  ;;  %v4318_v29 = vperm.slane %v4313_v40, 3  ;;  %v7385_v35 = vor.u32 %v8094_v50, %v7382_v25 }
 0x2c6   : > { %4763 = vmatpush.bf16.msra.mxu2 %v7341_v58  ;;  %v8060_v32 = vld [vmem:[%s9885_s3 + $0x64] sm:$0xf]  ;;  %v7246_v33 = vld [vmem:[%s9885_s3 + $0x68] sm:$0xf0]  ;;  %v4319_v37 = vrot.slane %v4316_v46, 6  ;;  %v7449_v43 = vor.u32 %v8110_v26, %v7446_v28  ;;  %vm5036_vm3 = vcmask 523264  }
 0x2c7   : > { %4776 = vmatpush.bf16.msra.mxu3 %v7405_v60  ;;  %v8076_v34 = vld [vmem:[%s9885_s3 + $0xe4] sm:$0xf]  ;;  %v7310_v36 = vld [vmem:[%s9885_s3 + $0xe8] sm:$0xf0]  ;;  %v4320_v39 = vrot.slane %v4317_v49, 4  ;;  %v4321_v41 = vrot.slane %v4318_v29, 2  ;;  %v7249_v1 = vor.u32 %v8060_v32, %v7246_v33 }
 0x2c8   : > { %4738 = vmatpush.bf16.msra.mxu0 %v7205_v5  ;;  %v8092_v44 = vld [vmem:[%s9885_s3 + $0x164] sm:$0xf]  ;;  %v7374_v45 = vld [vmem:[%s9885_s3 + $0x168] sm:$0xf0]  ;;  %v4322_v52 = vsel %vm4299_vm0, %v4315_v47, %v4319_v37  ;;  %v7313_v54 = vor.u32 %v8076_v34, %v7310_v36  ;;  %v8058_v56 = vld [vmem:[%s9885_s3 + $0x54] sm:$0xf] }
 0x2c9   : > { %4751 = vmatpush.bf16.msra.mxu1 %v7269_v9  ;;  %v4312_v48 = vld [vmem:[#allocation2] sm:$0xff]  ;;  %v8108_v61 = vld [vmem:[%s9885_s3 + $0x1e4] sm:$0xf]  ;;  %v4323_v53 = vsel %vm4301_vm1, %v4320_v39, %v4321_v41  ;;  %v7377_v55 = vor.u32 %v8092_v44, %v7374_v45  ;;  %v7238_v57 = vld [vmem:[%s9885_s3 + $0x58] sm:$0xf0]  ;;  %vm5053_vm4 = vcmask 9216  }
 0x2ca   : > { %4764 = vmatpush.bf16.msra.mxu2 %v7333_v27  ;;  %v7438_v51 = vld [vmem:[%s9885_s3 + $0x1e8] sm:$0xf0]  ;;  %v4324_v2 = vsel %vm4303_vm2, %v4322_v52, %v4323_v53  ;;  %v8074_v58 = vld [vmem:[%s9885_s3 + $0xd4] sm:$0xf]  ;;  %v7302_v3 = vld [vmem:[%s9885_s3 + $0xd8] sm:$0xf0]  ;;  %v7241_v0 = vor.u32 %v8058_v56, %v7238_v57 }
 0x2cb   : > { %4777 = vmatpush.bf16.msra.mxu3 %v7397_v12  ;;  %v4326_v8 = vadd.f32 %v4324_v2, %v4312_v48  ;;  %v7441_v42 = vor.u32 %v8108_v61, %v7438_v51  ;;  %v8090_v59 = vld [vmem:[%s9885_s3 + $0x154] sm:$0xf]  ;;  %v7366_v60 = vld [vmem:[%s9885_s3 + $0x158] sm:$0xf0]  ;;  %v8056_v4 = vld [vmem:[%s9885_s3 + $0x44] sm:$0xf]  ;;  %v7305_v22 = vor.u32 %v8074_v58, %v7302_v3 }
 0x2cc   : > { %4739 = vmatpush.bf16.msra.mxu0 %v7197_v18  ;;  %v8106_v63 = vld [vmem:[%s9885_s3 + $0x1d4] sm:$0xf]  ;;  %v7430_v21 = vld [vmem:[%s9885_s3 + $0x1d8] sm:$0xf0]  ;;  %v7369_v5 = vor.u32 %v8090_v59, %v7366_v60  ;;  %v7230_v23 = vld [vmem:[%s9885_s3 + $0x48] sm:$0xf0] }
 0x2cd   : > { %4752 = vmatpush.bf16.msra.mxu1 %v7261_v19  ;;  %v4327_v62 = vmax.f32 %v4326_v8, 0.0  ;;  %v8072_v6 = vld [vmem:[%s9885_s3 + $0xc4] sm:$0xf]  ;;  %v7433_v7 = vor.u32 %v8106_v63, %v7430_v21  ;;  %v7294_v9 = vld [vmem:[%s9885_s3 + $0xc8] sm:$0xf0]  ;;  %v7233_v12 = vor.u32 %v8056_v4, %v7230_v23 }
 0x2ce   : > { %4765 = vmatpush.bf16.msra.mxu2 %v7325_v24  ;;  %v8088_v27 = vld [vmem:[%s9885_s3 + $0x144] sm:$0xf]  ;;  %v7358_v10 = vld [vmem:[%s9885_s3 + $0x148] sm:$0xf0]  ;;  %v7297_v13 = vor.u32 %v8072_v6, %v7294_v9  ;;  %v8054_v15 = vld [vmem:[%s9885_s3 + $0x34] sm:$0xf] }
 0x2cf   : > { %4778 = vmatpush.bf16.msra.mxu3 %v7389_v30  ;;  %4329 = vst [vmem:[#allocation1] ss:$4 sm:$0xff] %v4327_v62  ;;  %v8104_v11 = vld [vmem:[%s9885_s3 + $0x1c4] sm:$0xf]  ;;  %v7422_v38 = vld [vmem:[%s9885_s3 + $0x1c8] sm:$0xf0]  ;;  %v7361_v14 = vor.u32 %v8088_v27, %v7358_v10 }
 0x2d0   : > { %4784 = vmatpush.bf16.msrb.mxu0 %v7257_v31  ;;  %v7222_v16 = vld [vmem:[%s9885_s3 + $0x38] sm:$0xf0]  ;;  %v7425_v17 = vor.u32 %v8104_v11, %v7422_v38  ;;  %v8070_v50 = vld [vmem:[%s9885_s3 + $0xb4] sm:$0xf]  ;;  %v8052_v46 = vld [vmem:[%s9885_s3 + $0x24] sm:$0xf] }
 0x2d1   : > { %4797 = vmatpush.bf16.msrb.mxu1 %v7321_v20  ;;  %v7286_v18 = vld [vmem:[%s9885_s3 + $0xb8] sm:$0xf0]  ;;  %v8086_v19 = vld [vmem:[%s9885_s3 + $0x134] sm:$0xf]  ;;  %v7225_v47 = vor.u32 %v8054_v15, %v7222_v16  ;;  %v7214_v49 = vld [vmem:[%s9885_s3 + $0x28] sm:$0xf0] }
 0x2d2   : > { %4810 = vmatpush.bf16.msrb.mxu2 %v7385_v35  ;;  %v7350_v24 = vld [vmem:[%s9885_s3 + $0x138] sm:$0xf0]  ;;  %v8102_v25 = vld [vmem:[%s9885_s3 + $0x1b4] sm:$0xf]  ;;  %v7289_v32 = vor.u32 %v8070_v50, %v7286_v18  ;;  %v8068_v37 = vld [vmem:[%s9885_s3 + $0xa4] sm:$0xf]  ;;  %v7217_v48 = vor.u32 %v8052_v46, %v7214_v49 }
 0x2d3   : > { %4823 = vmatpush.bf16.msrb.mxu3 %v7449_v43  ;;  %v7414_v26 = vld [vmem:[%s9885_s3 + $0x1b8] sm:$0xf0]  ;;  %v7353_v35 = vor.u32 %v8086_v19, %v7350_v24  ;;  %v7278_v39 = vld [vmem:[%s9885_s3 + $0xa8] sm:$0xf0]  ;;  %v8084_v41 = vld [vmem:[%s9885_s3 + $0x124] sm:$0xf] }
 0x2d4   : > { %4785 = vmatpush.bf16.msrb.mxu0 %v7249_v1  ;;  %v7417_v36 = vor.u32 %v8102_v25, %v7414_v26  ;;  %v7342_v43 = vld [vmem:[%s9885_s3 + $0x128] sm:$0xf0]  ;;  %v8100_v44 = vld [vmem:[%s9885_s3 + $0x1a4] sm:$0xf]  ;;  %v7281_v61 = vor.u32 %v8068_v37, %v7278_v39  ;;  %v8050_v51 = vld [vmem:[%s9885_s3 + $0x14] sm:$0xf] }
 0x2d5   : > { %4798 = vmatpush.bf16.msrb.mxu1 %v7313_v54  ;;  %v7406_v45 = vld [vmem:[%s9885_s3 + $0x1a8] sm:$0xf0]  ;;  %v7206_v52 = vld [vmem:[%s9885_s3 + $0x18] sm:$0xf0]  ;;  %v7345_v53 = vor.u32 %v8084_v41, %v7342_v43  ;;  %v8066_v2 = vld [vmem:[%s9885_s3 + $0x94] sm:$0xf] }
 0x2d6   : > { %4811 = vmatpush.bf16.msrb.mxu2 %v7377_v55  ;;  %v4332_v40 = vld.sshfl [vmem:[#allocation1 + $0x10] sm:$0xff pattern:$0x73625140]  ;;  %v4330_v28 = vld.sshfl [vmem:[#allocation1] sm:$0xff pattern:$0x73625140]  ;;  %v7409_v1 = vor.u32 %v8100_v44, %v7406_v45  ;;  %v7209_v58 = vor.u32 %v8050_v51, %v7206_v52 }
 0x2d7   : > { %4824 = vmatpush.bf16.msrb.mxu3 %v7441_v42  ;;  %v9725_v29 = vpack.c.bf16 %v4332_v40, %v4332_v40  ;;  %v9727_v30 = vpack.c.bf16 %v4330_v28, %v4330_v28  ;;  %v4333_v31 = vld.sshfl [vmem:[#allocation1 + $0x18] sm:$0xff pattern:$0x73625140]  ;;  %v4331_v20 = vld.sshfl [vmem:[#allocation1 + $0x8] sm:$0xff pattern:$0x73625140] }
 0x2d8   : > { %4786 = vmatpush.bf16.msrb.mxu0 %v7241_v0  ;;  %v9729_v33 = vpack.c.bf16 %v4333_v31, %v4333_v31  ;;  %v4339_v34 = vpack.c.bf16 %v4331_v20, %v4331_v20  ;;  %v7270_v54 = vld [vmem:[%s9885_s3 + $0x98] sm:$0xf0]  ;;  %v8082_v55 = vld [vmem:[%s9885_s3 + $0x114] sm:$0xf]  ;;  %v8048_v3 = vld [vmem:[%s9885_s3 + $0x4] sm:$0xf] }
 0x2d9   : > { %4799 = vmatpush.bf16.msrb.mxu1 %v7305_v22  ;;  %4766 = vmatmul.bf16.vlgmr.msra.gmra.mxu2 %v9725_v29  ;;  %v7334_v8 = vld [vmem:[%s9885_s3 + $0x118] sm:$0xf0]  ;;  %v8098_v56 = vld [vmem:[%s9885_s3 + $0x194] sm:$0xf]  ;;  %v7273_v42 = vor.u32 %v8066_v2, %v7270_v54  ;;  %v7198_v59 = vld [vmem:[%s9885_s3 + $0x8] sm:$0xf0] }
 0x2da   : > { %4812 = vmatpush.bf16.msrb.mxu2 %v7369_v5  ;;  %4740 = vmatmul.bf16.vlgmr.msra.gmra.mxu0 %v9727_v30  ;;  %v7398_v57 = vld [vmem:[%s9885_s3 + $0x198] sm:$0xf0]  ;;  %v7337_v60 = vor.u32 %v8082_v55, %v7334_v8  ;;  %v8064_v63 = vld [vmem:[%s9885_s3 + $0x84] sm:$0xf]  ;;  %v7262_v21 = vld [vmem:[%s9885_s3 + $0x88] sm:$0xf0]  ;;  %v7201_v23 = vor.u32 %v8048_v3, %v7198_v59 }
 0x2db   : > { %4825 = vmatpush.bf16.msrb.mxu3 %v7433_v7  ;;  %4753 = vmatmul.bf16.vlgmr.msra.gmra.mxu1 %v4339_v34  ;;  %v7401_v62 = vor.u32 %v8098_v56, %v7398_v57  ;;  %v8080_v0 = vld [vmem:[%s9885_s3 + $0x104] sm:$0xf]  ;;  %v7326_v4 = vld [vmem:[%s9885_s3 + $0x108] sm:$0xf0]  ;;  %v7265_v6 = vor.u32 %v8064_v63, %v7262_v21  ;;  %v8119_v27 = vld [vmem:[%s9887_s5 + $0x38] sm:$0xff] }
 0x2dc   : > { %4787 = vmatpush.bf16.msrb.mxu0 %v7233_v12  ;;  %4779 = vmatmul.bf16.vlgmr.msra.gmra.mxu3 %v9729_v33  ;;  %v8096_v22 = vld [vmem:[%s9885_s3 + $0x184] sm:$0xf]  ;;  %v7390_v5 = vld [vmem:[%s9885_s3 + $0x188] sm:$0xf0]  ;;  %v7329_v7 = vor.u32 %v8080_v0, %v7326_v4  ;;  %v8118_v10 = vld [vmem:[%s9887_s5 + $0x30] sm:$0xff] }
 0x2dd   : > { %4800 = vmatpush.bf16.msrb.mxu1 %v7297_v13  ;;  %v7393_v9 = vor.u32 %v8096_v22, %v7390_v5  ;;  %v8117_v11 = vld [vmem:[%s9887_s5 + $0x28] sm:$0xff]  ;;  %v8116_v38 = vld [vmem:[%s9887_s5 + $0x20] sm:$0xff]  ;;  %v8115_v12 = vld [vmem:[%s9887_s5 + $0x18] sm:$0xff] }
 0x2de   : > { %4813 = vmatpush.bf16.msrb.mxu2 %v7361_v14  ;;  %v8114_v13 = vld [vmem:[%s9887_s5 + $0x10] sm:$0xff]  ;;  %v8113_v14 = vld [vmem:[%s9887_s5 + $0x8] sm:$0xff]  ;;  %v8127_v15 = vld [vmem:[%s9887_s5 + $0x78] sm:$0xff] }
 0x2df   : > { %4826 = vmatpush.bf16.msrb.mxu3 %v7425_v17  ;;  %v8112_v16 = vld [vmem:[%s9887_s5] sm:$0xff]  ;;  %v8126_v17 = vld [vmem:[%s9887_s5 + $0x70] sm:$0xff]  ;;  %v8125_v50 = vld [vmem:[%s9887_s5 + $0x68] sm:$0xff] }
 0x2e0   : > { %4788 = vmatpush.bf16.msrb.mxu0 %v7225_v47  ;;  %v8124_v18 = vld [vmem:[%s9887_s5 + $0x60] sm:$0xff]  ;;  %v8123_v19 = vld [vmem:[%s9887_s5 + $0x58] sm:$0xff]  ;;  %v8122_v24 = vld [vmem:[%s9887_s5 + $0x50] sm:$0xff] }
 0x2e1   : > { %4801 = vmatpush.bf16.msrb.mxu1 %v7289_v32  ;;  %v4406_v25 = vld [vmem:[%s9886_s4] sm:$0x3]  ;;  %v8121_v40 = vld [vmem:[%s9887_s5 + $0x48] sm:$0xff]  ;;  %v8131_v57 = vld [vmem:[%s9889_s7 + $0x18] sm:$0xff] }
 0x2e2   : > { %4814 = vmatpush.bf16.msrb.mxu2 %v7353_v35  ;;  %v4408_v26 = vperm.slane %v4406_v25, 0  ;;  %v8120_v47 = vld [vmem:[%s9887_s5 + $0x40] sm:$0xff]  ;;  %v4409_v39 = vperm.slane %v4406_v25, 1 }
 0x2e3   : > { %4827 = vmatpush.bf16.msrb.mxu3 %v7417_v36  ;;  %v8128_v3 = vld [vmem:[%s9889_s7] sm:$0xff] }
 0x2e4   : > { %4789 = vmatpush.bf16.msrb.mxu0 %v7217_v48 }
 0x2e5   : > { %4802 = vmatpush.bf16.msrb.mxu1 %v7281_v61 }
 0x2e6   : > { %4815 = vmatpush.bf16.msrb.mxu2 %v7345_v53 }
 0x2e7   : > { %4828 = vmatpush.bf16.msrb.mxu3 %v7409_v1 }
 0x2e8   : > { %4790 = vmatpush.bf16.msrb.mxu0 %v7209_v58  ;;  %v8130_v58 = vld [vmem:[%s9889_s7 + $0x10] sm:$0xff] }
 0x2e9   : > { %4803 = vmatpush.bf16.msrb.mxu1 %v7273_v42  ;;  %v8129_v42 = vld [vmem:[%s9889_s7 + $0x8] sm:$0xff] }
 0x2ea   : > { %4816 = vmatpush.bf16.msrb.mxu2 %v7337_v60 }
 0x2eb   : > { %4829 = vmatpush.bf16.msrb.mxu3 %v7401_v62  ;;  %v8172_v62 = vld [vmem:[%s9888_s6] ss:$0 sm:$0xff] }
 0x2ec   : > { %4791 = vmatpush.bf16.msrb.mxu0 %v7201_v23  ;;  %v8173_v23 = vld [vmem:[%s9890_s8] ss:$0 sm:$0xff] }
 0x2ed   : > { %4804 = vmatpush.bf16.msrb.mxu1 %v7265_v6 }
 0x2ee   : > { %4817 = vmatpush.bf16.msrb.mxu2 %v7329_v7 }
 0x2ef   : > { %4830 = vmatpush.bf16.msrb.mxu3 %v7393_v9  ;;  %4792 = vmatmul.bf16.vlgmr.msrb.gmra.mxu0 %v9727_v30 }
 0x2f0   : > { %4972 = vmatpush.bf16.msra.mxu0 %v8119_v27  ;;  %4805 = vmatmul.bf16.vlgmr.msrb.gmra.mxu1 %v4339_v34 }
 0x2f1   : > { %4818 = vmatmul.bf16.vlgmr.msrb.gmra.mxu2 %v9725_v29  ;;  %4985 = vmatpush.bf16.msra.mxu1 %v8127_v15 }
 0x2f2   : > { %4831 = vmatmul.bf16.vlgmr.msrb.gmra.mxu3 %v9729_v33  ;;  %5044 = vmatpush.bf16.msra.mxu2 %v8131_v57 }
 0x2f4   : > { %4973 = vmatpush.bf16.msra.mxu0 %v8118_v10 }
 0x2f5   : > { %4986 = vmatpush.bf16.msra.mxu1 %v8126_v17 }
 0x2f6   : > { %5045 = vmatpush.bf16.msra.mxu2 %v8130_v58 }
 0x2f8   : > { %4974 = vmatpush.bf16.msra.mxu0 %v8117_v11 }
 0x2f9   : > { %4987 = vmatpush.bf16.msra.mxu1 %v8125_v50 }
 0x2fa   : > { %5046 = vmatpush.bf16.msra.mxu2 %v8129_v42 }
 0x2fc   : > { %4975 = vmatpush.bf16.msra.mxu0 %v8116_v38 }
 0x2fd   : > { %4988 = vmatpush.bf16.msra.mxu1 %v8124_v18 }
 0x2fe   : > { %5047 = vmatpush.bf16.msra.mxu2 %v8128_v3 }
 0x300   : > { %4976 = vmatpush.bf16.msra.mxu0 %v8115_v12 }
 0x301   : > { %4989 = vmatpush.bf16.msra.mxu1 %v8123_v19 }
 0x304   : > { %4977 = vmatpush.bf16.msra.mxu0 %v8114_v13 }
 0x305   : > { %4990 = vmatpush.bf16.msra.mxu1 %v8122_v24 }
 0x308   : > { %4978 = vmatpush.bf16.msra.mxu0 %v8113_v14 }
 0x309   : > { %4991 = vmatpush.bf16.msra.mxu1 %v8121_v40 }
 0x30c   : > { %4979 = vmatpush.bf16.msra.mxu0 %v8112_v16 }
 0x30d   : > { %4992 = vmatpush.bf16.msra.mxu1 %v8120_v47 }
 0x357   : > { %v4741_v28 = vpop.f32.mrf.mxu0 }
 0x358   : > { %v4742_v46 = vadd.f32 %v4741_v28, %v4408_v26  ;;  %v4754_v49 = vpop.f32.mrf.mxu1 }
 0x35a   : > { %v4755_v29 = vadd.f32 %v4754_v49, %v4742_v46 }
 0x35c   : > { %v4767_v30 = vpop.f32.mrf.mxu2 }
 0x35d   : > { %v4768_v31 = vadd.f32 %v4767_v30, %v4755_v29 }
 0x35f   : > { %v4780_v20 = vpop.f32.mrf.mxu3  ;;  %v4743_v32 = vpop.f32.mrf.mxu0 }
 0x360   : > { %v4781_v33 = vadd.f32 %v4780_v20, %v4768_v31  ;;  %v4756_v34 = vpop.f32.mrf.mxu1 }
 0x362   : > { %v4836_v35 = vmax.f32 %v4781_v33, 0.0 }
 0x364   : > { %v4838_v36 = vpack.c.bf16 %v4836_v35, %v4836_v35  ;;  %v4769_v37 = vpop.f32.mrf.mxu2 }
 0x366   : > { %4980 = vmatmul.bf16.vlgmr.msra.gmra.mxu0 %v4838_v36 }
 0x367   : > { %v4782_v41 = vpop.f32.mrf.mxu3 }
 0x36c   : > { %v4793_v43 = vpop.f32.mrf.mxu0 }
 0x36d   : > { %v4806_v44 = vpop.f32.mrf.mxu1  ;;  %v4794_v45 = vadd.f32 %v4793_v43, %v4409_v39 }
 0x36f   : > { %v4807_v48 = vadd.f32 %v4806_v44, %v4794_v45 }
 0x374   : > { %v4819_v61 = vpop.f32.mrf.mxu2  ;;  %v4795_v53 = vpop.f32.mrf.mxu0 }
 0x375   : > { %v4832_v51 = vpop.f32.mrf.mxu3  ;;  %v4820_v52 = vadd.f32 %v4819_v61, %v4807_v48  ;;  %v4808_v1 = vpop.f32.mrf.mxu1 }
 0x377   : > { %v4833_v2 = vadd.f32 %v4832_v51, %v4820_v52 }
 0x379   : > { %v4837_v54 = vmax.f32 %v4833_v2, 0.0 }
 0x37b   : > { %v4839_v55 = vpack.c.bf16 %v4837_v54, %v4837_v54 }
 0x37c   : > { %v4821_v8 = vpop.f32.mrf.mxu2 }
 0x37d   : > { %v4834_v56 = vpop.f32.mrf.mxu3  ;;  %4993 = vmatmul.bf16.vlgmr.msra.gmra.mxu1 %v4839_v55 }
 0x3e3   : > { %v4981_v59 = vpop.f32.mrf.mxu0 }
 0x3e4   : > { %v4982_v63 = vadd.f32 %v8172_v62, %v4981_v59 }
 0x3eb   : > { %v4983_v60 = vpop.f32.mrf.mxu0 }
 0x3fa   : > { %v4994_v21 = vpop.f32.mrf.mxu1 }
 0x3fb   : > { %v4995_v0 = vadd.f32 %v4994_v21, %v4982_v63 }
 0x3fd   : > { %v4998_v4 = vmax.f32 %v4995_v0, 0.0 }
 0x3ff   : > { %v4999_v22 = vpack.c.bf16 %v4998_v4, %v4998_v4 }
 0x401   : > { %7530 = vmatmul.msk.bf16.vlgmr.msra.gmra.mxu2 %vm5036_vm3, %v4999_v22 }
 0x402   : > { %v4996_v5 = vpop.f32.mrf.mxu1 }
 0x484   : > { %v5049_v6 = vpop.f32.mrf.mxu2 }
 0x485   : > { %v5050_v7 = vadd.f32 %v8173_v23, %v5049_v6 }
 0x487   : > { %v5054_v9 = vsel %vm5053_vm4, %v5050_v7, -inf }
 0x488   : > { %5055 = vmax.xlane.f32.xlu0 %v5054_v9 }
 0x48c   : > { %v5051_v27 = vpop.f32.mrf.mxu2 }
 0x4fb   : > { %v5056_v10 = vpop.xlane.xlu0 %5055 }
 0x4fc   : > { %v5057_v11 = vsub.f32 %v5050_v7, %v5056_v10 }
 0x4fe   : > { %v5058_v38 = vmul.f32 1.442695, %v5057_v11 }
 0x500   : > { %8174 = vpow2.f32 %v5058_v38 }
 0x506   : > { %v8175_v12 = vpop.eup %8174 }
 0x507   : > { %v5060_v13 = vsel %vm5053_vm4, %v8175_v12, 0.0 }
 0x508   : > { %5061 = vadd.xlane.f32.xlu0 %v5060_v13 }
 0x57b   : > { %v5062_v14 = vpop.xlane.xlu0 %5061 }
 0x57c   : > { %8176 = vrcp.f32 %v5062_v14  ;;  %v5074_v50 = vand.u32 2147483648, %v5062_v14  ;;  %v5072_v19 = vand.u32 2147483647, %v5062_v14  ;;  %vm5068_vm6 = vweird.f32 %v5062_v14 }
 0x57e   : > { %v5075_v25 = vor.u32 1.1754944e-38, %v5074_v50  ;;  %vm5073_vm8 = vcmp.eq.f32.partialorder %v5072_v19, 8.507059e+37 }
 0x582   : > { %v8177_v15 = vpop.eup %8176 }
 0x583   : > { %v5064_v16 = vmul.f32 %v8177_v15, %v5062_v14  ;;  %vm5069_vm5 = vweird.f32 %v8177_v15 }
 0x584   : > { %vm5070_vm7 = vmor %vm5068_vm6, %vm5069_vm5 }
 0x585   : > { %v5065_v17 = vsub.f32 1.0, %v5064_v16 }
 0x587   : > { %v5066_v18 = vmul.f32 %v8177_v15, %v5065_v17 }
 0x589   : > { %v5067_v24 = vadd.f32 %v8177_v15, %v5066_v18 }
 0x58b   : > { %v5071_v26 = vsel %vm5070_vm7, %v8177_v15, %v5067_v24 }
 0x58c   : > { %v5076_v40 = vsel %vm5073_vm8, %v5075_v25, %v5071_v26 }
 0x58d   : > { %v5077_v28 = vmul.f32 %v8175_v12, %v5076_v40 }
 0x58f   : > { %5078 = vst.msk [vmem:[#allocation3] sm:$0x3] %vm5053_vm4, %v5077_v28 }
 0x590 PF: > { %p8136_p7 = scmp.eq.s32.totalorder %s8276_s10, 2  ;;  %s8219_s20 = smov [#allocation3]  }
 0x591   : > { %s5085_s21 = sshll.u32 %s8219_s20, 4  ;;  %s5087_s24 = sshll.u32 %s9891_s9, 4  ;;  %s5086_s21 = int_to_ptr.vmem [resolvable:$true] %s5085_s21  ;;  %s5088_s24 = int_to_ptr.hbm [resolvable:$true] %s5087_s24 }
 0x592   : > { %8133 = dma.vmem_to_hbm [thread:$0]  (%p8136_p7), %s5086_s21, 32, %s5088_s24, [#allocation4]  }
 0x593   : > { %8211 = dma.done.wait (%p8136_p7), [#allocation4], 32  }
 0x594   : > { %8213 = vsyncadd (%p8136_p7), [#allocation4], 4294967264 }
 0x595 PF: > { %s20_s30 = sadd.s32 1, %s8216_s30  }
 0x596   : > { %p17_p8 = scmp.ge.s32.totalorder %s20_s30, 5  }
 0x598   :  { %19 = sbr.rel (!%p17_p8) target bundleno = 1 (0x1), region = 94 }
 0x59d   :  { %5101 = vsyncpa [#allocation4], 1 }
 0x59e   :  { %5103 = vsyncpa [#allocation4 + $0x1], 1 }

</bundles_post_ra>
